<compile_context>
chip_gen: v6e
topology: v6e:2x2x1
jax: 0.10.0
libtpu: 0.0.40
codegen_flags: <defaults>
</compile_context>

<pallas_src>
import math

import jax
import jax.numpy as jnp
from jax.experimental import pallas as pl
from jax.experimental.pallas import tpu as pltpu


# ----------------------------- Pallas kernels -----------------------------

def _make_dense_kernel(has_bias):
    """Per-pixel dense layer: eval-BN + ReLU on the input, bf16 MXU matmul,
    optional bias, f32 accumulation, bf16 (or f32) store."""

    def kernel(*refs):
        if has_bias:
            x_ref, w_ref, sc_ref, sf_ref, b_ref, o_ref = refs
        else:
            x_ref, w_ref, sc_ref, sf_ref, o_ref = refs
        a = jnp.maximum(x_ref[0] * sc_ref[...] + sf_ref[...], 0.0)
        y = jnp.dot(a.astype(w_ref.dtype), w_ref[...],
                    preferred_element_type=jnp.float32)
        if has_bias:
            y = y + b_ref[...]
        o_ref[0] = y.astype(o_ref.dtype)

    return kernel


def bn_relu_dense(x, w, scale, shift, bias=None, out_dtype=jnp.bfloat16):
    """x: (N, HW, Cin) f32; w: (Cin, K) bf16 -> (N, HW, K) out_dtype."""
    N, HW, cin = x.shape
    K = w.shape[-1]
    has_bias = bias is not None

    in_specs = [pl.BlockSpec((1, HW, cin), lambda b: (b, 0, 0)),
                pl.BlockSpec(w.shape, lambda b: (0, 0)),
                pl.BlockSpec(scale.shape, lambda b: (0, 0)),
                pl.BlockSpec(shift.shape, lambda b: (0, 0))]
    args = [x, w, scale, shift]
    if has_bias:
        in_specs.append(pl.BlockSpec(bias.shape, lambda b: (0, 0)))
        args.append(bias)

    return pl.pallas_call(
        _make_dense_kernel(has_bias),
        out_shape=jax.ShapeDtypeStruct((N, HW, K), out_dtype),
        grid_spec=pltpu.PrefetchScalarGridSpec(
            num_scalar_prefetch=0,
            grid=(N,),
            in_specs=in_specs,
            out_specs=pl.BlockSpec((1, HW, K), lambda b: (b, 0, 0)),
        ),
        compiler_params=pltpu.CompilerParams(
            dimension_semantics=("parallel",),
        ),
    )(*args)


def _make_res_block_kernel(H, W, cout, pre, with_cat):
    """Whole ResConvBlock in one kernel:
       BN1+PReLU1 -> packed 3x3 conv1 -> BN2+PReLU2 -> packed 3x3 conv2 -> + residual.
    Each 3x3 conv is a single matmul with a (Cin, 9*Cout) lane-packed weight; the
    result is staged in a halo-padded (2*pre+HW, 9*Cout) f32 scratch and the nine
    row-shifted, lane-sliced taps are accumulated on the VPU with width masks."""
    HW = H * W
    rows = 2 * pre + HW
    yw = 9 * cout

    def zero_halo(yp_ref):
        # Only the halo rows: the interior [pre, pre+HW) is fully rewritten below.
        yp_ref[0:pre, :] = jnp.zeros((pre, yw), jnp.float32)
        yp_ref[pre + HW:rows, :] = jnp.zeros((pre, yw), jnp.float32)

    def taps(yp_ref, not_left, not_right):
        acc = None
        for dw in range(3):
            part = None
            for dh in range(3):
                t = dh * 3 + dw
                s = pre + (dh - 1) * W + (dw - 1)
                blk = yp_ref[s:s + HW, t * cout:(t + 1) * cout]   # (HW, cout) f32
                part = blk if part is None else part + blk
            if dw == 0:
                part = jnp.where(not_left, part, 0.0)
            elif dw == 2:
                part = jnp.where(not_right, part, 0.0)
            acc = part if acc is None else acc + part
        return acc

    def prelu(v, alpha):
        return jnp.where(v > 0, v, alpha * v)

    if with_cat:
        def kernel(x1_ref, x2_ref, w1_ref, w2_ref, wsc_ref, bsc_ref,
                   sc1_ref, sf1_ref, al1_ref, sc2_ref, sf2_ref, al2_ref,
                   o_ref, xc_ref, yp_ref):
            zero_halo(yp_ref)
            col = jax.lax.broadcasted_iota(jnp.int32, (HW, 1), 0) % W
            not_left = col != 0
            not_right = col != (W - 1)

            # Channel concat built in VMEM (never materialised in HBM).
            c = cout
            xc_ref[:, 0:c] = x1_ref[0]
            xc_ref[:, c:2 * c] = x2_ref[0]
            xcat = xc_ref[...]                                     # (HW, 2c) bf16

            # 1x1 shortcut on the raw concatenated input (single merged-K matmul).
            short = jnp.dot(xcat, wsc_ref[...],
                            preferred_element_type=jnp.float32) + bsc_ref[...]

            # BN1 + PReLU1 + packed conv1 (single matmul, unsplit 2c contraction).
            a = prelu(xcat.astype(jnp.float32) * sc1_ref[...] + sf1_ref[...],
                      al1_ref[...]).astype(jnp.bfloat16)
            yp_ref[pre:pre + HW, :] = jnp.dot(a, w1_ref[...],
                                              preferred_element_type=jnp.float32)
            h = taps(yp_ref, not_left, not_right)                  # (HW, c) f32

            # BN2 + PReLU2 + packed conv2 (scratch reused).
            h = prelu(h * sc2_ref[...] + sf2_ref[...],
                      al2_ref[...]).astype(jnp.bfloat16)
            yp_ref[pre:pre + HW, :] = jnp.dot(h, w2_ref[...],
                                              preferred_element_type=jnp.float32)
            out = taps(yp_ref, not_left, not_right) + short
            o_ref[0] = out.astype(o_ref.dtype)

        return kernel

    def kernel(x_ref, w1_ref, w2_ref,
               sc1_ref, sf1_ref, al1_ref, sc2_ref, sf2_ref, al2_ref,
               o_ref, yp_ref):
        zero_halo(yp_ref)
        col = jax.lax.broadcasted_iota(jnp.int32, (HW, 1), 0) % W
        not_left = col != 0
        not_right = col != (W - 1)

        x = x_ref[0]                                               # (HW, c) bf16
        a = prelu(x.astype(jnp.float32) * sc1_ref[...] + sf1_ref[...],
                  al1_ref[...]).astype(jnp.bfloat16)
        yp_ref[pre:pre + HW, :] = jnp.dot(a, w1_ref[...],
                                          preferred_element_type=jnp.float32)
        h = taps(yp_ref, not_left, not_right)

        h = prelu(h * sc2_ref[...] + sf2_ref[...],
                  al2_ref[...]).astype(jnp.bfloat16)
        yp_ref[pre:pre + HW, :] = jnp.dot(h, w2_ref[...],
                                          preferred_element_type=jnp.float32)
        out = taps(yp_ref, not_left, not_right) + x.astype(jnp.float32)
        o_ref[0] = out.astype(o_ref.dtype)

    return kernel


def _halo_pre(W):
    return ((W + 1 + 7) // 8) * 8        # sublane-aligned halo depth (>= W + 1)


def res_block_fused(x, p, H, W, out_dtype):
    """ResConvBlock with in_planes == out_planes (identity residual), one pallas_call.
    x: (N, H*W, C) bf16."""
    N, HW, c = x.shape
    assert HW == H * W and HW % 8 == 0
    pre = _halo_pre(W)
    rows = 2 * pre + HW
    sc1, sf1 = _fold_bn(p['bn1'])
    sc2, sf2 = _fold_bn(p['bn2'])
    al1 = _alpha_vec(p['act1_alpha'], c)
    al2 = _alpha_vec(p['act2_alpha'], c)
    w1, w2 = p['conv1_w'], p['conv2_w']          # (c, 9c) bf16 each

    args = [x, w1, w2, sc1, sf1, al1, sc2, sf2, al2]
    in_specs = [pl.BlockSpec((1, HW, c), lambda b: (b, 0, 0))] + \
               [pl.BlockSpec(a.shape, lambda b: (0, 0)) for a in args[1:]]

    return pl.pallas_call(
        _make_res_block_kernel(H, W, c, pre, with_cat=False),
        out_shape=jax.ShapeDtypeStruct((N, HW, c), out_dtype),
        grid_spec=pltpu.PrefetchScalarGridSpec(
            num_scalar_prefetch=0,
            grid=(N,),
            in_specs=in_specs,
            out_specs=pl.BlockSpec((1, HW, c), lambda b: (b, 0, 0)),
            scratch_shapes=[pltpu.VMEM((rows, 9 * c), jnp.float32)],
        ),
        compiler_params=pltpu.CompilerParams(
            dimension_semantics=("parallel",),
        ),
    )(*args)


def res_block_cat_fused(x1, x2, p, H, W, out_dtype):
    """First decoder ResConvBlock: input is cat(x1, x2) along channels (built in VMEM,
    never materialised); 1x1 shortcut + conv1 + conv2 + residual in one pallas_call.
    x1, x2: (N, H*W, C) bf16."""
    N, HW, c = x1.shape
    assert x2.shape == x1.shape and HW == H * W and HW % 8 == 0
    pre = _halo_pre(W)
    rows = 2 * pre + HW
    sc1, sf1 = _fold_bn(p['bn1'])                # over 2c channels
    sc2, sf2 = _fold_bn(p['bn2'])
    al1 = _alpha_vec(p['act1_alpha'], 2 * c)
    al2 = _alpha_vec(p['act2_alpha'], c)
    w1, w2 = p['conv1_w'], p['conv2_w']          # (2c, 9c), (c, 9c) bf16
    wsc, bsc = p['short_w'], p['short_b']        # (2c, c) bf16, (1, c) f32

    args = [x1, x2, w1, w2, wsc, bsc, sc1, sf1, al1, sc2, sf2, al2]
    in_specs = [pl.BlockSpec((1, HW, c), lambda b: (b, 0, 0)),
                pl.BlockSpec((1, HW, c), lambda b: (b, 0, 0))] + \
               [pl.BlockSpec(a.shape, lambda b: (0, 0)) for a in args[2:]]

    return pl.pallas_call(
        _make_res_block_kernel(H, W, c, pre, with_cat=True),
        out_shape=jax.ShapeDtypeStruct((N, HW, c), out_dtype),
        grid_spec=pltpu.PrefetchScalarGridSpec(
            num_scalar_prefetch=0,
            grid=(N,),
            in_specs=in_specs,
            out_specs=pl.BlockSpec((1, HW, c), lambda b: (b, 0, 0)),
            scratch_shapes=[pltpu.VMEM((HW, 2 * c), jnp.bfloat16),
                            pltpu.VMEM((rows, 9 * c), jnp.float32)],
        ),
        compiler_params=pltpu.CompilerParams(
            dimension_semantics=("parallel",),
        ),
    )(*args)


# ------------------------------- model blocks -------------------------------

def _fold_bn(bn, eps=1e-5):
    scale = bn['gamma'] / jnp.sqrt(bn['var'] + eps)
    shift = bn['beta'] - bn['mean'] * scale
    c = scale.shape[0]
    return (scale.reshape(1, c).astype(jnp.float32),
            shift.reshape(1, c).astype(jnp.float32))


def _alpha_vec(alpha, c):
    return jnp.broadcast_to(alpha.reshape(1, 1), (1, c)).astype(jnp.float32)


def res_decoder_block_forward(params, x_nchw, concat_nchw, stride=(1, 2)):
    """ResDecoderBlock.forward (gate=False): NCHW in, NCHW out (f32)."""
    sh, sw = stride
    N, cin, H, W = x_nchw.shape
    cout = concat_nchw.shape[1]
    Ho, Wo = sh * H, sw * W
    HWo = Ho * Wo

    # NCHW -> channels-last flat rows (XLA fuses the cast into the transpose copy).
    x = jnp.transpose(x_nchw, (0, 2, 3, 1)).reshape(N, H * W, cin)
    skip = (jnp.transpose(concat_nchw, (0, 2, 3, 1))
            .reshape(N, HWo, cout).astype(jnp.bfloat16))

    # bn1 + ReLU + ConvTranspose2d(kernel=stride, stride=stride), fused; bf16 output.
    sc, sf = _fold_bn(params['bn1'])
    y = bn_relu_dense(x, params['conv1_w'], sc, sf, params.get('conv1_b'),
                      out_dtype=jnp.bfloat16)           # (N, H*W, sh*sw*cout)
    h = y.reshape(N, H, W, sh, sw, cout)
    h = jnp.transpose(h, (0, 1, 3, 2, 4, 5)).reshape(N, HWo, cout)   # pixel shuffle

    # TODO(synk): gate=True attention path (W_g/W_x/psi) not implemented.

    n_blocks = len(params['convs'])
    out = res_block_cat_fused(
        h, skip, params['convs'][0], Ho, Wo,
        out_dtype=jnp.float32 if n_blocks == 1 else jnp.bfloat16)
    for i, p in enumerate(params['convs'][1:], start=1):
        out = res_block_fused(
            out, p, Ho, Wo,
            out_dtype=jnp.float32 if i == n_blocks - 1 else jnp.bfloat16)

    out = out.reshape(N, Ho, Wo, cout)
    return jnp.transpose(out, (0, 3, 1, 2))


# ------------------------------- parameter init -------------------------------

class _KeyGen:
    def __init__(self, key):
        self._key, self._i = key, 0

    def __call__(self):
        self._i += 1
        return jax.random.fold_in(self._key, self._i)


def _xavier(key, shape):
    receptive = 1
    for d in shape[2:]:
        receptive *= d
    fan_a, fan_b = shape[0] * receptive, shape[1] * receptive
    bound = math.sqrt(6.0 / (fan_a + fan_b))
    return jax.random.uniform(key, shape, jnp.float32, -bound, bound)


def _bn_params(c):
    return dict(gamma=jnp.ones((c,), jnp.float32), beta=jnp.zeros((c,), jnp.float32),
                mean=jnp.zeros((c,), jnp.float32), var=jnp.ones((c,), jnp.float32))


def _pack_conv3x3(w):
    """PyTorch (Cout, Cin, 3, 3) -> lane-packed (Cin, 9*Cout) bf16:
    lane block t = kh*3 + kw holds the (Cin, Cout) tap-t weight."""
    cout, cin = w.shape[0], w.shape[1]
    w = jnp.transpose(w, (2, 3, 1, 0)).reshape(9, cin, cout)   # (t, Cin, Cout)
    return jnp.transpose(w, (1, 0, 2)).reshape(cin, 9 * cout).astype(jnp.bfloat16)


def _resconv_params(kg, cin, cout):
    p = dict(bn1=_bn_params(cin), bn2=_bn_params(cout),
             act1_alpha=jnp.full((1,), 0.25, jnp.float32),
             act2_alpha=jnp.full((1,), 0.25, jnp.float32),
             conv1_w=_pack_conv3x3(_xavier(kg(), (cout, cin, 3, 3))),
             conv2_w=_pack_conv3x3(_xavier(kg(), (cout, cout, 3, 3))))
    if cin != cout:
        wsc = _xavier(kg(), (cout, cin, 1, 1)).reshape(cout, cin)
        p['short_w'] = jnp.transpose(wsc, (1, 0)).astype(jnp.bfloat16)  # (cin, cout)
        p['short_b'] = jnp.zeros((1, cout), jnp.float32)
    return p


def init_res_decoder_block_params(key, in_channels, out_channels, n_blocks,
                                  stride, bias=False):
    kg = _KeyGen(key)
    sh, sw = stride
    wt = _xavier(kg(), (in_channels, out_channels, sh, sw))   # ConvTranspose2d weight
    conv1_w = (jnp.transpose(wt, (0, 2, 3, 1))
               .reshape(in_channels, sh * sw * out_channels).astype(jnp.bfloat16))
    p = dict(bn1=_bn_params(in_channels), conv1_w=conv1_w)
    if bias:
        p['conv1_b'] = jnp.zeros((1, sh * sw * out_channels), jnp.float32)
    convs = [_resconv_params(kg, out_channels * 2, out_channels)]
    for _ in range(n_blocks - 1):
        convs.append(_resconv_params(kg, out_channels, out_channels))
    p['convs'] = convs
    return p


# ------------------------------------ main ------------------------------------

if __name__ == "__main__":
    key = jax.random.PRNGKey(0)
    N = 2
    in_channels, out_channels = 64, 32
    n_blocks = 2
    stride = (1, 2)
    H, W = 8, 8                 # input time x freq; output feature map is (8, 16)

    params = init_res_decoder_block_params(jax.random.fold_in(key, 0),
                                           in_channels, out_channels,
                                           n_blocks, stride, bias=False)
    x = jax.random.normal(jax.random.fold_in(key, 1),
                          (N, in_channels, H, W), jnp.float32)
    concat = jax.random.normal(jax.random.fold_in(key, 2),
                               (N, out_channels, H * stride[0], W * stride[1]),
                               jnp.float32)

    fwd = jax.jit(lambda p, a, c: res_decoder_block_forward(p, a, c, stride=stride))
    out = jax.block_until_ready(fwd(params, x, concat))
    assert out.shape == (N, out_channels, H * stride[0], W * stride[1]), out.shape
    assert bool(jnp.all(jnp.isfinite(out)))
    print("KERNEL_OK")
</pallas_src>

<mosaic_0001>
module attributes {stable_mosaic.version = 11 : i64} {
  func.func @kernel(%arg0: i32, %arg1: memref<1x64x64xf32, #tpu.memory_space<vmem>>, %arg2: memref<64x64xbf16, #tpu.memory_space<vmem>>, %arg3: memref<1x64xf32, #tpu.memory_space<vmem>>, %arg4: memref<1x64xf32, #tpu.memory_space<vmem>>, %arg5: memref<1x64x64xbf16, #tpu.memory_space<vmem>>) attributes {dimension_semantics = [#tpu.dimension_semantics<parallel>], iteration_bounds = array<i64: 2>, scalar_prefetch = 0 : i64, scratch_operands = 0 : i64, tpu.core_type = #tpu.core_type<tc>, window_params = [{transform_indices = @transform_0, window_bounds = array<i64: 1, 64, 64>}, {pipeline_mode = #tpu.pipeline_mode<synchronous>, transform_indices = @transform_1, window_bounds = array<i64: 64, 64>}, {pipeline_mode = #tpu.pipeline_mode<synchronous>, transform_indices = @transform_2, window_bounds = array<i64: 1, 64>}, {pipeline_mode = #tpu.pipeline_mode<synchronous>, transform_indices = @transform_3, window_bounds = array<i64: 1, 64>}, {transform_indices = @transform_4, window_bounds = array<i64: 1, 64, 64>}]} {
    %c0 = arith.constant 0 : index
    %c0_0 = arith.constant 0 : index
    %c0_1 = arith.constant 0 : index
    %0 = vector.load %arg1[%c0, %c0_0, %c0_1] : memref<1x64x64xf32, #tpu.memory_space<vmem>>, vector<1x64x64xf32>
    %1 = vector.shape_cast %0 : vector<1x64x64xf32> to vector<64x64xf32>
    %c0_2 = arith.constant 0 : index
    %c0_3 = arith.constant 0 : index
    %2 = vector.load %arg3[%c0_2, %c0_3] : memref<1x64xf32, #tpu.memory_space<vmem>>, vector<1x64xf32>
    %3 = vector.broadcast %2 : vector<1x64xf32> to vector<64x64xf32>
    %4 = arith.mulf %1, %3 : vector<64x64xf32>
    %c0_4 = arith.constant 0 : index
    %c0_5 = arith.constant 0 : index
    %5 = vector.load %arg4[%c0_4, %c0_5] : memref<1x64xf32, #tpu.memory_space<vmem>>, vector<1x64xf32>
    %6 = vector.broadcast %5 : vector<1x64xf32> to vector<64x64xf32>
    %7 = arith.addf %4, %6 : vector<64x64xf32>
    %cst = arith.constant 0.000000e+00 : f32
    %8 = vector.broadcast %cst : f32 to vector<64x64xf32>
    %9 = arith.maximumf %7, %8 : vector<64x64xf32>
    %10 = arith.truncf %9 : vector<64x64xf32> to vector<64x64xbf16>
    %c0_6 = arith.constant 0 : index
    %c0_7 = arith.constant 0 : index
    %11 = vector.load %arg2[%c0_6, %c0_7] : memref<64x64xbf16, #tpu.memory_space<vmem>>, vector<64x64xbf16>
    %cst_8 = arith.constant dense<0.000000e+00> : vector<64x64xf32>
    %12 = tpu.matmul %10, %11, %cst_8 {dimension_numbers = #tpu.dot_dimension_numbers<[1], [0], [0], [1], [0, 0, 1, 1], [], []>} : vector<64x64xbf16>, vector<64x64xbf16>, vector<64x64xf32> -> vector<64x64xf32>
    %13 = arith.truncf %12 : vector<64x64xf32> to vector<64x64xbf16>
    %c0_9 = arith.constant 0 : index
    %c0_10 = arith.constant 0 : index
    %c0_11 = arith.constant 0 : index
    %14 = vector.load %arg5[%c0_9, %c0_10, %c0_11] : memref<1x64x64xbf16, #tpu.memory_space<vmem>>, vector<1x64x64xbf16>
    %15 = vector.shape_cast %14 : vector<1x64x64xbf16> to vector<64x64xbf16>
    %16 = vector.shape_cast %13 : vector<64x64xbf16> to vector<1x64x64xbf16>
    tpu.vector_store %arg5[%c0_9, %c0_10, %c0_11], %16 {strides = array<i32>} : memref<1x64x64xbf16, #tpu.memory_space<vmem>>, vector<1x64x64xbf16>,
    return
  }
  func.func @transform_0(%arg0: i32) -> (i32, i32, i32) {
    %c0_i32 = arith.constant 0 : i32
    %c0_i32_0 = arith.constant 0 : i32
    %c0_i32_1 = arith.constant 0 : i32
    return %arg0, %c0_i32, %c0_i32_0 : i32, i32, i32
  }
  func.func @transform_1(%arg0: i32) -> (i32, i32) {
    %c0_i32 = arith.constant 0 : i32
    %c0_i32_0 = arith.constant 0 : i32
    %c0_i32_1 = arith.constant 0 : i32
    return %c0_i32, %c0_i32_0 : i32, i32
  }
  func.func @transform_2(%arg0: i32) -> (i32, i32) {
    %c0_i32 = arith.constant 0 : i32
    %c0_i32_0 = arith.constant 0 : i32
    %c0_i32_1 = arith.constant 0 : i32
    return %c0_i32, %c0_i32_0 : i32, i32
  }
  func.func @transform_3(%arg0: i32) -> (i32, i32) {
    %c0_i32 = arith.constant 0 : i32
    %c0_i32_0 = arith.constant 0 : i32
    %c0_i32_1 = arith.constant 0 : i32
    return %c0_i32, %c0_i32_0 : i32, i32
  }
  func.func @transform_4(%arg0: i32) -> (i32, i32, i32) {
    %c0_i32 = arith.constant 0 : i32
    %c0_i32_0 = arith.constant 0 : i32
    %c0_i32_1 = arith.constant 0 : i32
    return %arg0, %c0_i32, %c0_i32_0 : i32, i32, i32
  }
}

module attributes {stable_mosaic.version = 11 : i64} {
  func.func @kernel(%arg0: i32, %arg1: memref<1x128x32xbf16, #tpu.memory_space<vmem>>, %arg2: memref<1x128x32xbf16, #tpu.memory_space<vmem>>, %arg3: memref<64x288xbf16, #tpu.memory_space<vmem>>, %arg4: memref<32x288xbf16, #tpu.memory_space<vmem>>, %arg5: memref<64x32xbf16, #tpu.memory_space<vmem>>, %arg6: memref<1x32xf32, #tpu.memory_space<vmem>>, %arg7: memref<1x64xf32, #tpu.memory_space<vmem>>, %arg8: memref<1x64xf32, #tpu.memory_space<vmem>>, %arg9: memref<1x64xf32, #tpu.memory_space<vmem>>, %arg10: memref<1x32xf32, #tpu.memory_space<vmem>>, %arg11: memref<1x32xf32, #tpu.memory_space<vmem>>, %arg12: memref<1x32xf32, #tpu.memory_space<vmem>>, %arg13: memref<1x128x32xbf16, #tpu.memory_space<vmem>>, %arg14: memref<128x64xbf16, #tpu.memory_space<vmem>>, %arg15: memref<176x288xf32, #tpu.memory_space<vmem>>) attributes {dimension_semantics = [#tpu.dimension_semantics<parallel>], iteration_bounds = array<i64: 2>, scalar_prefetch = 0 : i64, scratch_operands = 2 : i64, tpu.core_type = #tpu.core_type<tc>, window_params = [{transform_indices = @transform_0, window_bounds = array<i64: 1, 128, 32>}, {transform_indices = @transform_1, window_bounds = array<i64: 1, 128, 32>}, {pipeline_mode = #tpu.pipeline_mode<synchronous>, transform_indices = @transform_2, window_bounds = array<i64: 64, 288>}, {pipeline_mode = #tpu.pipeline_mode<synchronous>, transform_indices = @transform_3, window_bounds = array<i64: 32, 288>}, {pipeline_mode = #tpu.pipeline_mode<synchronous>, transform_indices = @transform_4, window_bounds = array<i64: 64, 32>}, {pipeline_mode = #tpu.pipeline_mode<synchronous>, transform_indices = @transform_5, window_bounds = array<i64: 1, 32>}, {pipeline_mode = #tpu.pipeline_mode<synchronous>, transform_indices = @transform_6, window_bounds = array<i64: 1, 64>}, {pipeline_mode = #tpu.pipeline_mode<synchronous>, transform_indices = @transform_7, window_bounds = array<i64: 1, 64>}, {pipeline_mode = #tpu.pipeline_mode<synchronous>, transform_indices = @transform_8, window_bounds = array<i64: 1, 64>}, {pipeline_mode = #tpu.pipeline_mode<synchronous>, transform_indices = @transform_9, window_bounds = array<i64: 1, 32>}, {pipeline_mode = #tpu.pipeline_mode<synchronous>, transform_indices = @transform_10, window_bounds = array<i64: 1, 32>}, {pipeline_mode = #tpu.pipeline_mode<synchronous>, transform_indices = @transform_11, window_bounds = array<i64: 1, 32>}, {transform_indices = @transform_12, window_bounds = array<i64: 1, 128, 32>}]} {
    %cst = arith.constant 0.000000e+00 : f32
    %0 = vector.broadcast %cst : f32 to vector<24x288xf32>
    %c0 = arith.constant 0 : index
    %c0_0 = arith.constant 0 : index
    %1 = vector.load %arg15[%c0, %c0_0] : memref<176x288xf32, #tpu.memory_space<vmem>>, vector<24x288xf32>
    tpu.vector_store %arg15[%c0, %c0_0], %0 {strides = array<i32>} : memref<176x288xf32, #tpu.memory_space<vmem>>, vector<24x288xf32>,
    %cst_1 = arith.constant 0.000000e+00 : f32
    %2 = vector.broadcast %cst_1 : f32 to vector<24x288xf32>
    %c152 = arith.constant 152 : index
    %c0_2 = arith.constant 0 : index
    %3 = vector.load %arg15[%c152, %c0_2] : memref<176x288xf32, #tpu.memory_space<vmem>>, vector<24x288xf32>
    tpu.vector_store %arg15[%c152, %c0_2], %2 {strides = array<i32>} : memref<176x288xf32, #tpu.memory_space<vmem>>, vector<24x288xf32>,
    %4 = tpu.iota {dimensions = array<i32: 0>} : vector<128x1xi32>
    %c16_i32 = arith.constant 16 : i32
    %c0_i32 = arith.constant 0 : i32
    %5 = arith.cmpi eq, %c16_i32, %c0_i32 : i32
    %c1_i32 = arith.constant 1 : i32
    %6 = arith.select %5, %c1_i32, %c16_i32 : i32
    %7 = vector.broadcast %6 : i32 to vector<128x1xi32>
    %8 = arith.remsi %4, %7 : vector<128x1xi32>
    %c0_i32_3 = arith.constant 0 : i32
    %9 = vector.broadcast %c0_i32_3 : i32 to vector<128x1xi32>
    %10 = arith.cmpi ne, %8, %9 : vector<128x1xi32>
    %c0_i32_4 = arith.constant 0 : i32
    %11 = vector.broadcast %c0_i32_4 : i32 to vector<128x1xi32>
    %12 = arith.cmpi slt, %8, %11 : vector<128x1xi32>
    %c0_i32_5 = arith.constant 0 : i32
    %13 = arith.cmpi slt, %6, %c0_i32_5 : i32
    %14 = vector.broadcast %13 : i1 to vector<128x1xi1>
    %15 = vector.broadcast %14 : vector<128x1xi1> to vector<128x1xi1>
    %16 = arith.xori %12, %15 : vector<128x1xi1>
    %17 = arith.andi %16, %10 : vector<128x1xi1>
    %18 = vector.broadcast %6 : i32 to vector<128x1xi32>
    %19 = arith.addi %8, %18 : vector<128x1xi32>
    %20 = arith.select %17, %19, %8 : vector<128x1xi1>, vector<128x1xi32>
    %c0_i32_6 = arith.constant 0 : i32
    %21 = vector.broadcast %c0_i32_6 : i32 to vector<128x1xi32>
    %22 = arith.cmpi ne, %20, %21 : vector<128x1xi32>
    %c15_i32 = arith.constant 15 : i32
    %23 = vector.broadcast %c15_i32 : i32 to vector<128x1xi32>
    %24 = arith.cmpi ne, %20, %23 : vector<128x1xi32>
    %c0_7 = arith.constant 0 : index
    %c0_8 = arith.constant 0 : index
    %c0_9 = arith.constant 0 : index
    %25 = vector.load %arg1[%c0_7, %c0_8, %c0_9] : memref<1x128x32xbf16, #tpu.memory_space<vmem>>, vector<1x128x32xbf16>
    %26 = vector.shape_cast %25 : vector<1x128x32xbf16> to vector<128x32xbf16>
    %c0_10 = arith.constant 0 : index
    %c0_11 = arith.constant 0 : index
    %27 = vector.load %arg14[%c0_10, %c0_11] : memref<128x64xbf16, #tpu.memory_space<vmem>>, vector<128x32xbf16>
    tpu.vector_store %arg14[%c0_10, %c0_11], %26 {strides = array<i32>} : memref<128x64xbf16, #tpu.memory_space<vmem>>, vector<128x32xbf16>,
    %c0_12 = arith.constant 0 : index
    %c0_13 = arith.constant 0 : index
    %c0_14 = arith.constant 0 : index
    %28 = vector.load %arg2[%c0_12, %c0_13, %c0_14] : memref<1x128x32xbf16, #tpu.memory_space<vmem>>, vector<1x128x32xbf16>
    %29 = vector.shape_cast %28 : vector<1x128x32xbf16> to vector<128x32xbf16>
    %c0_15 = arith.constant 0 : index
    %c32 = arith.constant 32 : index
    %30 = vector.load %arg14[%c0_15, %c32] : memref<128x64xbf16, #tpu.memory_space<vmem>>, vector<128x32xbf16>
    tpu.vector_store %arg14[%c0_15, %c32], %29 {strides = array<i32>} : memref<128x64xbf16, #tpu.memory_space<vmem>>, vector<128x32xbf16>,
    %c0_16 = arith.constant 0 : index
    %c0_17 = arith.constant 0 : index
    %31 = vector.load %arg14[%c0_16, %c0_17] : memref<128x64xbf16, #tpu.memory_space<vmem>>, vector<128x64xbf16>
    %c0_18 = arith.constant 0 : index
    %c0_19 = arith.constant 0 : index
    %32 = vector.load %arg5[%c0_18, %c0_19] : memref<64x32xbf16, #tpu.memory_space<vmem>>, vector<64x32xbf16>
    %cst_20 = arith.constant dense<0.000000e+00> : vector<128x32xf32>
    %33 = tpu.matmul %31, %32, %cst_20 {dimension_numbers = #tpu.dot_dimension_numbers<[1], [0], [0], [1], [0, 0, 1, 1], [], []>} : vector<128x64xbf16>, vector<64x32xbf16>, vector<128x32xf32> -> vector<128x32xf32>
    %c0_21 = arith.constant 0 : index
    %c0_22 = arith.constant 0 : index
    %34 = vector.load %arg6[%c0_21, %c0_22] : memref<1x32xf32, #tpu.memory_space<vmem>>, vector<1x32xf32>
    %35 = vector.broadcast %34 : vector<1x32xf32> to vector<128x32xf32>
    %36 = arith.addf %33, %35 : vector<128x32xf32>
    %37 = arith.extf %31 : vector<128x64xbf16> to vector<128x64xf32>
    %c0_23 = arith.constant 0 : index
    %c0_24 = arith.constant 0 : index
    %38 = vector.load %arg7[%c0_23, %c0_24] : memref<1x64xf32, #tpu.memory_space<vmem>>, vector<1x64xf32>
    %39 = vector.broadcast %38 : vector<1x64xf32> to vector<128x64xf32>
    %40 = arith.mulf %37, %39 : vector<128x64xf32>
    %c0_25 = arith.constant 0 : index
    %c0_26 = arith.constant 0 : index
    %41 = vector.load %arg8[%c0_25, %c0_26] : memref<1x64xf32, #tpu.memory_space<vmem>>, vector<1x64xf32>
    %42 = vector.broadcast %41 : vector<1x64xf32> to vector<128x64xf32>
    %43 = arith.addf %40, %42 : vector<128x64xf32>
    %c0_27 = arith.constant 0 : index
    %c0_28 = arith.constant 0 : index
    %44 = vector.load %arg9[%c0_27, %c0_28] : memref<1x64xf32, #tpu.memory_space<vmem>>, vector<1x64xf32>
    %cst_29 = arith.constant 0.000000e+00 : f32
    %45 = vector.broadcast %cst_29 : f32 to vector<128x64xf32>
    %46 = arith.cmpf ogt, %43, %45 : vector<128x64xf32>
    %47 = vector.broadcast %44 : vector<1x64xf32> to vector<128x64xf32>
    %48 = arith.mulf %47, %43 : vector<128x64xf32>
    %49 = arith.select %46, %43, %48 : vector<128x64xi1>, vector<128x64xf32>
    %50 = arith.truncf %49 : vector<128x64xf32> to vector<128x64xbf16>
    %c0_30 = arith.constant 0 : index
    %c0_31 = arith.constant 0 : index
    %51 = vector.load %arg3[%c0_30, %c0_31] : memref<64x288xbf16, #tpu.memory_space<vmem>>, vector<64x288xbf16>
    %cst_32 = arith.constant dense<0.000000e+00> : vector<128x288xf32>
    %52 = tpu.matmul %50, %51, %cst_32 {dimension_numbers = #tpu.dot_dimension_numbers<[1], [0], [0], [1], [0, 0, 1, 1], [], []>} : vector<128x64xbf16>, vector<64x288xbf16>, vector<128x288xf32> -> vector<128x288xf32>
    %c24 = arith.constant 24 : index
    %c0_33 = arith.constant 0 : index
    %53 = vector.load %arg15[%c24, %c0_33] : memref<176x288xf32, #tpu.memory_space<vmem>>, vector<128x288xf32>
    tpu.vector_store %arg15[%c24, %c0_33], %52 {strides = array<i32>} : memref<176x288xf32, #tpu.memory_space<vmem>>, vector<128x288xf32>,
    %c7 = arith.constant 7 : index
    %c0_34 = arith.constant 0 : index
    %54 = vector.load %arg15[%c7, %c0_34] : memref<176x288xf32, #tpu.memory_space<vmem>>, vector<128x32xf32>
    %c23 = arith.constant 23 : index
    %c96 = arith.constant 96 : index
    %55 = vector.load %arg15[%c23, %c96] : memref<176x288xf32, #tpu.memory_space<vmem>>, vector<128x32xf32>
    %56 = arith.addf %54, %55 : vector<128x32xf32>
    %c39 = arith.constant 39 : index
    %c192 = arith.constant 192 : index
    %57 = vector.load %arg15[%c39, %c192] : memref<176x288xf32, #tpu.memory_space<vmem>>, vector<128x32xf32>
    %58 = arith.addf %56, %57 : vector<128x32xf32>
    %cst_35 = arith.constant 0.000000e+00 : f32
    %59 = vector.shape_cast %22 : vector<128x1xi1> to vector<128x1xi1>
    %60 = vector.broadcast %59 : vector<128x1xi1> to vector<128x32xi1>
    %61 = vector.broadcast %cst_35 : f32 to vector<128x32xf32>
    %62 = arith.select %60, %58, %61 : vector<128x32xi1>, vector<128x32xf32>
    %c8 = arith.constant 8 : index
    %c32_36 = arith.constant 32 : index
    %63 = vector.load %arg15[%c8, %c32_36] : memref<176x288xf32, #tpu.memory_space<vmem>>, vector<128x32xf32>
    %c24_37 = arith.constant 24 : index
    %c128 = arith.constant 128 : index
    %64 = vector.load %arg15[%c24_37, %c128] : memref<176x288xf32, #tpu.memory_space<vmem>>, vector<128x32xf32>
    %65 = arith.addf %63, %64 : vector<128x32xf32>
    %c40 = arith.constant 40 : index
    %c224 = arith.constant 224 : index
    %66 = vector.load %arg15[%c40, %c224] : memref<176x288xf32, #tpu.memory_space<vmem>>, vector<128x32xf32>
    %67 = arith.addf %65, %66 : vector<128x32xf32>
    %68 = arith.addf %62, %67 : vector<128x32xf32>
    %c9 = arith.constant 9 : index
    %c64 = arith.constant 64 : index
    %69 = vector.load %arg15[%c9, %c64] : memref<176x288xf32, #tpu.memory_space<vmem>>, vector<128x32xf32>
    %c25 = arith.constant 25 : index
    %c160 = arith.constant 160 : index
    %70 = vector.load %arg15[%c25, %c160] : memref<176x288xf32, #tpu.memory_space<vmem>>, vector<128x32xf32>
    %71 = arith.addf %69, %70 : vector<128x32xf32>
    %c41 = arith.constant 41 : index
    %c256 = arith.constant 256 : index
    %72 = vector.load %arg15[%c41, %c256] : memref<176x288xf32, #tpu.memory_space<vmem>>, vector<128x32xf32>
    %73 = arith.addf %71, %72 : vector<128x32xf32>
    %cst_38 = arith.constant 0.000000e+00 : f32
    %74 = vector.shape_cast %24 : vector<128x1xi1> to vector<128x1xi1>
    %75 = vector.broadcast %74 : vector<128x1xi1> to vector<128x32xi1>
    %76 = vector.broadcast %cst_38 : f32 to vector<128x32xf32>
    %77 = arith.select %75, %73, %76 : vector<128x32xi1>, vector<128x32xf32>
    %78 = arith.addf %68, %77 : vector<128x32xf32>
    %c0_39 = arith.constant 0 : index
    %c0_40 = arith.constant 0 : index
    %79 = vector.load %arg10[%c0_39, %c0_40] : memref<1x32xf32, #tpu.memory_space<vmem>>, vector<1x32xf32>
    %80 = vector.broadcast %79 : vector<1x32xf32> to vector<128x32xf32>
    %81 = arith.mulf %78, %80 : vector<128x32xf32>
    %c0_41 = arith.constant 0 : index
    %c0_42 = arith.constant 0 : index
    %82 = vector.load %arg11[%c0_41, %c0_42] : memref<1x32xf32, #tpu.memory_space<vmem>>, vector<1x32xf32>
    %83 = vector.broadcast %82 : vector<1x32xf32> to vector<128x32xf32>
    %84 = arith.addf %81, %83 : vector<128x32xf32>
    %c0_43 = arith.constant 0 : index
    %c0_44 = arith.constant 0 : index
    %85 = vector.load %arg12[%c0_43, %c0_44] : memref<1x32xf32, #tpu.memory_space<vmem>>, vector<1x32xf32>
    %cst_45 = arith.constant 0.000000e+00 : f32
    %86 = vector.broadcast %cst_45 : f32 to vector<128x32xf32>
    %87 = arith.cmpf ogt, %84, %86 : vector<128x32xf32>
    %88 = vector.broadcast %85 : vector<1x32xf32> to vector<128x32xf32>
    %89 = arith.mulf %88, %84 : vector<128x32xf32>
    %90 = arith.select %87, %84, %89 : vector<128x32xi1>, vector<128x32xf32>
    %91 = arith.truncf %90 : vector<128x32xf32> to vector<128x32xbf16>
    %c0_46 = arith.constant 0 : index
    %c0_47 = arith.constant 0 : index
    %92 = vector.load %arg4[%c0_46, %c0_47] : memref<32x288xbf16, #tpu.memory_space<vmem>>, vector<32x288xbf16>
    %cst_48 = arith.constant dense<0.000000e+00> : vector<128x288xf32>
    %93 = tpu.matmul %91, %92, %cst_48 {dimension_numbers = #tpu.dot_dimension_numbers<[1], [0], [0], [1], [0, 0, 1, 1], [], []>} : vector<128x32xbf16>, vector<32x288xbf16>, vector<128x288xf32> -> vector<128x288xf32>
    %c24_49 = arith.constant 24 : index
    %c0_50 = arith.constant 0 : index
    %94 = vector.load %arg15[%c24_49, %c0_50] : memref<176x288xf32, #tpu.memory_space<vmem>>, vector<128x288xf32>
    tpu.vector_store %arg15[%c24_49, %c0_50], %93 {strides = array<i32>} : memref<176x288xf32, #tpu.memory_space<vmem>>, vector<128x288xf32>,
    %c7_51 = arith.constant 7 : index
    %c0_52 = arith.constant 0 : index
    %95 = vector.load %arg15[%c7_51, %c0_52] : memref<176x288xf32, #tpu.memory_space<vmem>>, vector<128x32xf32>
    %c23_53 = arith.constant 23 : index
    %c96_54 = arith.constant 96 : index
    %96 = vector.load %arg15[%c23_53, %c96_54] : memref<176x288xf32, #tpu.memory_space<vmem>>, vector<128x32xf32>
    %97 = arith.addf %95, %96 : vector<128x32xf32>
    %c39_55 = arith.constant 39 : index
    %c192_56 = arith.constant 192 : index
    %98 = vector.load %arg15[%c39_55, %c192_56] : memref<176x288xf32, #tpu.memory_space<vmem>>, vector<128x32xf32>
    %99 = arith.addf %97, %98 : vector<128x32xf32>
    %cst_57 = arith.constant 0.000000e+00 : f32
    %100 = vector.shape_cast %22 : vector<128x1xi1> to vector<128x1xi1>
    %101 = vector.broadcast %100 : vector<128x1xi1> to vector<128x32xi1>
    %102 = vector.broadcast %cst_57 : f32 to vector<128x32xf32>
    %103 = arith.select %101, %99, %102 : vector<128x32xi1>, vector<128x32xf32>
    %c8_58 = arith.constant 8 : index
    %c32_59 = arith.constant 32 : index
    %104 = vector.load %arg15[%c8_58, %c32_59] : memref<176x288xf32, #tpu.memory_space<vmem>>, vector<128x32xf32>
    %c24_60 = arith.constant 24 : index
    %c128_61 = arith.constant 128 : index
    %105 = vector.load %arg15[%c24_60, %c128_61] : memref<176x288xf32, #tpu.memory_space<vmem>>, vector<128x32xf32>
    %106 = arith.addf %104, %105 : vector<128x32xf32>
    %c40_62 = arith.constant 40 : index
    %c224_63 = arith.constant 224 : index
    %107 = vector.load %arg15[%c40_62, %c224_63] : memref<176x288xf32, #tpu.memory_space<vmem>>, vector<128x32xf32>
    %108 = arith.addf %106, %107 : vector<128x32xf32>
    %109 = arith.addf %103, %108 : vector<128x32xf32>
    %c9_64 = arith.constant 9 : index
    %c64_65 = arith.constant 64 : index
    %110 = vector.load %arg15[%c9_64, %c64_65] : memref<176x288xf32, #tpu.memory_space<vmem>>, vector<128x32xf32>
    %c25_66 = arith.constant 25 : index
    %c160_67 = arith.constant 160 : index
    %111 = vector.load %arg15[%c25_66, %c160_67] : memref<176x288xf32, #tpu.memory_space<vmem>>, vector<128x32xf32>
    %112 = arith.addf %110, %111 : vector<128x32xf32>
    %c41_68 = arith.constant 41 : index
    %c256_69 = arith.constant 256 : index
    %113 = vector.load %arg15[%c41_68, %c256_69] : memref<176x288xf32, #tpu.memory_space<vmem>>, vector<128x32xf32>
    %114 = arith.addf %112, %113 : vector<128x32xf32>
    %cst_70 = arith.constant 0.000000e+00 : f32
    %115 = vector.shape_cast %24 : vector<128x1xi1> to vector<128x1xi1>
    %116 = vector.broadcast %115 : vector<128x1xi1> to vector<128x32xi1>
    %117 = vector.broadcast %cst_70 : f32 to vector<128x32xf32>
    %118 = arith.select %116, %114, %117 : vector<128x32xi1>, vector<128x32xf32>
    %119 = arith.addf %109, %118 : vector<128x32xf32>
    %120 = arith.addf %119, %36 : vector<128x32xf32>
    %121 = arith.truncf %120 : vector<128x32xf32> to vector<128x32xbf16>
    %c0_71 = arith.constant 0 : index
    %c0_72 = arith.constant 0 : index
    %c0_73 = arith.constant 0 : index
    %122 = vector.load %arg13[%c0_71, %c0_72, %c0_73] : memref<1x128x32xbf16, #tpu.memory_space<vmem>>, vector<1x128x32xbf16>
    %123 = vector.shape_cast %122 : vector<1x128x32xbf16> to vector<128x32xbf16>
    %124 = vector.shape_cast %121 : vector<128x32xbf16> to vector<1x128x32xbf16>
    tpu.vector_store %arg13[%c0_71, %c0_72, %c0_73], %124 {strides = array<i32>} : memref<1x128x32xbf16, #tpu.memory_space<vmem>>, vector<1x128x32xbf16>,
    return
  }
  func.func @transform_0(%arg0: i32) -> (i32, i32, i32) {
    %c0_i32 = arith.constant 0 : i32
    %c0_i32_0 = arith.constant 0 : i32
    %c0_i32_1 = arith.constant 0 : i32
    return %arg0, %c0_i32, %c0_i32_0 : i32, i32, i32
  }
  func.func @transform_1(%arg0: i32) -> (i32, i32, i32) {
    %c0_i32 = arith.constant 0 : i32
    %c0_i32_0 = arith.constant 0 : i32
    %c0_i32_1 = arith.constant 0 : i32
    return %arg0, %c0_i32, %c0_i32_0 : i32, i32, i32
  }
  func.func @transform_2(%arg0: i32) -> (i32, i32) {
    %c0_i32 = arith.constant 0 : i32
    %c0_i32_0 = arith.constant 0 : i32
    %c0_i32_1 = arith.constant 0 : i32
    return %c0_i32, %c0_i32_0 : i32, i32
  }
  func.func @transform_3(%arg0: i32) -> (i32, i32) {
    %c0_i32 = arith.constant 0 : i32
    %c0_i32_0 = arith.constant 0 : i32
    %c0_i32_1 = arith.constant 0 : i32
    return %c0_i32, %c0_i32_0 : i32, i32
  }
  func.func @transform_4(%arg0: i32) -> (i32, i32) {
    %c0_i32 = arith.constant 0 : i32
    %c0_i32_0 = arith.constant 0 : i32
    %c0_i32_1 = arith.constant 0 : i32
    return %c0_i32, %c0_i32_0 : i32, i32
  }
  func.func @transform_5(%arg0: i32) -> (i32, i32) {
    %c0_i32 = arith.constant 0 : i32
    %c0_i32_0 = arith.constant 0 : i32
    %c0_i32_1 = arith.constant 0 : i32
    return %c0_i32, %c0_i32_0 : i32, i32
  }
  func.func @transform_6(%arg0: i32) -> (i32, i32) {
    %c0_i32 = arith.constant 0 : i32
    %c0_i32_0 = arith.constant 0 : i32
    %c0_i32_1 = arith.constant 0 : i32
    return %c0_i32, %c0_i32_0 : i32, i32
  }
  func.func @transform_7(%arg0: i32) -> (i32, i32) {
    %c0_i32 = arith.constant 0 : i32
    %c0_i32_0 = arith.constant 0 : i32
    %c0_i32_1 = arith.constant 0 : i32
    return %c0_i32, %c0_i32_0 : i32, i32
  }
  func.func @transform_8(%arg0: i32) -> (i32, i32) {
    %c0_i32 = arith.constant 0 : i32
    %c0_i32_0 = arith.constant 0 : i32
    %c0_i32_1 = arith.constant 0 : i32
    return %c0_i32, %c0_i32_0 : i32, i32
  }
  func.func @transform_9(%arg0: i32) -> (i32, i32) {
    %c0_i32 = arith.constant 0 : i32
    %c0_i32_0 = arith.constant 0 : i32
    %c0_i32_1 = arith.constant 0 : i32
    return %c0_i32, %c0_i32_0 : i32, i32
  }
  func.func @transform_10(%arg0: i32) -> (i32, i32) {
    %c0_i32 = arith.constant 0 : i32
    %c0_i32_0 = arith.constant 0 : i32
    %c0_i32_1 = arith.constant 0 : i32
    return %c0_i32, %c0_i32_0 : i32, i32
  }
  func.func @transform_11(%arg0: i32) -> (i32, i32) {
    %c0_i32 = arith.constant 0 : i32
    %c0_i32_0 = arith.constant 0 : i32
    %c0_i32_1 = arith.constant 0 : i32
    return %c0_i32, %c0_i32_0 : i32, i32
  }
  func.func @transform_12(%arg0: i32) -> (i32, i32, i32) {
    %c0_i32 = arith.constant 0 : i32
    %c0_i32_0 = arith.constant 0 : i32
    %c0_i32_1 = arith.constant 0 : i32
    return %arg0, %c0_i32, %c0_i32_0 : i32, i32, i32
  }
}

module attributes {stable_mosaic.version = 11 : i64} {
  func.func @kernel(%arg0: i32, %arg1: memref<1x128x32xbf16, #tpu.memory_space<vmem>>, %arg2: memref<32x288xbf16, #tpu.memory_space<vmem>>, %arg3: memref<32x288xbf16, #tpu.memory_space<vmem>>, %arg4: memref<1x32xf32, #tpu.memory_space<vmem>>, %arg5: memref<1x32xf32, #tpu.memory_space<vmem>>, %arg6: memref<1x32xf32, #tpu.memory_space<vmem>>, %arg7: memref<1x32xf32, #tpu.memory_space<vmem>>, %arg8: memref<1x32xf32, #tpu.memory_space<vmem>>, %arg9: memref<1x32xf32, #tpu.memory_space<vmem>>, %arg10: memref<1x128x32xf32, #tpu.memory_space<vmem>>, %arg11: memref<176x288xf32, #tpu.memory_space<vmem>>) attributes {dimension_semantics = [#tpu.dimension_semantics<parallel>], iteration_bounds = array<i64: 2>, scalar_prefetch = 0 : i64, scratch_operands = 1 : i64, tpu.core_type = #tpu.core_type<tc>, window_params = [{transform_indices = @transform_0, window_bounds = array<i64: 1, 128, 32>}, {pipeline_mode = #tpu.pipeline_mode<synchronous>, transform_indices = @transform_1, window_bounds = array<i64: 32, 288>}, {pipeline_mode = #tpu.pipeline_mode<synchronous>, transform_indices = @transform_2, window_bounds = array<i64: 32, 288>}, {pipeline_mode = #tpu.pipeline_mode<synchronous>, transform_indices = @transform_3, window_bounds = array<i64: 1, 32>}, {pipeline_mode = #tpu.pipeline_mode<synchronous>, transform_indices = @transform_4, window_bounds = array<i64: 1, 32>}, {pipeline_mode = #tpu.pipeline_mode<synchronous>, transform_indices = @transform_5, window_bounds = array<i64: 1, 32>}, {pipeline_mode = #tpu.pipeline_mode<synchronous>, transform_indices = @transform_6, window_bounds = array<i64: 1, 32>}, {pipeline_mode = #tpu.pipeline_mode<synchronous>, transform_indices = @transform_7, window_bounds = array<i64: 1, 32>}, {pipeline_mode = #tpu.pipeline_mode<synchronous>, transform_indices = @transform_8, window_bounds = array<i64: 1, 32>}, {transform_indices = @transform_9, window_bounds = array<i64: 1, 128, 32>}]} {
    %cst = arith.constant 0.000000e+00 : f32
    %0 = vector.broadcast %cst : f32 to vector<24x288xf32>
    %c0 = arith.constant 0 : index
    %c0_0 = arith.constant 0 : index
    %1 = vector.load %arg11[%c0, %c0_0] : memref<176x288xf32, #tpu.memory_space<vmem>>, vector<24x288xf32>
    tpu.vector_store %arg11[%c0, %c0_0], %0 {strides = array<i32>} : memref<176x288xf32, #tpu.memory_space<vmem>>, vector<24x288xf32>,
    %cst_1 = arith.constant 0.000000e+00 : f32
    %2 = vector.broadcast %cst_1 : f32 to vector<24x288xf32>
    %c152 = arith.constant 152 : index
    %c0_2 = arith.constant 0 : index
    %3 = vector.load %arg11[%c152, %c0_2] : memref<176x288xf32, #tpu.memory_space<vmem>>, vector<24x288xf32>
    tpu.vector_store %arg11[%c152, %c0_2], %2 {strides = array<i32>} : memref<176x288xf32, #tpu.memory_space<vmem>>, vector<24x288xf32>,
    %4 = tpu.iota {dimensions = array<i32: 0>} : vector<128x1xi32>
    %c16_i32 = arith.constant 16 : i32
    %c0_i32 = arith.constant 0 : i32
    %5 = arith.cmpi eq, %c16_i32, %c0_i32 : i32
    %c1_i32 = arith.constant 1 : i32
    %6 = arith.select %5, %c1_i32, %c16_i32 : i32
    %7 = vector.broadcast %6 : i32 to vector<128x1xi32>
    %8 = arith.remsi %4, %7 : vector<128x1xi32>
    %c0_i32_3 = arith.constant 0 : i32
    %9 = vector.broadcast %c0_i32_3 : i32 to vector<128x1xi32>
    %10 = arith.cmpi ne, %8, %9 : vector<128x1xi32>
    %c0_i32_4 = arith.constant 0 : i32
    %11 = vector.broadcast %c0_i32_4 : i32 to vector<128x1xi32>
    %12 = arith.cmpi slt, %8, %11 : vector<128x1xi32>
    %c0_i32_5 = arith.constant 0 : i32
    %13 = arith.cmpi slt, %6, %c0_i32_5 : i32
    %14 = vector.broadcast %13 : i1 to vector<128x1xi1>
    %15 = vector.broadcast %14 : vector<128x1xi1> to vector<128x1xi1>
    %16 = arith.xori %12, %15 : vector<128x1xi1>
    %17 = arith.andi %16, %10 : vector<128x1xi1>
    %18 = vector.broadcast %6 : i32 to vector<128x1xi32>
    %19 = arith.addi %8, %18 : vector<128x1xi32>
    %20 = arith.select %17, %19, %8 : vector<128x1xi1>, vector<128x1xi32>
    %c0_i32_6 = arith.constant 0 : i32
    %21 = vector.broadcast %c0_i32_6 : i32 to vector<128x1xi32>
    %22 = arith.cmpi ne, %20, %21 : vector<128x1xi32>
    %c15_i32 = arith.constant 15 : i32
    %23 = vector.broadcast %c15_i32 : i32 to vector<128x1xi32>
    %24 = arith.cmpi ne, %20, %23 : vector<128x1xi32>
    %c0_7 = arith.constant 0 : index
    %c0_8 = arith.constant 0 : index
    %c0_9 = arith.constant 0 : index
    %25 = vector.load %arg1[%c0_7, %c0_8, %c0_9] : memref<1x128x32xbf16, #tpu.memory_space<vmem>>, vector<1x128x32xbf16>
    %26 = vector.shape_cast %25 : vector<1x128x32xbf16> to vector<128x32xbf16>
    %27 = arith.extf %26 : vector<128x32xbf16> to vector<128x32xf32>
    %c0_10 = arith.constant 0 : index
    %c0_11 = arith.constant 0 : index
    %28 = vector.load %arg4[%c0_10, %c0_11] : memref<1x32xf32, #tpu.memory_space<vmem>>, vector<1x32xf32>
    %29 = vector.broadcast %28 : vector<1x32xf32> to vector<128x32xf32>
    %30 = arith.mulf %27, %29 : vector<128x32xf32>
    %c0_12 = arith.constant 0 : index
    %c0_13 = arith.constant 0 : index
    %31 = vector.load %arg5[%c0_12, %c0_13] : memref<1x32xf32, #tpu.memory_space<vmem>>, vector<1x32xf32>
    %32 = vector.broadcast %31 : vector<1x32xf32> to vector<128x32xf32>
    %33 = arith.addf %30, %32 : vector<128x32xf32>
    %c0_14 = arith.constant 0 : index
    %c0_15 = arith.constant 0 : index
    %34 = vector.load %arg6[%c0_14, %c0_15] : memref<1x32xf32, #tpu.memory_space<vmem>>, vector<1x32xf32>
    %cst_16 = arith.constant 0.000000e+00 : f32
    %35 = vector.broadcast %cst_16 : f32 to vector<128x32xf32>
    %36 = arith.cmpf ogt, %33, %35 : vector<128x32xf32>
    %37 = vector.broadcast %34 : vector<1x32xf32> to vector<128x32xf32>
    %38 = arith.mulf %37, %33 : vector<128x32xf32>
    %39 = arith.select %36, %33, %38 : vector<128x32xi1>, vector<128x32xf32>
    %40 = arith.truncf %39 : vector<128x32xf32> to vector<128x32xbf16>
    %c0_17 = arith.constant 0 : index
    %c0_18 = arith.constant 0 : index
    %41 = vector.load %arg2[%c0_17, %c0_18] : memref<32x288xbf16, #tpu.memory_space<vmem>>, vector<32x288xbf16>
    %cst_19 = arith.constant dense<0.000000e+00> : vector<128x288xf32>
    %42 = tpu.matmul %40, %41, %cst_19 {dimension_numbers = #tpu.dot_dimension_numbers<[1], [0], [0], [1], [0, 0, 1, 1], [], []>} : vector<128x32xbf16>, vector<32x288xbf16>, vector<128x288xf32> -> vector<128x288xf32>
    %c24 = arith.constant 24 : index
    %c0_20 = arith.constant 0 : index
    %43 = vector.load %arg11[%c24, %c0_20] : memref<176x288xf32, #tpu.memory_space<vmem>>, vector<128x288xf32>
    tpu.vector_store %arg11[%c24, %c0_20], %42 {strides = array<i32>} : memref<176x288xf32, #tpu.memory_space<vmem>>, vector<128x288xf32>,
    %c7 = arith.constant 7 : index
    %c0_21 = arith.constant 0 : index
    %44 = vector.load %arg11[%c7, %c0_21] : memref<176x288xf32, #tpu.memory_space<vmem>>, vector<128x32xf32>
    %c23 = arith.constant 23 : index
    %c96 = arith.constant 96 : index
    %45 = vector.load %arg11[%c23, %c96] : memref<176x288xf32, #tpu.memory_space<vmem>>, vector<128x32xf32>
    %46 = arith.addf %44, %45 : vector<128x32xf32>
    %c39 = arith.constant 39 : index
    %c192 = arith.constant 192 : index
    %47 = vector.load %arg11[%c39, %c192] : memref<176x288xf32, #tpu.memory_space<vmem>>, vector<128x32xf32>
    %48 = arith.addf %46, %47 : vector<128x32xf32>
    %cst_22 = arith.constant 0.000000e+00 : f32
    %49 = vector.shape_cast %22 : vector<128x1xi1> to vector<128x1xi1>
    %50 = vector.broadcast %49 : vector<128x1xi1> to vector<128x32xi1>
    %51 = vector.broadcast %cst_22 : f32 to vector<128x32xf32>
    %52 = arith.select %50, %48, %51 : vector<128x32xi1>, vector<128x32xf32>
    %c8 = arith.constant 8 : index
    %c32 = arith.constant 32 : index
    %53 = vector.load %arg11[%c8, %c32] : memref<176x288xf32, #tpu.memory_space<vmem>>, vector<128x32xf32>
    %c24_23 = arith.constant 24 : index
    %c128 = arith.constant 128 : index
    %54 = vector.load %arg11[%c24_23, %c128] : memref<176x288xf32, #tpu.memory_space<vmem>>, vector<128x32xf32>
    %55 = arith.addf %53, %54 : vector<128x32xf32>
    %c40 = arith.constant 40 : index
    %c224 = arith.constant 224 : index
    %56 = vector.load %arg11[%c40, %c224] : memref<176x288xf32, #tpu.memory_space<vmem>>, vector<128x32xf32>
    %57 = arith.addf %55, %56 : vector<128x32xf32>
    %58 = arith.addf %52, %57 : vector<128x32xf32>
    %c9 = arith.constant 9 : index
    %c64 = arith.constant 64 : index
    %59 = vector.load %arg11[%c9, %c64] : memref<176x288xf32, #tpu.memory_space<vmem>>, vector<128x32xf32>
    %c25 = arith.constant 25 : index
    %c160 = arith.constant 160 : index
    %60 = vector.load %arg11[%c25, %c160] : memref<176x288xf32, #tpu.memory_space<vmem>>, vector<128x32xf32>
    %61 = arith.addf %59, %60 : vector<128x32xf32>
    %c41 = arith.constant 41 : index
    %c256 = arith.constant 256 : index
    %62 = vector.load %arg11[%c41, %c256] : memref<176x288xf32, #tpu.memory_space<vmem>>, vector<128x32xf32>
    %63 = arith.addf %61, %62 : vector<128x32xf32>
    %cst_24 = arith.constant 0.000000e+00 : f32
    %64 = vector.shape_cast %24 : vector<128x1xi1> to vector<128x1xi1>
    %65 = vector.broadcast %64 : vector<128x1xi1> to vector<128x32xi1>
    %66 = vector.broadcast %cst_24 : f32 to vector<128x32xf32>
    %67 = arith.select %65, %63, %66 : vector<128x32xi1>, vector<128x32xf32>
    %68 = arith.addf %58, %67 : vector<128x32xf32>
    %c0_25 = arith.constant 0 : index
    %c0_26 = arith.constant 0 : index
    %69 = vector.load %arg7[%c0_25, %c0_26] : memref<1x32xf32, #tpu.memory_space<vmem>>, vector<1x32xf32>
    %70 = vector.broadcast %69 : vector<1x32xf32> to vector<128x32xf32>
    %71 = arith.mulf %68, %70 : vector<128x32xf32>
    %c0_27 = arith.constant 0 : index
    %c0_28 = arith.constant 0 : index
    %72 = vector.load %arg8[%c0_27, %c0_28] : memref<1x32xf32, #tpu.memory_space<vmem>>, vector<1x32xf32>
    %73 = vector.broadcast %72 : vector<1x32xf32> to vector<128x32xf32>
    %74 = arith.addf %71, %73 : vector<128x32xf32>
    %c0_29 = arith.constant 0 : index
    %c0_30 = arith.constant 0 : index
    %75 = vector.load %arg9[%c0_29, %c0_30] : memref<1x32xf32, #tpu.memory_space<vmem>>, vector<1x32xf32>
    %cst_31 = arith.constant 0.000000e+00 : f32
    %76 = vector.broadcast %cst_31 : f32 to vector<128x32xf32>
    %77 = arith.cmpf ogt, %74, %76 : vector<128x32xf32>
    %78 = vector.broadcast %75 : vector<1x32xf32> to vector<128x32xf32>
    %79 = arith.mulf %78, %74 : vector<128x32xf32>
    %80 = arith.select %77, %74, %79 : vector<128x32xi1>, vector<128x32xf32>
    %81 = arith.truncf %80 : vector<128x32xf32> to vector<128x32xbf16>
    %c0_32 = arith.constant 0 : index
    %c0_33 = arith.constant 0 : index
    %82 = vector.load %arg3[%c0_32, %c0_33] : memref<32x288xbf16, #tpu.memory_space<vmem>>, vector<32x288xbf16>
    %cst_34 = arith.constant dense<0.000000e+00> : vector<128x288xf32>
    %83 = tpu.matmul %81, %82, %cst_34 {dimension_numbers = #tpu.dot_dimension_numbers<[1], [0], [0], [1], [0, 0, 1, 1], [], []>} : vector<128x32xbf16>, vector<32x288xbf16>, vector<128x288xf32> -> vector<128x288xf32>
    %c24_35 = arith.constant 24 : index
    %c0_36 = arith.constant 0 : index
    %84 = vector.load %arg11[%c24_35, %c0_36] : memref<176x288xf32, #tpu.memory_space<vmem>>, vector<128x288xf32>
    tpu.vector_store %arg11[%c24_35, %c0_36], %83 {strides = array<i32>} : memref<176x288xf32, #tpu.memory_space<vmem>>, vector<128x288xf32>,
    %c7_37 = arith.constant 7 : index
    %c0_38 = arith.constant 0 : index
    %85 = vector.load %arg11[%c7_37, %c0_38] : memref<176x288xf32, #tpu.memory_space<vmem>>, vector<128x32xf32>
    %c23_39 = arith.constant 23 : index
    %c96_40 = arith.constant 96 : index
    %86 = vector.load %arg11[%c23_39, %c96_40] : memref<176x288xf32, #tpu.memory_space<vmem>>, vector<128x32xf32>
    %87 = arith.addf %85, %86 : vector<128x32xf32>
    %c39_41 = arith.constant 39 : index
    %c192_42 = arith.constant 192 : index
    %88 = vector.load %arg11[%c39_41, %c192_42] : memref<176x288xf32, #tpu.memory_space<vmem>>, vector<128x32xf32>
    %89 = arith.addf %87, %88 : vector<128x32xf32>
    %cst_43 = arith.constant 0.000000e+00 : f32
    %90 = vector.shape_cast %22 : vector<128x1xi1> to vector<128x1xi1>
    %91 = vector.broadcast %90 : vector<128x1xi1> to vector<128x32xi1>
    %92 = vector.broadcast %cst_43 : f32 to vector<128x32xf32>
    %93 = arith.select %91, %89, %92 : vector<128x32xi1>, vector<128x32xf32>
    %c8_44 = arith.constant 8 : index
    %c32_45 = arith.constant 32 : index
    %94 = vector.load %arg11[%c8_44, %c32_45] : memref<176x288xf32, #tpu.memory_space<vmem>>, vector<128x32xf32>
    %c24_46 = arith.constant 24 : index
    %c128_47 = arith.constant 128 : index
    %95 = vector.load %arg11[%c24_46, %c128_47] : memref<176x288xf32, #tpu.memory_space<vmem>>, vector<128x32xf32>
    %96 = arith.addf %94, %95 : vector<128x32xf32>
    %c40_48 = arith.constant 40 : index
    %c224_49 = arith.constant 224 : index
    %97 = vector.load %arg11[%c40_48, %c224_49] : memref<176x288xf32, #tpu.memory_space<vmem>>, vector<128x32xf32>
    %98 = arith.addf %96, %97 : vector<128x32xf32>
    %99 = arith.addf %93, %98 : vector<128x32xf32>
    %c9_50 = arith.constant 9 : index
    %c64_51 = arith.constant 64 : index
    %100 = vector.load %arg11[%c9_50, %c64_51] : memref<176x288xf32, #tpu.memory_space<vmem>>, vector<128x32xf32>
    %c25_52 = arith.constant 25 : index
    %c160_53 = arith.constant 160 : index
    %101 = vector.load %arg11[%c25_52, %c160_53] : memref<176x288xf32, #tpu.memory_space<vmem>>, vector<128x32xf32>
    %102 = arith.addf %100, %101 : vector<128x32xf32>
    %c41_54 = arith.constant 41 : index
    %c256_55 = arith.constant 256 : index
    %103 = vector.load %arg11[%c41_54, %c256_55] : memref<176x288xf32, #tpu.memory_space<vmem>>, vector<128x32xf32>
    %104 = arith.addf %102, %103 : vector<128x32xf32>
    %cst_56 = arith.constant 0.000000e+00 : f32
    %105 = vector.shape_cast %24 : vector<128x1xi1> to vector<128x1xi1>
    %106 = vector.broadcast %105 : vector<128x1xi1> to vector<128x32xi1>
    %107 = vector.broadcast %cst_56 : f32 to vector<128x32xf32>
    %108 = arith.select %106, %104, %107 : vector<128x32xi1>, vector<128x32xf32>
    %109 = arith.addf %99, %108 : vector<128x32xf32>
    %110 = arith.extf %26 : vector<128x32xbf16> to vector<128x32xf32>
    %111 = arith.addf %109, %110 : vector<128x32xf32>
    %c0_57 = arith.constant 0 : index
    %c0_58 = arith.constant 0 : index
    %c0_59 = arith.constant 0 : index
    %112 = vector.load %arg10[%c0_57, %c0_58, %c0_59] : memref<1x128x32xf32, #tpu.memory_space<vmem>>, vector<1x128x32xf32>
    %113 = vector.shape_cast %112 : vector<1x128x32xf32> to vector<128x32xf32>
    %114 = vector.shape_cast %111 : vector<128x32xf32> to vector<1x128x32xf32>
    tpu.vector_store %arg10[%c0_57, %c0_58, %c0_59], %114 {strides = array<i32>} : memref<1x128x32xf32, #tpu.memory_space<vmem>>, vector<1x128x32xf32>,
    return
  }
  func.func @transform_0(%arg0: i32) -> (i32, i32, i32) {
    %c0_i32 = arith.constant 0 : i32
    %c0_i32_0 = arith.constant 0 : i32
    %c0_i32_1 = arith.constant 0 : i32
    return %arg0, %c0_i32, %c0_i32_0 : i32, i32, i32
  }
  func.func @transform_1(%arg0: i32) -> (i32, i32) {
    %c0_i32 = arith.constant 0 : i32
    %c0_i32_0 = arith.constant 0 : i32
    %c0_i32_1 = arith.constant 0 : i32
    return %c0_i32, %c0_i32_0 : i32, i32
  }
  func.func @transform_2(%arg0: i32) -> (i32, i32) {
    %c0_i32 = arith.constant 0 : i32
    %c0_i32_0 = arith.constant 0 : i32
    %c0_i32_1 = arith.constant 0 : i32
    return %c0_i32, %c0_i32_0 : i32, i32
  }
  func.func @transform_3(%arg0: i32) -> (i32, i32) {
    %c0_i32 = arith.constant 0 : i32
    %c0_i32_0 = arith.constant 0 : i32
    %c0_i32_1 = arith.constant 0 : i32
    return %c0_i32, %c0_i32_0 : i32, i32
  }
  func.func @transform_4(%arg0: i32) -> (i32, i32) {
    %c0_i32 = arith.constant 0 : i32
    %c0_i32_0 = arith.constant 0 : i32
    %c0_i32_1 = arith.constant 0 : i32
    return %c0_i32, %c0_i32_0 : i32, i32
  }
  func.func @transform_5(%arg0: i32) -> (i32, i32) {
    %c0_i32 = arith.constant 0 : i32
    %c0_i32_0 = arith.constant 0 : i32
    %c0_i32_1 = arith.constant 0 : i32
    return %c0_i32, %c0_i32_0 : i32, i32
  }
  func.func @transform_6(%arg0: i32) -> (i32, i32) {
    %c0_i32 = arith.constant 0 : i32
    %c0_i32_0 = arith.constant 0 : i32
    %c0_i32_1 = arith.constant 0 : i32
    return %c0_i32, %c0_i32_0 : i32, i32
  }
  func.func @transform_7(%arg0: i32) -> (i32, i32) {
    %c0_i32 = arith.constant 0 : i32
    %c0_i32_0 = arith.constant 0 : i32
    %c0_i32_1 = arith.constant 0 : i32
    return %c0_i32, %c0_i32_0 : i32, i32
  }
  func.func @transform_8(%arg0: i32) -> (i32, i32) {
    %c0_i32 = arith.constant 0 : i32
    %c0_i32_0 = arith.constant 0 : i32
    %c0_i32_1 = arith.constant 0 : i32
    return %c0_i32, %c0_i32_0 : i32, i32
  }
  func.func @transform_9(%arg0: i32) -> (i32, i32, i32) {
    %c0_i32 = arith.constant 0 : i32
    %c0_i32_0 = arith.constant 0 : i32
    %c0_i32_1 = arith.constant 0 : i32
    return %arg0, %c0_i32, %c0_i32_0 : i32, i32, i32
  }
}

</mosaic_0001>

<bundles_post_ra>
// kernel: _lambda_.3
= control target key start
LH: loop header
LB: loop body
LE: loop exit
PB: predicated region body
PF: predicated region fallthrough
CT: control target
= control target key end

     0   :  { %9 = vsyncpa [#allocation3], 0  ;;  %s827_s0 = inlined_call_operand.hbm [shape: f32[2,64,64], index: 0, kind: input, shape index: {}]   ;;  %s828_s1 = inlined_call_operand.vmem [shape: bf16[64,64], index: 1, kind: input, shape index: {}]   ;;  %s829_s2 = inlined_call_operand.vmem [shape: f32[1,64], index: 2, kind: input, shape index: {}]   ;;  %s830_s3 = inlined_call_operand.vmem [shape: f32[1,64], index: 3, kind: input, shape index: {}]   ;;  %s831_s4 = inlined_call_operand.vmem [shape: bf16[2,64,64], index: 4, kind: output, shape index: {}]  }
   0x1   :  { %11 = vsyncpa [#allocation3 + $0x1], 0  ;;  %s696_s15 = smov 0   ;;  %s698_s16 = smov 0  }
   0x2   :  { %s700_s17 = smov 0   ;;  %s702_s18 = smov 0  }
   0x3 LB: > { %s715_s19 = sadd.s32 4294967295, %s666_s18   ;;  %s718_s20 = sadd.s32 1, %s666_s18   ;;  %s666_s18 = sphi %s702_s18, %s840_s18   ;;  %s662_s17 = sphi %s700_s17, %s839_s17   ;;  %s658_s16 = sphi %s698_s16, %s838_s16   ;;  %s654_s15 = sphi %s696_s15, %s837_s15  }
   0x4   : > { %s21_s21 = ssub.s32 %s666_s18, %s718_s20  ;;  %s24_s22 = sadd.s32 1, %s662_s17 }
   0x5   : > { %p22_p0 = scmp.eq.s32.totalorder %s21_s21, 0  ;;  %p31_p1 = scmp.ne.s32.totalorder %s662_s17, %s658_s16 }
   0x6   : > { %p32_p2 = scmp.eq.s32.totalorder %s666_s18, 0  ;;  %p37_p3 = scmp.ne.s32.totalorder %s658_s16, %s654_s15 }
   0x7   : > { %s728_s23 = scalar_select %p22_p0, %s662_s17, %s24_s22  }
   0x8   : > { %p33_p4 = por %p32_p2, %p31_p1  ;;  %p38_p5 = scmp.eq.s32.totalorder %s715_s19, 0 }
   0x9   : > { %p565_p6 = scmp.lt.s32.totalorder %s666_s18, 2  ;;  %s159_s25 = sand.u32 1, %s662_s17  }
   0xa   : > { %p732_p7 = por %p38_p5, %p37_p3  ;;  %s490_s26 = sshll.u32 %s159_s25, 6 }
   0xb   : > { %s517_s27 = sshll.u32 %s666_s18, 10  ;;  %s163_s5 = scalar_lea.vmem [#allocation2], %s490_s26 }
   0xc   : > { %s833_s24 = scalar_select %p732_p7, 1, 0 }
   0xd   : > { %s741_s30 = scalar_lea.hbm %s827_s0, %s517_s27  ;;  %s170_s6 = sshll.u32 %s163_s5, 4  ;;  %s743_s6 = int_to_ptr.vmem [resolvable:$true] %s170_s6 }
   0xe   : > { %p745_p8 = pnand %p565_p6, %p33_p4  ;;  %s750_s8 = scalar_lea.sflag [#allocation3], %s159_s25 }
   0xf   : > { %s604_s9 = scalar_lea.hbm %s741_s30, 1024  ;;  %s609_s12 = scalar_lea.hbm %s827_s0, 2048 }
  0x10   : > { %p605_p10 = scmp.ne.s32.totalorder %s741_s30, %s604_s9  ;;  %p606_p11 = pneg %p745_p8 }
  0x11   : > { %p610_p0 = scmp.lt.s32.totalorder %s741_s30, %s827_s0  ;;  %p611_p1 = scmp.lt.s32.totalorder %s609_s12, %s604_s9 }
  0x12   : > { %p607_p12 = pnand %p606_p11, %p605_p10 }
  0x13   : > { %p612_p2 = por %p611_p1, %p610_p0 }
  0x14   : > { %p608_p13 = pneg %p607_p12 }
  0x16   : > { %p613_p3 = pnand %p612_p2, %p608_p13 }
  0x18   : > { %616 = shalt.err (!%p613_p3)
}
  0x19   : > { %s617_s15 = scalar_lea.vmem %s743_s6, 1024  ;;  %s668_s21 = smov [#allocation2]  }
  0x1a   : > { %p618_p4 = scmp.ne.s32.totalorder %s743_s6, %s617_s15  ;;  %s622_s22 = sshll.u32 %s668_s21, 4  ;;  %s623_s22 = int_to_ptr.vmem [resolvable:$false] %s622_s22 }
  0x1b   : > { %s624_s25 = scalar_lea.vmem %s623_s22, 2048  ;;  %p625_p10 = scmp.lt.s32.totalorder %s743_s6, %s623_s22 }
  0x1c   : > { %p620_p5 = pnand %p618_p4, %p606_p11  ;;  %p626_p12 = scmp.lt.s32.totalorder %s624_s25, %s617_s15 }
  0x1e   : > { %p621_p6 = pneg %p620_p5  ;;  %p627_p9 = por %p626_p12, %p625_p10 }
  0x20   : > { %p628_p7 = pnand %p627_p9, %p621_p6 }
  0x22   : > { %631 = shalt.err (!%p628_p7)
}
  0x23   : > { %s669_s26 = smov 128   ;;  %s670_s27 = smov 8  }
  0x24   : > { %564 = dma.hbm_to_vmem [thread:$0]  (!%p745_p8), %s741_s30, 1024, %s743_s6, %s750_s8, %s669_s26, %s669_s26, %s670_s27  }
  0x25   : > { %p178_p11 = scmp.lt.s32.totalorder %s666_s18, 3  ;;  %p835_p13 = scmp.ge.s32.totalorder %s666_s18, 1 }
  0x27   : > { %p179_p0 = pnand %p835_p13, %p178_p11 }
  0x28   : > { %s184_s28 = sand.u32 (!%p179_p0), 1, %s658_s16   ;;  %p836_p7 = scmp.ne.s32.totalorder (!%p179_p0), %s833_s24, 0 }
  0x29   : > { %182 = sbr.rel (%p179_p0) target bundleno = 266 (0x10a), region = 36  ;;  %s494_s29 = sshll.u32 (!%p179_p0), %s184_s28, 6 }
  0x2a   : > { %s185_s5 = scalar_lea.sflag (!%p179_p0), [#allocation3], %s184_s28  ;;  %s188_s9 = scalar_lea.vmem (!%p179_p0), [#allocation2], %s494_s29 }
  0x2e   : > { %649 = dma.done.wait (%p836_p7), %s185_s5, 1024  }
  0x2f   : > { %651 = vsyncadd (%p836_p7), %s185_s5, 4294966272  ;;  %v600_v0 = vld [vmem:[%s828_s1 + $0x18] sm:$0xff]   ;;  %v601_v1 = vld [vmem:[%s828_s1 + $0x10] sm:$0xff]   ;;  %vm301_vm0 = vcmask 523264   ;;  %p213_p8 = scmp.lt.s32.totalorder %s715_s19, 1  ;;  %vm411_vm1 = vcmask 519168  }
  0x30   : > { %535 = vmatprep.subr.bf16.mxu0 %v600_v0  ;;  %551 = vmatprep.subr.bf16.mxu1 %v600_v0  ;;  %v602_v2 = vld [vmem:[%s828_s1 + $0x8] sm:$0xff]   ;;  %v219_v3 = vld [vmem:[%s188_s9] sm:$0xff]  ;;  %v221_v13 = vld [vmem:[%s188_s9 + $0x10] sm:$0xff] }
  0x31   : > { %536 = vmatpush3.bf16.msra.mxu0 %v600_v0  ;;  %555 = vmatpush3.bf16.msra.mxu1 %v600_v0  ;;  %v220_v4 = vld [vmem:[%s188_s9 + $0x8] sm:$0xff]  ;;  %v497_v5 = vld [vmem:[%s829_s2] ss:$0 sm:$0xff]  ;;  %v222_v14 = vld [vmem:[%s188_s9 + $0x18] sm:$0xff]  ;;  %s842_s19 = smov (!%p213_p8, %s715_s19), 1 }
  0x32   : > { %537 = vmatprep.subr.bf16.mxu0 %v601_v1  ;;  %552 = vmatprep.subr.bf16.mxu1 %v601_v1  ;;  %v234_v6 = vmul.f32 %v497_v5, %v219_v3  ;;  %v235_v7 = vmul.f32 %v497_v5, %v220_v4  ;;  %v498_v8 = vld [vmem:[%s830_s3] ss:$0 sm:$0xff]  ;;  %v224_v10 = vld [vmem:[%s188_s9 + $0x28] sm:$0xff]  ;;  %v225_v15 = vld [vmem:[%s188_s9 + $0x30] sm:$0xff]  ;;  %v236_v18 = vmul.f32 %v497_v5, %v221_v13  ;;  %s518_s21 = sshll.u32 %s842_s19, 5 }
  0x33   : > { %v223_v9 = vld [vmem:[%s188_s9 + $0x20] sm:$0xff]  ;;  %v239_v12 = vmul.f32 %v497_v5, %v224_v10  ;;  %v226_v19 = vld [vmem:[%s188_s9 + $0x38] sm:$0xff]  ;;  %v237_v23 = vmul.f32 %v497_v5, %v222_v14  ;;  %v240_v27 = vmul.f32 %v497_v5, %v225_v15  ;;  %s217_s26 = scalar_lea.vmem %s831_s4, %s518_s21 }
  0x34   : > { %v238_v11 = vmul.f32 %v497_v5, %v223_v9  ;;  %v249_v16 = vadd.f32 %v498_v8, %v234_v6  ;;  %v250_v17 = vadd.f32 %v498_v8, %v235_v7  ;;  %v603_v20 = vld [vmem:[%s828_s1] sm:$0xff]   ;;  %v251_v26 = vadd.f32 %v498_v8, %v236_v18 }
  0x35   : > { %538 = vmatpush3.bf16.msra.mxu0 %v601_v1  ;;  %556 = vmatpush3.bf16.msra.mxu1 %v601_v1  ;;  %v254_v22 = vadd.f32 %v498_v8, %v239_v12  ;;  %v252_v30 = vadd.f32 %v498_v8, %v237_v23  ;;  %v241_v31 = vmul.f32 %v497_v5, %v226_v19 }
  0x36   : > { %539 = vmatprep.subr.bf16.mxu0 %v602_v2  ;;  %553 = vmatprep.subr.bf16.mxu1 %v602_v2  ;;  %v253_v21 = vadd.f32 %v498_v8, %v238_v11  ;;  %v257_v24 = vmax.f32 %v249_v16, 0.0  ;;  %v258_v25 = vmax.f32 %v250_v17, 0.0  ;;  %v259_v33 = vmax.f32 %v251_v26, 0.0 }
  0x37   : > { %v262_v29 = vmax.f32 %v254_v22, 0.0  ;;  %v255_v34 = vadd.f32 %v498_v8, %v240_v27  ;;  %v260_v36 = vmax.f32 %v252_v30, 0.0  ;;  %v256_v37 = vadd.f32 %v498_v8, %v241_v31 }
  0x38   : > { %v261_v28 = vmax.f32 %v253_v21, 0.0  ;;  %v265_v32 = vpack.c.bf16 %v258_v25, %v257_v24 }
  0x39   : > { %540 = vmatpush3.bf16.msra.mxu0 %v602_v2  ;;  %557 = vmatpush3.bf16.msra.mxu1 %v602_v2  ;;  %v263_v38 = vmax.f32 %v255_v34, 0.0  ;;  %v266_v39 = vpack.c.bf16 %v260_v36, %v259_v33  ;;  %v264_v40 = vmax.f32 %v256_v37, 0.0 }
  0x3a   : > { %541 = vmatprep.subr.bf16.mxu0 %v603_v20  ;;  %554 = vmatprep.subr.bf16.mxu1 %v603_v20  ;;  %v267_v35 = vpack.c.bf16 %v262_v29, %v261_v28 }
  0x3b   : > { %543 = vmatprep.mubr.msk.bf16.mxu0 %vm301_vm0, %v265_v32  ;;  %v268_v41 = vpack.c.bf16 %v264_v40, %v263_v38 }
  0x3c   : > { %547 = vmatprep.mubr.msk.bf16.mxu1 %vm301_vm0, %v267_v35 }
  0x3d   : > { %542 = vmatpush3.bf16.msra.mxu0 %v603_v20  ;;  %558 = vmatpush3.bf16.msra.mxu1 %v603_v20 }
  0x40   : > { %544 = vmatmul.mubr.msk.bf16.vlgmr.msra.gmra.mxu0 %vm301_vm0, %v266_v39  ;;  %548 = vmatmul.mubr.msk.bf16.vlgmr.msra.gmra.mxu1 %vm301_vm0, %v268_v41 }
 0x100   : > { %v545_v42 = vpop.f32.mrf.mxu0  ;;  %v549_v43 = vpop.f32.mrf.mxu1 }
 0x101   : > { %v521_v44 = vpack.c.bf16 %v545_v42, %v545_v42  ;;  %v525_v45 = vpack.c.bf16 %v549_v43, %v549_v43 }
 0x102   : > { %v348_v46 = vpop.f32.mrf.mxu0  ;;  %v364_v47 = vpop.f32.mrf.mxu1 }
 0x103   : > { %414 = vst.msk [vmem:[%s217_s26 + $0x8] sm:$0xf] %vm411_vm1, %v521_v44  ;;  %418 = vst.msk [vmem:[%s217_s26 + $0x18] sm:$0xf] %vm411_vm1, %v525_v45  ;;  %v519_v48 = vpack.c.bf16 %v348_v46, %v348_v46  ;;  %v523_v49 = vpack.c.bf16 %v364_v47, %v364_v47 }
 0x104   : > { %v546_v50 = vpop.f32.mrf.mxu0  ;;  %v550_v51 = vpop.f32.mrf.mxu1 }
 0x105   : > { %412 = vst.msk [vmem:[%s217_s26] sm:$0xf] %vm411_vm1, %v519_v48  ;;  %416 = vst.msk [vmem:[%s217_s26 + $0x10] sm:$0xf] %vm411_vm1, %v523_v49  ;;  %v522_v52 = vpack.c.bf16 %v546_v50, %v546_v50  ;;  %v526_v53 = vpack.c.bf16 %v550_v51, %v550_v51 }
 0x106   : > { %v351_v54 = vpop.f32.mrf.mxu0  ;;  %v367_v55 = vpop.f32.mrf.mxu1 }
 0x107   : > { %415 = vst.msk [vmem:[%s217_s26 + $0xc] sm:$0xf] %vm411_vm1, %v522_v52  ;;  %419 = vst.msk [vmem:[%s217_s26 + $0x1c] sm:$0xf] %vm411_vm1, %v526_v53  ;;  %v520_v56 = vpack.c.bf16 %v351_v54, %v351_v54  ;;  %v524_v57 = vpack.c.bf16 %v367_v55, %v367_v55 }
 0x109   : > { %413 = vst.msk [vmem:[%s217_s26 + $0x4] sm:$0xf] %vm411_vm1, %v520_v56  ;;  %417 = vst.msk [vmem:[%s217_s26 + $0x14] sm:$0xf] %vm411_vm1, %v524_v57 }
 0x10a PF: > { %p14_p9 = scmp.ge.s32.totalorder %s718_s20, 4   ;;  %s837_s15 = smov %s658_s16 }
 0x10b   : > { %s838_s16 = smov %s662_s17  ;;  %s839_s17 = smov %s728_s23 }
 0x10c   : > { %s840_s18 = smov %s718_s20  ;;  %16 = sbr.rel (!%p14_p9) target bundleno = 3 (0x3), region = 76 }
 0x111   :  { %441 = vsyncpa [#allocation3], 1 }
 0x112   :  { %443 = vsyncpa [#allocation3 + $0x1], 1 }

// kernel: _lambda_.5
= control target key start
LH: loop header
LB: loop body
LE: loop exit
PB: predicated region body
PF: predicated region fallthrough
CT: control target
= control target key end

     0   :  { %14 = vsyncpa [#allocation4], 0  ;;  %s4814_s0 = inlined_call_operand.vmem [shape: bf16[2,128,32], index: 0, kind: input, shape index: {}]   ;;  %s4815_s1 = inlined_call_operand.vmem [shape: bf16[32,288], index: 1, kind: input, shape index: {}]   ;;  %s4816_s2 = inlined_call_operand.vmem [shape: bf16[32,288], index: 2, kind: input, shape index: {}]   ;;  %s4817_s3 = inlined_call_operand.vmem [shape: f32[1,32], index: 3, kind: input, shape index: {}]   ;;  %s4818_s4 = inlined_call_operand.vmem [shape: f32[1,32], index: 4, kind: input, shape index: {}]   ;;  %s4819_s5 = inlined_call_operand.vmem [shape: f32[1,32], index: 5, kind: input, shape index: {}]   ;;  %s4820_s6 = inlined_call_operand.vmem [shape: f32[1,32], index: 6, kind: input, shape index: {}]   ;;  %s4821_s7 = inlined_call_operand.vmem [shape: f32[1,32], index: 7, kind: input, shape index: {}]   ;;  %s4822_s8 = inlined_call_operand.vmem [shape: f32[1,32], index: 8, kind: input, shape index: {}]   ;;  %s4823_s9 = inlined_call_operand.hbm [shape: f32[2,128,32], index: 9, kind: output, shape index: {}]  }
   0x1   :  { %16 = vsyncpa [#allocation4 + $0x1], 0  ;;  %s3443_s30 = smov 0   ;;  %s3445_s10 = smov 0  }
   0x2   :  { %s3447_s11 = smov 0   ;;  %s3449_s12 = smov 0  }
   0x3 LB: > { %s3464_s13 = sadd.s32 4294967295, %s3383_s12   ;;  %s3070_s14 = sadd.s32 4294967294, %s3383_s12   ;;  %s3383_s12 = sphi %s3449_s12, %s5050_s12   ;;  %s3379_s11 = sphi %s3447_s11, %s5049_s11   ;;  %s3375_s10 = sphi %s3445_s10, %s5048_s10   ;;  %s3371_s30 = sphi %s3443_s30, %s5047_s30  }
   0x4   : > { %s3468_s15 = sadd.s32 1, %s3383_s12   ;;  %s223_s16 = sadd.s32 1, %s3379_s11 }
   0x5   : > { %s220_s17 = ssub.s32 %s3383_s12, %s3468_s15  ;;  %p233_p0 = scmp.ne.s32.totalorder %s3379_s11, %s3375_s10 }
   0x6   : > { %p221_p1 = scmp.eq.s32.totalorder %s220_s17, 0  ;;  %p234_p2 = scmp.eq.s32.totalorder %s3464_s13, 1 }
   0x7   : > { %p239_p3 = scmp.ne.s32.totalorder %s3375_s10, %s3371_s30  ;;  %p240_p4 = scmp.eq.s32.totalorder %s3070_s14, 1 }
   0x8   : > { %s3479_s18 = scalar_select %p221_p1, %s3379_s11, %s223_s16  }
   0x9   : > { %p3481_p5 = por %p234_p2, %p233_p0  ;;  %p3485_p6 = por %p240_p4, %p239_p3 }
   0xa   : > { %p3073_p7 = scmp.ge.s32.totalorder %s3383_s12, 1  ;;  %p290_p8 = scmp.lt.s32.totalorder %s3383_s12, 3 }
   0xc   : > { %p291_p9 = pnand %p3073_p7, %p290_p8 }
   0xe   : > { %294 = sbr.rel (%p291_p9) target bundleno = 1157 (0x485), region = 56 }
  0x13   : > { %v3299_v0 = vld [vmem:[%s4815_s1 + $0x1c] ss:$12 sps:$4 sm:$0xff]   ;;  %p326_p10 = scmp.lt.s32.totalorder %s3464_s13, 1  ;;  %v3301_v1 = vld [vmem:[%s4815_s1 + $0x18] ss:$12 sps:$4 sm:$0xff]   ;;  %v4840_v2 = vmov 0  }
  0x14   : > { %829 = vmatprep.mubr.bf16.mxu0 %v4840_v2  ;;  %809 = vmatprep.subr.bf16.mxu0 %v3299_v0  ;;  %v3302_v3 = vld [vmem:[%s4815_s1 + $0x20] ss:$12 sps:$4 sm:$0xff]   ;;  %vm4858_vm0 = vcmask 261120   ;;  %v3303_v4 = vld [vmem:[%s4815_s1 + $0x4] ss:$12 sps:$4 sm:$0xff]   ;;  %v3386_v8 = vmov 0.0  }
  0x15   : > { %s327_s27 = scalar_select %p326_p10, %s3464_s13, 1  ;;  %810 = vmatpush1.bf16.msra.mxu0 %v3301_v1  ;;  %v3305_v5 = vld [vmem:[%s4815_s1] ss:$12 sps:$4 sm:$0xff]   ;;  %3193 = vmatprep.subr.bf16.mxu1 %v3302_v3  ;;  %v3306_v6 = vld [vmem:[%s4815_s1 + $0x8] ss:$12 sps:$4 sm:$0xff]   ;;  %344 = vst.msk [vmem:[#allocation2 + $0x1d8] sm:$0xff] %vm4858_vm0, %v3386_v8 }
  0x16   : > { %3194 = vmatpush3.bf16.msra.mxu1 %v3302_v3  ;;  %811 = vmatprep.subr.bf16.mxu0 %v3303_v4  ;;  %v3520_v7 = vld [vmem:[%s4817_s3] ss:$0 sm:$0xff]  ;;  %345 = vst [vmem:[#allocation2 + $0x1e0] sm:$0xff] %v3386_v8  ;;  %332 = vst [vmem:[#allocation2] sm:$0xff] %v3386_v8  ;;  %s3387_s17 = smov 64   ;;  %s3388_s21 = smov 32  }
  0x17   : > { %s3132_s22 = sshll.u32 %s327_s27, 6  ;;  %336 = vst [vmem:[#allocation2 + $0x18] sm:$0xff] %v3386_v8  ;;  %339 = vst [vmem:[#allocation2 + $0x30] sm:$0xff] %v3386_v8  ;;  %3195 = vmatprep.subr.bf16.mxu1 %v3306_v6  ;;  %v3553_v17 = vld [vmem:[%s4818_s4] ss:$0 sm:$0xff]  ;;  %s3389_s27 = smov 96  }
  0x18   : > { %s3515_s25 = scalar_lea.vmem %s4814_s0, %s3132_s22  ;;  %343 = vst [vmem:[#allocation2 + $0x1d0] sm:$0xff] %v3386_v8  ;;  %346 = vst [vmem:[#allocation2 + $0x1e8] sm:$0xff] %v3386_v8  ;;  %v3558_v18 = vld [vmem:[%s4819_s5] ss:$0 sm:$0xff]  ;;  %s3390_s29 = smov [#allocation3]  }
  0x19   : > { %347 = vst.msk [vmem:[#allocation2 + $0x1f0] sm:$0xff] %vm4858_vm0, %v3386_v8  ;;  %350 = vst.msk [vmem:[#allocation2 + $0x208] sm:$0xff] %vm4858_vm0, %v3386_v8  ;;  %v3535_v9 = vld [vmem:[%s3515_s25] sm:$0xff]   ;;  %v3538_v10 = vld [vmem:[%s3515_s25 + $0x8] sm:$0xff]   ;;  %812 = vmatpush1.bf16.msra.mxu0 %v3305_v5  ;;  %s3327_s14 = sshll.u32 %s3390_s29, 4  ;;  %s3328_s14 = int_to_ptr.vmem [resolvable:$false] %s3327_s14 }
  0x1a   : > { %4884 = vst [vmem:[#allocation6_spill] sm:$0xff] %v3535_v9  ;;  %v3541_v11 = vld [vmem:[%s3515_s25 + $0x10] sm:$0xff]   ;;  %v4836_v12 = vunpack.c.l.bf16 %v3535_v9  ;;  %v4833_v13 = vunpack.c.h.bf16 %v3535_v9  ;;  %v4834_v14 = vunpack.c.l.bf16 %v3538_v10  ;;  %v4839_v15 = vunpack.c.h.bf16 %v3538_v10  ;;  %v3548_v16 = vld [vmem:[%s3515_s25 + $0x18] sm:$0xff]   ;;  %3196 = vmatpush3.bf16.msra.mxu1 %v3306_v6  ;;  %v3602_v46 = vld [vmem:[%s3515_s25 + $0x20] sm:$0xff]   ;;  %s3329_s16 = scalar_lea.vmem %s3328_s14, 4096 }
  0x1b   : > { %4885 = vst [vmem:[#allocation7_spill] sm:$0xff] %v3541_v11  ;;  %4886 = vst [vmem:[#allocation8_spill] sm:$0xff] %v3548_v16  ;;  %v4832_v19 = vunpack.c.l.bf16 %v3541_v11  ;;  %v4830_v20 = vunpack.c.h.bf16 %v3541_v11  ;;  %v4831_v21 = vunpack.c.l.bf16 %v3548_v16  ;;  %v4838_v22 = vunpack.c.h.bf16 %v3548_v16  ;;  %v3606_v51 = vld [vmem:[%s3515_s25 + $0x28] sm:$0xff]   ;;  %v3621_v62 = vld [vmem:[%s3515_s25 + $0x30] sm:$0xff]  }
  0x1c   : > { %v631_v23 = vmul.f32 %v4836_v12, %v3520_v7  ;;  %v632_v24 = vmul.f32 %v4833_v13, %v3520_v7  ;;  %v633_v25 = vmul.f32 %v4834_v14, %v3520_v7  ;;  %v634_v26 = vmul.f32 %v4839_v15, %v3520_v7  ;;  %v1575_v39 = vld [vmem:[#allocation2 + $0x1d8] sm:$0xff]  ;;  %4887 = vst [vmem:[#allocation9_spill] sm:$0xff] %v3602_v46 }
  0x1d   : > { %v635_v27 = vmul.f32 %v4832_v19, %v3520_v7  ;;  %v636_v28 = vmul.f32 %v4830_v20, %v3520_v7  ;;  %v637_v29 = vmul.f32 %v4831_v21, %v3520_v7  ;;  %v638_v30 = vmul.f32 %v4838_v22, %v3520_v7  ;;  %1623 = vrot.lane.b32.xlu0 %v1575_v39, %s3387_s17  ;;  %v3624_v63 = vld [vmem:[%s3515_s25 + $0x38] sm:$0xff]  }
  0x1e   : > { %v654_v31 = vadd.f32 %v3553_v17, %v631_v23  ;;  %v655_v32 = vadd.f32 %v3553_v17, %v632_v24  ;;  %v656_v33 = vadd.f32 %v3553_v17, %v633_v25  ;;  %v657_v34 = vadd.f32 %v3553_v17, %v634_v26  ;;  %4888 = vst [vmem:[#allocation10_spill] sm:$0xff] %v3606_v51 }
  0x1f   : > { %v658_v35 = vadd.f32 %v3553_v17, %v635_v27  ;;  %v659_v36 = vadd.f32 %v3553_v17, %v636_v28  ;;  %v660_v37 = vadd.f32 %v3553_v17, %v637_v29  ;;  %v661_v38 = vadd.f32 %v3553_v17, %v638_v30  ;;  %4889 = vst [vmem:[#allocation11_spill] sm:$0xff] %v3621_v62 }
  0x20   : > { %vm671_vm1 = vcmp.gt.f32.partialorder %v654_v31, 0.0  ;;  %vm672_vm2 = vcmp.gt.f32.partialorder %v655_v32, 0.0  ;;  %v693_v40 = vmul.f32 %v3558_v18, %v654_v31  ;;  %v694_v41 = vmul.f32 %v3558_v18, %v655_v32  ;;  %4890 = vst [vmem:[#allocation12_spill] sm:$0xff] %v3624_v63 }
  0x21   : > { %vm673_vm3 = vcmp.gt.f32.partialorder %v656_v33, 0.0  ;;  %vm674_vm4 = vcmp.gt.f32.partialorder %v657_v34, 0.0  ;;  %v695_v42 = vmul.f32 %v3558_v18, %v656_v33  ;;  %v696_v43 = vmul.f32 %v3558_v18, %v657_v34 }
  0x22   : > { %v709_v44 = vsel %vm671_vm1, %v654_v31, %v693_v40  ;;  %v710_v45 = vsel %vm672_vm2, %v655_v32, %v694_v41  ;;  %vm675_vm5 = vcmp.gt.f32.partialorder %v658_v35, 0.0  ;;  %vm676_vm6 = vcmp.gt.f32.partialorder %v659_v36, 0.0 }
  0x23   : > { %v725_v47 = vpack.c.bf16 %v710_v45, %v709_v44  ;;  %v711_v48 = vsel %vm673_vm3, %v656_v33, %v695_v42  ;;  %v712_v49 = vsel %vm674_vm4, %v657_v34, %v696_v43  ;;  %v697_v50 = vmul.f32 %v3558_v18, %v658_v35 }
  0x24   : > { %v726_v52 = vpack.c.bf16 %v712_v49, %v711_v48  ;;  %v698_v53 = vmul.f32 %v3558_v18, %v659_v36  ;;  %vm677_vm7 = vcmp.gt.f32.partialorder %v660_v37, 0.0  ;;  %vm678_vm8 = vcmp.gt.f32.partialorder %v661_v38, 0.0 }
  0x25   : > { %3086 = vmatmul.mubr.msk.bf16.vlgmr.msra.gmra.mxu0 %vm4858_vm0, %v725_v47  ;;  %3197 = vmatprep.mubr.msk.bf16.mxu1 %vm4858_vm0, %v725_v47  ;;  %v713_v54 = vsel %vm675_vm5, %v658_v35, %v697_v50  ;;  %v699_v55 = vmul.f32 %v3558_v18, %v660_v37  ;;  %v700_v56 = vmul.f32 %v3558_v18, %v661_v38  ;;  %v4829_v57 = vunpack.c.l.bf16 %v3602_v46 }
  0x26   : > { %3198 = vmatmul.mubr.msk.bf16.vlgmr.msra.gmra.mxu1 %vm4858_vm0, %v726_v52  ;;  %839 = vmatprep.mubr.bf16.mxu0 %v4840_v2  ;;  %v714_v58 = vsel %vm676_vm6, %v659_v36, %v698_v53  ;;  %v4827_v59 = vunpack.c.h.bf16 %v3602_v46  ;;  %v4828_v60 = vunpack.c.l.bf16 %v3606_v51  ;;  %v4837_v61 = vunpack.c.h.bf16 %v3606_v51 }
  0x27   : > { %v727_v0 = vpack.c.bf16 %v714_v58, %v713_v54  ;;  %v715_v1 = vsel %vm677_vm7, %v660_v37, %v699_v55  ;;  %v716_v3 = vsel %vm678_vm8, %v661_v38, %v700_v56  ;;  %v639_v4 = vmul.f32 %v4829_v57, %v3520_v7 }
  0x28   : > { %v728_v5 = vpack.c.bf16 %v716_v3, %v715_v1  ;;  %v640_v6 = vmul.f32 %v4827_v59, %v3520_v7  ;;  %v641_v23 = vmul.f32 %v4828_v60, %v3520_v7  ;;  %v642_v24 = vmul.f32 %v4837_v61, %v3520_v7 }
  0x29   : > { %3201 = vmatprep.mubr.msk.bf16.mxu1 %vm4858_vm0, %v727_v0  ;;  %v662_v25 = vadd.f32 %v3553_v17, %v639_v4  ;;  %v4824_v26 = vunpack.c.l.bf16 %v3621_v62  ;;  %v4825_v27 = vunpack.c.h.bf16 %v3621_v62  ;;  %v4826_v28 = vunpack.c.l.bf16 %v3624_v63 }
  0x2a   : > { %v663_v29 = vadd.f32 %v3553_v17, %v640_v6  ;;  %v664_v30 = vadd.f32 %v3553_v17, %v641_v23  ;;  %v665_v31 = vadd.f32 %v3553_v17, %v642_v24  ;;  %v4835_v32 = vunpack.c.h.bf16 %v3624_v63  ;;  %v1577_v23 = vld [vmem:[#allocation2 + $0x208] sm:$0x1] }
  0x2b   : > { %vm679_vm9 = vcmp.gt.f32.partialorder %v662_v25, 0.0  ;;  %v701_v33 = vmul.f32 %v3558_v18, %v662_v25  ;;  %v643_v34 = vmul.f32 %v4824_v26, %v3520_v7  ;;  %v644_v35 = vmul.f32 %v4825_v27, %v3520_v7 }
  0x2c   : > { %vm680_vm10 = vcmp.gt.f32.partialorder %v663_v29, 0.0  ;;  %v702_v36 = vmul.f32 %v3558_v18, %v663_v29  ;;  %vm681_vm11 = vcmp.gt.f32.partialorder %v664_v30, 0.0  ;;  %vm682_vm12 = vcmp.gt.f32.partialorder %v665_v31, 0.0 }
  0x2d   : > { %3087 = vmatmul.mubr.msk.bf16.gmra.mxu0 %vm4858_vm0, %v726_v52  ;;  %v717_v37 = vsel %vm679_vm9, %v662_v25, %v701_v33  ;;  %v703_v38 = vmul.f32 %v3558_v18, %v664_v30  ;;  %v704_v39 = vmul.f32 %v3558_v18, %v665_v31  ;;  %v666_v40 = vadd.f32 %v3553_v17, %v643_v34 }
  0x2e   : > { %3202 = vmatmul.mubr.msk.bf16.gmra.mxu1 %vm4858_vm0, %v728_v5  ;;  %v718_v41 = vsel %vm680_vm10, %v663_v29, %v702_v36  ;;  %849 = vmatprep.mubr.bf16.mxu0 %v4840_v2  ;;  %v667_v42 = vadd.f32 %v3553_v17, %v644_v35  ;;  %v645_v43 = vmul.f32 %v4826_v28, %v3520_v7  ;;  %vm4857_vm2 = vcmask 1046528  }
  0x2f   : > { %v729_v44 = vpack.c.bf16 %v718_v41, %v717_v37  ;;  %v719_v45 = vsel %vm681_vm11, %v664_v30, %v703_v38  ;;  %v720_v47 = vsel %vm682_vm12, %v665_v31, %v704_v39  ;;  %vm683_vm13 = vcmp.gt.f32.partialorder %v666_v40, 0.0 }
  0x30   : > { %vm684_vm14 = vcmp.gt.f32.partialorder %v667_v42, 0.0  ;;  %v705_v48 = vmul.f32 %v3558_v18, %v666_v40  ;;  %v706_v49 = vmul.f32 %v3558_v18, %v667_v42  ;;  %v646_v50 = vmul.f32 %v4835_v32, %v3520_v7 }
  0x31   : > { %3205 = vmatprep.mubr.msk.bf16.mxu1 %vm4858_vm0, %v729_v44  ;;  %v668_v52 = vadd.f32 %v3553_v17, %v645_v43  ;;  %v730_v53 = vpack.c.bf16 %v720_v47, %v719_v45  ;;  %vm4860_vm3 = vcmask 1040384  }
  0x32   : > { %v721_v54 = vsel %vm683_vm13, %v666_v40, %v705_v48  ;;  %v722_v55 = vsel %vm684_vm14, %v667_v42, %v706_v49  ;;  %v669_v58 = vadd.f32 %v3553_v17, %v646_v50  ;;  %v1576_v17 = vld [vmem:[#allocation2 + $0x1f0] sm:$0xff] }
  0x33   : > { %v731_v56 = vpack.c.bf16 %v722_v55, %v721_v54  ;;  %v707_v1 = vmul.f32 %v3558_v18, %v668_v52  ;;  %vm685_vm15 = vcmp.gt.f32.partialorder %v668_v52, 0.0  ;;  %1625 = vrot.lane.b32.xlu0 %v1576_v17, %s3387_s17 }
  0x34   : > { %vm686_vm1 = vcmp.gt.f32.partialorder %v669_v58, 0.0  ;;  %v708_v3 = vmul.f32 %v3558_v18, %v669_v58  ;;  %v1072_v18 = vld [vmem:[#allocation2 + $0x30] sm:$0x80] }
  0x35   : > { %3088 = vmatmul.mubr.msk.bf16.gmra.mxu0 %vm4858_vm0, %v727_v0  ;;  %v723_v7 = vsel %vm685_vm15, %v668_v52, %v707_v1  ;;  %v1550_v0 = vld [vmem:[#allocation2 + $0x1d0] sm:$0x1] }
  0x36   : > { %3206 = vmatmul.mubr.msk.bf16.gmra.mxu1 %vm4858_vm0, %v730_v53  ;;  %859 = vmatprep.mubr.bf16.mxu0 %v4840_v2  ;;  %v724_v4 = vsel %vm686_vm1, %v669_v58, %v708_v3 }
  0x37   : > { %3209 = vmatprep.mubr.msk.bf16.mxu1 %vm4858_vm0, %v731_v56  ;;  %v732_v6 = vpack.c.bf16 %v724_v4, %v723_v7  ;;  %3285 = vrot.lane.b32.xlu0 %v3386_v8, %s3387_s17 }
  0x3d   : > { %3089 = vmatmul.mubr.msk.bf16.gmra.mxu0 %vm4858_vm0, %v728_v5  ;;  %v3279_v5 = vpack.i.bf16 %v1550_v0, %v1072_v18 }
  0x3e   : > { %3210 = vmatmul.mubr.msk.bf16.gmra.mxu1 %vm4858_vm0, %v732_v6  ;;  %869 = vmatprep.mubr.bf16.mxu0 %v4840_v2 }
  0x3f   : > { %2031 = vmatprep.mubr.bf16.mxu1 %v4840_v2  ;;  %3280 = vrot.lane.b32.xlu1 %v3279_v5, %s3388_s21 }
  0x43   : > { %1627 = vrot.lane.b32.xlu1 %v1577_v23, %s3387_s17 }
  0x45   : > { %3090 = vmatmul.mubr.msk.bf16.gmra.mxu0 %vm4858_vm0, %v729_v44 }
  0x46   : > { %879 = vmatprep.mubr.bf16.mxu0 %v4840_v2 }
  0x4d   : > { %3091 = vmatmul.mubr.msk.bf16.gmra.mxu0 %vm4858_vm0, %v730_v53 }
  0x4e   : > { %889 = vmatprep.mubr.bf16.mxu0 %v4840_v2 }
  0x55   : > { %3092 = vmatmul.mubr.msk.bf16.gmra.mxu0 %vm4858_vm0, %v731_v56 }
  0x56   : > { %899 = vmatprep.mubr.bf16.mxu0 %v4840_v2 }
  0x5d   : > { %3093 = vmatmul.mubr.msk.bf16.gmra.mxu0 %vm4858_vm0, %v732_v6 }
  0xe5   : > { %v3697_v24 = vpop.f32.mrf.mxu0 }
  0xe6   : > { %v3199_v25 = vpop.f32.mrf.mxu1  ;;  %1095 = vrot.lane.b32.xlu0 %v3697_v24, %s3388_s21 }
  0xe7   : > { %1015 = vst.msk [vmem:[#allocation2 + $0x88] sm:$0xff] %vm4858_vm0, %v3199_v25  ;;  %v833_v29 = vpop.f32.mrf.mxu0 }
  0xe8   : > { %1008 = vst [vmem:[#allocation2 + $0x50] sm:$0xff] %v833_v29  ;;  %v944_v8 = vpop.f32.mrf.mxu1 }
  0xe9   : > { %v3702_v30 = vpop.f32.mrf.mxu0 }
  0xea   : > { %v3200_v31 = vpop.f32.mrf.mxu1 }
  0xeb   : > { %1018 = vst.msk [vmem:[#allocation2 + $0xa0] sm:$0xff] %vm4858_vm0, %v3200_v31  ;;  %v837_v33 = vpop.f32.mrf.mxu0 }
  0xec   : > { %1011 = vst [vmem:[#allocation2 + $0x68] sm:$0xff] %v837_v33  ;;  %v947_v34 = vpop.f32.mrf.mxu1 }
  0xed   : > { %v3705_v35 = vpop.f32.mrf.mxu0 }
  0xee   : > { %v1561_v36 = vld [vmem:[#allocation2 + $0x88] sm:$0xfe]  ;;  %v3203_v37 = vpop.f32.mrf.mxu1 }
  0xef   : > { %v1549_v38 = vld [vmem:[#allocation2 + $0x50] sm:$0xfe]  ;;  %1595 = vrot.lane.b32.xlu0 %v1561_v36, %s3387_s17  ;;  %v843_v39 = vpop.f32.mrf.mxu0  ;;  %1027 = vst.msk [vmem:[#allocation2 + $0xe8] sm:$0xff] %vm4858_vm0, %v3203_v37 }
  0xf0   : > { %1553 = vrot.lane.b32.xlu1 %v1549_v38, %s3388_s21  ;;  %v960_v40 = vpop.f32.mrf.mxu1 }
  0xf1   : > { %v3710_v41 = vpop.f32.mrf.mxu0  ;;  %1021 = vst.msk [vmem:[#allocation2 + $0xb8] sm:$0xff] %vm4858_vm0, %v960_v40 }
  0xf2   : > { %v3204_v42 = vpop.f32.mrf.mxu1  ;;  %v1562_v47 = vld [vmem:[#allocation2 + $0xa0] sm:$0xff] }
  0xf3   : > { %1097 = vrot.lane.b32.xlu0 %v3702_v30, %s3388_s21  ;;  %v847_v43 = vpop.f32.mrf.mxu0  ;;  %1030 = vst.msk [vmem:[#allocation2 + $0x100] sm:$0xff] %vm4858_vm0, %v3204_v42  ;;  %v1161_v49 = vld [vmem:[#allocation2 + $0x68] sm:$0x80] }
  0xf4   : > { %1382 = vrot.lane.b32.xlu1 %v833_v29, %s3388_s21  ;;  %v963_v44 = vpop.f32.mrf.mxu1 }
  0xf5   : > { %1024 = vst.msk [vmem:[#allocation2 + $0xd0] sm:$0xff] %vm4858_vm0, %v963_v44  ;;  %v3718_v45 = vpop.f32.mrf.mxu0 }
  0xf6   : > { %v3207_v48 = vpop.f32.mrf.mxu1  ;;  %v1565_v56 = vld [vmem:[#allocation2 + $0xe8] sm:$0xff] }
  0xf7   : > { %1597 = vrot.lane.b32.xlu0 %v1562_v47, %s3387_s17  ;;  %1039 = vst.msk [vmem:[#allocation2 + $0x148] sm:$0xff] %vm4858_vm0, %v3207_v48  ;;  %v853_v50 = vpop.f32.mrf.mxu0 }
  0xf8   : > { %1195 = vrot.lane.b32.xlu1 %v1161_v49, %s3387_s17  ;;  %v976_v52 = vpop.f32.mrf.mxu1  ;;  %v1563_v18 = vld [vmem:[#allocation2 + $0xb8] sm:$0xff] }
  0xf9   : > { %1033 = vst.msk [vmem:[#allocation2 + $0x118] sm:$0xff] %vm4858_vm0, %v976_v52  ;;  %v3724_v53 = vpop.f32.mrf.mxu0 }
  0xfa   : > { %v3208_v54 = vpop.f32.mrf.mxu1  ;;  %v1566_v25 = vld [vmem:[#allocation2 + $0x100] sm:$0xff] }
  0xfb   : > { %1384 = vrot.lane.b32.xlu0 %v837_v33, %s3388_s21  ;;  %1042 = vst.msk [vmem:[#allocation2 + $0x160] sm:$0xff] %vm4858_vm0, %v3208_v54  ;;  %v857_v55 = vpop.f32.mrf.mxu0 }
  0xfc   : > { %1099 = vrot.lane.b32.xlu1 %v3705_v35, %s3388_s21  ;;  %v979_v58 = vpop.f32.mrf.mxu1  ;;  %v1564_v36 = vld [vmem:[#allocation2 + $0xd0] sm:$0xff] }
  0xfd   : > { %1036 = vst.msk [vmem:[#allocation2 + $0x130] sm:$0xff] %vm4858_vm0, %v979_v58  ;;  %v3731_v1 = vpop.f32.mrf.mxu0 }
  0xfe   : > { %v3211_v3 = vpop.f32.mrf.mxu1  ;;  %v1569_v33 = vld [vmem:[#allocation2 + $0x148] sm:$0xff] }
  0xff   : > { %1603 = vrot.lane.b32.xlu0 %v1565_v56, %s3387_s17  ;;  %1051 = vst.msk [vmem:[#allocation2 + $0x1a8] sm:$0xff] %vm4858_vm0, %v3211_v3  ;;  %v863_v7 = vpop.f32.mrf.mxu0 }
 0x100   : > { %1197 = vrot.lane.b32.xlu1 %v843_v39, %s3387_s17  ;;  %v992_v4 = vpop.f32.mrf.mxu1  ;;  %v1567_v42 = vld [vmem:[#allocation2 + $0x118] sm:$0xff] }
 0x101   : > { %1045 = vst.msk [vmem:[#allocation2 + $0x178] sm:$0xff] %vm4858_vm0, %v992_v4  ;;  %v3737_v6 = vpop.f32.mrf.mxu0 }
 0x102   : > { %v3212_v17 = vpop.f32.mrf.mxu1  ;;  %v1570_v47 = vld [vmem:[#allocation2 + $0x160] sm:$0xff] }
 0x103   : > { %1386 = vrot.lane.b32.xlu0 %v843_v39, %s3388_s21  ;;  %1054 = vst.msk [vmem:[#allocation2 + $0x1c0] sm:$0xff] %vm4858_vm0, %v3212_v17  ;;  %v867_v0 = vpop.f32.mrf.mxu0  ;;  %v3810_v17 = vpop.permute.xlu1 %3280 }
 0x104   : > { %1599 = vrot.lane.b32.xlu1 %v1563_v18, %s3387_s17  ;;  %v995_v5 = vpop.f32.mrf.mxu1  ;;  %v1568_v56 = vld [vmem:[#allocation2 + $0x130] sm:$0xff] }
 0x105   : > { %1048 = vst.msk [vmem:[#allocation2 + $0x190] sm:$0xff] %vm4858_vm0, %v995_v5  ;;  %v3743_v23 = vpop.f32.mrf.mxu0 }
 0x106   : > { %v1573_v54 = vld [vmem:[#allocation2 + $0x1a8] sm:$0xff] }
 0x107   : > { %1101 = vrot.lane.b32.xlu0 %v3710_v41, %s3388_s21  ;;  %v873_v29 = vpop.f32.mrf.mxu0  ;;  %v3818_v5 = vpop.permute.xlu1 %1627 }
 0x108   : > { %1605 = vrot.lane.b32.xlu1 %v1566_v25, %s3387_s17  ;;  %v1571_v58 = vld [vmem:[#allocation2 + $0x178] sm:$0xff] }
 0x109   : > { %v3748_v8 = vpop.f32.mrf.mxu0 }
 0x10a   : > { %v1574_v3 = vld [vmem:[#allocation2 + $0x1c0] sm:$0xff] }
 0x10b   : > { %1199 = vrot.lane.b32.xlu0 %v847_v43, %s3387_s17  ;;  %v877_v31 = vpop.f32.mrf.mxu0 }
 0x10c   : > { %1388 = vrot.lane.b32.xlu1 %v847_v43, %s3388_s21 }
 0x10d   : > { %v3752_v34 = vpop.f32.mrf.mxu0 }
 0x10f   : > { %1611 = vrot.lane.b32.xlu0 %v1569_v33, %s3387_s17  ;;  %v883_v37 = vpop.f32.mrf.mxu0 }
 0x110   : > { %1601 = vrot.lane.b32.xlu1 %v1564_v36, %s3387_s17  ;;  %v3307_v36 = vld [vmem:[%s4816_s2 + $0x20] ss:$12 sps:$4 sm:$0xff]  }
 0x111   : > { %v3756_v38 = vpop.f32.mrf.mxu0  ;;  %3213 = vmatprep.subr.bf16.mxu0 %v3307_v36 }
 0x112   : > { %3214 = vmatpush3.bf16.msra.mxu0 %v3307_v36 }
 0x113   : > { %1390 = vrot.lane.b32.xlu0 %v853_v50, %s3388_s21  ;;  %v887_v39 = vpop.f32.mrf.mxu0 }
 0x114   : > { %1103 = vrot.lane.b32.xlu1 %v3718_v45, %s3388_s21 }
 0x115   : > { %v3761_v40 = vpop.f32.mrf.mxu0 }
 0x117   : > { %1607 = vrot.lane.b32.xlu0 %v1567_v42, %s3387_s17  ;;  %v893_v43 = vpop.f32.mrf.mxu0 }
 0x118   : > { %1201 = vrot.lane.b32.xlu1 %v853_v50, %s3387_s17 }
 0x119   : > { %v3765_v44 = vpop.f32.mrf.mxu0 }
 0x11a   : > { %1046 = vst [vmem:[#allocation2 + $0x180] sm:$0xff] %v3765_v44 }
 0x11b   : > { %1105 = vrot.lane.b32.xlu0 %v3724_v53, %s3388_s21  ;;  %v897_v48 = vpop.f32.mrf.mxu0 }
 0x11c   : > { %1613 = vrot.lane.b32.xlu1 %v1570_v47, %s3387_s17  ;;  %v1547_v47 = vld [vmem:[#allocation2 + $0x18] sm:$0xfe] }
 0x11d   : > { %v901_v49 = vpop.f32.mrf.mxu0 }
 0x11e   : > { %1049 = vst [vmem:[#allocation2 + $0x198] sm:$0xff] %v901_v49 }
 0x11f   : > { %1203 = vrot.lane.b32.xlu0 %v857_v55, %s3387_s17  ;;  %v903_v52 = vpop.f32.mrf.mxu0 }
 0x120   : > { %1392 = vrot.lane.b32.xlu1 %v857_v55, %s3388_s21  ;;  %v1572_v55 = vld [vmem:[#allocation2 + $0x190] sm:$0xff] }
 0x121   : > { %v905_v50 = vpop.f32.mrf.mxu0 }
 0x122   : > { %1052 = vst [vmem:[#allocation2 + $0x1b0] sm:$0xff] %v905_v50 }
 0x123   : > { %1619 = vrot.lane.b32.xlu0 %v1573_v54, %s3387_s17 }
 0x124   : > { %1609 = vrot.lane.b32.xlu1 %v1568_v56, %s3387_s17 }
 0x127   : > { %1394 = vrot.lane.b32.xlu0 %v863_v7, %s3388_s21 }
 0x128   : > { %1107 = vrot.lane.b32.xlu1 %v3731_v1, %s3388_s21 }
 0x12b   : > { %1615 = vrot.lane.b32.xlu0 %v1571_v58, %s3387_s17 }
 0x12c   : > { %1205 = vrot.lane.b32.xlu1 %v863_v7, %s3387_s17  ;;  %v3800_v7 = vpop.permute.xlu0 %1623 }
 0x12f   : > { %1109 = vrot.lane.b32.xlu0 %v3737_v6, %s3388_s21 }
 0x130   : > { %1621 = vrot.lane.b32.xlu1 %v1574_v3, %s3387_s17  ;;  %v3805_v4 = vpop.permute.xlu0 %1625 }
 0x133   : > { %1207 = vrot.lane.b32.xlu0 %v867_v0, %s3387_s17 }
 0x134   : > { %1396 = vrot.lane.b32.xlu1 %v867_v0, %s3388_s21  ;;  %v3813_v18 = vpop.permute.xlu0 %3285  ;;  %v907_v0 = vpop.f32.mrf.mxu0 }
 0x137   : > { %1398 = vrot.lane.b32.xlu0 %v873_v29, %s3388_s21 }
 0x138   : > { %1617 = vrot.lane.b32.xlu1 %v1572_v55, %s3387_s17 }
 0x13b   : > { %1113 = vrot.lane.b32.xlu0 %v3748_v8, %s3388_s21 }
 0x13c   : > { %1111 = vrot.lane.b32.xlu1 %v3743_v23, %s3388_s21 }
 0x13f   : > { %1211 = vrot.lane.b32.xlu0 %v877_v31, %s3387_s17 }
 0x140   : > { %1209 = vrot.lane.b32.xlu1 %v873_v29, %s3387_s17  ;;  %v1075_v29 = vld [vmem:[#allocation2 + $0x1b0] sm:$0x7f] }
 0x143   : > { %1402 = vrot.lane.b32.xlu0 %v883_v37, %s3388_s21 }
 0x144   : > { %1400 = vrot.lane.b32.xlu1 %v877_v31, %s3388_s21 }
 0x147   : > { %1117 = vrot.lane.b32.xlu0 %v3756_v38, %s3388_s21 }
 0x148   : > { %1115 = vrot.lane.b32.xlu1 %v3752_v34, %s3388_s21 }
 0x14b   : > { %1215 = vrot.lane.b32.xlu0 %v887_v39, %s3387_s17 }
 0x14c   : > { %1213 = vrot.lane.b32.xlu1 %v883_v37, %s3387_s17 }
 0x14f   : > { %1406 = vrot.lane.b32.xlu0 %v893_v43, %s3388_s21 }
 0x150   : > { %1404 = vrot.lane.b32.xlu1 %v887_v39, %s3388_s21 }
 0x153   : > { %1219 = vrot.lane.b32.xlu0 %v897_v48, %s3387_s17 }
 0x154   : > { %1119 = vrot.lane.b32.xlu1 %v3761_v40, %s3388_s21 }
 0x157   : > { %1410 = vrot.lane.b32.xlu0 %v903_v52, %s3388_s21 }
 0x158   : > { %1217 = vrot.lane.b32.xlu1 %v893_v43, %s3387_s17  ;;  %v3820_v25 = vpop.permute.xlu0 %1095 }
 0x15b   : > { %1223 = vrot.lane.b32.xlu0 %v907_v0, %s3387_s17 }
 0x15c   : > { %1408 = vrot.lane.b32.xlu1 %v897_v48, %s3388_s21 }
 0x15f   : > { %1121 = vrot.lane.b32.xlu0 %v3765_v44, %s3388_s21 }
 0x160   : > { %1221 = vrot.lane.b32.xlu1 %v903_v52, %s3387_s17 }
 0x161   : > { %v1596_v31 = vpop.permute.xlu0 %1595 }
 0x162   : > { %v1554_v33 = vpop.permute.xlu1 %1553 }
 0x163   : > { %1125 = vrot.lane.b32.xlu0 %v1075_v29, %s3388_s21  ;;  %v1559_v52 = vadd.f32 %v1554_v33, %v1547_v47  ;;  %v3310_v29 = vld [vmem:[%s4816_s2 + $0x1c] ss:$12 sps:$4 sm:$0xff]  }
 0x164   : > { %1123 = vrot.lane.b32.xlu1 %v901_v49, %s3388_s21  ;;  %2011 = vmatprep.subr.bf16.mxu1 %v3310_v29 }
 0x165   : > { %v3830_v37 = vpop.permute.xlu0 %1097  ;;  %v1646_v58 = vadd.f32 %v1596_v31, %v1559_v52 }
 0x166   : > { %v1383_v39 = vpop.permute.xlu1 %1382 }
 0x167   : > { %v1713_v36 = vrot.slane %v1646_v58, 1 }
 0x168   : > { %1412 = vrot.lane.b32.xlu1 %v907_v0, %s3388_s21  ;;  %v3308_v0 = vld [vmem:[%s4816_s2 + $0x18] ss:$12 sps:$4 sm:$0xff]  }
 0x169   : > { %v1598_v42 = vpop.permute.xlu0 %1597  ;;  %2012 = vmatpush1.bf16.msra.mxu1 %v3308_v0  ;;  %v3311_v0 = vld [vmem:[%s4816_s2] ss:$12 sps:$4 sm:$0xff]  }
 0x16a   : > { %v3833_v43 = vpop.permute.xlu1 %1195 }
 0x16d   : > { %v1385_v48 = vpop.permute.xlu0 %1384 }
 0x16e   : > { %v3835_v54 = vpop.permute.xlu1 %1099  ;;  %v1647_v50 = vadd.f32 %v1598_v42, %v1385_v48 }
 0x170   : > { %v1714_v55 = vrot.slane %v1647_v50, 1 }
 0x171   : > { %v1604_v56 = vpop.permute.xlu0 %1603 }
 0x172   : > { %v3837_v3 = vpop.permute.xlu1 %1197 }
 0x173   : > { %v1451_v49 = vadd.f32 %v1383_v39, %v3837_v3  ;;  %v1715_v39 = vsel %vm4857_vm2, %v1713_v36, %v1714_v55 }
 0x175   : > { %1483 = vrot.lane.b32.xlu0 %v1451_v49, %s3389_s27  ;;  %v1387_v33 = vpop.permute.xlu0 %1386  ;;  %v3313_v49 = vld [vmem:[%s4816_s2 + $0x4] ss:$12 sps:$4 sm:$0xff]  }
 0x176   : > { %v1600_v31 = vpop.permute.xlu1 %1599  ;;  %v1432_v42 = vadd.f32 %v1387_v33, %v3697_v24  ;;  %2013 = vmatprep.subr.bf16.mxu1 %v3313_v49 }
 0x177   : > { %2014 = vmatpush1.bf16.msra.mxu1 %v3311_v0 }
 0x178   : > { %v1648_v50 = vadd.f32 %v1600_v31, %v1432_v42  ;;  %v3314_v31 = vld [vmem:[%s4816_s2 + $0x8] ss:$12 sps:$4 sm:$0xff]  }
 0x179   : > { %1746 = vrot.lane.b32.xlu0 %v1715_v39, %s3387_s17  ;;  %v3850_v47 = vpop.permute.xlu0 %1101  ;;  %3215 = vmatprep.subr.bf16.mxu0 %v3314_v31 }
 0x17a   : > { %v1606_v52 = vpop.permute.xlu1 %1605  ;;  %v1716_v33 = vrot.slane %v1648_v50, 1  ;;  %3216 = vmatpush3.bf16.msra.mxu0 %v3314_v31 }
 0x17c   : > { %v1717_v27 = vsel %vm4857_vm2, %v1714_v55, %v1716_v33 }
 0x17d   : > { %v3852_v26 = vpop.permute.xlu0 %1199 }
 0x17e   : > { %v1389_v58 = vpop.permute.xlu1 %1388  ;;  %v1452_v29 = vadd.f32 %v1385_v48, %v3852_v26 }
 0x17f   : > { %v1433_v28 = vadd.f32 %v1389_v58, %v3702_v30 }
 0x180   : > { %1485 = vrot.lane.b32.xlu1 %v1452_v29, %s3389_s27 }
 0x181   : > { %v1612_v36 = vpop.permute.xlu0 %1611 }
 0x182   : > { %v1602_v39 = vpop.permute.xlu1 %1601 }
 0x183   : > { %v1649_v49 = vadd.f32 %v1602_v39, %v1433_v28 }
 0x184   : > { %1748 = vrot.lane.b32.xlu1 %v1717_v27, %s3387_s17 }
 0x185   : > { %v1391_v48 = vpop.permute.xlu0 %1390  ;;  %v1718_v57 = vrot.slane %v1649_v49, 1 }
 0x186   : > { %v3868_v50 = vpop.permute.xlu1 %1103  ;;  %v1434_v59 = vadd.f32 %v1391_v48, %v3705_v35 }
 0x187   : > { %v1719_v20 = vsel %vm4857_vm2, %v1716_v33, %v1718_v57 }
 0x188   : > { %v1650_v31 = vadd.f32 %v1604_v56, %v1434_v59 }
 0x189   : > { %v1608_v29 = vpop.permute.xlu0 %1607 }
 0x18a   : > { %v3870_v0 = vpop.permute.xlu1 %1201  ;;  %v1720_v19 = vrot.slane %v1650_v31, 1 }
 0x18b   : > { %v1453_v60 = vadd.f32 %v1432_v42, %v3870_v0 }
 0x18d   : > { %1487 = vrot.lane.b32.xlu0 %v1453_v60, %s3389_s27  ;;  %v3875_v55 = vpop.permute.xlu0 %1105  ;;  %v1721_v60 = vsel %vm4857_vm2, %v1718_v57, %v1720_v19 }
 0x18e   : > { %v1614_v27 = vpop.permute.xlu1 %1613 }
 0x191   : > { %1750 = vrot.lane.b32.xlu0 %v1719_v20, %s3387_s17  ;;  %v3879_v58 = vpop.permute.xlu0 %1203 }
 0x192   : > { %v1393_v39 = vpop.permute.xlu1 %1392  ;;  %v1454_v21 = vadd.f32 %v1433_v28, %v3879_v58 }
 0x193   : > { %v1435_v49 = vadd.f32 %v1393_v39, %v3710_v41 }
 0x194   : > { %1489 = vrot.lane.b32.xlu1 %v1454_v21, %s3389_s27 }
 0x195   : > { %v3883_v42 = vpop.permute.xlu0 %1619  ;;  %v1651_v20 = vadd.f32 %v1606_v52, %v1435_v49 }
 0x196   : > { %v1610_v48 = vpop.permute.xlu1 %1609 }
 0x197   : > { %v1722_v31 = vrot.slane %v1651_v20, 1 }
 0x198   : > { %1752 = vrot.lane.b32.xlu1 %v1721_v60, %s3387_s17 }
 0x199   : > { %v1395_v56 = vpop.permute.xlu0 %1394  ;;  %v1723_v60 = vsel %vm4857_vm2, %v1720_v19, %v1722_v31 }
 0x19a   : > { %v3888_v33 = vpop.permute.xlu1 %1107  ;;  %v1436_v28 = vadd.f32 %v1395_v56, %v3718_v45 }
 0x19c   : > { %v1652_v39 = vadd.f32 %v1608_v29, %v1436_v28 }
 0x19d   : > { %v1616_v13 = vpop.permute.xlu0 %1615 }
 0x19e   : > { %v3890_v14 = vpop.permute.xlu1 %1205  ;;  %v1724_v56 = vrot.slane %v1652_v39, 1 }
 0x19f   : > { %v1455_v21 = vadd.f32 %v1434_v59, %v3890_v14 }
 0x1a0   : > { %v1725_v22 = vsel %vm4857_vm2, %v1722_v31, %v1724_v56 }
 0x1a1   : > { %1491 = vrot.lane.b32.xlu0 %v1455_v21, %s3389_s27  ;;  %v3895_v32 = vpop.permute.xlu0 %1109 }
 0x1a2   : > { %v3897_v57 = vpop.permute.xlu1 %1621 }
 0x1a5   : > { %1754 = vrot.lane.b32.xlu0 %v1723_v60, %s3387_s17  ;;  %v3901_v52 = vpop.permute.xlu0 %1207 }
 0x1a6   : > { %v1397_v12 = vpop.permute.xlu1 %1396  ;;  %v1456_v61 = vadd.f32 %v1435_v49, %v3901_v52 }
 0x1a7   : > { %v1437_v29 = vadd.f32 %v1397_v12, %v3724_v53 }
 0x1a8   : > { %1493 = vrot.lane.b32.xlu1 %v1456_v61, %s3389_s27 }
 0x1a9   : > { %v1399_v59 = vpop.permute.xlu0 %1398  ;;  %v1653_v2 = vadd.f32 %v1610_v48, %v1437_v29 }
 0x1aa   : > { %v1618_v20 = vpop.permute.xlu1 %1617  ;;  %v1438_v21 = vadd.f32 %v1399_v59, %v3731_v1 }
 0x1ab   : > { %v1726_v31 = vrot.slane %v1653_v2, 1 }
 0x1ac   : > { %1756 = vrot.lane.b32.xlu1 %v1725_v22, %s3387_s17  ;;  %v1654_v15 = vadd.f32 %v1612_v36, %v1438_v21 }
 0x1ad   : > { %v3909_v19 = vpop.permute.xlu0 %1113  ;;  %v1727_v11 = vsel %vm4857_vm2, %v1724_v56, %v1726_v31 }
 0x1ae   : > { %v3911_v60 = vpop.permute.xlu1 %1111  ;;  %v1728_v62 = vrot.slane %v1654_v15, 1 }
 0x1b0   : > { %v1729_v48 = vsel %vm4857_vm2, %v1726_v31, %v1728_v62 }
 0x1b1   : > { %v3913_v49 = vpop.permute.xlu0 %1211 }
 0x1b2   : > { %v3915_v39 = vpop.permute.xlu1 %1209  ;;  %v1458_v61 = vadd.f32 %v1437_v29, %v3913_v49 }
 0x1b3   : > { %v1457_v59 = vadd.f32 %v1436_v28, %v3915_v39 }
 0x1b4   : > { %1497 = vrot.lane.b32.xlu1 %v1458_v61, %s3389_s27 }
 0x1b5   : > { %1495 = vrot.lane.b32.xlu0 %v1457_v59, %s3389_s27  ;;  %v1403_v12 = vpop.permute.xlu0 %1402 }
 0x1b6   : > { %v1401_v22 = vpop.permute.xlu1 %1400  ;;  %v1440_v36 = vadd.f32 %v1403_v12, %v3743_v23 }
 0x1b7   : > { %v1439_v46 = vadd.f32 %v1401_v22, %v3737_v6 }
 0x1b8   : > { %1760 = vrot.lane.b32.xlu1 %v1729_v48, %s3387_s17  ;;  %v1656_v29 = vadd.f32 %v1616_v13, %v1440_v36 }
 0x1b9   : > { %1758 = vrot.lane.b32.xlu0 %v1727_v11, %s3387_s17  ;;  %v3927_v15 = vpop.permute.xlu0 %1117  ;;  %v1655_v28 = vadd.f32 %v1614_v27, %v1439_v46 }
 0x1ba   : > { %v3929_v2 = vpop.permute.xlu1 %1115  ;;  %v1732_v63 = vrot.slane %v1656_v29, 1 }
 0x1bb   : > { %v1730_v22 = vrot.slane %v1655_v28, 1 }
 0x1bd   : > { %v3931_v61 = vpop.permute.xlu0 %1215  ;;  %v1733_v27 = vsel %vm4857_vm2, %v1730_v22, %v1732_v63 }
 0x1be   : > { %v3933_v59 = vpop.permute.xlu1 %1213  ;;  %v1460_v12 = vadd.f32 %v1439_v46, %v3931_v61  ;;  %v1731_v46 = vsel %vm4857_vm2, %v1728_v62, %v1730_v22 }
 0x1bf   : > { %v1459_v56 = vadd.f32 %v1438_v21, %v3933_v59 }
 0x1c0   : > { %1501 = vrot.lane.b32.xlu1 %v1460_v12, %s3389_s27 }
 0x1c1   : > { %1499 = vrot.lane.b32.xlu0 %v1459_v56, %s3389_s27  ;;  %v1407_v11 = vpop.permute.xlu0 %1406 }
 0x1c2   : > { %v1405_v31 = vpop.permute.xlu1 %1404  ;;  %v1442_v48 = vadd.f32 %v1407_v11, %v3752_v34 }
 0x1c3   : > { %v1441_v13 = vadd.f32 %v1405_v31, %v3748_v8 }
 0x1c4   : > { %v1658_v9 = vadd.f32 %v3883_v42, %v1442_v48  ;;  %1764 = vrot.lane.b32.xlu1 %v1733_v27, %s3387_s17 }
 0x1c5   : > { %v1657_v28 = vadd.f32 %v1618_v20, %v1441_v13  ;;  %1762 = vrot.lane.b32.xlu0 %v1731_v46, %s3387_s17  ;;  %v3946_v21 = vpop.permute.xlu0 %1219 }
 0x1c6   : > { %v3948_v29 = vpop.permute.xlu1 %1119  ;;  %v1462_v12 = vadd.f32 %v1441_v13, %v3946_v21  ;;  %v1736_v11 = vrot.slane %v1658_v9, 1 }
 0x1c7   : > { %v1734_v56 = vrot.slane %v1657_v28, 1 }
 0x1c8   : > { %1505 = vrot.lane.b32.xlu1 %v1462_v12, %s3389_s27 }
 0x1c9   : > { %v1411_v31 = vpop.permute.xlu0 %1410  ;;  %v1737_v20 = vsel %vm4857_vm2, %v1734_v56, %v1736_v11  ;;  %v1735_v46 = vsel %vm4857_vm2, %v1732_v63, %v1734_v56 }
 0x1ca   : > { %v3952_v51 = vpop.permute.xlu1 %1217  ;;  %v1444_v42 = vadd.f32 %v1411_v31, %v3761_v40 }
 0x1cb   : > { %v1461_v62 = vadd.f32 %v1440_v36, %v3952_v51 }
 0x1cc   : > { %1768 = vrot.lane.b32.xlu1 %v1737_v20, %s3387_s17  ;;  %v1660_v13 = vadd.f32 %v3800_v7, %v1444_v42  ;;  %v1548_v7 = vld [vmem:[#allocation2 + $0x198] sm:$0x1] }
 0x1cd   : > { %1503 = vrot.lane.b32.xlu0 %v1461_v62, %s3389_s27  ;;  %v3961_v27 = vpop.permute.xlu0 %1223 }
 0x1ce   : > { %v1409_v22 = vpop.permute.xlu1 %1408  ;;  %v1740_v31 = vrot.slane %v1660_v13, 1  ;;  %v4856_v13 = vunpack.i.l.bf16 %v3813_v18 }
 0x1cf   : > { %v1443_v9 = vadd.f32 %v1409_v22, %v3756_v38 }
 0x1d1   : > { %v1659_v28 = vadd.f32 %v3897_v57, %v1443_v9  ;;  %v1464_v36 = vadd.f32 %v1443_v9, %v3961_v27  ;;  %1766 = vrot.lane.b32.xlu0 %v1735_v46, %s3387_s17  ;;  %v3317_v57 = vadd.high.f32.bf16 %v1548_v7, %v3810_v17  ;;  %v1177_v9 = vld [vmem:[#allocation2 + $0x1e8] sm:$0x7f] }
 0x1d2   : > { %v3967_v12 = vpop.permute.xlu1 %1221 }
 0x1d3   : > { %v1738_v20 = vrot.slane %v1659_v28, 1  ;;  %v1463_v62 = vadd.f32 %v1442_v48, %v3967_v12  ;;  %1509 = vrot.lane.b32.xlu1 %v1464_v36, %s3389_s27  ;;  %v1662_v46 = vadd.f32 %v3317_v57, %v3818_v5  ;;  %v1465_v28 = vadd.f32 %v4856_v13, %v1444_v42  ;;  %v3991_v5 = vld [vmem:[#allocation2 + $0x1e0] sm:$0xff] }
 0x1d5   : > { %1507 = vrot.lane.b32.xlu0 %v1463_v62, %s3389_s27  ;;  %v1741_v22 = vsel %vm4857_vm2, %v1738_v20, %v1740_v31  ;;  %v1739_v56 = vsel %vm4857_vm2, %v1736_v11, %v1738_v20  ;;  %v3985_v62 = vpop.permute.xlu0 %1121  ;;  %v351_v20 = vlaneseq }
 0x1d6   : > { %v3973_v63 = vpop.permute.xlu1 %1123 }
 0x1d7   : > { %1772 = vrot.lane.b32.xlu1 %v1741_v22, %s3387_s17  ;;  %v1744_v22 = vrot.slane %v1662_v46, 1  ;;  %v4000_v46 = vshrl.u32 %v351_v20, 7 }
 0x1d9   : > { %1770 = vrot.lane.b32.xlu0 %v1739_v56, %s3387_s17  ;;  %v1055_v56 = vld [vmem:[#allocation2] sm:$0x80] }
 0x1da   : > { %v1413_v48 = vpop.permute.xlu1 %1412 }
 0x1db   : > { %v1445_v36 = vadd.f32 %v1413_v48, %v3765_v44  ;;  %1227 = vrot.lane.b32.xlu1 %v1177_v9, %s3387_s17  ;;  %v1145_v44 = vadd.f32 %v3991_v5, %v3820_v25  ;;  %v2274_v9 = vld [vmem:[#allocation2 + $0x30] sm:$0x80]  ;;  %v2719_v48 = vld [vmem:[#allocation2 + $0x1d0] sm:$0x1] }
 0x1dd   : > { %v3318_v7 = vadd.high.f32.bf16 %v1445_v36, %v3813_v18  ;;  %v1661_v11 = vadd.f32 %v3805_v4, %v1445_v36  ;;  %1511 = vrot.lane.b32.xlu0 %v1465_v28, %s3389_s27  ;;  %v3319_v4 = vadd.low.f32.bf16 %v1055_v56, %v3810_v17  ;;  %v1247_v28 = vadd.f32 %v3837_v3, %v1145_v44 }
 0x1de   : > { %v3289_v36 = vpack.i.bf16 %v2719_v48, %v2274_v9  ;;  %v353_v44 = vadd.s32 8, %v4000_v46 }
 0x1df   : > { %v1742_v16 = vrot.slane %v1661_v11, 1  ;;  %1513 = vrot.lane.b32.xlu1 %v3318_v7, %s3389_s27  ;;  %v4002_v7 = vpop.permute.xlu0 %1125  ;;  %v1246_v25 = vadd.f32 %v3319_v4, %v3833_v43  ;;  %v2744_v11 = vld [vmem:[#allocation2 + $0x1d8] sm:$0xff]  ;;  %v1146_v43 = vadd.f32 %v3991_v5, %v3830_v37 }
 0x1e1   : > { %v1745_v42 = vsel %vm4857_vm2, %v1742_v16, %v1744_v22  ;;  %v1743_v57 = vsel %vm4857_vm2, %v1740_v31, %v1742_v16  ;;  %v1314_v22 = vrot.slane %v1247_v28, 7  ;;  %v372_v16 = vand.u32 15, %v4000_v46  ;;  %v2746_v31 = vld [vmem:[#allocation2 + $0x208] sm:$0x1] }
 0x1e2   : > { %1776 = vrot.lane.b32.xlu0 %v1745_v42, %s3387_s17  ;;  %v1313_v3 = vrot.slane %v1246_v25, 7  ;;  %v1248_v42 = vadd.f32 %v3852_v26, %v1146_v43  ;;  %v379_v28 = vand.u32 15, %v353_v44  ;;  %v4024_v25 = vld [vmem:[%s4820_s6] ss:$0 sm:$0xff]  ;;  %v4893_v26 = vmov 0 }
 0x1e3   : > { %1774 = vrot.lane.b32.xlu1 %v1743_v57, %s3387_s17  ;;  %vm4009_vm4 = vcmp.ne.s32.totalorder %v372_v16, 0  ;;  %v354_v44 = vadd.s32 16, %v4000_v46 }
 0x1e4   : > { %v1315_v56 = vsel %vm4860_vm3, %v1313_v3, %v1314_v22  ;;  %vm4029_vm5 = vcmp.ne.s32.totalorder %v379_v28, 15 }
 0x1e5   : > { %v1362_v57 = vsel %vm4009_vm4, %v1315_v56, 0.0  ;;  %v4894_v26 = vsel %vm4029_vm5, 4294967295, %v4893_v26 }
 0x1e6   : > { %3290 = vrot.lane.b32.xlu0 %v3289_v36, %s3388_s21  ;;  %v1316_v36 = vrot.slane %v1248_v42, 7  ;;  %4895 = vst [vmem:[#allocation13_spill] sm:$0xff] %v4894_v26 }
 0x1e7   : > { %v1484_v17 = vpop.permute.xlu0 %1483  ;;  %2792 = vrot.lane.b32.xlu1 %v2744_v11, %s3387_s17  ;;  %v1147_v11 = vadd.f32 %v3835_v54, %v3697_v24 }
 0x1e8   : > { %v1531_v48 = vadd.f32 %v1484_v17, %v1362_v57  ;;  %v4036_v17 = vld [vmem:[%s4821_s7] ss:$0 sm:$0xff]  ;;  %v1317_v3 = vsel %vm4860_vm3, %v1314_v22, %v1316_v36 }
 0x1e9   : > { %v4047_v57 = vld [vmem:[%s4822_s8] ss:$0 sm:$0xff] }
 0x1eb   : > { %2796 = vrot.lane.b32.xlu1 %v2746_v31, %s3387_s17  ;;  %v1747_v9 = vpop.permute.xlu0 %1746  ;;  %v1249_v31 = vadd.f32 %v3870_v0, %v1147_v11 }
 0x1ec   : > { %v1810_v4 = vadd.f32 %v1747_v9, %v1531_v48  ;;  %v386_v48 = vand.u32 15, %v354_v44 }
 0x1ed   : > { %v1318_v9 = vrot.slane %v1249_v31, 7 }
 0x1ee   : > { %v1833_v16 = vmul.f32 %v4024_v25, %v1810_v4  ;;  %vm4053_vm8 = vcmp.ne.s32.totalorder %v386_v48, 0 }
 0x1ef   : > { %v1319_v11 = vsel %vm4860_vm3, %v1316_v36, %v1318_v9 }
 0x1f0   : > { %v1856_v54 = vadd.f32 %v4036_v17, %v1833_v16  ;;  %v1148_v16 = vadd.f32 %v3850_v47, %v3702_v30  ;;  %v4899_v30 = vmov 0  }
 0x1f2   : > { %v1486_v37 = vpop.permute.xlu1 %1485  ;;  %v1895_v0 = vmul.f32 %v4047_v57, %v1856_v54  ;;  %vm1873_vm6 = vcmp.gt.f32.partialorder %v1856_v54, 0.0  ;;  %v1250_v44 = vadd.f32 %v3879_v58, %v1148_v16 }
 0x1f3   : > { %v1532_v56 = vadd.f32 %v1486_v37, %v1317_v3  ;;  %v4896_v37 = vmov 0 }
 0x1f4   : > { %v4897_v37 = vsel %vm4053_vm8, 4294967295, %v4896_v37  ;;  %v1911_v31 = vsel %vm1873_vm6, %v1856_v54, %v1895_v0  ;;  %v1320_v47 = vrot.slane %v1250_v44, 7  ;;  %v1149_v0 = vadd.f32 %v3868_v50, %v3705_v35 }
 0x1f5   : > { %4898 = vst [vmem:[#allocation14_spill] sm:$0xff] %v4897_v37 }
 0x1f6   : > { %v1749_v43 = vpop.permute.xlu1 %1748 }
 0x1f7   : > { %v1795_v24 = vsel %vm4029_vm5, %v1749_v43, 0.0  ;;  %v355_v43 = vadd.s32 24, %v4000_v46 }
 0x1f8   : > { %v1811_v42 = vadd.f32 %v1795_v24, %v1532_v56 }
 0x1f9   : > { %v393_v13 = vand.u32 15, %v355_v43 }
 0x1fa   : > { %v1834_v22 = vmul.f32 %v4024_v25, %v1811_v42  ;;  %v1364_v42 = vsel %vm4053_vm8, %v1319_v11, 0.0  ;;  %v1251_v11 = vadd.f32 %v3890_v14, %v1149_v0 }
 0x1fb   : > { %vm4070_vm9 = vcmp.ne.s32.totalorder %v393_v13, 15 }
 0x1fc   : > { %v1857_v4 = vadd.f32 %v4036_v17, %v1834_v22  ;;  %v1322_v50 = vrot.slane %v1251_v11, 7 }
 0x1fe   : > { %vm1874_vm7 = vcmp.gt.f32.partialorder %v1857_v4, 0.0  ;;  %v1896_v28 = vmul.f32 %v4047_v57, %v1857_v4 }
 0x1ff   : > { %v1488_v3 = vpop.permute.xlu0 %1487 }
 0x200   : > { %v1912_v56 = vsel %vm1874_vm7, %v1857_v4, %v1896_v28  ;;  %v1533_v22 = vadd.f32 %v1488_v3, %v1364_v42  ;;  %v1321_v28 = vsel %vm4860_vm3, %v1318_v9, %v1320_v47  ;;  %v4902_v42 = vmov 0 }
 0x201   : > { %v1927_v24 = vpack.c.bf16 %v1912_v56, %v1911_v31  ;;  %v356_v31 = vadd.s32 32, %v4000_v46 }
 0x203   : > { %v1751_v48 = vpop.permute.xlu0 %1750  ;;  %3111 = vmatmul.mubr.msk.bf16.vlgmr.msra.gmra.mxu1 %vm4858_vm0, %v1927_v24  ;;  %3217 = vmatprep.mubr.msk.bf16.mxu0 %vm4858_vm0, %v1927_v24  ;;  %v400_v44 = vand.u32 15, %v356_v31 }
 0x204   : > { %v1812_v36 = vadd.f32 %v1751_v48, %v1533_v22  ;;  %2041 = vmatprep.mubr.bf16.mxu1 %v4899_v30  ;;  %v1323_v22 = vsel %vm4860_vm3, %v1320_v47, %v1322_v50  ;;  %v1150_v48 = vadd.f32 %v3875_v55, %v3710_v41 }
 0x205   : > { %vm4084_vm11 = vcmp.ne.s32.totalorder %v400_v44, 0 }
 0x206   : > { %v1490_v54 = vpop.permute.xlu1 %1489  ;;  %v1835_v58 = vmul.f32 %v4024_v25, %v1812_v36  ;;  %v4903_v42 = vsel %vm4084_vm11, 4294967295, %v4902_v42  ;;  %v1366_v11 = vsel %vm4084_vm11, %v1323_v22, 0.0  ;;  %v1152_v22 = vadd.f32 %v3895_v32, %v3724_v53 }
 0x207   : > { %v1534_v16 = vadd.f32 %v1490_v54, %v1321_v28  ;;  %4904 = vst [vmem:[#allocation15_spill] sm:$0xff] %v4903_v42  ;;  %v1252_v28 = vadd.f32 %v3901_v52, %v1150_v48 }
 0x208   : > { %v1858_v43 = vadd.f32 %v4036_v17, %v1835_v58  ;;  %v357_v58 = vadd.s32 40, %v4000_v46 }
 0x209   : > { %v1324_v41 = vrot.slane %v1252_v28, 7 }
 0x20a   : > { %v1753_v3 = vpop.permute.xlu1 %1752  ;;  %v1897_v24 = vmul.f32 %v4047_v57, %v1858_v43  ;;  %vm1875_vm10 = vcmp.gt.f32.partialorder %v1858_v43, 0.0 }
 0x20b   : > { %v1797_v56 = vsel %vm4070_vm9, %v1753_v3, 0.0 }
 0x20c   : > { %v1813_v35 = vadd.f32 %v1797_v56, %v1534_v16  ;;  %v1913_v54 = vsel %vm1875_vm10, %v1858_v43, %v1897_v24  ;;  %v407_v56 = vand.u32 15, %v357_v58  ;;  %v1151_v43 = vadd.f32 %v3888_v33, %v3718_v45 }
 0x20e   : > { %v1836_v13 = vmul.f32 %v4024_v25, %v1813_v35  ;;  %vm4101_vm13 = vcmp.ne.s32.totalorder %v407_v56, 15  ;;  %v4905_v35 = vmov 0  ;;  %v1253_v44 = vadd.f32 %v3915_v39, %v1151_v43 }
 0x20f   : > { %v4906_v35 = vsel %vm4101_vm13, 4294967295, %v4905_v35 }
 0x210   : > { %v1859_v9 = vadd.f32 %v4036_v17, %v1836_v13  ;;  %4907 = vst [vmem:[#allocation16_spill] sm:$0xff] %v4906_v35  ;;  %v1325_v13 = vsel %vm4860_vm3, %v1322_v50, %v1324_v41  ;;  %v1326_v50 = vrot.slane %v1253_v44, 7 }
 0x212   : > { %v1898_v14 = vmul.f32 %v4047_v57, %v1859_v9  ;;  %vm1876_vm12 = vcmp.gt.f32.partialorder %v1859_v9, 0.0 }
 0x213   : > { %v1492_v36 = vpop.permute.xlu0 %1491 }
 0x214   : > { %v1914_v0 = vsel %vm1876_vm12, %v1859_v9, %v1898_v14  ;;  %v1535_v3 = vadd.f32 %v1492_v36, %v1366_v11  ;;  %v358_v14 = vadd.s32 48, %v4000_v46  ;;  %v359_v36 = vadd.s32 56, %v4000_v46 }
 0x215   : > { %v1928_v16 = vpack.c.bf16 %v1914_v0, %v1913_v54  ;;  %v1254_v54 = vadd.f32 %v3913_v49, %v1152_v22 }
 0x216   : > { %v414_v0 = vand.u32 15, %v358_v14  ;;  %v421_v11 = vand.u32 15, %v359_v36 }
 0x217   : > { %v1755_v31 = vpop.permute.xlu0 %1754  ;;  %3112 = vmatmul.mubr.msk.bf16.gmra.mxu1 %vm4858_vm0, %v1928_v16  ;;  %3218 = vmatmul.mubr.msk.bf16.vlgmr.msra.gmra.mxu0 %vm4858_vm0, %v1928_v16  ;;  %v1328_v32 = vrot.slane %v1254_v54, 7  ;;  %v4908_v16 = vmov 0 }
 0x218   : > { %v1814_v47 = vadd.f32 %v1755_v31, %v1535_v3  ;;  %2051 = vmatprep.mubr.bf16.mxu1 %v4899_v30  ;;  %vm4119_vm15 = vcmp.ne.s32.totalorder %v414_v0, 0  ;;  %v1327_v3 = vsel %vm4860_vm3, %v1324_v41, %v1326_v50  ;;  %v1153_v31 = vadd.f32 %v3911_v60, %v3731_v1 }
 0x219   : > { %v4909_v16 = vsel %vm4119_vm15, 4294967295, %v4908_v16  ;;  %vm4126_vm6 = vcmp.ne.s32.totalorder %v421_v11, 15  ;;  %v1368_v44 = vsel %vm4119_vm15, %v1327_v3, 0.0  ;;  %v1329_v41 = vsel %vm4860_vm3, %v1326_v50, %v1328_v32 }
 0x21a   : > { %v1494_v55 = vpop.permute.xlu1 %1493  ;;  %v1837_v52 = vmul.f32 %v4024_v25, %v1814_v47  ;;  %4910 = vst [vmem:[#allocation17_spill] sm:$0xff] %v4909_v16  ;;  %v1154_v60 = vadd.f32 %v3909_v19, %v3737_v6 }
 0x21b   : > { %v1536_v24 = vadd.f32 %v1494_v55, %v1325_v13  ;;  %v1255_v13 = vadd.f32 %v3933_v59, %v1153_v31  ;;  %v361_v59 = vadd.s32 72, %v4000_v46 }
 0x21c   : > { %v1860_v33 = vadd.f32 %v4036_v17, %v1837_v52  ;;  %v360_v52 = vadd.s32 64, %v4000_v46  ;;  %v1256_v54 = vadd.f32 %v3931_v61, %v1154_v60 }
 0x21d   : > { %v1330_v36 = vrot.slane %v1255_v13, 7 }
 0x21e   : > { %v1757_v9 = vpop.permute.xlu1 %1756  ;;  %v1899_v58 = vmul.f32 %v4047_v57, %v1860_v33  ;;  %vm1877_vm14 = vcmp.gt.f32.partialorder %v1860_v33, 0.0  ;;  %v428_v50 = vand.u32 15, %v360_v52  ;;  %v1332_v11 = vrot.slane %v1256_v54, 7 }
 0x21f   : > { %v1799_v45 = vsel %vm4101_vm13, %v1757_v9, 0.0  ;;  %v1331_v61 = vsel %vm4860_vm3, %v1328_v32, %v1330_v36 }
 0x220   : > { %v1815_v48 = vadd.f32 %v1799_v45, %v1536_v24  ;;  %v1915_v55 = vsel %vm1877_vm14, %v1860_v33, %v1899_v58  ;;  %vm4150_vm7 = vcmp.ne.s32.totalorder %v428_v50, 0  ;;  %v1157_v50 = vadd.f32 %v3948_v29, %v3752_v34 }
 0x222   : > { %v1838_v39 = vmul.f32 %v4024_v25, %v1815_v48 }
 0x224   : > { %v1861_v28 = vadd.f32 %v4036_v17, %v1838_v39  ;;  %v435_v39 = vand.u32 15, %v361_v59 }
 0x226   : > { %v1900_v53 = vmul.f32 %v4047_v57, %v1861_v28  ;;  %v1498_v49 = vpop.permute.xlu1 %1497  ;;  %vm1878_vm1 = vcmp.gt.f32.partialorder %v1861_v28, 0.0  ;;  %vm4157_vm14 = vcmp.ne.s32.totalorder %v435_v39, 15  ;;  %v1158_v39 = vadd.f32 %v3985_v62, %v3756_v38 }
 0x227   : > { %v1496_v47 = vpop.permute.xlu0 %1495  ;;  %v1538_v14 = vadd.f32 %v1498_v49, %v1329_v41  ;;  %v1333_v41 = vsel %vm4860_vm3, %v1330_v36, %v1332_v11 }
 0x228   : > { %v1916_v43 = vsel %vm1878_vm1, %v1861_v28, %v1900_v53  ;;  %v1537_v9 = vadd.f32 %v1496_v47, %v1368_v44  ;;  %v1155_v28 = vadd.f32 %v3929_v2, %v3743_v23  ;;  %v4913_v53 = vmov 0 }
 0x229   : > { %v1929_v24 = vpack.c.bf16 %v1916_v43, %v1915_v55  ;;  %v4914_v53 = vsel %vm4150_vm7, 4294967295, %v4913_v53  ;;  %v4916_v55 = vmov 0  ;;  %v362_v23 = vadd.s32 80, %v4000_v46 }
 0x22a   : > { %v1761_v1 = vpop.permute.xlu1 %1760  ;;  %4915 = vst [vmem:[#allocation18_spill] sm:$0xff] %v4914_v53  ;;  %v4917_v55 = vsel %vm4157_vm14, 4294967295, %v4916_v55  ;;  %v363_v2 = vadd.s32 88, %v4000_v46  ;;  %v1156_v43 = vadd.f32 %v3927_v15, %v3748_v8  ;;  %v1257_v32 = vadd.f32 %v3952_v51, %v1155_v28 }
 0x22b   : > { %v1759_v22 = vpop.permute.xlu0 %1758  ;;  %v1801_v45 = vsel %vm4126_vm6, %v1761_v1, 0.0  ;;  %3113 = vmatmul.mubr.msk.bf16.gmra.mxu1 %vm4858_vm0, %v1929_v24  ;;  %3221 = vmatprep.mubr.msk.bf16.mxu0 %vm4858_vm0, %v1929_v24  ;;  %4918 = vst [vmem:[#allocation19_spill] sm:$0xff] %v4917_v55  ;;  %v1370_v44 = vsel %vm4150_vm7, %v1331_v61, 0.0  ;;  %v442_v51 = vand.u32 15, %v362_v23  ;;  %v1259_v61 = vadd.f32 %v3967_v12, %v1157_v50 }
 0x22c   : > { %v1816_v33 = vadd.f32 %v1759_v22, %v1537_v9  ;;  %v1817_v48 = vadd.f32 %v1801_v45, %v1538_v14  ;;  %2061 = vmatprep.mubr.bf16.mxu1 %v4899_v30  ;;  %v4170_v9 = vadd.f32 %v3946_v21, %v1156_v43  ;;  %v449_v15 = vand.u32 15, %v363_v2 }
 0x22d   : > { %v1334_v45 = vrot.slane %v1257_v32, 7  ;;  %vm4182_vm1 = vcmp.ne.s32.totalorder %v442_v51, 0  ;;  %v365_v2 = vadd.s32 104, %v4000_v46 }
 0x22e   : > { %v1839_v6 = vmul.f32 %v4024_v25, %v1816_v33  ;;  %v1840_v19 = vmul.f32 %v4024_v25, %v1817_v48  ;;  %v1336_v21 = vrot.slane %v4170_v9, 7 }
 0x22f   : > { %v1335_v29 = vsel %vm4860_vm3, %v1332_v11, %v1334_v45  ;;  %v4205_v11 = vadd.f32 %v3961_v27, %v1158_v39  ;;  %v463_v27 = vand.u32 15, %v365_v2 }
 0x230   : > { %v1862_v0 = vadd.f32 %v4036_v17, %v1839_v6  ;;  %v1863_v58 = vadd.f32 %v4036_v17, %v1840_v19  ;;  %v4919_v6 = vmov 0  ;;  %v1337_v28 = vsel %vm4860_vm3, %v1334_v45, %v1336_v21 }
 0x231   : > { %v4920_v6 = vsel %vm4182_vm1, 4294967295, %v4919_v6 }
 0x232   : > { %vm1879_vm10 = vcmp.gt.f32.partialorder %v1862_v0, 0.0  ;;  %v1901_v3 = vmul.f32 %v4047_v57, %v1862_v0  ;;  %v1902_v49 = vmul.f32 %v4047_v57, %v1863_v58  ;;  %v1502_v31 = vpop.permute.xlu1 %1501  ;;  %vm1880_vm12 = vcmp.gt.f32.partialorder %v1863_v58, 0.0  ;;  %4921 = vst [vmem:[#allocation20_spill] sm:$0xff] %v4920_v6 }
 0x233   : > { %v1500_v47 = vpop.permute.xlu0 %1499  ;;  %v1540_v1 = vadd.f32 %v1502_v31, %v1333_v41  ;;  %v1338_v41 = vrot.slane %v1259_v61, 7  ;;  %v367_v61 = vadd.s32 120, %v4000_v46 }
 0x234   : > { %v1917_v52 = vsel %vm1879_vm10, %v1862_v0, %v1901_v3  ;;  %v1918_v13 = vsel %vm1880_vm12, %v1863_v58, %v1902_v49  ;;  %v1539_v14 = vadd.f32 %v1500_v47, %v1370_v44  ;;  %vm4186_vm10 = vcmp.ne.s32.totalorder %v449_v15, 15  ;;  %v2379_v49 = vld [vmem:[#allocation2 + $0x1e8] sm:$0x7f] }
 0x235   : > { %v1930_v24 = vpack.c.bf16 %v1918_v13, %v1917_v52  ;;  %v364_v3 = vadd.s32 96, %v4000_v46  ;;  %v3294_v12 = vpack.i.bf16 %v2379_v49, %v3991_v5  ;;  %v1372_v13 = vsel %vm4182_vm1, %v1335_v29, 0.0  ;;  %v2745_v5 = vld [vmem:[#allocation2 + $0x1f0] sm:$0xff] }
 0x236   : > { %v1765_v60 = vpop.permute.xlu1 %1764 }
 0x237   : > { %v1763_v22 = vpop.permute.xlu0 %1762  ;;  %v1803_v8 = vsel %vm4157_vm14, %v1765_v60, 0.0  ;;  %3114 = vmatmul.mubr.msk.bf16.gmra.mxu1 %vm4858_vm0, %v1930_v24  ;;  %3222 = vmatmul.mubr.msk.bf16.gmra.mxu0 %vm4858_vm0, %v1930_v24  ;;  %v1340_v60 = vrot.slane %v4205_v11, 7 }
 0x238   : > { %v1818_v59 = vadd.f32 %v1763_v22, %v1539_v14  ;;  %v1819_v33 = vadd.f32 %v1803_v8, %v1540_v1  ;;  %2071 = vmatprep.mubr.bf16.mxu1 %v4899_v30  ;;  %3295 = vrot.lane.b32.xlu0 %v3294_v12, %s3387_s17  ;;  %v456_v14 = vand.u32 15, %v364_v3  ;;  %v1159_v22 = vadd.f32 %v3973_v63, %v3761_v40 }
 0x239   : > { %v366_v40 = vadd.s32 112, %v4000_v46  ;;  %v4930_v63 = vunpack.i.l.bf16 %v3813_v18 }
 0x23a   : > { %v1841_v48 = vmul.f32 %v4024_v25, %v1818_v59  ;;  %v1842_v36 = vmul.f32 %v4024_v25, %v1819_v33  ;;  %v1506_v54 = vpop.permute.xlu1 %1505  ;;  %v4924_v59 = vmov 0  ;;  %v1339_v33 = vsel %vm4860_vm3, %v1336_v21, %v1338_v41 }
 0x23b   : > { %v1542_v34 = vadd.f32 %v1506_v54, %v1337_v28  ;;  %v1261_v54 = vadd.f32 %v4930_v63, %v1159_v22 }
 0x23c   : > { %v1864_v0 = vadd.f32 %v4036_v17, %v1841_v48  ;;  %v1865_v58 = vadd.f32 %v4036_v17, %v1842_v36  ;;  %2794 = vrot.lane.b32.xlu0 %v2745_v5, %s3387_s17  ;;  %v4927_v36 = vmov 0 }
 0x23e   : > { %vm1881_vm12 = vcmp.gt.f32.partialorder %v1864_v0, 0.0  ;;  %v1903_v31 = vmul.f32 %v4047_v57, %v1864_v0  ;;  %v1904_v47 = vmul.f32 %v4047_v57, %v1865_v58  ;;  %v1769_v38 = vpop.permute.xlu1 %1768  ;;  %vm1882_vm2 = vcmp.gt.f32.partialorder %v1865_v58, 0.0 }
 0x23f   : > { %v1504_v62 = vpop.permute.xlu0 %1503  ;;  %v1805_v23 = vsel %vm4186_vm10, %v1769_v38, 0.0  ;;  %v470_v38 = vand.u32 15, %v366_v40 }
 0x240   : > { %v1821_v43 = vadd.f32 %v1805_v23, %v1542_v34  ;;  %v1919_v32 = vsel %vm1881_vm12, %v1864_v0, %v1903_v31  ;;  %v1920_v52 = vsel %vm1882_vm2, %v1865_v58, %v1904_v47  ;;  %v1541_v24 = vadd.f32 %v1504_v62, %v1372_v13  ;;  %v1071_v34 = vld [vmem:[#allocation2 + $0x180] sm:$0x7f] }
 0x241   : > { %v1931_v44 = vpack.c.bf16 %v1920_v52, %v1919_v32  ;;  %vm4220_vm2 = vcmp.ne.s32.totalorder %v456_v14, 0  ;;  %vm4225_vm12 = vcmp.ne.s32.totalorder %v463_v27, 15  ;;  %v1341_v0 = vsel %vm4860_vm3, %v1338_v41, %v1340_v60 }
 0x242   : > { %v1844_v9 = vmul.f32 %v4024_v25, %v1821_v43  ;;  %v4925_v59 = vsel %vm4220_vm2, 4294967295, %v4924_v59  ;;  %v4928_v36 = vsel %vm4225_vm12, 4294967295, %v4927_v36  ;;  %v1374_v21 = vsel %vm4220_vm2, %v1339_v33, 0.0 }
 0x243   : > { %v1767_v1 = vpop.permute.xlu0 %1766  ;;  %3115 = vmatmul.mubr.msk.bf16.gmra.mxu1 %vm4858_vm0, %v1931_v44  ;;  %3225 = vmatprep.mubr.msk.bf16.mxu0 %vm4858_vm0, %v1931_v44  ;;  %4926 = vst [vmem:[#allocation21_spill] sm:$0xff] %v4925_v59  ;;  %4929 = vst [vmem:[#allocation22_spill] sm:$0xff] %v4928_v36  ;;  %v1160_v49 = vadd.f32 %v4002_v7, %v1071_v34  ;;  %v1342_v62 = vrot.slane %v1261_v54, 7  ;;  %v477_v13 = vand.u32 15, %v367_v61  ;;  %vm4931_vm3 = vcmask 261120  }
 0x244   : > { %v1867_v8 = vadd.f32 %v4036_v17, %v1844_v9  ;;  %v1820_v51 = vadd.f32 %v1767_v1, %v1541_v24  ;;  %2081 = vmatprep.mubr.bf16.mxu1 %v4899_v30  ;;  %vm4932_vm2 = vmmov %vm4931_vm3  ;;  %v4933_v9 = vmov 0 }
 0x245   : > { %v1510_v15 = vpop.permute.xlu1 %1509 }
 0x246   : > { %v1843_v45 = vmul.f32 %v4024_v25, %v1820_v51  ;;  %v1906_v50 = vmul.f32 %v4047_v57, %v1867_v8  ;;  %v1544_v58 = vadd.f32 %v1510_v15, %v1341_v0  ;;  %vm1884_vm0 = vcmp.gt.f32.partialorder %v1867_v8, 0.0 }
 0x247   : > { %v1508_v48 = vpop.permute.xlu0 %1507 }
 0x248   : > { %v1866_v39 = vadd.f32 %v4036_v17, %v1843_v45  ;;  %v1543_v18 = vadd.f32 %v1508_v48, %v1374_v21  ;;  %v1922_v12 = vsel %vm1884_vm0, %v1867_v8, %v1906_v50  ;;  %vm4936_vm0 = vcmask 1040384  }
 0x249   : > { %v1773_v28 = vpop.permute.xlu1 %1772  ;;  %v1343_v14 = vsel %vm4936_vm0, %v1340_v60, %v1342_v62  ;;  %v4938_v8 = vmov 0 }
 0x24a   : > { %vm1883_vm14 = vcmp.gt.f32.partialorder %v1866_v39, 0.0  ;;  %v1905_v29 = vmul.f32 %v4047_v57, %v1866_v39  ;;  %v1807_v3 = vsel %vm4225_vm12, %v1773_v28, 0.0 }
 0x24b   : > { %v1823_v31 = vadd.f32 %v1807_v3, %v1544_v58  ;;  %v1771_v47 = vpop.permute.xlu0 %1770 }
 0x24c   : > { %v1822_v23 = vadd.f32 %v1771_v47, %v1543_v18  ;;  %v1921_v2 = vsel %vm1883_vm14, %v1866_v39, %v1905_v29  ;;  %vm4248_vm14 = vcmp.ne.s32.totalorder %v470_v38, 0 }
 0x24d   : > { %v1846_v11 = vmul.f32 %v4024_v25, %v1823_v31  ;;  %v1228_v46 = vpop.permute.xlu1 %1227  ;;  %v1932_v43 = vpack.c.bf16 %v1922_v12, %v1921_v2  ;;  %v4934_v9 = vsel %vm4248_vm14, 4294967295, %v4933_v9  ;;  %v1376_v51 = vsel %vm4248_vm14, %v1343_v14, 0.0 }
 0x24e   : > { %v1845_v32 = vmul.f32 %v4024_v25, %v1822_v23  ;;  %v1262_v52 = vadd.f32 %v1228_v46, %v1160_v49  ;;  %4935 = vst [vmem:[#allocation23_spill] sm:$0xff] %v4934_v9 }
 0x24f   : > { %v1869_v44 = vadd.f32 %v4036_v17, %v1846_v11  ;;  %3116 = vmatmul.mubr.msk.bf16.gmra.mxu1 %vm4931_vm3, %v1932_v43  ;;  %3226 = vmatmul.mubr.msk.bf16.gmra.mxu0 %vm4932_vm2, %v1932_v43  ;;  %v1512_v7 = vpop.permute.xlu0 %1511  ;;  %vm4937_vm3 = vmmov %vm4936_vm0  ;;  %vm4257_vm2 = vcmp.ne.s32.totalorder %v477_v13, 15  ;;  %vm4941_vm0 = vcmask 261120  }
 0x250   : > { %v1868_v41 = vadd.f32 %v4036_v17, %v1845_v32  ;;  %v1344_v24 = vrot.slane %v1262_v52, 7  ;;  %2091 = vmatprep.mubr.bf16.mxu1 %v4899_v30  ;;  %v4939_v8 = vsel %vm4257_vm2, 4294967295, %v4938_v8  ;;  %v1545_v45 = vadd.f32 %v1512_v7, %v1376_v51 }
 0x251   : > { %v1908_v1 = vmul.f32 %v4047_v57, %v1869_v44  ;;  %v1514_v27 = vpop.permute.xlu1 %1513  ;;  %vm1886_vm12 = vcmp.gt.f32.partialorder %v1869_v44, 0.0  ;;  %4940 = vst [vmem:[#allocation24_spill] sm:$0xff] %v4939_v8 }
 0x252   : > { %vm1885_vm1 = vcmp.gt.f32.partialorder %v1868_v41, 0.0  ;;  %v1907_v5 = vmul.f32 %v4047_v57, %v1868_v41  ;;  %v1345_v22 = vsel %vm4937_vm3, %v1342_v62, %v1344_v24  ;;  %vm4942_vm3 = vmmov %vm4941_vm0 }
 0x253   : > { %v1546_v15 = vadd.f32 %v1514_v27, %v1345_v22  ;;  %v1924_v60 = vsel %vm1886_vm12, %v1869_v44, %v1908_v1 }
 0x254   : > { %v1777_v33 = vpop.permute.xlu0 %1776  ;;  %v1923_v48 = vsel %vm1885_vm1, %v1868_v41, %v1907_v5 }
 0x255   : > { %v1809_v40 = vsel %vm4257_vm2, %v1777_v33, 0.0  ;;  %v1775_v63 = vpop.permute.xlu1 %1774  ;;  %v1933_v54 = vpack.c.bf16 %v1924_v60, %v1923_v48 }
 0x256   : > { %v1825_v50 = vadd.f32 %v1809_v40, %v1546_v15  ;;  %v1824_v39 = vadd.f32 %v1775_v63, %v1545_v45 }
 0x257   : > { %3117 = vmatmul.mubr.msk.bf16.gmra.mxu1 %vm4941_vm0, %v1933_v54  ;;  %3229 = vmatprep.mubr.msk.bf16.mxu0 %vm4942_vm3, %v1933_v54  ;;  %vm4943_vm3 = vmmov %vm4941_vm0 }
 0x258   : > { %v1848_v0 = vmul.f32 %v4024_v25, %v1825_v50  ;;  %v1847_v58 = vmul.f32 %v4024_v25, %v1824_v39  ;;  %2101 = vmatprep.mubr.bf16.mxu1 %v4899_v30 }
 0x25a   : > { %v1871_v21 = vadd.f32 %v4036_v17, %v1848_v0  ;;  %v1870_v28 = vadd.f32 %v4036_v17, %v1847_v58 }
 0x25c   : > { %v1910_v61 = vmul.f32 %v4047_v57, %v1871_v21  ;;  %vm1887_vm1 = vcmp.gt.f32.partialorder %v1870_v28, 0.0  ;;  %v1909_v34 = vmul.f32 %v4047_v57, %v1870_v28  ;;  %vm1888_vm12 = vcmp.gt.f32.partialorder %v1871_v21, 0.0 }
 0x25e   : > { %v1925_v29 = vsel %vm1887_vm1, %v1870_v28, %v1909_v34  ;;  %v1926_v18 = vsel %vm1888_vm12, %v1871_v21, %v1910_v61  ;;  %vm4944_vm1 = vmmov %vm4941_vm0 }
 0x25f   : > { %v1934_v3 = vpack.c.bf16 %v1926_v18, %v1925_v29  ;;  %vm4945_vm12 = vmmov %vm4941_vm0 }
 0x261   : > { %3118 = vmatmul.mubr.msk.bf16.gmra.mxu1 %vm4941_vm0, %v1934_v3  ;;  %3230 = vmatmul.mubr.msk.bf16.gmra.mxu0 %vm4943_vm3, %v1934_v3  ;;  %vm4946_vm3 = vmmov %vm4941_vm0 }
 0x2c3   : > { %v4276_v25 = vpop.f32.mrf.mxu1 }
 0x2c4   : > { %2297 = vrot.lane.b32.xlu1 %v4276_v25, %s3388_s21 }
 0x2c5   : > { %v2035_v30 = vpop.f32.mrf.mxu1 }
 0x2c6   : > { %2210 = vst [vmem:[#allocation2 + $0x50] sm:$0xff] %v2035_v30 }
 0x2c7   : > { %v4280_v17 = vpop.f32.mrf.mxu1 }
 0x2c8   : > { %2551 = vrot.lane.b32.xlu1 %v2035_v30, %s3388_s21  ;;  %2299 = vrot.lane.b32.xlu0 %v4280_v17, %s3388_s21 }
 0x2c9   : > { %v2039_v57 = vpop.f32.mrf.mxu1 }
 0x2ca   : > { %2213 = vst [vmem:[#allocation2 + $0x68] sm:$0xff] %v2039_v57 }
 0x2cc   : > { %2553 = vrot.lane.b32.xlu0 %v2039_v57, %s3388_s21 }
 0x2cd   : > { %v2718_v49 = vld [vmem:[#allocation2 + $0x50] sm:$0xfe] }
 0x2ce   : > { %2722 = vrot.lane.b32.xlu1 %v2718_v49, %s3388_s21 }
 0x2d1   : > { %v2363_v31 = vld [vmem:[#allocation2 + $0x68] sm:$0x80] }
 0x2d2   : > { %2397 = vrot.lane.b32.xlu1 %v2363_v31, %s3387_s17 }
 0x2d7   : > { %v4288_v47 = vpop.f32.mrf.mxu1  ;;  %v3219_v38 = vpop.f32.mrf.mxu0 }
 0x2d8   : > { %2217 = vst.msk [vmem:[#allocation2 + $0x88] sm:$0xff] %vm4944_vm1, %v3219_v38  ;;  %2301 = vrot.lane.b32.xlu1 %v4288_v47, %s3388_s21  ;;  %vm4947_vm1 = vmmov %vm4941_vm0 }
 0x2d9   : > { %v2045_v62 = vpop.f32.mrf.mxu1  ;;  %v2146_v23 = vpop.f32.mrf.mxu0 }
 0x2da   : > { %2399 = vrot.lane.b32.xlu0 %v2045_v62, %s3387_s17 }
 0x2db   : > { %v4294_v2 = vpop.f32.mrf.mxu1  ;;  %v3220_v12 = vpop.f32.mrf.mxu0 }
 0x2dc   : > { %2220 = vst.msk [vmem:[#allocation2 + $0xa0] sm:$0xff] %vm4945_vm12, %v3220_v12  ;;  %2555 = vrot.lane.b32.xlu1 %v2045_v62, %s3388_s21  ;;  %vm4948_vm12 = vmmov %vm4941_vm0 }
 0x2dd   : > { %v2049_v11 = vpop.f32.mrf.mxu1  ;;  %v2149_v46 = vpop.f32.mrf.mxu0 }
 0x2de   : > { %2303 = vrot.lane.b32.xlu0 %v4294_v2, %s3388_s21 }
 0x2e0   : > { %2401 = vrot.lane.b32.xlu1 %v2049_v11, %s3387_s17 }
 0x2e3   : > { %v2731_v43 = vld [vmem:[#allocation2 + $0xa0] sm:$0xff] }
 0x2e4   : > { %2766 = vrot.lane.b32.xlu0 %v2731_v43, %s3387_s17 }
 0x2e8   : > { %2557 = vrot.lane.b32.xlu0 %v2049_v11, %s3388_s21 }
 0x2eb   : > { %v4303_v32 = vpop.f32.mrf.mxu1 }
 0x2ec   : > { %2305 = vrot.lane.b32.xlu1 %v4303_v32, %s3388_s21 }
 0x2ed   : > { %v2055_v52 = vpop.f32.mrf.mxu1 }
 0x2ee   : > { %2403 = vrot.lane.b32.xlu0 %v2055_v52, %s3387_s17 }
 0x2ef   : > { %v4308_v13 = vpop.f32.mrf.mxu1 }
 0x2f0   : > { %2559 = vrot.lane.b32.xlu1 %v2055_v52, %s3388_s21 }
 0x2f1   : > { %v2059_v44 = vpop.f32.mrf.mxu1 }
 0x2f2   : > { %2307 = vrot.lane.b32.xlu0 %v4308_v13, %s3388_s21 }
 0x2f4   : > { %2405 = vrot.lane.b32.xlu1 %v2059_v44, %s3387_s17 }
 0x2f6   : > { %2561 = vrot.lane.b32.xlu0 %v2059_v44, %s3388_s21  ;;  %v4374_v44 = vpop.permute.xlu1 %2792 }
 0x2f7   : > { %v4315_v7 = vpop.f32.mrf.mxu1  ;;  %v3223_v41 = vpop.f32.mrf.mxu0 }
 0x2f8   : > { %2229 = vst.msk [vmem:[#allocation2 + $0xe8] sm:$0xff] %vm4941_vm0, %v3223_v41  ;;  %2309 = vrot.lane.b32.xlu1 %v4315_v7, %s3388_s21  ;;  %v4381_v41 = vpop.permute.xlu0 %3290 }
 0x2f9   : > { %v2065_v24 = vpop.f32.mrf.mxu1  ;;  %v2162_v14 = vpop.f32.mrf.mxu0 }
 0x2fa   : > { %2223 = vst.msk [vmem:[#allocation2 + $0xb8] sm:$0xff] %vm4946_vm3, %v2162_v14  ;;  %2407 = vrot.lane.b32.xlu0 %v2065_v24, %s3387_s17  ;;  %vm4949_vm3 = vmmov %vm4941_vm0 }
 0x2fb   : > { %v4322_v1 = vpop.f32.mrf.mxu1  ;;  %v3224_v27 = vpop.f32.mrf.mxu0 }
 0x2fc   : > { %2232 = vst.msk [vmem:[#allocation2 + $0x100] sm:$0xff] %vm4947_vm1, %v3224_v27  ;;  %vm4950_vm1 = vmmov %vm4941_vm0  ;;  %v4388_v14 = vpop.permute.xlu0 %3295 }
 0x2fd   : > { %v2069_v5 = vpop.f32.mrf.mxu1  ;;  %v2165_v22 = vpop.f32.mrf.mxu0 }
 0x2fe   : > { %2226 = vst.msk [vmem:[#allocation2 + $0xd0] sm:$0xff] %vm4948_vm12, %v2165_v22  ;;  %2311 = vrot.lane.b32.xlu0 %v4322_v1, %s3388_s21  ;;  %vm4951_vm12 = vmmov %vm4941_vm0 }
 0x2ff   : > { %v2734_v51 = vld [vmem:[#allocation2 + $0xe8] sm:$0xff] }
 0x300   : > { %2772 = vrot.lane.b32.xlu1 %v2734_v51, %s3387_s17  ;;  %v4392_v51 = vpop.permute.xlu0 %2794 }
 0x301   : > { %v2732_v48 = vld [vmem:[#allocation2 + $0xb8] sm:$0xff] }
 0x303   : > { %v4329_v15 = vpop.f32.mrf.mxu1  ;;  %v2735_v60 = vld [vmem:[#allocation2 + $0x100] sm:$0xff] }
 0x304   : > { %2563 = vrot.lane.b32.xlu1 %v2065_v24, %s3388_s21  ;;  %2774 = vrot.lane.b32.xlu0 %v2735_v60, %s3387_s17  ;;  %v4383_v24 = vpop.permute.xlu1 %2796 }
 0x305   : > { %v2075_v45 = vpop.f32.mrf.mxu1  ;;  %v2733_v63 = vld [vmem:[#allocation2 + $0xd0] sm:$0xff] }
 0x307   : > { %v4333_v33 = vpop.f32.mrf.mxu1 }
 0x308   : > { %2768 = vrot.lane.b32.xlu1 %v2732_v48, %s3387_s17  ;;  %2565 = vrot.lane.b32.xlu0 %v2069_v5, %s3388_s21 }
 0x309   : > { %v2079_v40 = vpop.f32.mrf.mxu1 }
 0x30c   : > { %2409 = vrot.lane.b32.xlu1 %v2069_v5, %s3387_s17  ;;  %2770 = vrot.lane.b32.xlu0 %v2733_v63, %s3387_s17 }
 0x30f   : > { %v4339_v54 = vpop.f32.mrf.mxu1  ;;  %v3227_v50 = vpop.f32.mrf.mxu0 }
 0x310   : > { %2241 = vst.msk [vmem:[#allocation2 + $0x148] sm:$0xff] %vm4941_vm0, %v3227_v50  ;;  %2313 = vrot.lane.b32.xlu1 %v4329_v15, %s3388_s21  ;;  %2411 = vrot.lane.b32.xlu0 %v2075_v45, %s3387_s17  ;;  %v2257_v50 = vld [vmem:[#allocation2] sm:$0x80] }
 0x311   : > { %v2085_v39 = vpop.f32.mrf.mxu1  ;;  %v2178_v0 = vpop.f32.mrf.mxu0 }
 0x312   : > { %2235 = vst.msk [vmem:[#allocation2 + $0x118] sm:$0xff] %vm4949_vm3, %v2178_v0  ;;  %vm4952_vm3 = vmmov %vm4941_vm0 }
 0x313   : > { %v4346_v58 = vpop.f32.mrf.mxu1  ;;  %v3228_v21 = vpop.f32.mrf.mxu0 }
 0x314   : > { %2244 = vst.msk [vmem:[#allocation2 + $0x160] sm:$0xff] %vm4950_vm1, %v3228_v21  ;;  %2567 = vrot.lane.b32.xlu1 %v2075_v45, %s3388_s21  ;;  %2315 = vrot.lane.b32.xlu0 %v4333_v33, %s3388_s21  ;;  %vm4953_vm1 = vmmov %vm4941_vm0 }
 0x315   : > { %v2089_v28 = vpop.f32.mrf.mxu1  ;;  %v2181_v61 = vpop.f32.mrf.mxu0 }
 0x316   : > { %2238 = vst.msk [vmem:[#allocation2 + $0x130] sm:$0xff] %vm4951_vm12, %v2181_v61  ;;  %vm4954_vm12 = vmmov %vm4941_vm0 }
 0x317   : > { %v4353_v34 = vpop.f32.mrf.mxu1  ;;  %v2738_v30 = vld [vmem:[#allocation2 + $0x148] sm:$0xff] }
 0x318   : > { %2413 = vrot.lane.b32.xlu1 %v2079_v40, %s3387_s17  ;;  %2569 = vrot.lane.b32.xlu0 %v2079_v40, %s3388_s21 }
 0x319   : > { %v2095_v29 = vpop.f32.mrf.mxu1  ;;  %v2736_v43 = vld [vmem:[#allocation2 + $0x118] sm:$0xff] }
 0x31b   : > { %v4357_v18 = vpop.f32.mrf.mxu1  ;;  %v2739_v62 = vld [vmem:[#allocation2 + $0x160] sm:$0xff] }
 0x31c   : > { %2248 = vst [vmem:[#allocation2 + $0x180] sm:$0xff] %v4357_v18  ;;  %2317 = vrot.lane.b32.xlu1 %v4339_v54, %s3388_s21  ;;  %2415 = vrot.lane.b32.xlu0 %v2085_v39, %s3387_s17 }
 0x31d   : > { %v2099_v3 = vpop.f32.mrf.mxu1  ;;  %v2737_v52 = vld [vmem:[#allocation2 + $0x130] sm:$0xff] }
 0x320   : > { %2780 = vrot.lane.b32.xlu1 %v2738_v30, %s3387_s17  ;;  %2319 = vrot.lane.b32.xlu0 %v4346_v58, %s3388_s21 }
 0x321   : > { %v2103_v57 = vpop.f32.mrf.mxu1  ;;  %v3231_v49 = vpop.f32.mrf.mxu0 }
 0x322   : > { %2251 = vst [vmem:[#allocation2 + $0x198] sm:$0xff] %v2103_v57  ;;  %2253 = vst.msk [vmem:[#allocation2 + $0x1a8] sm:$0xff] %vm4941_vm0, %v3231_v49  ;;  %vm4955_vm0 = vcmask 1040384  }
 0x323   : > { %v2105_v31 = vpop.f32.mrf.mxu1  ;;  %v2194_v38 = vpop.f32.mrf.mxu0 }
 0x324   : > { %2247 = vst.msk [vmem:[#allocation2 + $0x178] sm:$0xff] %vm4952_vm3, %v2194_v38  ;;  %2571 = vrot.lane.b32.xlu1 %v2085_v39, %s3388_s21  ;;  %2782 = vrot.lane.b32.xlu0 %v2739_v62, %s3387_s17  ;;  %vm4956_vm3 = vmmov %vm4955_vm0 }
 0x325   : > { %v2107_v23 = vpop.f32.mrf.mxu1  ;;  %v3232_v12 = vpop.f32.mrf.mxu0 }
 0x326   : > { %2254 = vst [vmem:[#allocation2 + $0x1b0] sm:$0xff] %v2107_v23  ;;  %2256 = vst.msk [vmem:[#allocation2 + $0x1c0] sm:$0xff] %vm4953_vm1, %v3232_v12  ;;  %v2730_v12 = vld [vmem:[#allocation2 + $0x88] sm:$0xfe] }
 0x327   : > { %v2109_v11 = vpop.f32.mrf.mxu1  ;;  %v2197_v46 = vpop.f32.mrf.mxu0  ;;  %vm4957_vm1 = vmmov %vm4955_vm0 }
 0x328   : > { %2250 = vst.msk [vmem:[#allocation2 + $0x190] sm:$0xff] %vm4954_vm12, %v2197_v46  ;;  %2776 = vrot.lane.b32.xlu1 %v2736_v43, %s3387_s17  ;;  %2573 = vrot.lane.b32.xlu0 %v2089_v28, %s3388_s21  ;;  %vm4958_vm12 = vmmov %vm4955_vm0 }
 0x329   : > { %v2742_v5 = vld [vmem:[#allocation2 + $0x1a8] sm:$0xff] }
 0x32b   : > { %v2740_v45 = vld [vmem:[#allocation2 + $0x178] sm:$0xff] }
 0x32c   : > { %2417 = vrot.lane.b32.xlu1 %v2089_v28, %s3387_s17  ;;  %2778 = vrot.lane.b32.xlu0 %v2737_v52, %s3387_s17  ;;  %v3320_v28 = vadd.low.f32.bf16 %v2257_v50, %v4381_v41 }
 0x32d   : > { %v2743_v22 = vld [vmem:[#allocation2 + $0x1c0] sm:$0xff]  ;;  %v2277_v0 = vld [vmem:[#allocation2 + $0x1b0] sm:$0x7f] }
 0x32f   : > { %v2741_v63 = vld [vmem:[#allocation2 + $0x190] sm:$0xff] }
 0x330   : > { %2321 = vrot.lane.b32.xlu1 %v4353_v34, %s3388_s21  ;;  %2419 = vrot.lane.b32.xlu0 %v2095_v29, %s3387_s17 }
 0x334   : > { %2575 = vrot.lane.b32.xlu1 %v2095_v29, %s3388_s21  ;;  %2323 = vrot.lane.b32.xlu0 %v4357_v18, %s3388_s21  ;;  %v3316_v29 = vld [vmem:[#allocation2 + $0x1e0] sm:$0xff] }
 0x336   : > { %v2298_v27 = vpop.permute.xlu1 %2297 }
 0x338   : > { %2788 = vrot.lane.b32.xlu1 %v2742_v5, %s3387_s17  ;;  %2577 = vrot.lane.b32.xlu0 %v2099_v3, %s3388_s21 }
 0x33a   : > { %v2552_v60 = vpop.permute.xlu1 %2551  ;;  %v2300_v40 = vpop.permute.xlu0 %2299 }
 0x33b   : > { %v2599_v46 = vadd.f32 %v3316_v29, %v2552_v60 }
 0x33c   : > { %2421 = vrot.lane.b32.xlu1 %v2099_v3, %s3387_s17  ;;  %2790 = vrot.lane.b32.xlu0 %v2743_v22, %s3387_s17  ;;  %v2347_v3 = vadd.f32 %v3316_v29, %v2298_v27 }
 0x33e   : > { %v2554_v21 = vpop.permute.xlu0 %2553 }
 0x33f   : > { %v2600_v43 = vadd.f32 %v3316_v29, %v2554_v21 }
 0x340   : > { %2784 = vrot.lane.b32.xlu1 %v2740_v45, %s3387_s17  ;;  %v4397_v48 = vpop.permute.xlu1 %2722  ;;  %2423 = vrot.lane.b32.xlu0 %v2105_v31, %s3387_s17 }
 0x344   : > { %2325 = vrot.lane.b32.xlu1 %v2103_v57, %s3388_s21  ;;  %2786 = vrot.lane.b32.xlu0 %v2741_v63, %s3387_s17  ;;  %v2398_v39 = vpop.permute.xlu1 %2397 }
 0x345   : > { %v2448_v30 = vadd.f32 %v3320_v28, %v2398_v39 }
 0x347   : > { %v2482_v62 = vrot.slane %v2448_v30, 7 }
 0x348   : > { %2579 = vrot.lane.b32.xlu1 %v2105_v31, %s3388_s21  ;;  %2327 = vrot.lane.b32.xlu0 %v2277_v0, %s3388_s21  ;;  %v2348_v31 = vadd.f32 %v3316_v29, %v2300_v40 }
 0x34a   : > { %v2302_v61 = vpop.permute.xlu1 %2301 }
 0x34b   : > { %v2349_v21 = vadd.f32 %v2302_v61, %v4276_v25 }
 0x34c   : > { %2425 = vrot.lane.b32.xlu1 %v2109_v11, %s3387_s17  ;;  %2581 = vrot.lane.b32.xlu0 %v2109_v11, %s3388_s21  ;;  %v2400_v57 = vpop.permute.xlu0 %2399  ;;  %s323_s21 = sand.u32 1, %s3375_s10  }
 0x34d   : > { %v2449_v49 = vadd.f32 %v2400_v57, %v2347_v3  ;;  %v2620_v27 = vadd.f32 %v2599_v46, %v2400_v57  ;;  %s3074_s22 = sshll.u32 %s323_s21, 7 }
 0x34e   : > { %v2556_v38 = vpop.permute.xlu1 %2555  ;;  %s4646_s23 = scalar_lea.vmem [#allocation3], %s3074_s22 }
 0x34f   : > { %v2483_v23 = vrot.slane %v2449_v49, 7  ;;  %v2601_v28 = vadd.f32 %v2556_v38, %v4276_v25 }
 0x350   : > { %2617 = vrot.lane.b32.xlu1 %v3316_v29, %s3387_s17  ;;  %2764 = vrot.lane.b32.xlu0 %v2730_v12, %s3387_s17  ;;  %v2304_v5 = vpop.permute.xlu0 %2303 }
 0x351   : > { %v4410_v52 = vsel %vm4955_vm0, %v2482_v62, %v2483_v23  ;;  %v2350_v12 = vadd.f32 %v2304_v5, %v4280_v17 }
 0x352   : > { %v2402_v22 = vpop.permute.xlu1 %2401 }
 0x353   : > { %v2450_v11 = vadd.f32 %v2402_v22, %v2348_v31  ;;  %v2621_v45 = vadd.f32 %v2600_v43, %v2402_v22 }
 0x354   : > { %2652 = vrot.lane.b32.xlu0 %v2620_v27, %s3389_s27 }
 0x355   : > { %v2485_v63 = vrot.slane %v2450_v11, 7  ;;  %2654 = vrot.lane.b32.xlu1 %v2621_v45, %s3389_s27 }
 0x356   : > { %v2767_v60 = vpop.permute.xlu0 %2766 }
 0x357   : > { %v4414_v50 = vadd.f32 %v2767_v60, %v2600_v43  ;;  %v4417_v39 = vsel %vm4956_vm3, %v2483_v23, %v2485_v63  ;;  %vm4960_vm3 = vcmask 1046528  }
 0x35a   : > { %v2558_v40 = vpop.permute.xlu0 %2557 }
 0x35b   : > { %v2602_v46 = vadd.f32 %v2558_v40, %v4280_v17 }
 0x35e   : > { %v2306_v0 = vpop.permute.xlu1 %2305 }
 0x35f   : > { %v2351_v25 = vadd.f32 %v2306_v0, %v4288_v47 }
 0x360   : > { %v2404_v29 = vpop.permute.xlu0 %2403 }
 0x361   : > { %v2451_v3 = vadd.f32 %v2404_v29, %v2349_v21  ;;  %v4421_v30 = vadd.f32 %v2601_v28, %v2404_v29 }
 0x362   : > { %v2560_v57 = vpop.permute.xlu1 %2559 }
 0x363   : > { %v2487_v49 = vrot.slane %v2451_v3, 7  ;;  %v2603_v38 = vadd.f32 %v2560_v57, %v4288_v47 }
 0x364   : > { %v2308_v62 = vpop.permute.xlu0 %2307 }
 0x365   : > { %v4426_v23 = vsel %vm4957_vm1, %v2485_v63, %v2487_v49  ;;  %vm4961_vm1 = vmmov %vm4960_vm3 }
 0x366   : > { %v2406_v31 = vpop.permute.xlu1 %2405 }
 0x367   : > { %v2452_v43 = vadd.f32 %v2406_v31, %v2350_v12  ;;  %v2623_v27 = vadd.f32 %v2602_v46, %v2406_v31 }
 0x368   : > { %v2562_v61 = vpop.permute.xlu0 %2561 }
 0x369   : > { %v2489_v22 = vrot.slane %v2452_v43, 7  ;;  %2658 = vrot.lane.b32.xlu1 %v2623_v27, %s3389_s27  ;;  %v2604_v3 = vadd.f32 %v2562_v61, %v4294_v2  ;;  %v2352_v61 = vadd.f32 %v2308_v62, %v4294_v2 }
 0x36a   : > { %v2310_v63 = vpop.permute.xlu1 %2309 }
 0x36b   : > { %v4432_v11 = vsel %vm4958_vm12, %v2487_v49, %v2489_v22  ;;  %vm4962_vm12 = vmmov %vm4961_vm1 }
 0x36c   : > { %v2408_v5 = vpop.permute.xlu0 %2407 }
 0x36d   : > { %v2453_v45 = vadd.f32 %v2408_v5, %v2351_v25  ;;  %v4434_v17 = vadd.f32 %v2603_v38, %v2408_v5  ;;  %v4869_v5 = vrot.slane %v4414_v50, 1 }
 0x36f   : > { %v2491_v60 = vrot.slane %v2453_v45, 7 }
 0x370   : > { %v2312_v29 = vpop.permute.xlu0 %2311 }
 0x371   : > { %v4437_v40 = vsel %vm4955_vm0, %v2489_v22, %v2491_v60 }
 0x372   : > { %4959 = vst [vmem:[#allocation25_spill] sm:$0xff] %v4437_v40  ;;  %v2773_v21 = vpop.permute.xlu1 %2772  ;;  %v2273_v40 = vld [vmem:[#allocation2 + $0x180] sm:$0x7f] }
 0x373   : > { %v2819_v12 = vadd.f32 %v2773_v21, %v2603_v38 }
 0x375   : > { %v2856_v49 = vrot.slane %v2819_v12, 1 }
 0x376   : > { %v4440_v0 = vpop.permute.xlu1 %2563  ;;  %v2775_v47 = vpop.permute.xlu0 %2774 }
 0x377   : > { %v4442_v57 = vadd.f32 %v2775_v47, %v2604_v3 }
 0x379   : > { %v4866_v31 = vrot.slane %v4442_v57, 1 }
 0x37a   : > { %v2769_v43 = vpop.permute.xlu1 %2768  ;;  %v2566_v27 = vpop.permute.xlu0 %2565 }
 0x37b   : > { %v2817_v25 = vadd.f32 %v2769_v43, %v2601_v28  ;;  %v4448_v22 = vsel %vm4960_vm3, %v2856_v49, %v4866_v31  ;;  %v2353_v28 = vadd.f32 %v2310_v63, %v4303_v32  ;;  %vm4963_vm3 = vmmov %vm4955_vm0 }
 0x37d   : > { %v2852_v38 = vrot.slane %v2817_v25, 1 }
 0x37e   : > { %v2410_v45 = vpop.permute.xlu1 %2409  ;;  %v2771_v21 = vpop.permute.xlu0 %2770 }
 0x37f   : > { %v2454_v47 = vadd.f32 %v2410_v45, %v2352_v61  ;;  %v2625_v59 = vadd.f32 %v2604_v3, %v2410_v45  ;;  %v2818_v12 = vadd.f32 %v2771_v21, %v2602_v46  ;;  %v4455_v36 = vsel %vm4961_vm1, %v4869_v5, %v2852_v38 }
 0x380   : > { %v2354_v45 = vadd.f32 %v2312_v29, %v4308_v13  ;;  %v2606_v21 = vadd.f32 %v2566_v27, %v4308_v13 }
 0x381   : > { %v2493_v43 = vrot.slane %v2454_v47, 7  ;;  %v2854_v31 = vrot.slane %v2818_v12, 1  ;;  %2662 = vrot.lane.b32.xlu1 %v2625_v59, %s3389_s27 }
 0x382   : > { %v2314_v9 = vpop.permute.xlu1 %2313  ;;  %v4459_v55 = vpop.permute.xlu0 %2411 }
 0x383   : > { %v2455_v2 = vadd.f32 %v4459_v55, %v2353_v28  ;;  %v2857_v62 = vsel %vm4962_vm12, %v2854_v31, %v2856_v49  ;;  %v4464_v46 = vsel %vm4955_vm0, %v2491_v60, %v2493_v43  ;;  %v2855_v59 = vsel %vm4961_vm1, %v2852_v38, %v2854_v31  ;;  %vm4965_vm12 = vmmov %vm4955_vm0 }
 0x384   : > { %v2355_v28 = vadd.f32 %v2314_v9, %v4315_v7 }
 0x385   : > { %v2495_v3 = vrot.slane %v2455_v2, 7  ;;  %2888 = vrot.lane.b32.xlu1 %v2857_v62, %s3387_s17 }
 0x386   : > { %v2568_v25 = vpop.permute.xlu1 %2567  ;;  %v2316_v61 = vpop.permute.xlu0 %2315 }
 0x387   : > { %v4468_v63 = vsel %vm4963_vm3, %v2493_v43, %v2495_v3  ;;  %vm4967_vm3 = vmmov %vm4961_vm1 }
 0x388   : > { %4964 = vst [vmem:[#allocation26_spill] sm:$0xff] %v4468_v63 }
 0x389   : > { %2886 = vrot.lane.b32.xlu1 %v2855_v59, %s3387_s17  ;;  %v4483_v59 = vadd.f32 %v2568_v25, %v4315_v7  ;;  %v2356_v25 = vadd.f32 %v2316_v61, %v4322_v1 }
 0x38a   : > { %v2414_v49 = vpop.permute.xlu1 %2413  ;;  %v2570_v47 = vpop.permute.xlu0 %2569 }
 0x38b   : > { %v2456_v60 = vadd.f32 %v2414_v49, %v2354_v45  ;;  %v2627_v12 = vadd.f32 %v2606_v21, %v2414_v49  ;;  %v2608_v9 = vadd.f32 %v2570_v47, %v4322_v1 }
 0x38d   : > { %v2497_v2 = vrot.slane %v2456_v60, 7  ;;  %2666 = vrot.lane.b32.xlu1 %v2627_v12, %s3389_s27 }
 0x38e   : > { %v2318_v62 = vpop.permute.xlu1 %2317  ;;  %v4476_v43 = vpop.permute.xlu0 %2415 }
 0x38f   : > { %v2457_v31 = vadd.f32 %v4476_v43, %v2355_v28  ;;  %v4480_v29 = vsel %vm4965_vm12, %v2495_v3, %v2497_v2  ;;  %vm4968_vm12 = vmmov %vm4955_vm0 }
 0x391   : > { %v2499_v13 = vrot.slane %v2457_v31, 7 }
 0x392   : > { %v2781_v27 = vpop.permute.xlu1 %2780  ;;  %v2320_v38 = vpop.permute.xlu0 %2319 }
 0x393   : > { %v4486_v45 = vsel %vm4955_vm0, %v2497_v2, %v2499_v13  ;;  %v2823_v49 = vadd.f32 %v2781_v27, %v4483_v59 }
 0x394   : > { %4966 = vst [vmem:[#allocation27_spill] sm:$0xff] %v4486_v45 }
 0x395   : > { %v2864_v28 = vrot.slane %v2823_v49, 1  ;;  %v2357_v49 = vadd.f32 %v2318_v62, %v4329_v15 }
 0x396   : > { %v2572_v60 = vpop.permute.xlu1 %2571  ;;  %v2783_v12 = vpop.permute.xlu0 %2782 }
 0x397   : > { %v4490_v5 = vadd.f32 %v2783_v12, %v2608_v9  ;;  %v4501_v12 = vadd.f32 %v4440_v0, %v4303_v32 }
 0x399   : > { %v4874_v3 = vrot.slane %v4490_v5, 1 }
 0x39a   : > { %v2777_v31 = vpop.permute.xlu1 %2776  ;;  %v2574_v6 = vpop.permute.xlu0 %2573 }
 0x39b   : > { %v4496_v7 = vsel %vm4967_vm3, %v2864_v28, %v4874_v3  ;;  %v4506_v3 = vadd.f32 %v2777_v31, %v4501_v12  ;;  %vm4970_vm3 = vmmov %vm4961_vm1 }
 0x39e   : > { %v2418_v2 = vpop.permute.xlu1 %2417  ;;  %v2779_v47 = vpop.permute.xlu0 %2778 }
 0x39f   : > { %v2458_v53 = vadd.f32 %v2418_v2, %v2356_v25  ;;  %v2629_v27 = vadd.f32 %v2608_v9, %v2418_v2  ;;  %v2822_v45 = vadd.f32 %v2779_v47, %v2606_v21  ;;  %v2358_v2 = vadd.f32 %v2320_v38, %v4333_v33 }
 0x3a0   : > { %v2610_v47 = vadd.f32 %v2574_v6, %v4333_v33 }
 0x3a1   : > { %v2501_v35 = vrot.slane %v2458_v53, 7  ;;  %v2862_v16 = vrot.slane %v2822_v45, 1  ;;  %2670 = vrot.lane.b32.xlu1 %v2629_v27, %s3389_s27  ;;  %v4875_v53 = vrot.slane %v4506_v3, 1 }
 0x3a2   : > { %v2322_v63 = vpop.permute.xlu1 %2321  ;;  %v4508_v1 = vpop.permute.xlu0 %2419 }
 0x3a3   : > { %v2459_v61 = vadd.f32 %v4508_v1, %v2357_v49  ;;  %v2865_v21 = vsel %vm4961_vm1, %v2862_v16, %v2864_v28  ;;  %v4513_v9 = vsel %vm4968_vm12, %v2499_v13, %v2501_v35  ;;  %v2863_v31 = vsel %vm4970_vm3, %v4875_v53, %v2862_v16  ;;  %vm4971_vm12 = vmmov %vm4955_vm0 }
 0x3a4   : > { %vm4973_vm3 = vmmov %vm4961_vm1 }
 0x3a5   : > { %v2503_v32 = vrot.slane %v2459_v61, 7  ;;  %2896 = vrot.lane.b32.xlu1 %v2865_v21, %s3387_s17 }
 0x3a6   : > { %v2576_v0 = vpop.permute.xlu1 %2575  ;;  %v2324_v62 = vpop.permute.xlu0 %2323 }
 0x3a7   : > { %v4518_v45 = vsel %vm4955_vm0, %v2501_v35, %v2503_v32  ;;  %v4525_v13 = vadd.f32 %v2576_v0, %v4339_v54 }
 0x3a8   : > { %4969 = vst [vmem:[#allocation28_spill] sm:$0xff] %v4518_v45 }
 0x3a9   : > { %2894 = vrot.lane.b32.xlu1 %v2863_v31, %s3387_s17  ;;  %v2359_v31 = vadd.f32 %v2322_v63, %v4339_v54  ;;  %v4880_v63 = vunpack.i.l.bf16 %v4388_v14 }
 0x3aa   : > { %v2789_v28 = vpop.permute.xlu1 %2788  ;;  %v2578_v25 = vpop.permute.xlu0 %2577 }
 0x3ab   : > { %v2827_v27 = vadd.f32 %v2789_v28, %v4525_v13  ;;  %v2612_v35 = vadd.f32 %v2578_v25, %v4346_v58 }
 0x3ad   : > { %v2872_v53 = vrot.slane %v2827_v27, 1 }
 0x3ae   : > { %v2422_v49 = vpop.permute.xlu1 %2421  ;;  %v2791_v61 = vpop.permute.xlu0 %2790 }
 0x3af   : > { %v2460_v21 = vadd.f32 %v2422_v49, %v2358_v2  ;;  %v2631_v45 = vadd.f32 %v2610_v47, %v2422_v49  ;;  %v4531_v16 = vadd.f32 %v2791_v61, %v2612_v35 }
 0x3b1   : > { %v2505_v42 = vrot.slane %v2460_v21, 7  ;;  %v4877_v0 = vrot.slane %v4531_v16, 1  ;;  %2674 = vrot.lane.b32.xlu1 %v2631_v45, %s3389_s27  ;;  %v4549_v45 = vadd.f32 %v2572_v60, %v4329_v15  ;;  %v2360_v60 = vadd.f32 %v2324_v62, %v4346_v58 }
 0x3b2   : > { %v2785_v38 = vpop.permute.xlu1 %2784  ;;  %v4536_v6 = vpop.permute.xlu0 %2423 }
 0x3b3   : > { %v2461_v33 = vadd.f32 %v4536_v6, %v2359_v31  ;;  %v4542_v28 = vsel %vm4961_vm1, %v2872_v53, %v4877_v0  ;;  %v4545_v25 = vsel %vm4971_vm12, %v2503_v32, %v2505_v42  ;;  %v4556_v31 = vadd.f32 %v2785_v38, %v4549_v45  ;;  %v2717_v38 = vld [vmem:[#allocation2 + $0x198] sm:$0x1]  ;;  %vm4974_vm12 = vmmov %vm4955_vm0 }
 0x3b5   : > { %v2507_v54 = vrot.slane %v2461_v33, 7 }
 0x3b6   : > { %v2326_v2 = vpop.permute.xlu1 %2325  ;;  %v2787_v27 = vpop.permute.xlu0 %2786 }
 0x3b7   : > { %v2361_v49 = vadd.f32 %v2326_v2, %v4353_v34  ;;  %v2826_v61 = vadd.f32 %v2787_v27, %v2610_v47  ;;  %v4553_v21 = vsel %vm4955_vm0, %v2505_v42, %v2507_v54  ;;  %v2868_v42 = vrot.slane %v4556_v31, 1  ;;  %v2716_v2 = vld [vmem:[#allocation2 + $0x18] sm:$0xfe] }
 0x3b8   : > { %4972 = vst [vmem:[#allocation29_spill] sm:$0xff] %v4553_v21  ;;  %v2728_v58 = vadd.f32 %v4397_v48, %v2716_v2  ;;  %v4986_v2 = vrot.slane %v4531_v16, 1 }
 0x3b9   : > { %v2463_v32 = vadd.f32 %v4880_v63, %v2361_v49  ;;  %v2870_v33 = vrot.slane %v2826_v61, 1 }
 0x3ba   : > { %v2580_v0 = vpop.permute.xlu1 %2579  ;;  %v2328_v26 = vpop.permute.xlu0 %2327 }
 0x3bb   : > { %v2362_v8 = vadd.f32 %v2328_v26, %v2273_v40  ;;  %v2873_v15 = vsel %vm4973_vm3, %v2870_v33, %v2872_v53  ;;  %v2511_v49 = vrot.slane %v2463_v32, 7  ;;  %v2871_v37 = vsel %vm4961_vm1, %v2868_v42, %v2870_v33  ;;  %vm4975_vm3 = vmmov %vm4955_vm0 }
 0x3bc   : > { %2904 = vrot.lane.b32.xlu1 %v2873_v15, %s3387_s17  ;;  %v3322_v40 = vadd.high.f32.bf16 %v2717_v38, %v4381_v41  ;;  %v2613_v41 = vadd.f32 %v2580_v0, %v4353_v34 }
 0x3bd   : > { %v3321_v47 = vadd.high.f32.bf16 %v2362_v8, %v4388_v14 }
 0x3be   : > { %v2426_v27 = vpop.permute.xlu1 %2425  ;;  %v2582_v21 = vpop.permute.xlu0 %2581 }
 0x3bf   : > { %v2513_v61 = vrot.slane %v3321_v47, 7  ;;  %v2462_v63 = vadd.f32 %v2426_v27, %v2360_v60  ;;  %v2614_v26 = vadd.f32 %v2582_v21, %v4357_v18  ;;  %v2633_v62 = vadd.f32 %v2612_v35, %v2426_v27 }
 0x3c0   : > { %2902 = vrot.lane.b32.xlu1 %v2871_v37, %s3387_s17  ;;  %v2831_v37 = vadd.f32 %v3322_v40, %v4383_v24  ;;  %v4976_v21 = vrot.slane %v4414_v50, 1  ;;  %v2829_v24 = vadd.f32 %v4374_v44, %v2613_v41  ;;  %v2626_v44 = vadd.f32 %v4501_v12, %v4459_v55 }
 0x3c1   : > { %v2509_v53 = vrot.slane %v2462_v63, 7  ;;  %v4571_v8 = vsel %vm4974_vm12, %v2511_v49, %v2513_v61  ;;  %v2830_v32 = vadd.f32 %v4392_v51, %v2614_v26  ;;  %vm4977_vm12 = vmmov %vm4961_vm1  ;;  %v2630_v55 = vadd.f32 %v4549_v45, %v4508_v1 }
 0x3c2   : > { %v2618_v31 = vpop.permute.xlu1 %2617  ;;  %v2765_v15 = vpop.permute.xlu0 %2764  ;;  %v2880_v38 = vrot.slane %v2831_v37, 1  ;;  %v2876_v50 = vrot.slane %v2829_v24, 1 }
 0x3c3   : > { %v2815_v60 = vadd.f32 %v2765_v15, %v2728_v58  ;;  %v4575_v33 = vsel %vm4955_vm0, %v2507_v54, %v2509_v53  ;;  %v4578_v18 = vsel %vm4975_vm3, %v2509_v53, %v2511_v49  ;;  %v2635_v63 = vadd.f32 %v2618_v31, %v2614_v26  ;;  %vm4978_vm0 = vmmov %vm4961_vm1  ;;  %v4989_v58 = vld [vmem:[#allocation8_spill] sm:$0xff] }
 0x3c4   : > { %2678 = vrot.lane.b32.xlu1 %v2633_v62, %s3389_s27  ;;  %v2878_v35 = vrot.slane %v2830_v32, 1  ;;  %vm4981_vm3 = vmmov %vm4978_vm0  ;;  %v4990_v53 = vunpack.c.h.bf16 %v4989_v58 }
 0x3c5   : > { %v2849_v48 = vrot.slane %v2815_v60, 1 }
 0x3c6   : > { %v2881_v34 = vsel %vm4977_vm12, %v2878_v35, %v2880_v38  ;;  %v2879_v0 = vsel %vm4978_vm0, %v2876_v50, %v2878_v35  ;;  %vm4987_vm12 = vmmov %vm4978_vm0  ;;  %v2531_v35 = vsel %vm4009_vm4, %v4410_v52, 0.0  ;;  %v5029_v52 = vld [vmem:[#allocation19_spill] sm:$0xff] }
 0x3c7   : > { %v2851_v51 = vsel %vm4961_vm1, %v2849_v48, %v4976_v21  ;;  %v2655_v47 = vpop.permute.xlu1 %2654  ;;  %vm4983_vm1 = vmmov %vm4978_vm0  ;;  %v2877_v27 = vsel %vm4987_vm12, %v4986_v2, %v2876_v50  ;;  %vm4988_vm0 = vcmask 261120   ;;  %v2653_v48 = vpop.permute.xlu0 %2652 }
 0x3c8   : > { %2682 = vrot.lane.b32.xlu1 %v2635_v63, %s3389_s27  ;;  %2882 = vrot.lane.b32.xlu0 %v2851_v51, %s3387_s17  ;;  %v4589_v54 = vadd.f32 %v2655_v47, %v4417_v39  ;;  %v2628_v39 = vadd.f32 %v4483_v59, %v4476_v43  ;;  %v4982_v43 = vrot.slane %v4490_v5, 1  ;;  %v4995_v47 = vld [vmem:[#allocation6_spill] sm:$0xff]  ;;  %vm5003_vm4 = vmmov %vm4988_vm0 }
 0x3c9   : > { %v4996_v38 = vunpack.c.l.bf16 %v4995_v47  ;;  %vm5033_vm12 = vmmov %vm4988_vm0 }
 0x3ca   : > { %v2869_v59 = vsel %vm4983_vm1, %v4982_v43, %v2868_v42  ;;  %vm5031_vm1 = vmmov %vm4988_vm0 }
 0x3cc   : > { %2656 = vrot.lane.b32.xlu0 %v4421_v30, %s3389_s27  ;;  %2912 = vrot.lane.b32.xlu1 %v2881_v34, %s3387_s17  ;;  %v4979_v30 = vrot.slane %v4506_v3, 1 }
 0x3d0   : > { %2660 = vrot.lane.b32.xlu0 %v4434_v17, %s3389_s27  ;;  %2910 = vrot.lane.b32.xlu1 %v2879_v0, %s3387_s17  ;;  %v4980_v17 = vrot.slane %v4442_v57, 1  ;;  %v2632_v57 = vadd.f32 %v4525_v13, %v4536_v6  ;;  %v2533_v0 = vsel %vm4053_vm8, %v4426_v23, 0.0  ;;  %vm5004_vm8 = vmmov %vm4988_vm0 }
 0x3d4   : > { %2884 = vrot.lane.b32.xlu0 %v4455_v36, %s3387_s17  ;;  %v2861_v36 = vsel %vm4981_vm3, %v4980_v17, %v4979_v30  ;;  %vm5030_vm3 = vnez %v5029_v52 }
 0x3d8   : > { %2890 = vrot.lane.b32.xlu0 %v4448_v22, %s3387_s17 }
 0x3db   : > { %v2659_v22 = vpop.permute.xlu1 %2658 }
 0x3dc   : > { %2664 = vrot.lane.b32.xlu0 %v2626_v44, %s3389_s27  ;;  %v2703_v45 = vadd.f32 %v2659_v22, %v4432_v11 }
 0x3e0   : > { %2668 = vrot.lane.b32.xlu0 %v2628_v39, %s3389_s27 }
 0x3e4   : > { %2892 = vrot.lane.b32.xlu0 %v2861_v36, %s3387_s17 }
 0x3e8   : > { %2898 = vrot.lane.b32.xlu0 %v4496_v7, %s3387_s17  ;;  %v4984_v7 = vunpack.i.l.bf16 %v4388_v14 }
 0x3ea   : > { %v2634_v1 = vadd.f32 %v4984_v7, %v2613_v41 }
 0x3ec   : > { %2672 = vrot.lane.b32.xlu0 %v2630_v55, %s3389_s27  ;;  %v5000_v55 = vld [vmem:[#allocation12_spill] sm:$0xff] }
 0x3ed   : > { %v5001_v22 = vunpack.c.h.bf16 %v5000_v55 }
 0x3f0   : > { %2900 = vrot.lane.b32.xlu0 %v2869_v59, %s3387_s17 }
 0x3f3   : > { %v2663_v3 = vpop.permute.xlu1 %2662 }
 0x3f4   : > { %v4628_v12 = vadd.f32 %v2663_v3, %v4464_v46  ;;  %2676 = vrot.lane.b32.xlu0 %v2632_v57, %s3389_s27  ;;  %v4985_v46 = vunpack.c.h.bf16 %v3538_v10 }
 0x3f7   : > { %v2889_v5 = vpop.permute.xlu1 %2888 }
 0x3f8   : > { %v2933_v42 = vsel %vm4070_vm9, %v2889_v5, 0.0  ;;  %2680 = vrot.lane.b32.xlu0 %v2634_v1, %s3389_s27  ;;  %vm4991_vm9 = vmmov %vm4988_vm0  ;;  %v5006_v1 = vld [vmem:[#allocation25_spill] sm:$0xff]  ;;  %s3008_s27 = sshll.u32 %s4646_s23, 4  ;;  %s4766_s27 = int_to_ptr.vmem [resolvable:$true] %s3008_s27 }
 0x3f9   : > { %v2949_v13 = vadd.f32 %v2933_v42, %v2703_v45  ;;  %v2535_v5 = vsel %vm4084_vm11, %v5006_v1, 0.0  ;;  %vm5016_vm11 = vmmov %vm4988_vm0  ;;  %v5036_v45 = vld [vmem:[#allocation22_spill] sm:$0xff]  ;;  %s3323_s28 = scalar_lea.vmem %s4766_s27, 2048  ;;  %p3330_p0 = scmp.lt.s32.totalorder %s4766_s27, %s3328_s14 }
 0x3fa   : > { %p3324_p11 = scmp.ne.s32.totalorder %s4766_s27, %s3323_s28  ;;  %p3331_p1 = scmp.lt.s32.totalorder %s3329_s16, %s3323_s28 }
 0x3fb   : > { %v2965_v6 = vadd.f32 %v4985_v46, %v2949_v13  ;;  %v2887_v4 = vpop.permute.xlu1 %2886 }
 0x3fc   : > { %2908 = vrot.lane.b32.xlu0 %v2877_v27, %s3387_s17  ;;  %v5010_v27 = vld [vmem:[#allocation7_spill] sm:$0xff]  ;;  %p3325_p12 = pnand %p3324_p11, %p3481_p5  ;;  %p3332_p2 = por %p3331_p1, %p3330_p0 }
 0x3fd   : > { %2981 = vst.msk [vmem:[%s4646_s23 + $0x18] sm:$0xff] %vm4988_vm0, %v2965_v6 }
 0x3fe   : > { %p3326_p13 = pneg %p3325_p12 }
 0x3ff   : > { %v2667_v14 = vpop.permute.xlu1 %2666 }
 0x400   : > { %2906 = vrot.lane.b32.xlu0 %v4542_v28, %s3387_s17  ;;  %v2707_v16 = vadd.f32 %v2667_v14, %v4480_v29  ;;  %v4992_v29 = vld [vmem:[#allocation10_spill] sm:$0xff]  ;;  %s3133_s17 = sshll.u32 %s3464_s13, 11  ;;  %s4774_s13 = scalar_lea.sflag [#allocation4], %s323_s21 }
 0x401   : > { %v4993_v37 = vunpack.c.h.bf16 %v4992_v29  ;;  %s4764_s26 = scalar_lea.hbm %s4823_s9, %s3133_s17  ;;  %p3333_p3 = pnand %p3332_p2, %p3326_p13 }
 0x413   : > { %v2671_v11 = vpop.permute.xlu1 %2670 }
 0x414   : > { %v4653_v49 = vadd.f32 %v2671_v11, %v4513_v9  ;;  %v5012_v11 = vld [vmem:[#allocation26_spill] sm:$0xff] }
 0x417   : > { %v2897_v61 = vpop.permute.xlu1 %2896 }
 0x418   : > { %v2937_v26 = vsel %vm4126_vm6, %v2897_v61, 0.0  ;;  %vm4994_vm6 = vmmov %vm4988_vm0  ;;  %v2537_v61 = vsel %vm4119_vm15, %v5012_v11, 0.0 }
 0x419   : > { %v2953_v40 = vadd.f32 %v2937_v26, %v2707_v16  ;;  %vm5021_vm15 = vmmov %vm4988_vm0 }
 0x41b   : > { %v2969_v62 = vadd.f32 %v4990_v53, %v2953_v40  ;;  %v2895_v28 = vpop.permute.xlu1 %2894 }
 0x41d   : > { %2985 = vst.msk [vmem:[%s4646_s23 + $0x38] sm:$0xff] %vm4991_vm9, %v2969_v62  ;;  %v5015_v62 = vunpack.c.l.bf16 %v4989_v58  ;;  %vm5041_vm9 = vmmov %vm5031_vm1 }
 0x423   : > { %v2675_v31 = vpop.permute.xlu1 %2674 }
 0x424   : > { %v2711_v15 = vadd.f32 %v2675_v31, %v4545_v25  ;;  %v2700_v25 = vadd.f32 %v2653_v48, %v2531_v35 }
 0x42e   : > { %v2905_v32 = vpop.permute.xlu1 %2904 }
 0x42f   : > { %v2941_v9 = vsel %vm4186_vm10, %v2905_v32, 0.0  ;;  %vm4998_vm10 = vmmov %vm4988_vm0 }
 0x430   : > { %v2957_v60 = vadd.f32 %v2941_v9, %v2711_v15 }
 0x432   : > { %v2973_v56 = vadd.f32 %v4993_v37, %v2957_v60  ;;  %v2903_v41 = vpop.permute.xlu1 %2902  ;;  %v5018_v60 = vld [vmem:[#allocation27_spill] sm:$0xff] }
 0x434   : > { %2989 = vst.msk [vmem:[%s4646_s23 + $0x58] sm:$0xff] %vm4994_vm6, %v2973_v56  ;;  %v2539_v56 = vsel %vm4150_vm7, %v5018_v60, 0.0  ;;  %vm5027_vm7 = vmmov %vm4988_vm0 }
 0x435   : > { %vm5044_vm6 = vmmov %vm5031_vm1 }
 0x436   : > { %v4669_v63 = vpop.permute.xlu1 %2678 }
 0x43a   : > { %v2683_v21 = vpop.permute.xlu1 %2682  ;;  %v2883_v19 = vpop.permute.xlu0 %2882 }
 0x43b   : > { %v2946_v51 = vadd.f32 %v2883_v19, %v2700_v25  ;;  %v2715_v34 = vadd.f32 %v2683_v21, %v4571_v8  ;;  %v5002_v8 = vunpack.c.l.bf16 %v3538_v10  ;;  %v5008_v10 = vunpack.c.h.bf16 %v4995_v47  ;;  %v5022_v19 = vld [vmem:[#allocation9_spill] sm:$0xff] }
 0x43d   : > { %v2962_v24 = vadd.f32 %v4996_v38, %v2946_v51  ;;  %v5023_v51 = vunpack.c.l.bf16 %v5022_v19  ;;  %v5024_v38 = vld [vmem:[#allocation28_spill] sm:$0xff] }
 0x43e   : > { %v2657_v44 = vpop.permute.xlu0 %2656  ;;  %v2913_v39 = vpop.permute.xlu1 %2912 }
 0x43f   : > { %2978 = vst.msk [vmem:[%s4646_s23] sm:$0xff] %vm4998_vm10, %v2962_v24  ;;  %v2702_v20 = vadd.f32 %v2657_v44, %v2533_v0  ;;  %v2945_v30 = vsel %vm4257_vm2, %v2913_v39, 0.0  ;;  %vm5009_vm2 = vmmov %vm4988_vm0  ;;  %v5025_v24 = vld [vmem:[#allocation20_spill] sm:$0xff]  ;;  %v5028_v39 = vunpack.c.l.bf16 %v4992_v29  ;;  %v2545_v29 = vsel %vm4248_vm14, %v4578_v18, 0.0 }
 0x440   : > { %v2961_v17 = vadd.f32 %v2945_v30, %v2715_v34  ;;  %vm5046_vm10 = vmmov %vm5031_vm1 }
 0x441   : > { %v2948_v36 = vadd.f32 %v2887_v4, %v2702_v20  ;;  %v5011_v4 = vunpack.c.l.bf16 %v5010_v27 }
 0x442   : > { %v2977_v43 = vadd.f32 %v5001_v22, %v2961_v17  ;;  %v2661_v59 = vpop.permute.xlu0 %2660 }
 0x443   : > { %v2964_v57 = vadd.f32 %v5002_v8, %v2948_v36  ;;  %v2704_v13 = vadd.f32 %v2661_v59, %v2535_v5  ;;  %v5032_v36 = vunpack.c.h.bf16 %v5022_v19 }
 0x444   : > { %2993 = vst.msk [vmem:[%s4646_s23 + $0x78] sm:$0xff] %vm5003_vm4, %v2977_v43 }
 0x445   : > { %2980 = vst.msk [vmem:[%s4646_s23 + $0x10] sm:$0xff] %vm5004_vm8, %v2964_v57  ;;  %v2911_v57 = vpop.permute.xlu1 %2910 }
 0x446   : > { %v2885_v23 = vpop.permute.xlu0 %2884 }
 0x447   : > { %v2931_v7 = vsel %vm4029_vm5, %v2885_v23, 0.0  ;;  %vm5014_vm5 = vmmov %vm4988_vm0  ;;  %v2713_v23 = vadd.f32 %v4669_v63, %v4575_v33  ;;  %vm5037_vm0 = vnez %v5036_v45  ;;  %v5042_v33 = vld [vmem:[#allocation11_spill] sm:$0xff] }
 0x448   : > { %v2947_v42 = vadd.f32 %v2931_v7, %v4589_v54  ;;  %v5035_v7 = vunpack.c.l.bf16 %v5000_v55  ;;  %v5043_v63 = vunpack.c.h.bf16 %v5042_v33 }
 0x44a   : > { %v2963_v46 = vadd.f32 %v5008_v10, %v2947_v42  ;;  %v2891_v6 = vpop.permute.xlu0 %2890  ;;  %v5038_v42 = vld [vmem:[#allocation29_spill] sm:$0xff] }
 0x44b   : > { %v2950_v2 = vadd.f32 %v2891_v6, %v2704_v13  ;;  %v5039_v13 = vld [vmem:[#allocation21_spill] sm:$0xff] }
 0x44c   : > { %2979 = vst.msk [vmem:[%s4646_s23 + $0x8] sm:$0xff] %vm5009_vm2, %v2963_v46  ;;  %vm5040_vm14 = vnez %v5039_v13 }
 0x44d   : > { %v2966_v14 = vadd.f32 %v5011_v4, %v2950_v2  ;;  %v2543_v18 = vsel %vm5040_vm14, %v5038_v42, 0.0 }
 0x44e   : > { %v2665_v26 = vpop.permute.xlu0 %2664 }
 0x44f   : > { %2982 = vst.msk [vmem:[%s4646_s23 + $0x20] sm:$0xff] %vm5014_vm5, %v2966_v14  ;;  %v2706_v54 = vadd.f32 %v2665_v26, %v2537_v61 }
 0x451   : > { %v2952_v40 = vadd.f32 %v2895_v28, %v2706_v54  ;;  %v5020_v28 = vunpack.c.h.bf16 %v5010_v27  ;;  %v5045_v27 = vunpack.c.l.bf16 %v5042_v33 }
 0x452   : > { %v2669_v53 = vpop.permute.xlu0 %2668 }
 0x453   : > { %v2968_v31 = vadd.f32 %v5015_v62, %v2952_v40  ;;  %v2708_v35 = vadd.f32 %v2669_v53, %v2539_v56 }
 0x455   : > { %2984 = vst.msk [vmem:[%s4646_s23 + $0x30] sm:$0xff] %vm5016_vm11, %v2968_v31 }
 0x456   : > { %v2893_v15 = vpop.permute.xlu0 %2892 }
 0x457   : > { %v2935_v9 = vsel %vm4101_vm13, %v2893_v15, 0.0  ;;  %vm5026_vm13 = vnez %v5025_v24 }
 0x458   : > { %v2951_v48 = vadd.f32 %v2935_v9, %v4628_v12  ;;  %v2541_v34 = vsel %vm5026_vm13, %v5024_v38, 0.0 }
 0x45a   : > { %v2967_v25 = vadd.f32 %v5020_v28, %v2951_v48  ;;  %v2899_v21 = vpop.permute.xlu0 %2898 }
 0x45b   : > { %v2954_v58 = vadd.f32 %v2899_v21, %v2708_v35 }
 0x45c   : > { %2983 = vst.msk [vmem:[%s4646_s23 + $0x28] sm:$0xff] %vm5021_vm15, %v2967_v25 }
 0x45d   : > { %v2970_v47 = vadd.f32 %v5023_v51, %v2954_v58 }
 0x45e   : > { %v2673_v50 = vpop.permute.xlu0 %2672 }
 0x45f   : > { %2986 = vst.msk [vmem:[%s4646_s23 + $0x40] sm:$0xff] %vm5027_vm7, %v2970_v47  ;;  %v2710_v12 = vadd.f32 %v2673_v50, %v2541_v34 }
 0x461   : > { %v2956_v0 = vadd.f32 %v2903_v41, %v2710_v12 }
 0x462   : > { %v2901_v44 = vpop.permute.xlu0 %2900 }
 0x463   : > { %v2972_v20 = vadd.f32 %v5028_v39, %v2956_v0  ;;  %v2939_v30 = vsel %vm5030_vm3, %v2901_v44, 0.0 }
 0x464   : > { %v2955_v17 = vadd.f32 %v2939_v30, %v4653_v49 }
 0x465   : > { %2988 = vst.msk [vmem:[%s4646_s23 + $0x50] sm:$0xff] %vm5031_vm1, %v2972_v20 }
 0x466   : > { %v2971_v22 = vadd.f32 %v5032_v36, %v2955_v17  ;;  %v2677_v43 = vpop.permute.xlu0 %2676 }
 0x467   : > { %v2712_v46 = vadd.f32 %v2677_v43, %v2543_v18 }
 0x468   : > { %2987 = vst.msk [vmem:[%s4646_s23 + $0x48] sm:$0xff] %vm5033_vm12, %v2971_v22 }
 0x46a   : > { %v2681_v59 = vpop.permute.xlu0 %2680 }
 0x46b   : > { %v2714_v8 = vadd.f32 %v2681_v59, %v2545_v29 }
 0x46d   : > { %v2960_v49 = vadd.f32 %v2911_v57, %v2714_v8 }
 0x46e   : > { %v2909_v3 = vpop.permute.xlu0 %2908 }
 0x46f   : > { %v2976_v1 = vadd.f32 %v5035_v7, %v2960_v49  ;;  %v2943_v5 = vsel %vm5037_vm0, %v2909_v3, 0.0 }
 0x470   : > { %v2959_v10 = vadd.f32 %v2943_v5, %v2713_v23 }
 0x471   : > { %2992 = vst.msk [vmem:[%s4646_s23 + $0x70] sm:$0xff] %vm5041_vm9, %v2976_v1 }
 0x472   : > { %v2975_v55 = vadd.f32 %v5043_v63, %v2959_v10  ;;  %v2907_v6 = vpop.permute.xlu0 %2906 }
 0x473   : > { %v2958_v2 = vadd.f32 %v2907_v6, %v2712_v46 }
 0x474   : > { %2991 = vst.msk [vmem:[%s4646_s23 + $0x68] sm:$0xff] %vm5044_vm6, %v2975_v55 }
 0x475   : > { %v2974_v4 = vadd.f32 %v5045_v27, %v2958_v2 }
 0x477   : > { %2990 = vst.msk [vmem:[%s4646_s23 + $0x60] sm:$0xff] %vm5046_vm10, %v2974_v4 }
 0x478   : > { %3336 = shalt.err (!%p3333_p3)
}
 0x479   : > { %s3337_s21 = scalar_lea.hbm %s4764_s26, 2048  ;;  %s3341_s17 = scalar_lea.hbm %s4823_s9, 4096 }
 0x47a   : > { %p3338_p4 = scmp.ne.s32.totalorder %s4764_s26, %s3337_s21  ;;  %p3342_p9 = scmp.lt.s32.totalorder %s4764_s26, %s4823_s9 }
 0x47b   : > { %p3343_p10 = scmp.lt.s32.totalorder %s3341_s17, %s3337_s21 }
 0x47c   : > { %p3339_p7 = pnand %p3338_p4, %p3481_p5 }
 0x47d   : > { %p3344_p11 = por %p3343_p10, %p3342_p9 }
 0x47e   : > { %p3340_p8 = pneg %p3339_p7 }
 0x480   : > { %p3345_p12 = pnand %p3344_p11, %p3340_p8 }
 0x482   : > { %3348 = shalt.err (!%p3345_p12)
}
 0x483   : > { %s3391_s28 = smov 128   ;;  %s3392_s29 = smov 8  }
 0x484   : > { %3233 = dma.vmem_to_hbm [thread:$0]  (%p3481_p5), %s4766_s27, 2048, %s4764_s26, %s4774_s13, %s3391_s28, %s3391_s28, %s3392_s29  }
 0x485 PF: > { %p3239_p13 = scmp.ge.s32.totalorder %s3383_s12, 2  ;;  %s3023_s14 = sand.u32 1, %s3371_s30  }
 0x486   : > { %s3024_s16 = scalar_lea.sflag [#allocation4], %s3023_s14 }
 0x487   : > { %p3236_p0 = pnand %p3239_p13, %p3485_p6 }
 0x489   : > { %p3237_p1 = pneg %p3236_p0 }
 0x48b   : > { %3366 = dma.done.wait (%p3237_p1), %s3024_s16, 2048  }
 0x48c   : > { %3368 = vsyncadd (%p3237_p1), %s3024_s16, 4294965248  ;;  %p19_p2 = scmp.ge.s32.totalorder %s3468_s15, 4   ;;  %s5047_s30 = smov %s3375_s10 }
 0x48d   : > { %s5048_s10 = smov %s3379_s11  ;;  %s5049_s11 = smov %s3479_s18 }
 0x48e   : > { %s5050_s12 = smov %s3468_s15  ;;  %21 = sbr.rel (!%p19_p2) target bundleno = 3 (0x3), region = 91 }
 0x493   :  { %3029 = vsyncpa [#allocation4], 1 }
 0x494   :  { %3031 = vsyncpa [#allocation4 + $0x1], 1 }

// kernel: _lambda_.4
= control target key start
LH: loop header
LB: loop body
LE: loop exit
PB: predicated region body
PF: predicated region fallthrough
CT: control target
= control target key end

     0   :  { %s3998_s21 = smov 0   ;;  %s5416_s0 = inlined_call_operand.vmem [shape: bf16[2,128,32], index: 0, kind: input, shape index: {}]   ;;  %s5417_s1 = inlined_call_operand.vmem [shape: bf16[2,128,32], index: 1, kind: input, shape index: {}]   ;;  %s5418_s2 = inlined_call_operand.vmem [shape: bf16[64,288], index: 2, kind: input, shape index: {}]   ;;  %s5419_s3 = inlined_call_operand.vmem [shape: bf16[32,288], index: 3, kind: input, shape index: {}]   ;;  %s5420_s4 = inlined_call_operand.vmem [shape: bf16[64,32], index: 4, kind: input, shape index: {}]   ;;  %s5421_s5 = inlined_call_operand.vmem [shape: f32[1,32], index: 5, kind: input, shape index: {}]   ;;  %s5422_s6 = inlined_call_operand.vmem [shape: f32[1,64], index: 6, kind: input, shape index: {}]   ;;  %s5423_s7 = inlined_call_operand.vmem [shape: f32[1,64], index: 7, kind: input, shape index: {}]   ;;  %s5424_s8 = inlined_call_operand.vmem [shape: f32[1,64], index: 8, kind: input, shape index: {}]   ;;  %s5425_s9 = inlined_call_operand.vmem [shape: f32[1,32], index: 9, kind: input, shape index: {}]   ;;  %s5426_s10 = inlined_call_operand.vmem [shape: f32[1,32], index: 10, kind: input, shape index: {}]   ;;  %s5427_s11 = inlined_call_operand.vmem [shape: f32[1,32], index: 11, kind: input, shape index: {}]   ;;  %s5428_s12 = inlined_call_operand.vmem [shape: bf16[2,128,32], index: 12, kind: output, shape index: {}]  }
   0x1 LB: > { %s3599_s22 = sadd.s32 4294967295, %s3926_s21   ;;  %p3603_p0 = scmp.ge.s32.totalorder %s3926_s21, 1  ;;  %s3926_s21 = sphi %s3998_s21, %s22_s21  }
   0x2   : > { %p372_p1 = scmp.lt.s32.totalorder %s3926_s21, 3 }
   0x4   : > { %p373_p2 = pnand %p3603_p0, %p372_p1 }
   0x6   : > { %376 = sbr.rel (%p373_p2) target bundleno = 1288 (0x508), region = 68 }
   0xb   : > { %p419_p3 = scmp.lt.s32.totalorder %s3599_s22, 1  ;;  %v3867_v0 = vld [vmem:[%s5420_s4 + $0x18] sm:$0xff]   ;;  %v3868_v1 = vld [vmem:[%s5420_s4 + $0x10] sm:$0xff]   ;;  %v3869_v2 = vld [vmem:[%s5420_s4 + $0x8] sm:$0xff]   ;;  %s3928_s15 = smov 32   ;;  %vm5433_vm0 = vcmask 257024  }
   0xc   : > { %3826 = vmatprep.subr.bf16.mxu1 %v3867_v0  ;;  %3758 = vmatprep.subr.bf16.mxu0 %v3867_v0  ;;  %v3870_v7 = vld [vmem:[%s5420_s4] sm:$0xff]   ;;  %v3877_v24 = vld [vmem:[%s5418_s2 + $0x4c] ss:$12 sps:$4 sm:$0xff]   ;;  %v4088_v31 = vld [vmem:[%s5418_s2 + $0x50] ss:$12 sps:$4 sm:$0xff]   ;;  %vm5435_vm1 = vcmask 261120  }
   0xd   : > { %s5633_s22 = smov (!%p419_p3, %s3599_s22), 1  ;;  %3830 = vmatpush3.bf16.msra.mxu1 %v3867_v0  ;;  %3759 = vmatpush3.bf16.msra.mxu0 %v3867_v0  ;;  %v3929_v38 = vmov 0.0   ;;  %s3930_s26 = smov 64   ;;  %vm808_vm2 = vcmask 519424   ;;  %vm920_vm3 = vcmask 523264  }
   0xe   : > { %s4012_s27 = sshll.u32 %s5633_s22, 6  ;;  %3827 = vmatprep.subr.bf16.mxu1 %v3868_v1  ;;  %3760 = vmatprep.subr.bf16.mxu0 %v3868_v1  ;;  %442 = vst [vmem:[#allocation3 + $0x30] sm:$0xff] %v3929_v38  ;;  %446 = vst [vmem:[#allocation3 + $0x1d0] sm:$0xff] %v3929_v38  ;;  %v3875_v53 = vld [vmem:[%s5418_s2 + $0x48] ss:$12 sps:$4 sm:$0xff]   ;;  %s3932_s30 = smov 96  }
   0xf   : > { %s4021_s14 = scalar_lea.vmem %s5417_s1, %s4012_s27  ;;  %s4033_s18 = scalar_lea.vmem %s5416_s0, %s4012_s27  ;;  %435 = vst [vmem:[#allocation3] sm:$0xff] %v3929_v38  ;;  %439 = vst [vmem:[#allocation3 + $0x18] sm:$0xff] %v3929_v38  ;;  %v3881_v54 = vld [vmem:[%s5418_s2 + $0x34] ss:$12 sps:$4 sm:$0xff]   ;;  %v3879_v59 = vld [vmem:[%s5418_s2 + $0x30] ss:$12 sps:$4 sm:$0xff]  }
  0x10   : > { %v738_v3 = vld [vmem:[%s4021_s14 + $0x28] sm:$0xf]  ;;  %v736_v4 = vld [vmem:[%s4021_s14 + $0x20] sm:$0xf]  ;;  %v739_v5 = vld [vmem:[%s4021_s14 + $0x2c] sm:$0xf]  ;;  %s5307_s20 = scalar_lea.vmem %s5428_s12, %s4012_s27 }
  0x11   : > { %780 = vrot.lane.b32.xlu1 %v738_v3, %s3928_s15  ;;  %776 = vrot.lane.b32.xlu0 %v736_v4, %s3928_s15  ;;  %v737_v6 = vld [vmem:[%s4021_s14 + $0x24] sm:$0xf]  ;;  %v728_v9 = vld [vmem:[%s4021_s14] sm:$0xf]  ;;  %447 = vst.msk [vmem:[#allocation3 + $0x1d8] sm:$0xff] %vm5435_vm1, %v3929_v38  ;;  %449 = vst [vmem:[#allocation3 + $0x1e8] sm:$0xff] %v3929_v38 }
  0x12   : > { %3831 = vmatpush3.bf16.msra.mxu1 %v3868_v1  ;;  %3761 = vmatpush3.bf16.msra.mxu0 %v3868_v1  ;;  %v729_v8 = vld [vmem:[%s4021_s14 + $0x4] sm:$0xf]  ;;  %v705_v10 = vld [vmem:[%s4033_s18 + $0x28] sm:$0xf]  ;;  %v703_v11 = vld [vmem:[%s4033_s18 + $0x20] sm:$0xf] }
  0x13   : > { %3828 = vmatprep.subr.bf16.mxu1 %v3869_v2  ;;  %3762 = vmatprep.subr.bf16.mxu0 %v3869_v2  ;;  %v706_v12 = vld [vmem:[%s4033_s18 + $0x2c] sm:$0xf]  ;;  %722 = vst.msk [vmem:[#allocation2 + $0x28] sm:$0xf] %vm5433_vm0, %v705_v10  ;;  %720 = vst.msk [vmem:[#allocation2 + $0x20] sm:$0xf] %vm5433_vm0, %v703_v11 }
  0x14   : > { %723 = vst.msk [vmem:[#allocation2 + $0x2c] sm:$0xf] %vm5433_vm0, %v706_v12  ;;  %v704_v13 = vld [vmem:[%s4033_s18 + $0x24] sm:$0xf]  ;;  %v695_v15 = vld [vmem:[%s4033_s18] sm:$0xf] }
  0x15   : > { %782 = vrot.lane.b32.xlu1 %v739_v5, %s3928_s15  ;;  %778 = vrot.lane.b32.xlu0 %v737_v6, %s3928_s15  ;;  %v696_v14 = vld [vmem:[%s4033_s18 + $0x4] sm:$0xf]  ;;  %721 = vst.msk [vmem:[#allocation2 + $0x24] sm:$0xf] %vm5433_vm0, %v704_v13  ;;  %712 = vst.msk [vmem:[#allocation2] sm:$0xf] %vm5433_vm0, %v695_v15 }
  0x16   : > { %3832 = vmatpush3.bf16.msra.mxu1 %v3869_v2  ;;  %3763 = vmatpush3.bf16.msra.mxu0 %v3869_v2  ;;  %713 = vst.msk [vmem:[#allocation2 + $0x4] sm:$0xf] %vm5433_vm0, %v696_v14  ;;  %v698_v16 = vld [vmem:[%s4033_s18 + $0xc] sm:$0xf]  ;;  %v697_v17 = vld [vmem:[%s4033_s18 + $0x8] sm:$0xf] }
  0x17   : > { %3829 = vmatprep.subr.bf16.mxu1 %v3870_v7  ;;  %3764 = vmatprep.subr.bf16.mxu0 %v3870_v7  ;;  %v731_v18 = vld [vmem:[%s4021_s14 + $0xc] sm:$0xf]  ;;  %v730_v19 = vld [vmem:[%s4021_s14 + $0x8] sm:$0xf]  ;;  %715 = vst.msk [vmem:[#allocation2 + $0xc] sm:$0xf] %vm5433_vm0, %v698_v16 }
  0x18   : > { %714 = vst.msk [vmem:[#allocation2 + $0x8] sm:$0xf] %vm5433_vm0, %v697_v17  ;;  %v708_v20 = vld [vmem:[%s4033_s18 + $0x34] sm:$0xf]  ;;  %v707_v21 = vld [vmem:[%s4033_s18 + $0x30] sm:$0xf] }
  0x19   : > { %762 = vrot.lane.b32.xlu1 %v729_v8, %s3928_s15  ;;  %760 = vrot.lane.b32.xlu0 %v728_v9, %s3928_s15  ;;  %v710_v22 = vld [vmem:[%s4033_s18 + $0x3c] sm:$0xf]  ;;  %725 = vst.msk [vmem:[#allocation2 + $0x34] sm:$0xf] %vm5433_vm0, %v708_v20  ;;  %724 = vst.msk [vmem:[#allocation2 + $0x30] sm:$0xf] %vm5433_vm0, %v707_v21 }
  0x1a   : > { %3833 = vmatpush3.bf16.msra.mxu1 %v3870_v7  ;;  %3765 = vmatpush3.bf16.msra.mxu0 %v3870_v7  ;;  %727 = vst.msk [vmem:[#allocation2 + $0x3c] sm:$0xf] %vm5433_vm0, %v710_v22  ;;  %v709_v23 = vld [vmem:[%s4033_s18 + $0x38] sm:$0xf]  ;;  %v700_v25 = vld [vmem:[%s4033_s18 + $0x14] sm:$0xf] }
  0x1b   : > { %726 = vst.msk [vmem:[#allocation2 + $0x38] sm:$0xf] %vm5433_vm0, %v709_v23  ;;  %v699_v26 = vld [vmem:[%s4033_s18 + $0x10] sm:$0xf]  ;;  %v741_v27 = vld [vmem:[%s4021_s14 + $0x34] sm:$0xf]  ;;  %1279 = vmatprep.subr.bf16.mxu1 %v3877_v24  ;;  %3782 = vmatprep.subr.bf16.mxu0 %v4088_v31 }
  0x1c   : > { %717 = vst.msk [vmem:[#allocation2 + $0x14] sm:$0xf] %vm5433_vm0, %v700_v25  ;;  %716 = vst.msk [vmem:[#allocation2 + $0x10] sm:$0xf] %vm5433_vm0, %v699_v26  ;;  %v740_v28 = vld [vmem:[%s4021_s14 + $0x30] sm:$0xf] }
  0x1d   : > { %766 = vrot.lane.b32.xlu1 %v731_v18, %s3928_s15  ;;  %764 = vrot.lane.b32.xlu0 %v730_v19, %s3928_s15  ;;  %v702_v29 = vld [vmem:[%s4033_s18 + $0x1c] sm:$0xf]  ;;  %v701_v30 = vld [vmem:[%s4033_s18 + $0x18] sm:$0xf]  ;;  %450 = vst.msk [vmem:[#allocation3 + $0x1f0] sm:$0xff] %vm5435_vm1, %v3929_v38  ;;  %453 = vst.msk [vmem:[#allocation3 + $0x208] sm:$0xff] %vm5435_vm1, %v3929_v38 }
  0x1e   : > { %719 = vst.msk [vmem:[#allocation2 + $0x1c] sm:$0xf] %vm5433_vm0, %v702_v29  ;;  %718 = vst.msk [vmem:[#allocation2 + $0x18] sm:$0xf] %vm5433_vm0, %v701_v30  ;;  %v743_v32 = vld [vmem:[%s4021_s14 + $0x3c] sm:$0xf] }
  0x1f   : > { %v742_v33 = vld [vmem:[%s4021_s14 + $0x38] sm:$0xf]  ;;  %v733_v34 = vld [vmem:[%s4021_s14 + $0x14] sm:$0xf]  ;;  %v732_v35 = vld [vmem:[%s4021_s14 + $0x10] sm:$0xf] }
  0x20   : > { %v735_v36 = vld [vmem:[%s4021_s14 + $0x1c] sm:$0xf]  ;;  %v734_v37 = vld [vmem:[%s4021_s14 + $0x18] sm:$0xf]  ;;  %v1546_v39 = vld [vmem:[#allocation3 + $0x30] sm:$0x80] }
  0x21   : > { %786 = vrot.lane.b32.xlu1 %v741_v27, %s3928_s15  ;;  %784 = vrot.lane.b32.xlu0 %v740_v28, %s3928_s15  ;;  %v2024_v40 = vld [vmem:[#allocation3 + $0x1d0] sm:$0x1]  ;;  %v3886_v61 = vld [vmem:[%s5418_s2 + $0x1c] ss:$12 sps:$4 sm:$0xff]   ;;  %v4151_v62 = vld [vmem:[%s5422_s6] ss:$0 sm:$0xff] }
  0x22   : > { %v3847_v41 = vpack.i.bf16 %v2024_v40, %v1546_v39  ;;  %v3884_v4 = vld [vmem:[%s5418_s2 + $0x18] ss:$12 sps:$4 sm:$0xff]   ;;  %v4170_v7 = vld [vmem:[%s5423_s7] ss:$0 sm:$0xff]  ;;  %v3894_v23 = vld [vmem:[%s5418_s2 + $0x8] ss:$12 sps:$4 sm:$0xff]  }
  0x23   : > { %v3887_v5 = vld [vmem:[%s5418_s2 + $0x38] ss:$12 sps:$4 sm:$0xff]   ;;  %v3889_v13 = vld [vmem:[%s5418_s2] ss:$12 sps:$4 sm:$0xff]   ;;  %v5429_v30 = vmov 0  }
  0x24   : > { %v2051_v42 = vld [vmem:[#allocation3 + $0x208] sm:$0x1]  ;;  %v3891_v6 = vld [vmem:[%s5418_s2 + $0x4] ss:$12 sps:$4 sm:$0xff]   ;;  %v3892_v14 = vld [vmem:[%s5418_s2 + $0x20] ss:$12 sps:$4 sm:$0xff]  }
  0x25   : > { %790 = vrot.lane.b32.xlu1 %v743_v32, %s3928_s15  ;;  %788 = vrot.lane.b32.xlu0 %v742_v33, %s3928_s15  ;;  %v4189_v17 = vld [vmem:[%s5424_s8] ss:$0 sm:$0xff] }
  0x29   : > { %770 = vrot.lane.b32.xlu1 %v733_v34, %s3928_s15  ;;  %768 = vrot.lane.b32.xlu0 %v732_v35, %s3928_s15 }
  0x2d   : > { %774 = vrot.lane.b32.xlu1 %v735_v36, %s3928_s15  ;;  %772 = vrot.lane.b32.xlu0 %v734_v37, %s3928_s15 }
  0x31   : > { %3848 = vrot.lane.b32.xlu1 %v3847_v41, %s3928_s15 }
  0x35   : > { %2101 = vrot.lane.b32.xlu1 %v2051_v42, %s3930_s26 }
  0x83   : > { %v781_v43 = vpop.permute.xlu1 %780  ;;  %v777_v44 = vpop.permute.xlu0 %776 }
  0x84   : > { %819 = vst.msk [vmem:[#allocation2 + $0x28] sm:$0xf] %vm808_vm2, %v781_v43  ;;  %817 = vst.msk [vmem:[#allocation2 + $0x20] sm:$0xf] %vm808_vm2, %v777_v44 }
  0x87   : > { %v783_v45 = vpop.permute.xlu1 %782  ;;  %v779_v46 = vpop.permute.xlu0 %778 }
  0x88   : > { %820 = vst.msk [vmem:[#allocation2 + $0x2c] sm:$0xf] %vm808_vm2, %v783_v45  ;;  %818 = vst.msk [vmem:[#allocation2 + $0x24] sm:$0xf] %vm808_vm2, %v779_v46 }
  0x8b   : > { %v763_v47 = vpop.permute.xlu1 %762  ;;  %v761_v48 = vpop.permute.xlu0 %760 }
  0x8c   : > { %810 = vst.msk [vmem:[#allocation2 + $0x4] sm:$0xf] %vm808_vm2, %v763_v47  ;;  %809 = vst.msk [vmem:[#allocation2] sm:$0xf] %vm808_vm2, %v761_v48 }
  0x8f   : > { %v767_v49 = vpop.permute.xlu1 %766  ;;  %v765_v50 = vpop.permute.xlu0 %764  ;;  %v4124_v51 = vld [vmem:[#allocation2 + $0x20] sm:$0xff]   ;;  %v4126_v52 = vld [vmem:[#allocation2 + $0x28] sm:$0xff]  }
  0x90   : > { %812 = vst.msk [vmem:[#allocation2 + $0xc] sm:$0xf] %vm808_vm2, %v767_v49  ;;  %811 = vst.msk [vmem:[#allocation2 + $0x8] sm:$0xf] %vm808_vm2, %v765_v50  ;;  %3774 = vmatprep.mubr.msk.bf16.mxu1 %vm920_vm3, %v4124_v51  ;;  %v1050_v26 = vunpack.c.l.bf16 %v4124_v51  ;;  %v1051_v27 = vunpack.c.h.bf16 %v4124_v51 }
  0x91   : > { %3775 = vmatmul.mubr.msk.bf16.vlgmr.msra.gmra.mxu1 %vm920_vm3, %v4126_v52 }
  0x92   : > { %1280 = vmatpush1.bf16.msra.mxu1 %v3875_v53  ;;  %v1073_v39 = vmul.f32 %v4151_v62, %v1050_v26  ;;  %v1074_v40 = vmul.f32 %v4151_v62, %v1051_v27 }
  0x93   : > { %v787_v55 = vpop.permute.xlu1 %786  ;;  %v785_v56 = vpop.permute.xlu0 %784  ;;  %v825_v57 = vld [vmem:[#allocation2] sm:$0xff]   ;;  %1281 = vmatprep.subr.bf16.mxu1 %v3881_v54 }
  0x94   : > { %822 = vst.msk [vmem:[#allocation2 + $0x34] sm:$0xf] %vm808_vm2, %v787_v55  ;;  %821 = vst.msk [vmem:[#allocation2 + $0x30] sm:$0xf] %vm808_vm2, %v785_v56  ;;  %v1042_v58 = vunpack.c.l.bf16 %v825_v57  ;;  %v1043_v60 = vunpack.c.h.bf16 %v825_v57  ;;  %3766 = vmatprep.mubr.msk.bf16.mxu0 %vm920_vm3, %v825_v57  ;;  %v1096_v54 = vadd.f32 %v4170_v7, %v1073_v39  ;;  %v1097_v55 = vadd.f32 %v4170_v7, %v1074_v40 }
  0x95   : > { %v1052_v56 = vunpack.c.l.bf16 %v4126_v52  ;;  %v1053_v57 = vunpack.c.h.bf16 %v4126_v52 }
  0x96   : > { %v1065_v63 = vmul.f32 %v4151_v62, %v1042_v58  ;;  %v1066_v3 = vmul.f32 %v4151_v62, %v1043_v60  ;;  %1282 = vmatpush1.bf16.msra.mxu1 %v3879_v59  ;;  %vm1113_vm12 = vcmp.gt.f32.partialorder %v1096_v54, 0.0  ;;  %vm1114_vm13 = vcmp.gt.f32.partialorder %v1097_v55, 0.0 }
  0x97   : > { %v791_v0 = vpop.permute.xlu1 %790  ;;  %v789_v1 = vpop.permute.xlu0 %788  ;;  %v827_v2 = vld [vmem:[#allocation2 + $0x8] sm:$0xff]   ;;  %1283 = vmatprep.subr.bf16.mxu1 %v3886_v61 }
  0x98   : > { %824 = vst.msk [vmem:[#allocation2 + $0x3c] sm:$0xf] %vm808_vm2, %v791_v0  ;;  %823 = vst.msk [vmem:[#allocation2 + $0x38] sm:$0xf] %vm808_vm2, %v789_v1  ;;  %3767 = vmatmul.mubr.msk.bf16.vlgmr.msra.gmra.mxu0 %vm920_vm3, %v827_v2  ;;  %v1088_v8 = vadd.f32 %v4170_v7, %v1065_v63  ;;  %v1089_v12 = vadd.f32 %v4170_v7, %v1066_v3  ;;  %v1044_v15 = vunpack.c.l.bf16 %v827_v2  ;;  %v1045_v16 = vunpack.c.h.bf16 %v827_v2 }
  0x99   : > { %3783 = vmatpush3.bf16.msra.mxu0 %v4088_v31  ;;  %v1135_v3 = vmul.f32 %v4189_v17, %v1096_v54 }
  0x9a   : > { %1284 = vmatpush1.bf16.msra.mxu1 %v3884_v4  ;;  %3784 = vmatprep.subr.bf16.mxu0 %v3887_v5  ;;  %v1127_v18 = vmul.f32 %v4189_v17, %v1088_v8  ;;  %vm1105_vm4 = vcmp.gt.f32.partialorder %v1088_v8, 0.0  ;;  %v1128_v22 = vmul.f32 %v4189_v17, %v1089_v12  ;;  %vm1106_vm5 = vcmp.gt.f32.partialorder %v1089_v12, 0.0 }
  0x9b   : > { %v771_v9 = vpop.permute.xlu1 %770  ;;  %v769_v10 = vpop.permute.xlu0 %768  ;;  %v4174_v11 = vld [vmem:[#allocation2 + $0x30] sm:$0xff]   ;;  %1285 = vmatprep.subr.bf16.mxu1 %v3891_v6  ;;  %v1067_v24 = vmul.f32 %v4151_v62, %v1044_v15  ;;  %v1068_v25 = vmul.f32 %v4151_v62, %v1045_v16  ;;  %v1075_v4 = vmul.f32 %v4151_v62, %v1052_v56  ;;  %v1136_v6 = vmul.f32 %v4189_v17, %v1097_v55 }
  0x9c   : > { %814 = vst.msk [vmem:[#allocation2 + $0x14] sm:$0xf] %vm808_vm2, %v771_v9  ;;  %813 = vst.msk [vmem:[#allocation2 + $0x10] sm:$0xf] %vm808_vm2, %v769_v10  ;;  %3778 = vmatprep.mubr.msk.bf16.mxu1 %vm920_vm3, %v4174_v11  ;;  %v1143_v28 = vsel %vm1105_vm4, %v1088_v8, %v1127_v18  ;;  %v1144_v31 = vsel %vm1106_vm5, %v1089_v12, %v1128_v22  ;;  %v1054_v63 = vunpack.c.l.bf16 %v4174_v11  ;;  %v1055_v0 = vunpack.c.h.bf16 %v4174_v11 }
  0x9d   : > { %3785 = vmatpush3.bf16.msra.mxu0 %v3887_v5  ;;  %v1090_v34 = vadd.f32 %v4170_v7, %v1067_v24  ;;  %v1091_v35 = vadd.f32 %v4170_v7, %v1068_v25  ;;  %v1159_v41 = vpack.c.bf16 %v1144_v31, %v1143_v28  ;;  %v1076_v5 = vmul.f32 %v4151_v62, %v1053_v57 }
  0x9e   : > { %1286 = vmatpush1.bf16.msra.mxu1 %v3889_v13  ;;  %3786 = vmatprep.subr.bf16.mxu0 %v3892_v14  ;;  %v1077_v12 = vmul.f32 %v4151_v62, %v1054_v63  ;;  %v1078_v11 = vmul.f32 %v4151_v62, %v1055_v0  ;;  %v1098_v13 = vadd.f32 %v4170_v7, %v1075_v4 }
  0x9f   : > { %v775_v19 = vpop.permute.xlu1 %774  ;;  %v773_v20 = vpop.permute.xlu0 %772  ;;  %v4194_v21 = vld [vmem:[#allocation2 + $0x38] sm:$0xff]   ;;  %vm1107_vm6 = vcmp.gt.f32.partialorder %v1090_v34, 0.0  ;;  %v1129_v46 = vmul.f32 %v4189_v17, %v1090_v34  ;;  %v1130_v47 = vmul.f32 %v4189_v17, %v1091_v35  ;;  %vm1108_vm7 = vcmp.gt.f32.partialorder %v1091_v35, 0.0 }
  0xa0   : > { %816 = vst.msk [vmem:[#allocation2 + $0x1c] sm:$0xf] %vm808_vm2, %v775_v19  ;;  %815 = vst.msk [vmem:[#allocation2 + $0x18] sm:$0xf] %vm808_vm2, %v773_v20  ;;  %3779 = vmatmul.mubr.msk.bf16.gmra.mxu1 %vm920_vm3, %v4194_v21  ;;  %v1056_v15 = vunpack.c.l.bf16 %v4194_v21  ;;  %v1057_v16 = vunpack.c.h.bf16 %v4194_v21  ;;  %v1151_v20 = vsel %vm1113_vm12, %v1096_v54, %v1135_v3  ;;  %v1152_v22 = vsel %vm1114_vm13, %v1097_v55, %v1136_v6 }
  0xa1   : > { %1303 = vmatprep.mubr.bf16.mxu1 %v5429_v30  ;;  %3787 = vmatpush3.bf16.msra.mxu0 %v3892_v14  ;;  %v1145_v58 = vsel %vm1107_vm6, %v1090_v34, %v1129_v46  ;;  %v1146_v59 = vsel %vm1108_vm7, %v1091_v35, %v1130_v47  ;;  %v1099_v14 = vadd.f32 %v4170_v7, %v1076_v5  ;;  %vm1115_vm14 = vcmp.gt.f32.partialorder %v1098_v13, 0.0  ;;  %v3610_v46 = vld [vmem:[%s5421_s5] ss:$0 sm:$0xff] }
  0xa2   : > { %3788 = vmatprep.subr.bf16.mxu0 %v3894_v23  ;;  %v1160_v52 = vpack.c.bf16 %v1146_v59, %v1145_v58  ;;  %v1101_v24 = vadd.f32 %v4170_v7, %v1078_v11  ;;  %v1137_v26 = vmul.f32 %v4189_v17, %v1098_v13  ;;  %v1079_v27 = vmul.f32 %v4151_v62, %v1056_v15 }
  0xa3   : > { %v829_v29 = vld [vmem:[#allocation2 + $0x10] sm:$0xff]   ;;  %v1080_v28 = vmul.f32 %v4151_v62, %v1057_v16  ;;  %v1138_v31 = vmul.f32 %v4189_v17, %v1099_v14  ;;  %vm1116_vm15 = vcmp.gt.f32.partialorder %v1099_v14, 0.0  ;;  %vm5436_vm7 = vcmask 1040384  }
  0xa4   : > { %v1046_v32 = vunpack.c.l.bf16 %v829_v29  ;;  %v1047_v33 = vunpack.c.h.bf16 %v829_v29  ;;  %3770 = vmatprep.mubr.msk.bf16.mxu0 %vm920_vm3, %v829_v29  ;;  %v1163_v29 = vpack.c.bf16 %v1152_v22, %v1151_v20  ;;  %vm1118_vm4 = vcmp.gt.f32.partialorder %v1101_v24, 0.0 }
  0xa5   : > { %3789 = vmatpush3.bf16.msra.mxu0 %v3894_v23  ;;  %v1100_v23 = vadd.f32 %v4170_v7, %v1077_v12  ;;  %v1102_v34 = vadd.f32 %v4170_v7, %v1079_v27  ;;  %v1103_v35 = vadd.f32 %v4170_v7, %v1080_v28 }
  0xa6   : > { %v1069_v36 = vmul.f32 %v4151_v62, %v1046_v32  ;;  %v1070_v37 = vmul.f32 %v4151_v62, %v1047_v33  ;;  %v1140_v32 = vmul.f32 %v4189_v17, %v1101_v24  ;;  %v1154_v33 = vsel %vm1116_vm15, %v1099_v14, %v1138_v31 }
  0xa7   : > { %v831_v42 = vld [vmem:[#allocation2 + $0x18] sm:$0xff]   ;;  %v1139_v21 = vmul.f32 %v4189_v17, %v1100_v23  ;;  %vm1117_vm2 = vcmp.gt.f32.partialorder %v1100_v23, 0.0  ;;  %vm1119_vm5 = vcmp.gt.f32.partialorder %v1102_v34, 0.0  ;;  %vm1120_vm6 = vcmp.gt.f32.partialorder %v1103_v35, 0.0 }
  0xa8   : > { %v1048_v43 = vunpack.c.l.bf16 %v831_v42  ;;  %v1049_v44 = vunpack.c.h.bf16 %v831_v42  ;;  %v1092_v45 = vadd.f32 %v4170_v7, %v1069_v36  ;;  %v1093_v48 = vadd.f32 %v4170_v7, %v1070_v37  ;;  %3771 = vmatmul.mubr.msk.bf16.gmra.mxu0 %vm920_vm3, %v831_v42  ;;  %3646 = vmatmul.mubr.msk.bf16.vlgmr.msra.gmra.mxu1 %vm920_vm3, %v1159_v41 }
  0xa9   : > { %3790 = vmatprep.mubr.msk.bf16.mxu0 %vm920_vm3, %v1159_v41  ;;  %1313 = vmatprep.mubr.bf16.mxu1 %v5429_v30  ;;  %v1155_v36 = vsel %vm1117_vm2, %v1100_v23, %v1139_v21  ;;  %v1156_v37 = vsel %vm1118_vm4, %v1101_v24, %v1140_v32  ;;  %v1141_v41 = vmul.f32 %v4189_v17, %v1102_v34 }
  0xaa   : > { %v1071_v49 = vmul.f32 %v4151_v62, %v1048_v43  ;;  %v1072_v50 = vmul.f32 %v4151_v62, %v1049_v44  ;;  %v1131_v51 = vmul.f32 %v4189_v17, %v1092_v45  ;;  %vm1109_vm8 = vcmp.gt.f32.partialorder %v1092_v45, 0.0 }
  0xab   : > { %vm1110_vm9 = vcmp.gt.f32.partialorder %v1093_v48, 0.0  ;;  %v1132_v53 = vmul.f32 %v4189_v17, %v1093_v48  ;;  %v1153_v62 = vsel %vm1115_vm14, %v1098_v13, %v1137_v26  ;;  %v1165_v40 = vpack.c.bf16 %v1156_v37, %v1155_v36 }
  0xac   : > { %v1094_v60 = vadd.f32 %v4170_v7, %v1071_v49  ;;  %v1095_v61 = vadd.f32 %v4170_v7, %v1072_v50  ;;  %v1147_v1 = vsel %vm1109_vm8, %v1092_v45, %v1131_v51  ;;  %v1164_v39 = vpack.c.bf16 %v1154_v33, %v1153_v62  ;;  %v2050_v45 = vld [vmem:[#allocation3 + $0x1f0] sm:$0xff] }
  0xad   : > { %v1148_v2 = vsel %vm1110_vm9, %v1093_v48, %v1132_v53  ;;  %v1142_v42 = vmul.f32 %v4189_v17, %v1103_v35  ;;  %v1157_v43 = vsel %vm1119_vm5, %v1102_v34, %v1141_v41 }
  0xae   : > { %v1161_v8 = vpack.c.bf16 %v1148_v2, %v1147_v1  ;;  %v1133_v9 = vmul.f32 %v4189_v17, %v1094_v60  ;;  %v1134_v10 = vmul.f32 %v4189_v17, %v1095_v61  ;;  %vm1111_vm10 = vcmp.gt.f32.partialorder %v1094_v60, 0.0  ;;  %v2049_v17 = vld [vmem:[#allocation3 + $0x1d8] sm:$0xff] }
  0xaf   : > { %vm1112_vm11 = vcmp.gt.f32.partialorder %v1095_v61, 0.0  ;;  %v1158_v7 = vsel %vm1120_vm6, %v1103_v35, %v1142_v42  ;;  %2097 = vrot.lane.b32.xlu0 %v2049_v17, %s3930_s26 }
  0xb0   : > { %3647 = vmatmul.mubr.msk.bf16.gmra.mxu1 %vm920_vm3, %v1160_v52  ;;  %3791 = vmatmul.mubr.msk.bf16.vlgmr.msra.gmra.mxu0 %vm920_vm3, %v1160_v52  ;;  %v1149_v18 = vsel %vm1111_vm10, %v1094_v60, %v1133_v9  ;;  %v1150_v19 = vsel %vm1112_vm11, %v1095_v61, %v1134_v10  ;;  %v1166_v44 = vpack.c.bf16 %v1158_v7, %v1157_v43 }
  0xb1   : > { %3794 = vmatprep.mubr.msk.bf16.mxu0 %vm920_vm3, %v1161_v8  ;;  %1323 = vmatprep.mubr.bf16.mxu1 %v5429_v30  ;;  %v1162_v25 = vpack.c.bf16 %v1150_v19, %v1149_v18 }
  0xb3   : > { %2099 = vrot.lane.b32.xlu0 %v2050_v45, %s3930_s26 }
  0xb7   : > { %3853 = vrot.lane.b32.xlu0 %v3929_v38, %s3930_s26 }
  0xb8   : > { %3648 = vmatmul.mubr.msk.bf16.gmra.mxu1 %vm920_vm3, %v1161_v8  ;;  %3795 = vmatmul.mubr.msk.bf16.gmra.mxu0 %vm920_vm3, %v1162_v25 }
  0xb9   : > { %3798 = vmatprep.mubr.msk.bf16.mxu0 %vm920_vm3, %v1163_v29  ;;  %1333 = vmatprep.mubr.bf16.mxu1 %v5429_v30 }
  0xc0   : > { %3649 = vmatmul.mubr.msk.bf16.gmra.mxu1 %vm920_vm3, %v1162_v25  ;;  %3799 = vmatmul.mubr.msk.bf16.gmra.mxu0 %vm920_vm3, %v1164_v39 }
  0xc1   : > { %3802 = vmatprep.mubr.msk.bf16.mxu0 %vm920_vm3, %v1165_v40  ;;  %1343 = vmatprep.mubr.bf16.mxu1 %v5429_v30 }
  0xc8   : > { %3650 = vmatmul.mubr.msk.bf16.gmra.mxu1 %vm920_vm3, %v1163_v29  ;;  %3803 = vmatmul.mubr.msk.bf16.gmra.mxu0 %vm920_vm3, %v1166_v44 }
  0xc9   : > { %1353 = vmatprep.mubr.bf16.mxu1 %v5429_v30  ;;  %2505 = vmatprep.mubr.bf16.mxu0 %v5429_v30 }
  0xd0   : > { %3651 = vmatmul.mubr.msk.bf16.gmra.mxu1 %vm920_vm3, %v1164_v39 }
  0xd1   : > { %1363 = vmatprep.mubr.bf16.mxu1 %v5429_v30 }
  0xd8   : > { %3652 = vmatmul.mubr.msk.bf16.gmra.mxu1 %vm920_vm3, %v1165_v40 }
  0xd9   : > { %1373 = vmatprep.mubr.bf16.mxu1 %v5429_v30 }
  0xe0   : > { %3653 = vmatmul.mubr.msk.bf16.gmra.mxu1 %vm920_vm3, %v1166_v44  ;;  %vm5434_vm3 = vcmask 1046528  }
 0x151   : > { %v3776_v47 = vpop.f32.mrf.mxu1 }
 0x152   : > { %v4289_v48 = vadd.f32 %v3776_v47, %v3610_v46 }
 0x153   : > { %v1011_v49 = vpop.f32.mrf.mxu1 }
 0x154   : > { %5459 = vst [vmem:[#allocation4_spill] sm:$0xff] %v4289_v48  ;;  %v4291_v50 = vadd.f32 %v3610_v46, %v1011_v49 }
 0x155   : > { %v4293_v51 = vpop.f32.mrf.mxu1 }
 0x156   : > { %5460 = vst [vmem:[#allocation5_spill] sm:$0xff] %v4291_v50  ;;  %5461 = vst [vmem:[#allocation6_spill] sm:$0xff] %v4293_v51 }
 0x157   : > { %v1014_v53 = vpop.f32.mrf.mxu1 }
 0x158   : > { %v4295_v54 = vadd.f32 %v3610_v46, %v1014_v53  ;;  %v3768_v55 = vpop.f32.mrf.mxu0 }
 0x159   : > { %v4297_v56 = vadd.f32 %v3768_v55, %v3610_v46 }
 0x15a   : > { %5462 = vst [vmem:[#allocation7_spill] sm:$0xff] %v4295_v54  ;;  %v979_v57 = vpop.f32.mrf.mxu0 }
 0x15b   : > { %5463 = vst [vmem:[#allocation8_spill] sm:$0xff] %v4297_v56  ;;  %v4299_v38 = vadd.f32 %v3610_v46, %v979_v57 }
 0x15c   : > { %v4301_v58 = vpop.f32.mrf.mxu0 }
 0x15d   : > { %5464 = vst [vmem:[#allocation9_spill] sm:$0xff] %v4299_v38 }
 0x15e   : > { %v982_v59 = vpop.f32.mrf.mxu0 }
 0x15f   : > { %v4303_v60 = vadd.f32 %v3610_v46, %v982_v59 }
 0x160   : > { %v3780_v61 = vpop.f32.mrf.mxu1 }
 0x161   : > { %5465 = vst [vmem:[#allocation10_spill] sm:$0xff] %v4303_v60  ;;  %v4305_v63 = vadd.f32 %v3780_v61, %v3610_v46 }
 0x162   : > { %v1027_v0 = vpop.f32.mrf.mxu1 }
 0x163   : > { %5466 = vst [vmem:[#allocation11_spill] sm:$0xff] %v4305_v63  ;;  %v4307_v1 = vadd.f32 %v3610_v46, %v1027_v0 }
 0x164   : > { %v3781_v2 = vpop.f32.mrf.mxu1 }
 0x165   : > { %5467 = vst [vmem:[#allocation12_spill] sm:$0xff] %v4307_v1  ;;  %v4309_v3 = vadd.f32 %v3781_v2, %v3610_v46 }
 0x166   : > { %v1030_v4 = vpop.f32.mrf.mxu1 }
 0x167   : > { %5468 = vst [vmem:[#allocation13_spill] sm:$0xff] %v4309_v3  ;;  %v4311_v5 = vadd.f32 %v3610_v46, %v1030_v4 }
 0x168   : > { %v3772_v52 = vpop.f32.mrf.mxu0  ;;  %v4313_v6 = vpop.f32.mrf.mxu1 }
 0x169   : > { %5469 = vst [vmem:[#allocation14_spill] sm:$0xff] %v4311_v5  ;;  %v4315_v8 = vadd.f32 %v3772_v52, %v3610_v46 }
 0x16a   : > { %v995_v9 = vpop.f32.mrf.mxu0  ;;  %v1307_v10 = vpop.f32.mrf.mxu1 }
 0x16b   : > { %5470 = vst [vmem:[#allocation15_spill] sm:$0xff] %v4315_v8  ;;  %v4317_v12 = vadd.f32 %v3610_v46, %v995_v9  ;;  %1482 = vst [vmem:[#allocation3 + $0x50] sm:$0xff] %v1307_v10  ;;  %1856 = vrot.lane.b32.xlu1 %v1307_v10, %s3928_s15 }
 0x16c   : > { %v4320_v11 = vpop.f32.mrf.mxu0  ;;  %v4322_v13 = vpop.f32.mrf.mxu1 }
 0x16d   : > { %5471 = vst [vmem:[#allocation16_spill] sm:$0xff] %v4317_v12  ;;  %5472 = vst [vmem:[#allocation17_spill] sm:$0xff] %v4320_v11 }
 0x16e   : > { %v998_v14 = vpop.f32.mrf.mxu0  ;;  %v4324_v15 = vpop.f32.mrf.mxu1 }
 0x16f   : > { %v4326_v16 = vadd.f32 %v3610_v46, %v998_v14  ;;  %1485 = vst [vmem:[#allocation3 + $0x68] sm:$0xff] %v4324_v15 }
 0x170   : > { %v4329_v18 = vpop.f32.mrf.mxu1  ;;  %v3792_v19 = vpop.f32.mrf.mxu0 }
 0x171   : > { %5473 = vst [vmem:[#allocation18_spill] sm:$0xff] %v4326_v16  ;;  %1489 = vst.msk [vmem:[#allocation3 + $0x88] sm:$0xff] %vm5435_vm1, %v3792_v19 }
 0x172   : > { %v1317_v20 = vpop.f32.mrf.mxu1  ;;  %v1418_v22 = vpop.f32.mrf.mxu0  ;;  %v2023_v39 = vld [vmem:[#allocation3 + $0x50] sm:$0xfe] }
 0x174   : > { %v4332_v23 = vpop.f32.mrf.mxu1  ;;  %v3793_v24 = vpop.f32.mrf.mxu0 }
 0x175   : > { %1492 = vst.msk [vmem:[#allocation3 + $0xa0] sm:$0xff] %vm5435_vm1, %v3793_v24 }
 0x176   : > { %v4335_v25 = vpop.f32.mrf.mxu1  ;;  %v1421_v26 = vpop.f32.mrf.mxu0  ;;  %v1635_v27 = vld [vmem:[#allocation3 + $0x68] sm:$0x80] }
 0x177   : > { %1669 = vrot.lane.b32.xlu1 %v1635_v27, %s3930_s26 }
 0x178   : > { %v4338_v28 = vpop.f32.mrf.mxu1  ;;  %v3796_v29 = vpop.f32.mrf.mxu0  ;;  %v2035_v31 = vld [vmem:[#allocation3 + $0x88] sm:$0xfe] }
 0x179   : > { %1501 = vst.msk [vmem:[#allocation3 + $0xe8] sm:$0xff] %vm5435_vm1, %v3796_v29  ;;  %2069 = vrot.lane.b32.xlu0 %v2035_v31, %s3930_s26 }
 0x17a   : > { %v4342_v21 = vpop.f32.mrf.mxu1  ;;  %v1434_v32 = vpop.f32.mrf.mxu0 }
 0x17b   : > { %1495 = vst.msk [vmem:[#allocation3 + $0xb8] sm:$0xff] %vm5435_vm1, %v1434_v32  ;;  %1573 = vrot.lane.b32.xlu1 %v4329_v18, %s3928_s15 }
 0x17c   : > { %v4347_v62 = vpop.f32.mrf.mxu1  ;;  %v3797_v33 = vpop.f32.mrf.mxu0  ;;  %v2036_v44 = vld [vmem:[#allocation3 + $0xa0] sm:$0xff] }
 0x17d   : > { %1504 = vst.msk [vmem:[#allocation3 + $0x100] sm:$0xff] %vm5435_vm1, %v3797_v33  ;;  %1569 = vrot.lane.b32.xlu0 %v4313_v6, %s3928_s15 }
 0x17e   : > { %v4352_v34 = vpop.f32.mrf.mxu1  ;;  %v1437_v35 = vpop.f32.mrf.mxu0 }
 0x17f   : > { %1498 = vst.msk [vmem:[#allocation3 + $0xd0] sm:$0xff] %vm5435_vm1, %v1437_v35  ;;  %1860 = vrot.lane.b32.xlu1 %v1317_v20, %s3928_s15 }
 0x180   : > { %v4356_v36 = vpop.f32.mrf.mxu1  ;;  %v3800_v37 = vpop.f32.mrf.mxu0  ;;  %v2039_v4 = vld [vmem:[#allocation3 + $0xe8] sm:$0xff] }
 0x181   : > { %1513 = vst.msk [vmem:[#allocation3 + $0x148] sm:$0xff] %vm5435_vm1, %v3800_v37  ;;  %2027 = vrot.lane.b32.xlu0 %v2023_v39, %s3928_s15  ;;  %v4454_v39 = vpop.permute.xlu1 %3848 }
 0x182   : > { %v4360_v40 = vpop.f32.mrf.mxu1  ;;  %v1450_v41 = vpop.f32.mrf.mxu0  ;;  %v2037_v42 = vld [vmem:[#allocation3 + $0xb8] sm:$0xff] }
 0x183   : > { %1507 = vst.msk [vmem:[#allocation3 + $0x118] sm:$0xff] %vm5435_vm1, %v1450_v41  ;;  %2073 = vrot.lane.b32.xlu1 %v2037_v42, %s3930_s26 }
 0x184   : > { %v4364_v43 = vpop.f32.mrf.mxu1  ;;  %v3801_v7 = vpop.f32.mrf.mxu0  ;;  %v2040_v55 = vld [vmem:[#allocation3 + $0x100] sm:$0xff] }
 0x185   : > { %1516 = vst.msk [vmem:[#allocation3 + $0x160] sm:$0xff] %vm5435_vm1, %v3801_v7  ;;  %2071 = vrot.lane.b32.xlu0 %v2036_v44, %s3930_s26  ;;  %v4461_v41 = vpop.permute.xlu1 %2101 }
 0x186   : > { %v4368_v17 = vpop.f32.mrf.mxu1  ;;  %v1453_v45 = vpop.f32.mrf.mxu0  ;;  %v2038_v9 = vld [vmem:[#allocation3 + $0xd0] sm:$0xff] }
 0x187   : > { %1510 = vst.msk [vmem:[#allocation3 + $0x130] sm:$0xff] %vm5435_vm1, %v1453_v45  ;;  %1671 = vrot.lane.b32.xlu1 %v1317_v20, %s3930_s26  ;;  %v3895_v45 = vld [vmem:[%s5419_s3 + $0x20] ss:$12 sps:$4 sm:$0xff]  }
 0x188   : > { %v4372_v46 = vpop.f32.mrf.mxu1  ;;  %v3804_v47 = vpop.f32.mrf.mxu0  ;;  %v2043_v22 = vld [vmem:[#allocation3 + $0x148] sm:$0xff]  ;;  %3806 = vmatprep.subr.bf16.mxu1 %v3895_v45 }
 0x189   : > { %1525 = vst.msk [vmem:[#allocation3 + $0x1a8] sm:$0xff] %vm5435_vm1, %v3804_v47  ;;  %1571 = vrot.lane.b32.xlu0 %v4322_v13, %s3928_s15  ;;  %3807 = vmatpush3.bf16.msra.mxu1 %v3895_v45 }
 0x18a   : > { %v1347_v49 = vpop.f32.mrf.mxu1  ;;  %v1466_v53 = vpop.f32.mrf.mxu0  ;;  %v2041_v31 = vld [vmem:[#allocation3 + $0x118] sm:$0xff] }
 0x18b   : > { %1519 = vst.msk [vmem:[#allocation3 + $0x178] sm:$0xff] %vm5435_vm1, %v1466_v53  ;;  %2079 = vrot.lane.b32.xlu1 %v2040_v55, %s3930_s26 }
 0x18c   : > { %v4379_v57 = vpop.f32.mrf.mxu1  ;;  %v3805_v59 = vpop.f32.mrf.mxu0  ;;  %v2044_v26 = vld [vmem:[#allocation3 + $0x160] sm:$0xff] }
 0x18d   : > { %1528 = vst.msk [vmem:[#allocation3 + $0x1c0] sm:$0xff] %vm5435_vm1, %v3805_v59  ;;  %1858 = vrot.lane.b32.xlu0 %v4324_v15, %s3928_s15 }
 0x18e   : > { %v1351_v61 = vpop.f32.mrf.mxu1  ;;  %v1469_v0 = vpop.f32.mrf.mxu0  ;;  %v2042_v32 = vld [vmem:[#allocation3 + $0x130] sm:$0xff] }
 0x18f   : > { %1522 = vst.msk [vmem:[#allocation3 + $0x190] sm:$0xff] %vm5435_vm1, %v1469_v0  ;;  %1862 = vrot.lane.b32.xlu1 %v4335_v25, %s3928_s15 }
 0x190   : > { %v4387_v2 = vpop.f32.mrf.mxu1 }
 0x191   : > { %2077 = vrot.lane.b32.xlu0 %v2039_v4, %s3930_s26 }
 0x192   : > { %v1357_v52 = vpop.f32.mrf.mxu1  ;;  %v2045_v35 = vld [vmem:[#allocation3 + $0x178] sm:$0xff] }
 0x193   : > { %2075 = vrot.lane.b32.xlu1 %v2038_v9, %s3930_s26 }
 0x194   : > { %v4391_v10 = vpop.f32.mrf.mxu1  ;;  %v2048_v33 = vld [vmem:[#allocation3 + $0x1c0] sm:$0xff] }
 0x195   : > { %1575 = vrot.lane.b32.xlu0 %v4332_v23, %s3928_s15 }
 0x196   : > { %v1361_v14 = vpop.f32.mrf.mxu1  ;;  %v2046_v37 = vld [vmem:[#allocation3 + $0x190] sm:$0xff] }
 0x197   : > { %1577 = vrot.lane.b32.xlu1 %v4338_v28, %s3928_s15 }
 0x198   : > { %v4397_v15 = vpop.f32.mrf.mxu1 }
 0x199   : > { %1673 = vrot.lane.b32.xlu0 %v4335_v25, %s3930_s26 }
 0x19a   : > { %v1367_v19 = vpop.f32.mrf.mxu1 }
 0x19b   : > { %1675 = vrot.lane.b32.xlu1 %v4342_v21, %s3930_s26 }
 0x19c   : > { %v4403_v20 = vpop.f32.mrf.mxu1 }
 0x19d   : > { %1520 = vst [vmem:[#allocation3 + $0x180] sm:$0xff] %v4403_v20  ;;  %2085 = vrot.lane.b32.xlu0 %v2043_v22, %s3930_s26 }
 0x19e   : > { %v1371_v24 = vpop.f32.mrf.mxu1 }
 0x19f   : > { %2087 = vrot.lane.b32.xlu1 %v2044_v26, %s3930_s26 }
 0x1a0   : > { %v1375_v27 = vpop.f32.mrf.mxu1 }
 0x1a1   : > { %1523 = vst [vmem:[#allocation3 + $0x198] sm:$0xff] %v1375_v27  ;;  %1864 = vrot.lane.b32.xlu0 %v4342_v21, %s3928_s15  ;;  %v2047_v21 = vld [vmem:[#allocation3 + $0x1a8] sm:$0xff] }
 0x1a2   : > { %v1377_v25 = vpop.f32.mrf.mxu1 }
 0x1a3   : > { %1866 = vrot.lane.b32.xlu1 %v4352_v34, %s3928_s15 }
 0x1a4   : > { %v1379_v29 = vpop.f32.mrf.mxu1 }
 0x1a5   : > { %1526 = vst [vmem:[#allocation3 + $0x1b0] sm:$0xff] %v1379_v29  ;;  %2081 = vrot.lane.b32.xlu0 %v2041_v31, %s3930_s26  ;;  %v3896_v31 = vld [vmem:[%s5419_s3 + $0x18] ss:$12 sps:$4 sm:$0xff]  }
 0x1a6   : > { %v1381_v44 = vpop.f32.mrf.mxu1 }
 0x1a7   : > { %2083 = vrot.lane.b32.xlu1 %v2042_v32, %s3930_s26  ;;  %v3898_v32 = vld [vmem:[%s5419_s3 + $0x1c] ss:$12 sps:$4 sm:$0xff]  }
 0x1a8   : > { %2485 = vmatprep.subr.bf16.mxu0 %v3898_v32 }
 0x1a9   : > { %1579 = vrot.lane.b32.xlu0 %v4347_v62, %s3928_s15  ;;  %2486 = vmatpush1.bf16.msra.mxu0 %v3896_v31 }
 0x1ab   : > { %1581 = vrot.lane.b32.xlu1 %v4356_v36, %s3928_s15 }
 0x1ac   : > { %v1549_v55 = vld [vmem:[#allocation3 + $0x1b0] sm:$0x7f] }
 0x1ad   : > { %1677 = vrot.lane.b32.xlu0 %v4352_v34, %s3930_s26  ;;  %v4452_v34 = vpop.permute.xlu0 %2097 }
 0x1af   : > { %1679 = vrot.lane.b32.xlu1 %v4360_v40, %s3930_s26 }
 0x1b1   : > { %2093 = vrot.lane.b32.xlu0 %v2047_v21, %s3930_s26 }
 0x1b3   : > { %2095 = vrot.lane.b32.xlu1 %v2048_v33, %s3930_s26 }
 0x1b5   : > { %1868 = vrot.lane.b32.xlu0 %v4360_v40, %s3928_s15  ;;  %v4459_v40 = vpop.permute.xlu0 %2099 }
 0x1b7   : > { %1870 = vrot.lane.b32.xlu1 %v4368_v17, %s3928_s15 }
 0x1b9   : > { %2089 = vrot.lane.b32.xlu0 %v2045_v35, %s3930_s26  ;;  %v4466_v7 = vpop.permute.xlu0 %3853 }
 0x1bb   : > { %2091 = vrot.lane.b32.xlu1 %v2046_v37, %s3930_s26 }
 0x1bd   : > { %1583 = vrot.lane.b32.xlu0 %v4364_v43, %s3928_s15 }
 0x1bf   : > { %1585 = vrot.lane.b32.xlu1 %v4372_v46, %s3928_s15 }
 0x1c1   : > { %1681 = vrot.lane.b32.xlu0 %v4368_v17, %s3930_s26 }
 0x1c3   : > { %1683 = vrot.lane.b32.xlu1 %v1347_v49, %s3930_s26 }
 0x1c5   : > { %1872 = vrot.lane.b32.xlu0 %v1347_v49, %s3928_s15 }
 0x1c7   : > { %1874 = vrot.lane.b32.xlu1 %v1351_v61, %s3928_s15 }
 0x1c9   : > { %1587 = vrot.lane.b32.xlu0 %v4379_v57, %s3928_s15 }
 0x1cb   : > { %1589 = vrot.lane.b32.xlu1 %v4387_v2, %s3928_s15 }
 0x1cd   : > { %1685 = vrot.lane.b32.xlu0 %v1351_v61, %s3930_s26 }
 0x1cf   : > { %1687 = vrot.lane.b32.xlu1 %v1357_v52, %s3930_s26 }
 0x1d1   : > { %1876 = vrot.lane.b32.xlu0 %v1357_v52, %s3928_s15  ;;  %v2021_v52 = vld [vmem:[#allocation3 + $0x18] sm:$0xfe] }
 0x1d3   : > { %1878 = vrot.lane.b32.xlu1 %v1361_v14, %s3928_s15 }
 0x1d5   : > { %1591 = vrot.lane.b32.xlu0 %v4391_v10, %s3928_s15 }
 0x1d7   : > { %1593 = vrot.lane.b32.xlu1 %v4397_v15, %s3928_s15 }
 0x1d9   : > { %1689 = vrot.lane.b32.xlu0 %v1361_v14, %s3930_s26 }
 0x1db   : > { %1691 = vrot.lane.b32.xlu1 %v1367_v19, %s3930_s26 }
 0x1dd   : > { %1880 = vrot.lane.b32.xlu0 %v1367_v19, %s3928_s15  ;;  %v1857_v42 = vpop.permute.xlu1 %1856 }
 0x1df   : > { %1882 = vrot.lane.b32.xlu1 %v1371_v24, %s3928_s15 }
 0x1e1   : > { %1693 = vrot.lane.b32.xlu0 %v1371_v24, %s3930_s26 }
 0x1e3   : > { %1695 = vrot.lane.b32.xlu1 %v1377_v25, %s3930_s26 }
 0x1e5   : > { %1884 = vrot.lane.b32.xlu0 %v1377_v25, %s3928_s15 }
 0x1e7   : > { %1597 = vrot.lane.b32.xlu1 %v1375_v27, %s3928_s15 }
 0x1e9   : > { %v4469_v17 = vpop.permute.xlu1 %1669  ;;  %1697 = vrot.lane.b32.xlu0 %v1381_v44, %s3930_s26 }
 0x1eb   : > { %v2070_v47 = vpop.permute.xlu0 %2069  ;;  %1886 = vrot.lane.b32.xlu1 %v1381_v44, %s3928_s15 }
 0x1ed   : > { %v4476_v49 = vpop.permute.xlu1 %1573  ;;  %1595 = vrot.lane.b32.xlu0 %v4403_v20, %s3928_s15 }
 0x1ef   : > { %v4480_v53 = vpop.permute.xlu0 %1569 }
 0x1f1   : > { %v1861_v59 = vpop.permute.xlu1 %1860  ;;  %1599 = vrot.lane.b32.xlu0 %v1549_v55, %s3928_s15 }
 0x1f2   : > { %v1906_v45 = vadd.f32 %v1861_v59, %v4313_v6  ;;  %v3899_v59 = vld [vmem:[%s5419_s3] ss:$12 sps:$4 sm:$0xff]  }
 0x1f3   : > { %v2028_v61 = vpop.permute.xlu0 %2027 }
 0x1f4   : > { %v2033_v22 = vadd.f32 %v2028_v61, %v2021_v52 }
 0x1f5   : > { %v2074_v0 = vpop.permute.xlu1 %2073 }
 0x1f6   : > { %v2120_v27 = vadd.f32 %v2070_v47, %v2033_v22  ;;  %v2122_v61 = vadd.f32 %v2074_v0, %v1906_v45  ;;  %v3901_v0 = vld [vmem:[%s5419_s3 + $0x4] ss:$12 sps:$4 sm:$0xff]  }
 0x1f7   : > { %v2072_v4 = vpop.permute.xlu0 %2071  ;;  %2487 = vmatprep.subr.bf16.mxu0 %v3901_v0 }
 0x1f8   : > { %v2187_v33 = vrot.slane %v2120_v27, 1  ;;  %v2190_v27 = vrot.slane %v2122_v61, 1  ;;  %2488 = vmatpush1.bf16.msra.mxu0 %v3899_v59 }
 0x1f9   : > { %v4483_v9 = vpop.permute.xlu1 %1671 }
 0x1fa   : > { %v1925_v14 = vadd.f32 %v1857_v42, %v4483_v9 }
 0x1fb   : > { %v4486_v19 = vpop.permute.xlu0 %1571 }
 0x1fc   : > { %1957 = vrot.lane.b32.xlu0 %v1925_v14, %s3932_s30 }
 0x1fd   : > { %v2080_v24 = vpop.permute.xlu1 %2079 }
 0x1ff   : > { %v1859_v26 = vpop.permute.xlu0 %1858 }
 0x200   : > { %v2121_v29 = vadd.f32 %v2072_v4, %v1859_v26 }
 0x201   : > { %v1863_v25 = vpop.permute.xlu1 %1862 }
 0x202   : > { %v2188_v35 = vrot.slane %v2121_v29, 1  ;;  %v1907_v47 = vadd.f32 %v1863_v25, %v4322_v13 }
 0x203   : > { %v2078_v21 = vpop.permute.xlu0 %2077 }
 0x204   : > { %v2189_v42 = vsel %vm5434_vm3, %v2187_v33, %v2188_v35  ;;  %v2191_v33 = vsel %vm5434_vm3, %v2188_v35, %v2190_v27 }
 0x205   : > { %v2076_v37 = vpop.permute.xlu1 %2075  ;;  %2220 = vrot.lane.b32.xlu0 %v2189_v42, %s3930_s26 }
 0x206   : > { %v2123_v4 = vadd.f32 %v2076_v37, %v1907_v47 }
 0x207   : > { %v4496_v44 = vpop.permute.xlu0 %1575 }
 0x208   : > { %v2192_v29 = vrot.slane %v2123_v4, 1 }
 0x209   : > { %v4501_v55 = vpop.permute.xlu1 %1577 }
 0x20a   : > { %v2193_v42 = vsel %vm5434_vm3, %v2190_v27, %v2192_v29 }
 0x20b   : > { %v4503_v52 = vpop.permute.xlu0 %1673 }
 0x20c   : > { %v1926_v14 = vadd.f32 %v1859_v26, %v4503_v52  ;;  %v3902_v26 = vld [vmem:[%s5419_s3 + $0x8] ss:$12 sps:$4 sm:$0xff]  }
 0x20d   : > { %v4506_v22 = vpop.permute.xlu1 %1675  ;;  %3808 = vmatprep.subr.bf16.mxu1 %v3902_v26 }
 0x20e   : > { %v1927_v31 = vadd.f32 %v1906_v45, %v4506_v22  ;;  %1959 = vrot.lane.b32.xlu1 %v1926_v14, %s3932_s30  ;;  %3809 = vmatpush3.bf16.msra.mxu1 %v3902_v26 }
 0x20f   : > { %v4510_v32 = vpop.permute.xlu0 %2085 }
 0x210   : > { %1961 = vrot.lane.b32.xlu0 %v1927_v31, %s3932_s30 }
 0x211   : > { %v2088_v25 = vpop.permute.xlu1 %2087 }
 0x212   : > { %2222 = vrot.lane.b32.xlu1 %v2191_v33, %s3930_s26 }
 0x213   : > { %v1865_v37 = vpop.permute.xlu0 %1864 }
 0x214   : > { %2224 = vrot.lane.b32.xlu0 %v2193_v42, %s3930_s26  ;;  %v1908_v4 = vadd.f32 %v1865_v37, %v4329_v18 }
 0x215   : > { %v1867_v45 = vpop.permute.xlu1 %1866 }
 0x216   : > { %v1909_v31 = vadd.f32 %v1867_v45, %v4332_v23  ;;  %v2124_v35 = vadd.f32 %v2078_v21, %v1908_v4 }
 0x217   : > { %v2082_v61 = vpop.permute.xlu0 %2081 }
 0x218   : > { %v2125_v33 = vadd.f32 %v2080_v24, %v1909_v31  ;;  %v2194_v26 = vrot.slane %v2124_v35, 1 }
 0x219   : > { %v2084_v14 = vpop.permute.xlu1 %2083 }
 0x21a   : > { %v2196_v37 = vrot.slane %v2125_v33, 1  ;;  %v2195_v24 = vsel %vm5434_vm3, %v2192_v29, %v2194_v26 }
 0x21b   : > { %v4528_v30 = vpop.permute.xlu0 %1579 }
 0x21d   : > { %v4530_v0 = vpop.permute.xlu1 %1581 }
 0x21f   : > { %v4532_v59 = vpop.permute.xlu0 %1677 }
 0x220   : > { %v1928_v27 = vadd.f32 %v1907_v47, %v4532_v59  ;;  %v2197_v47 = vsel %vm5434_vm3, %v2194_v26, %v2196_v37 }
 0x221   : > { %v4535_v1 = vpop.permute.xlu1 %1679 }
 0x222   : > { %v1929_v42 = vadd.f32 %v1908_v4, %v4535_v1  ;;  %1963 = vrot.lane.b32.xlu1 %v1928_v27, %s3932_s30 }
 0x223   : > { %v4539_v5 = vpop.permute.xlu0 %2093 }
 0x224   : > { %1965 = vrot.lane.b32.xlu0 %v1929_v42, %s3932_s30 }
 0x225   : > { %v4542_v21 = vpop.permute.xlu1 %2095 }
 0x226   : > { %2226 = vrot.lane.b32.xlu1 %v2195_v24, %s3930_s26 }
 0x227   : > { %v1869_v45 = vpop.permute.xlu0 %1868 }
 0x228   : > { %2228 = vrot.lane.b32.xlu0 %v2197_v47, %s3930_s26  ;;  %v1910_v27 = vadd.f32 %v1869_v45, %v4338_v28 }
 0x229   : > { %v1871_v35 = vpop.permute.xlu1 %1870 }
 0x22a   : > { %v1911_v63 = vadd.f32 %v1871_v35, %v4347_v62  ;;  %v2126_v42 = vadd.f32 %v2082_v61, %v1910_v27 }
 0x22b   : > { %v2090_v4 = vpop.permute.xlu0 %2089 }
 0x22c   : > { %v2127_v29 = vadd.f32 %v2084_v14, %v1911_v63  ;;  %v2198_v26 = vrot.slane %v2126_v42, 1 }
 0x22d   : > { %v2092_v33 = vpop.permute.xlu1 %2091 }
 0x22e   : > { %v2200_v45 = vrot.slane %v2127_v29, 1  ;;  %v2199_v14 = vsel %vm5434_vm3, %v2196_v37, %v2198_v26 }
 0x22f   : > { %v4550_v54 = vpop.permute.xlu0 %1583 }
 0x230   : > { %v2201_v12 = vsel %vm5434_vm3, %v2198_v26, %v2200_v45 }
 0x231   : > { %v4552_v48 = vpop.permute.xlu1 %1585 }
 0x233   : > { %v4554_v50 = vpop.permute.xlu0 %1681 }
 0x234   : > { %v1930_v24 = vadd.f32 %v1909_v31, %v4554_v50 }
 0x235   : > { %v4557_v16 = vpop.permute.xlu1 %1683 }
 0x236   : > { %v1931_v47 = vadd.f32 %v1910_v27, %v4557_v16  ;;  %1967 = vrot.lane.b32.xlu1 %v1930_v24, %s3932_s30 }
 0x237   : > { %v1873_v8 = vpop.permute.xlu0 %1872 }
 0x238   : > { %1969 = vrot.lane.b32.xlu0 %v1931_v47, %s3932_s30  ;;  %v1912_v61 = vadd.f32 %v1873_v8, %v4356_v36 }
 0x239   : > { %v1875_v35 = vpop.permute.xlu1 %1874 }
 0x23a   : > { %2230 = vrot.lane.b32.xlu1 %v2199_v14, %s3930_s26  ;;  %v1913_v31 = vadd.f32 %v1875_v35, %v4364_v43  ;;  %v2128_v27 = vadd.f32 %v4510_v32, %v1912_v61 }
 0x23b   : > { %v4566_v42 = vpop.permute.xlu0 %1587 }
 0x23c   : > { %2232 = vrot.lane.b32.xlu0 %v2201_v12, %s3930_s26  ;;  %v2129_v24 = vadd.f32 %v2088_v25, %v1913_v31  ;;  %v2202_v37 = vrot.slane %v2128_v27, 1 }
 0x23d   : > { %v4571_v29 = vpop.permute.xlu1 %1589 }
 0x23e   : > { %v2204_v14 = vrot.slane %v2129_v24, 1  ;;  %v2203_v25 = vsel %vm5434_vm3, %v2200_v45, %v2202_v37 }
 0x23f   : > { %v4573_v47 = vpop.permute.xlu0 %1685 }
 0x240   : > { %v1932_v8 = vadd.f32 %v1911_v63, %v4573_v47  ;;  %v2205_v56 = vsel %vm5434_vm3, %v2202_v37, %v2204_v14 }
 0x241   : > { %v4576_v60 = vpop.permute.xlu1 %1687 }
 0x242   : > { %v1933_v35 = vadd.f32 %v1912_v61, %v4576_v60  ;;  %1971 = vrot.lane.b32.xlu1 %v1932_v8, %s3932_s30 }
 0x243   : > { %v1877_v26 = vpop.permute.xlu0 %1876 }
 0x244   : > { %1973 = vrot.lane.b32.xlu0 %v1933_v35, %s3932_s30  ;;  %v1914_v12 = vadd.f32 %v1877_v26, %v4372_v46 }
 0x245   : > { %v1879_v32 = vpop.permute.xlu1 %1878 }
 0x246   : > { %2234 = vrot.lane.b32.xlu1 %v2203_v25, %s3930_s26  ;;  %v1915_v63 = vadd.f32 %v1879_v32, %v4379_v57  ;;  %v2130_v61 = vadd.f32 %v2090_v4, %v1914_v12 }
 0x247   : > { %v4585_v27 = vpop.permute.xlu0 %1591 }
 0x248   : > { %2236 = vrot.lane.b32.xlu0 %v2205_v56, %s3930_s26  ;;  %v2131_v8 = vadd.f32 %v2092_v33, %v1915_v63  ;;  %v2206_v3 = vrot.slane %v2130_v61, 1 }
 0x249   : > { %v4589_v24 = vpop.permute.xlu1 %1593 }
 0x24a   : > { %v2208_v32 = vrot.slane %v2131_v8, 1  ;;  %v2207_v4 = vsel %vm5434_vm3, %v2204_v14, %v2206_v3 }
 0x24b   : > { %v4591_v35 = vpop.permute.xlu0 %1689 }
 0x24c   : > { %v1934_v26 = vadd.f32 %v1913_v31, %v4591_v35 }
 0x24d   : > { %v4594_v45 = vpop.permute.xlu1 %1691 }
 0x24e   : > { %v1935_v25 = vadd.f32 %v1914_v12, %v4594_v45  ;;  %1975 = vrot.lane.b32.xlu1 %v1934_v26, %s3932_s30  ;;  %v2209_v12 = vsel %vm5434_vm3, %v2206_v3, %v2208_v32 }
 0x24f   : > { %v1881_v38 = vpop.permute.xlu0 %1880 }
 0x250   : > { %v1916_v37 = vadd.f32 %v1881_v38, %v4387_v2  ;;  %1977 = vrot.lane.b32.xlu0 %v1935_v25, %s3932_s30 }
 0x251   : > { %v1883_v56 = vpop.permute.xlu1 %1882 }
 0x252   : > { %v2132_v33 = vadd.f32 %v4539_v5, %v1916_v37  ;;  %v1917_v31 = vadd.f32 %v1883_v56, %v4391_v10  ;;  %2238 = vrot.lane.b32.xlu1 %v2207_v4, %s3930_s26  ;;  %v2022_v5 = vld [vmem:[#allocation3 + $0x198] sm:$0x1] }
 0x253   : > { %v4604_v61 = vpop.permute.xlu0 %1693 }
 0x254   : > { %v2133_v8 = vadd.f32 %v4542_v21, %v1917_v31  ;;  %v1936_v26 = vadd.f32 %v1915_v63, %v4604_v61  ;;  %2240 = vrot.lane.b32.xlu0 %v2209_v12, %s3930_s26  ;;  %v2210_v38 = vrot.slane %v2132_v33, 1  ;;  %v3914_v63 = vadd.high.f32.bf16 %v2022_v5, %v4454_v39 }
 0x255   : > { %v4610_v25 = vpop.permute.xlu1 %1695 }
 0x256   : > { %v1937_v14 = vadd.f32 %v1916_v37, %v4610_v25  ;;  %1979 = vrot.lane.b32.xlu1 %v1936_v26, %s3932_s30  ;;  %v2212_v56 = vrot.slane %v2133_v8, 1  ;;  %v2211_v21 = vsel %vm5434_vm3, %v2208_v32, %v2210_v38  ;;  %v5431_v8 = vunpack.i.l.bf16 %v4466_v7 }
 0x257   : > { %v1885_v4 = vpop.permute.xlu0 %1884  ;;  %v2136_v32 = vadd.f32 %v3914_v63, %v4461_v41  ;;  %v2748_v63 = vld [vmem:[#allocation3 + $0x30] sm:$0x80] }
 0x258   : > { %v1918_v51 = vadd.f32 %v1885_v4, %v4397_v15  ;;  %1981 = vrot.lane.b32.xlu0 %v1937_v14, %s3932_s30  ;;  %v2213_v12 = vsel %vm5434_vm3, %v2210_v38, %v2212_v56 }
 0x259   : > { %v4616_v3 = vpop.permute.xlu1 %1597 }
 0x25a   : > { %v2134_v33 = vadd.f32 %v4452_v34, %v1918_v51  ;;  %2242 = vrot.lane.b32.xlu1 %v2211_v21, %s3930_s26  ;;  %v1939_v5 = vadd.f32 %v5431_v8, %v1918_v51 }
 0x25b   : > { %v4622_v37 = vpop.permute.xlu0 %1697 }
 0x25c   : > { %v1938_v26 = vadd.f32 %v1917_v31, %v4622_v37  ;;  %2244 = vrot.lane.b32.xlu0 %v2213_v12, %s3930_s26  ;;  %v2214_v14 = vrot.slane %v2134_v33, 1  ;;  %v2218_v31 = vrot.slane %v2136_v32, 1  ;;  %v1651_v33 = vld [vmem:[#allocation3 + $0x1e8] sm:$0x7f]  ;;  %v3193_v12 = vld [vmem:[#allocation3 + $0x1d0] sm:$0x1] }
 0x25d   : > { %v1887_v4 = vpop.permute.xlu1 %1886 }
 0x25e   : > { %v1919_v34 = vadd.f32 %v1887_v4, %v4403_v20  ;;  %1983 = vrot.lane.b32.xlu1 %v1938_v26, %s3932_s30  ;;  %v2215_v38 = vsel %vm5434_vm3, %v2212_v56, %v2214_v14  ;;  %v1529_v20 = vld [vmem:[#allocation3] sm:$0x80]  ;;  %v3857_v4 = vpack.i.bf16 %v3193_v12, %v2748_v63 }
 0x25f   : > { %v4642_v56 = vpop.permute.xlu0 %1595  ;;  %v3916_v32 = vadd.low.f32.bf16 %v1529_v20, %v4454_v39  ;;  %v3220_v39 = vld [vmem:[#allocation3 + $0x208] sm:$0x1] }
 0x260   : > { %v2135_v21 = vadd.f32 %v4459_v40, %v1919_v34  ;;  %1985 = vrot.lane.b32.xlu0 %v1939_v5, %s3932_s30  ;;  %v3915_v51 = vadd.high.f32.bf16 %v1919_v34, %v4466_v7  ;;  %v454_v40 = vlaneseq  ;;  %v4646_v5 = vld [vmem:[#allocation3 + $0x30] sm:$0xff]  ;;  %v3218_v34 = vld [vmem:[#allocation3 + $0x1d8] sm:$0xff] }
 0x262   : > { %v2216_v11 = vrot.slane %v2135_v21, 1  ;;  %2246 = vrot.lane.b32.xlu1 %v2215_v38, %s3930_s26  ;;  %v1619_v21 = vadd.f32 %v4646_v5, %v4480_v53 }
 0x264   : > { %v2219_v41 = vsel %vm5434_vm3, %v2216_v11, %v2218_v31  ;;  %v2217_v26 = vsel %vm5434_vm3, %v2214_v14, %v2216_v11  ;;  %v1721_v38 = vadd.f32 %v4483_v9, %v1619_v21  ;;  %v4653_v31 = vshrl.u32 %v454_v40, 7  ;;  %v4657_v11 = vpop.permute.xlu0 %1599 }
 0x265   : > { %2250 = vrot.lane.b32.xlu0 %v2219_v41, %s3930_s26 }
 0x266   : > { %1701 = vrot.lane.b32.xlu1 %v1651_v33, %s3930_s26  ;;  %v1720_v33 = vadd.f32 %v3916_v32, %v4469_v17  ;;  %v1788_v14 = vrot.slane %v1721_v38, 7  ;;  %v475_v41 = vand.u32 15, %v4653_v31  ;;  %v1620_v17 = vadd.f32 %v4646_v5, %v4486_v19  ;;  %v4675_v38 = vld [vmem:[%s5425_s9] ss:$0 sm:$0xff] }
 0x267   : > { %v456_v40 = vadd.s32 8, %v4653_v31  ;;  %v1621_v19 = vadd.f32 %v4476_v49, %v4313_v6 }
 0x268   : > { %v1787_v53 = vrot.slane %v1720_v33, 7  ;;  %vm4661_vm8 = vcmp.ne.s32.totalorder %v475_v41, 0  ;;  %v1722_v63 = vadd.f32 %v4503_v52, %v1620_v17  ;;  %v5476_v52 = vmov 0  ;;  %v4687_v41 = vld [vmem:[%s5426_s10] ss:$0 sm:$0xff] }
 0x269   : > { %3858 = vrot.lane.b32.xlu0 %v3857_v4, %s3928_s15  ;;  %v482_v21 = vand.u32 15, %v456_v40  ;;  %v457_v17 = vadd.s32 16, %v4653_v31 }
 0x26a   : > { %1987 = vrot.lane.b32.xlu1 %v3915_v51, %s3932_s30  ;;  %v1789_v9 = vsel %vm5436_vm7, %v1787_v53, %v1788_v14 }
 0x26b   : > { %v1836_v12 = vsel %vm4661_vm8, %v1789_v9, 0.0  ;;  %vm4680_vm9 = vcmp.ne.s32.totalorder %v482_v21, 15 }
 0x26c   : > { %v5477_v52 = vsel %vm4680_vm9, 4294967295, %v5476_v52 }
 0x26d   : > { %5478 = vst [vmem:[#allocation19_spill] sm:$0xff] %v5477_v52  ;;  %v5482_v52 = vmov 0  }
 0x26e   : > { %2248 = vrot.lane.b32.xlu1 %v2217_v26, %s3930_s26  ;;  %v1958_v51 = vpop.permute.xlu0 %1957 }
 0x26f   : > { %v2005_v4 = vadd.f32 %v1958_v51, %v1836_v12  ;;  %v1723_v51 = vadd.f32 %v4506_v22, %v1621_v19  ;;  %v4698_v12 = vld [vmem:[%s5427_s11] ss:$0 sm:$0xff] }
 0x272   : > { %3266 = vrot.lane.b32.xlu1 %v3218_v34, %s3930_s26  ;;  %v1790_v34 = vrot.slane %v1722_v63, 7 }
 0x274   : > { %v1791_v53 = vsel %vm5436_vm7, %v1788_v14, %v1790_v34 }
 0x276   : > { %3270 = vrot.lane.b32.xlu1 %v3220_v39, %s3930_s26 }
 0x277   : > { %v2221_v26 = vpop.permute.xlu0 %2220 }
 0x278   : > { %v2284_v32 = vadd.f32 %v2221_v26, %v2005_v4  ;;  %v1792_v26 = vrot.slane %v1723_v51, 7  ;;  %v489_v4 = vand.u32 15, %v457_v17  ;;  %v458_v17 = vadd.s32 24, %v4653_v31 }
 0x27a   : > { %v2307_v39 = vmul.f32 %v4675_v38, %v2284_v32  ;;  %vm4703_vm11 = vcmp.ne.s32.totalorder %v489_v4, 0  ;;  %v1793_v19 = vsel %vm5436_vm7, %v1790_v34, %v1792_v26  ;;  %v496_v8 = vand.u32 15, %v458_v17 }
 0x27c   : > { %v2330_v49 = vadd.f32 %v4687_v41, %v2307_v39  ;;  %vm4721_vm13 = vcmp.ne.s32.totalorder %v496_v8, 15 }
 0x27e   : > { %v2369_v32 = vmul.f32 %v4698_v12, %v2330_v49  ;;  %vm2347_vm10 = vcmp.gt.f32.partialorder %v2330_v49, 0.0 }
 0x280   : > { %v1960_v33 = vpop.permute.xlu1 %1959  ;;  %v2385_v51 = vsel %vm2347_vm10, %v2330_v49, %v2369_v32  ;;  %v1623_v49 = vadd.f32 %v4501_v55, %v4329_v18 }
 0x281   : > { %v2006_v9 = vadd.f32 %v1960_v33, %v1791_v53  ;;  %v5479_v33 = vmov 0  ;;  %v1622_v53 = vadd.f32 %v4496_v44, %v4322_v13 }
 0x282   : > { %v1962_v22 = vpop.permute.xlu0 %1961  ;;  %v5480_v33 = vsel %vm4703_vm11, 4294967295, %v5479_v33 }
 0x283   : > { %5481 = vst [vmem:[#allocation20_spill] sm:$0xff] %v5480_v33 }
 0x284   : > { %v2223_v40 = vpop.permute.xlu1 %2222 }
 0x285   : > { %v2269_v6 = vsel %vm4680_vm9, %v2223_v40, 0.0  ;;  %v1724_v40 = vadd.f32 %v4532_v59, %v1622_v53 }
 0x286   : > { %v2285_v63 = vadd.f32 %v2269_v6, %v2006_v9  ;;  %v1838_v6 = vsel %vm4703_vm11, %v1793_v19, 0.0  ;;  %v2225_v4 = vpop.permute.xlu0 %2224 }
 0x287   : > { %v1794_v13 = vrot.slane %v1724_v40, 7 }
 0x288   : > { %v2308_v14 = vmul.f32 %v4675_v38, %v2285_v63 }
 0x28a   : > { %v2331_v21 = vadd.f32 %v4687_v41, %v2308_v14  ;;  %v2007_v14 = vadd.f32 %v1962_v22, %v1838_v6  ;;  %v1795_v22 = vsel %vm5436_vm7, %v1792_v26, %v1794_v13 }
 0x28c   : > { %vm2348_vm12 = vcmp.gt.f32.partialorder %v2331_v21, 0.0  ;;  %v2370_v39 = vmul.f32 %v4698_v12, %v2331_v21  ;;  %v2286_v34 = vadd.f32 %v2225_v4, %v2007_v14  ;;  %v1624_v14 = vadd.f32 %v4528_v30, %v4332_v23 }
 0x28e   : > { %v2386_v9 = vsel %vm2348_vm12, %v2331_v21, %v2370_v39  ;;  %v2309_v59 = vmul.f32 %v4675_v38, %v2286_v34  ;;  %v1725_v21 = vadd.f32 %v4535_v1, %v1623_v49  ;;  %v459_v39 = vadd.s32 32, %v4653_v31 }
 0x28f   : > { %v2401_v63 = vpack.c.bf16 %v2386_v9, %v2385_v51  ;;  %v5485_v1 = vmov 0  ;;  %v1625_v34 = vadd.f32 %v4530_v0, %v4338_v28 }
 0x290   : > { %v2332_v9 = vadd.f32 %v4687_v41, %v2309_v59  ;;  %v1796_v55 = vrot.slane %v1725_v21, 7  ;;  %v503_v17 = vand.u32 15, %v459_v39  ;;  %v460_v59 = vadd.s32 40, %v4653_v31 }
 0x291   : > { %3671 = vmatmul.mubr.msk.bf16.vlgmr.msra.gmra.mxu0 %vm5435_vm1, %v2401_v63  ;;  %3810 = vmatprep.mubr.msk.bf16.mxu1 %vm5435_vm1, %v2401_v63  ;;  %v1727_v39 = vadd.f32 %v4557_v16, %v1625_v34  ;;  %v5488_v16 = vmov 0  ;;  %v1627_v34 = vadd.f32 %v4552_v48, %v4356_v36 }
 0x292   : > { %2515 = vmatprep.mubr.bf16.mxu0 %v5482_v52  ;;  %v2371_v6 = vmul.f32 %v4698_v12, %v2332_v9  ;;  %vm2349_vm14 = vcmp.gt.f32.partialorder %v2332_v9, 0.0  ;;  %vm4734_vm15 = vcmp.ne.s32.totalorder %v503_v17, 0  ;;  %v1797_v63 = vsel %vm5436_vm7, %v1794_v13, %v1796_v55 }
 0x293   : > { %v5486_v1 = vsel %vm4734_vm15, 4294967295, %v5485_v1  ;;  %v1840_v21 = vsel %vm4734_vm15, %v1797_v63, 0.0  ;;  %v510_v23 = vand.u32 15, %v460_v59 }
 0x294   : > { %v1964_v44 = vpop.permute.xlu1 %1963  ;;  %5487 = vst [vmem:[#allocation21_spill] sm:$0xff] %v5486_v1 }
 0x295   : > { %v2008_v19 = vadd.f32 %v1964_v44, %v1795_v22  ;;  %v2387_v44 = vsel %vm2349_vm14, %v2332_v9, %v2371_v6  ;;  %v1726_v22 = vadd.f32 %v4554_v50, %v1624_v14  ;;  %v1800_v50 = vrot.slane %v1727_v39, 7 }
 0x296   : > { %v1966_v40 = vpop.permute.xlu0 %1965  ;;  %vm4754_vm4 = vcmp.ne.s32.totalorder %v510_v23, 15  ;;  %v5491_v6 = vmov 0 }
 0x297   : > { %v1798_v28 = vrot.slane %v1726_v22, 7  ;;  %v5489_v16 = vsel %vm4754_vm4, 4294967295, %v5488_v16 }
 0x298   : > { %v2227_v53 = vpop.permute.xlu1 %2226  ;;  %5490 = vst [vmem:[#allocation22_spill] sm:$0xff] %v5489_v16 }
 0x299   : > { %v2271_v51 = vsel %vm4721_vm13, %v2227_v53, 0.0  ;;  %v2009_v53 = vadd.f32 %v1966_v40, %v1840_v21 }
 0x29a   : > { %v2287_v18 = vadd.f32 %v2271_v51, %v2008_v19  ;;  %v2229_v19 = vpop.permute.xlu0 %2228  ;;  %v461_v51 = vadd.s32 48, %v4653_v31 }
 0x29b   : > { %v2288_v30 = vadd.f32 %v2229_v19, %v2009_v53  ;;  %v4776_v19 = vadd.f32 %v4576_v60, %v1627_v34 }
 0x29c   : > { %v2310_v8 = vmul.f32 %v4675_v38, %v2287_v18  ;;  %v517_v9 = vand.u32 15, %v461_v51 }
 0x29d   : > { %v2311_v18 = vmul.f32 %v4675_v38, %v2288_v30 }
 0x29e   : > { %v2333_v26 = vadd.f32 %v4687_v41, %v2310_v8  ;;  %v1799_v8 = vsel %vm5436_vm7, %v1796_v55, %v1798_v28  ;;  %vm4759_vm5 = vcmp.ne.s32.totalorder %v517_v9, 0 }
 0x29f   : > { %v5492_v6 = vsel %vm4759_vm5, 4294967295, %v5491_v6 }
 0x2a0   : > { %v2372_v4 = vmul.f32 %v4698_v12, %v2333_v26  ;;  %vm2350_vm2 = vcmp.gt.f32.partialorder %v2333_v26, 0.0  ;;  %5493 = vst [vmem:[#allocation23_spill] sm:$0xff] %v5492_v6 }
 0x2a2   : > { %v2388_v49 = vsel %vm2350_vm2, %v2333_v26, %v2372_v4  ;;  %v1801_v26 = vsel %vm5436_vm7, %v1798_v28, %v1800_v50  ;;  %v1626_v4 = vadd.f32 %v4550_v54, %v4347_v62 }
 0x2a3   : > { %v2402_v13 = vpack.c.bf16 %v2388_v49, %v2387_v44  ;;  %v2334_v44 = vadd.f32 %v4687_v41, %v2311_v18  ;;  %v462_v49 = vadd.s32 56, %v4653_v31  ;;  %v1842_v22 = vsel %vm4759_vm5, %v1801_v26, 0.0 }
 0x2a4   : > { %v1728_v59 = vadd.f32 %v4573_v47, %v1626_v4  ;;  %v1804_v47 = vrot.slane %v4776_v19, 7  ;;  %v5496_v4 = vmov 0 }
 0x2a5   : > { %3672 = vmatmul.mubr.msk.bf16.gmra.mxu0 %vm5435_vm1, %v2402_v13  ;;  %3811 = vmatmul.mubr.msk.bf16.vlgmr.msra.gmra.mxu1 %vm5435_vm1, %v2402_v13  ;;  %v463_v13 = vadd.s32 64, %v4653_v31  ;;  %v2373_v48 = vmul.f32 %v4698_v12, %v2334_v44  ;;  %v524_v53 = vand.u32 15, %v462_v49  ;;  %vm2351_vm6 = vcmp.gt.f32.partialorder %v2334_v44, 0.0 }
 0x2a6   : > { %2525 = vmatprep.mubr.bf16.mxu0 %v5482_v52  ;;  %v1802_v51 = vrot.slane %v1728_v59, 7 }
 0x2a7   : > { %v531_v60 = vand.u32 15, %v463_v13  ;;  %vm4785_vm12 = vcmp.ne.s32.totalorder %v524_v53, 15  ;;  %v2389_v18 = vsel %vm2351_vm6, %v2334_v44, %v2373_v48  ;;  %v1628_v44 = vadd.f32 %v4566_v42, %v4364_v43 }
 0x2a8   : > { %v1968_v0 = vpop.permute.xlu1 %1967 }
 0x2a9   : > { %v2010_v40 = vadd.f32 %v1968_v0, %v1799_v8  ;;  %v1629_v8 = vadd.f32 %v4571_v29, %v4372_v46  ;;  %vm4792_vm14 = vcmp.ne.s32.totalorder %v531_v60, 0  ;;  %v464_v29 = vadd.s32 72, %v4653_v31 }
 0x2aa   : > { %v1970_v17 = vpop.permute.xlu0 %1969  ;;  %v5497_v4 = vsel %vm4792_vm14, 4294967295, %v5496_v4  ;;  %v1630_v60 = vadd.f32 %v4585_v27, %v4379_v57 }
 0x2ab   : > { %v2011_v54 = vadd.f32 %v1970_v17, %v1842_v22  ;;  %5498 = vst [vmem:[#allocation24_spill] sm:$0xff] %v5497_v4  ;;  %v4801_v49 = vadd.f32 %v4594_v45, %v1629_v8  ;;  %v1730_v22 = vadd.f32 %v4591_v35, %v1628_v44 }
 0x2ac   : > { %v2231_v63 = vpop.permute.xlu1 %2230 }
 0x2ad   : > { %v2273_v14 = vsel %vm4754_vm4, %v2231_v63, 0.0  ;;  %v1806_v35 = vrot.slane %v1730_v22, 7 }
 0x2ae   : > { %v2289_v55 = vadd.f32 %v2273_v14, %v2010_v40  ;;  %v2233_v21 = vpop.permute.xlu0 %2232  ;;  %v1803_v40 = vsel %vm5436_vm7, %v1800_v50, %v1802_v51  ;;  %v1805_v14 = vsel %vm5436_vm7, %v1802_v51, %v1804_v47 }
 0x2af   : > { %v2290_v39 = vadd.f32 %v2233_v21, %v2011_v54  ;;  %v1844_v43 = vsel %vm4792_vm14, %v1805_v14, 0.0  ;;  %v1808_v54 = vrot.slane %v4801_v49, 7  ;;  %v1807_v57 = vsel %vm5436_vm7, %v1804_v47, %v1806_v35 }
 0x2b0   : > { %v2312_v62 = vmul.f32 %v4675_v38, %v2289_v55  ;;  %v465_v55 = vadd.s32 80, %v4653_v31 }
 0x2b1   : > { %v2313_v28 = vmul.f32 %v4675_v38, %v2290_v39  ;;  %v1631_v39 = vadd.f32 %v4589_v24, %v4387_v2  ;;  %v1809_v2 = vsel %vm5436_vm7, %v1806_v35, %v1808_v54  ;;  %v5502_v24 = vmov 0 }
 0x2b2   : > { %v2335_v36 = vadd.f32 %v4687_v41, %v2312_v62  ;;  %v545_v19 = vand.u32 15, %v465_v55  ;;  %v538_v62 = vand.u32 15, %v464_v29 }
 0x2b3   : > { %v2336_v50 = vadd.f32 %v4687_v41, %v2313_v28  ;;  %v4828_v28 = vadd.f32 %v4610_v25, %v1631_v39 }
 0x2b4   : > { %v2374_v30 = vmul.f32 %v4698_v12, %v2335_v36  ;;  %v1972_v23 = vpop.permute.xlu1 %1971  ;;  %vm2352_vm10 = vcmp.gt.f32.partialorder %v2335_v36, 0.0  ;;  %vm4820_vm6 = vcmp.ne.s32.totalorder %v545_v19, 0  ;;  %vm4831_vm0 = vcmp.ne.s32.totalorder %v538_v62, 15 }
 0x2b5   : > { %v2012_v63 = vadd.f32 %v1972_v23, %v1803_v40  ;;  %v2375_v13 = vmul.f32 %v4698_v12, %v2336_v50  ;;  %vm2353_vm2 = vcmp.gt.f32.partialorder %v2336_v50, 0.0  ;;  %v467_v23 = vadd.s32 96, %v4653_v31 }
 0x2b6   : > { %v1974_v0 = vpop.permute.xlu0 %1973  ;;  %v2390_v17 = vsel %vm2352_vm10, %v2335_v36, %v2374_v30  ;;  %v5499_v30 = vmov 0  ;;  %v5503_v24 = vsel %vm4831_vm0, 4294967295, %v5502_v24  ;;  %v466_v40 = vadd.s32 88, %v4653_v31 }
 0x2b7   : > { %v2403_v26 = vpack.c.bf16 %v2390_v17, %v2389_v18  ;;  %v2013_v45 = vadd.f32 %v1974_v0, %v1844_v43  ;;  %v5500_v30 = vsel %vm4820_vm6, 4294967295, %v5499_v30  ;;  %5504 = vst [vmem:[#allocation26_spill] sm:$0xff] %v5503_v24  ;;  %v2391_v17 = vsel %vm2353_vm2, %v2336_v50, %v2375_v13 }
 0x2b8   : > { %v2235_v34 = vpop.permute.xlu1 %2234  ;;  %5501 = vst [vmem:[#allocation25_spill] sm:$0xff] %v5500_v30  ;;  %v559_v49 = vand.u32 15, %v467_v23  ;;  %v552_v29 = vand.u32 15, %v466_v40  ;;  %v468_v19 = vadd.s32 104, %v4653_v31 }
 0x2b9   : > { %v2275_v46 = vsel %vm4785_vm12, %v2235_v34, 0.0  ;;  %3673 = vmatmul.mubr.msk.bf16.gmra.mxu0 %vm5435_vm1, %v2403_v26  ;;  %3814 = vmatprep.mubr.msk.bf16.mxu1 %vm5435_vm1, %v2403_v26  ;;  %v1732_v26 = vadd.f32 %v4604_v61, %v1630_v60  ;;  %v1812_v34 = vrot.slane %v4828_v28, 7 }
 0x2ba   : > { %v2291_v59 = vadd.f32 %v2275_v46, %v2012_v63  ;;  %2535 = vmatprep.mubr.bf16.mxu0 %v5482_v52  ;;  %v2237_v42 = vpop.permute.xlu0 %2236  ;;  %v1846_v63 = vsel %vm4820_vm6, %v1809_v2, 0.0  ;;  %vm4851_vm2 = vcmp.ne.s32.totalorder %v559_v49, 0  ;;  %v566_v2 = vand.u32 15, %v468_v19  ;;  %v2853_v49 = vld [vmem:[#allocation3 + $0x1e8] sm:$0x7f] }
 0x2bb   : > { %v2292_v36 = vadd.f32 %v2237_v42, %v2013_v45  ;;  %v1810_v50 = vrot.slane %v1732_v26, 7  ;;  %v5505_v45 = vmov 0 }
 0x2bc   : > { %v2314_v21 = vmul.f32 %v4675_v38, %v2291_v59  ;;  %v1632_v59 = vadd.f32 %v4642_v56, %v4391_v10  ;;  %v5506_v45 = vsel %vm4851_vm2, 4294967295, %v5505_v45 }
 0x2bd   : > { %v2315_v0 = vmul.f32 %v4675_v38, %v2292_v36  ;;  %5507 = vst [vmem:[#allocation27_spill] sm:$0xff] %v5506_v45  ;;  %v1811_v39 = vsel %vm5436_vm7, %v1808_v54, %v1810_v50 }
 0x2be   : > { %v2337_v48 = vadd.f32 %v4687_v41, %v2314_v21  ;;  %v1813_v21 = vsel %vm5436_vm7, %v1810_v50, %v1812_v34  ;;  %v4865_v56 = vadd.f32 %v4622_v37, %v1632_v59  ;;  %vm5510_vm7 = vcmask 261120  }
 0x2bf   : > { %v2338_v61 = vadd.f32 %v4687_v41, %v2315_v0  ;;  %v470_v50 = vadd.s32 120, %v4653_v31  ;;  %v5516_v59 = vunpack.i.l.bf16 %v4466_v7 }
 0x2c0   : > { %v2376_v53 = vmul.f32 %v4698_v12, %v2337_v48  ;;  %v1976_v51 = vpop.permute.xlu1 %1975  ;;  %vm2354_vm10 = vcmp.gt.f32.partialorder %v2337_v48, 0.0  ;;  %v1814_v54 = vrot.slane %v4865_v56, 7 }
 0x2c1   : > { %v2014_v25 = vadd.f32 %v1976_v51, %v1807_v57  ;;  %v2377_v62 = vmul.f32 %v4698_v12, %v2338_v61  ;;  %vm2355_vm3 = vcmp.gt.f32.partialorder %v2338_v61, 0.0  ;;  %v1848_v51 = vsel %vm4851_vm2, %v1813_v21, 0.0  ;;  %vm5511_vm2 = vmmov %vm5510_vm7 }
 0x2c2   : > { %v1978_v18 = vpop.permute.xlu0 %1977  ;;  %v2392_v8 = vsel %vm2354_vm10, %v2337_v48, %v2376_v53  ;;  %vm4860_vm10 = vcmp.ne.s32.totalorder %v552_v29, 15  ;;  %v580_v56 = vand.u32 15, %v470_v50 }
 0x2c3   : > { %v2404_v27 = vpack.c.bf16 %v2392_v8, %v2391_v17  ;;  %v2015_v55 = vadd.f32 %v1978_v18, %v1846_v63  ;;  %v2393_v17 = vsel %vm2355_vm3, %v2338_v61, %v2377_v62  ;;  %v3862_v61 = vpack.i.bf16 %v2853_v49, %v4646_v5 }
 0x2c4   : > { %v2239_v14 = vpop.permute.xlu1 %2238 }
 0x2c5   : > { %v2277_v44 = vsel %vm4831_vm0, %v2239_v14, 0.0  ;;  %3674 = vmatmul.mubr.msk.bf16.gmra.mxu0 %vm5435_vm1, %v2404_v27  ;;  %3815 = vmatmul.mubr.msk.bf16.gmra.mxu1 %vm5435_vm1, %v2404_v27  ;;  %vm5515_vm0 = vcmask 1040384  }
 0x2c6   : > { %v2293_v47 = vadd.f32 %v2277_v44, %v2014_v25  ;;  %v2241_v46 = vpop.permute.xlu0 %2240  ;;  %2545 = vmatprep.mubr.bf16.mxu0 %v5482_v52  ;;  %v1633_v25 = vadd.f32 %v4616_v3, %v4397_v15  ;;  %v5512_v44 = vmov 0  ;;  %v1815_v15 = vsel %vm5515_vm0, %v1812_v34, %v1814_v54  ;;  %3863 = vrot.lane.b32.xlu0 %v3862_v61, %s3930_s26  ;;  %v1545_v34 = vld [vmem:[#allocation3 + $0x180] sm:$0x7f]  ;;  %vm5517_vm0 = vmmov %vm5511_vm2 }
 0x2c7   : > { %v2294_v22 = vadd.f32 %v2241_v46, %v2015_v55  ;;  %v469_v3 = vadd.s32 112, %v4653_v31 }
 0x2c8   : > { %v2316_v43 = vmul.f32 %v4675_v38, %v2293_v47  ;;  %v1980_v42 = vpop.permute.xlu1 %1979 }
 0x2c9   : > { %v2317_v48 = vmul.f32 %v4675_v38, %v2294_v22  ;;  %v2016_v53 = vadd.f32 %v1980_v42, %v1811_v39  ;;  %v1735_v22 = vadd.f32 %v5516_v59, %v1633_v25  ;;  %v573_v31 = vand.u32 15, %v469_v3 }
 0x2ca   : > { %v2339_v13 = vadd.f32 %v4687_v41, %v2316_v43  ;;  %v1982_v36 = vpop.permute.xlu0 %1981 }
 0x2cb   : > { %v2017_v60 = vadd.f32 %v1982_v36, %v1848_v51  ;;  %v2340_v0 = vadd.f32 %v4687_v41, %v2317_v48  ;;  %v1634_v48 = vadd.f32 %v4657_v11, %v1545_v34  ;;  %v5519_v11 = vmov 0 }
 0x2cc   : > { %v2378_v35 = vmul.f32 %v4698_v12, %v2339_v13  ;;  %v2243_v23 = vpop.permute.xlu1 %2242  ;;  %vm2356_vm1 = vcmp.gt.f32.partialorder %v2339_v13, 0.0 }
 0x2cd   : > { %v2279_v28 = vsel %vm4860_vm10, %v2243_v23, 0.0  ;;  %v2379_v63 = vmul.f32 %v4698_v12, %v2340_v0  ;;  %vm2357_vm3 = vcmp.gt.f32.partialorder %v2340_v0, 0.0 }
 0x2ce   : > { %v2295_v37 = vadd.f32 %v2279_v28, %v2016_v53  ;;  %v2245_v18 = vpop.permute.xlu0 %2244  ;;  %v2394_v8 = vsel %vm2356_vm1, %v2339_v13, %v2378_v35  ;;  %vm4883_vm1 = vcmp.ne.s32.totalorder %v566_v2, 15  ;;  %v3219_v35 = vld [vmem:[#allocation3 + $0x1f0] sm:$0xff]  ;;  %v1816_v53 = vrot.slane %v1735_v22, 7 }
 0x2cf   : > { %v2296_v40 = vadd.f32 %v2245_v18, %v2017_v60  ;;  %v2405_v26 = vpack.c.bf16 %v2394_v8, %v2393_v17  ;;  %v5513_v44 = vsel %vm4883_vm1, 4294967295, %v5512_v44  ;;  %v2395_v62 = vsel %vm2357_vm3, %v2340_v0, %v2379_v63  ;;  %3268 = vrot.lane.b32.xlu0 %v3219_v35, %s3930_s26 }
 0x2d0   : > { %v2318_v57 = vmul.f32 %v4675_v38, %v2295_v37  ;;  %v1984_v27 = vpop.permute.xlu1 %1983  ;;  %5514 = vst [vmem:[#allocation28_spill] sm:$0xff] %v5513_v44  ;;  %v5523_v37 = vmov 0 }
 0x2d1   : > { %3675 = vmatmul.mubr.msk.bf16.gmra.mxu0 %vm5510_vm7, %v2405_v26  ;;  %3818 = vmatprep.mubr.msk.bf16.mxu1 %vm5511_vm2, %v2405_v26  ;;  %v2319_v55 = vmul.f32 %v4675_v38, %v2296_v40  ;;  %v2018_v46 = vadd.f32 %v1984_v27, %v1815_v15  ;;  %vm5518_vm2 = vmmov %vm5517_vm0 }
 0x2d2   : > { %v2341_v14 = vadd.f32 %v4687_v41, %v2318_v57  ;;  %2555 = vmatprep.mubr.bf16.mxu0 %v5482_v52  ;;  %v1986_v21 = vpop.permute.xlu0 %1985 }
 0x2d3   : > { %v2342_v42 = vadd.f32 %v4687_v41, %v2319_v55 }
 0x2d4   : > { %v2380_v47 = vmul.f32 %v4698_v12, %v2341_v14  ;;  %v2247_v29 = vpop.permute.xlu1 %2246  ;;  %vm2358_vm7 = vcmp.gt.f32.partialorder %v2341_v14, 0.0 }
 0x2d5   : > { %v2281_v43 = vsel %vm4883_vm1, %v2247_v29, 0.0  ;;  %v2381_v23 = vmul.f32 %v4698_v12, %v2342_v42  ;;  %vm2359_vm3 = vcmp.gt.f32.partialorder %v2342_v42, 0.0  ;;  %vm5522_vm1 = vcmask 1040384  }
 0x2d6   : > { %v2297_v19 = vadd.f32 %v2281_v43, %v2018_v46  ;;  %v2396_v13 = vsel %vm2358_vm7, %v2341_v14, %v2380_v47  ;;  %vm4908_vm7 = vcmp.ne.s32.totalorder %v573_v31, 0  ;;  %v1817_v28 = vsel %vm5522_vm1, %v1814_v54, %v1816_v53  ;;  %vm5526_vm6 = vmmov %vm5522_vm1 }
 0x2d7   : > { %v2406_v36 = vpack.c.bf16 %v2396_v13, %v2395_v62  ;;  %v5520_v11 = vsel %vm4908_vm7, 4294967295, %v5519_v11  ;;  %v2251_v18 = vpop.permute.xlu0 %2250  ;;  %v1850_v40 = vsel %vm4908_vm7, %v1817_v28, 0.0  ;;  %v2397_v57 = vsel %vm2359_vm3, %v2342_v42, %v2381_v23 }
 0x2d8   : > { %v2320_v7 = vmul.f32 %v4675_v38, %v2297_v19  ;;  %v1702_v39 = vpop.permute.xlu1 %1701  ;;  %5521 = vst [vmem:[#allocation29_spill] sm:$0xff] %v5520_v11  ;;  %v2019_v25 = vadd.f32 %v1986_v21, %v1850_v40  ;;  %vm5527_vm1 = vcmask 261120  }
 0x2d9   : > { %v1736_v51 = vadd.f32 %v1702_v39, %v1634_v48  ;;  %3676 = vmatmul.mubr.msk.bf16.gmra.mxu0 %vm5517_vm0, %v2406_v36  ;;  %3819 = vmatmul.mubr.msk.bf16.gmra.mxu1 %vm5518_vm2, %v2406_v36  ;;  %vm4914_vm0 = vcmp.ne.s32.totalorder %v580_v56, 15  ;;  %vm5528_vm14 = vmmov %vm5527_vm1 }
 0x2da   : > { %v2343_v60 = vadd.f32 %v4687_v41, %v2320_v7  ;;  %2565 = vmatprep.mubr.bf16.mxu0 %v5482_v52  ;;  %v5524_v37 = vsel %vm4914_vm0, 4294967295, %v5523_v37  ;;  %v2283_v54 = vsel %vm4914_vm0, %v2251_v18, 0.0 }
 0x2db   : > { %v1818_v2 = vrot.slane %v1736_v51, 7  ;;  %5525 = vst [vmem:[#allocation30_spill] sm:$0xff] %v5524_v37 }
 0x2dc   : > { %v2382_v0 = vmul.f32 %v4698_v12, %v2343_v60  ;;  %v1988_v17 = vpop.permute.xlu1 %1987  ;;  %vm2360_vm2 = vcmp.gt.f32.partialorder %v2343_v60, 0.0 }
 0x2dd   : > { %v1819_v8 = vsel %vm5526_vm6, %v1816_v53, %v1818_v2 }
 0x2de   : > { %v2020_v26 = vadd.f32 %v1988_v17, %v1819_v8  ;;  %v2398_v27 = vsel %vm2360_vm2, %v2343_v60, %v2382_v0  ;;  %vm5530_vm2 = vmmov %vm5527_vm1 }
 0x2df   : > { %v2407_v63 = vpack.c.bf16 %v2398_v27, %v2397_v57 }
 0x2e0   : > { %v2299_v14 = vadd.f32 %v2283_v54, %v2020_v26  ;;  %v2249_v55 = vpop.permute.xlu1 %2248 }
 0x2e1   : > { %v2298_v49 = vadd.f32 %v2249_v55, %v2019_v25  ;;  %3677 = vmatmul.mubr.msk.bf16.gmra.mxu0 %vm5527_vm1, %v2407_v63  ;;  %3822 = vmatprep.mubr.msk.bf16.mxu1 %vm5528_vm14, %v2407_v63  ;;  %vm5529_vm14 = vmmov %vm5527_vm1 }
 0x2e2   : > { %v2322_v15 = vmul.f32 %v4675_v38, %v2299_v14  ;;  %2575 = vmatprep.mubr.bf16.mxu0 %v5482_v52 }
 0x2e3   : > { %v2321_v3 = vmul.f32 %v4675_v38, %v2298_v49 }
 0x2e4   : > { %v2345_v61 = vadd.f32 %v4687_v41, %v2322_v15 }
 0x2e5   : > { %v2344_v47 = vadd.f32 %v4687_v41, %v2321_v3 }
 0x2e6   : > { %v2384_v46 = vmul.f32 %v4698_v12, %v2345_v61  ;;  %vm2362_vm6 = vcmp.gt.f32.partialorder %v2345_v61, 0.0 }
 0x2e7   : > { %vm2361_vm3 = vcmp.gt.f32.partialorder %v2344_v47, 0.0  ;;  %v2383_v29 = vmul.f32 %v4698_v12, %v2344_v47 }
 0x2e8   : > { %v2400_v50 = vsel %vm2362_vm6, %v2345_v61, %v2384_v46  ;;  %vm5531_vm6 = vmmov %vm5527_vm1 }
 0x2e9   : > { %v2399_v59 = vsel %vm2361_vm3, %v2344_v47, %v2383_v29  ;;  %vm5532_vm3 = vmmov %vm5527_vm1 }
 0x2ea   : > { %v2408_v22 = vpack.c.bf16 %v2400_v50, %v2399_v59 }
 0x2ec   : > { %3678 = vmatmul.mubr.msk.bf16.gmra.mxu0 %vm5529_vm14, %v2408_v22  ;;  %3823 = vmatmul.mubr.msk.bf16.gmra.mxu1 %vm5530_vm2, %v2408_v22  ;;  %vm5533_vm14 = vmmov %vm5527_vm1 }
 0x2ed   : > { %vm5534_vm2 = vmmov %vm5527_vm1 }
 0x351   : > { %v4934_v52 = vpop.f32.mrf.mxu0 }
 0x352   : > { %2771 = vrot.lane.b32.xlu1 %v4934_v52, %s3928_s15 }
 0x353   : > { %v2509_v38 = vpop.f32.mrf.mxu0 }
 0x354   : > { %2684 = vst [vmem:[#allocation3 + $0x50] sm:$0xff] %v2509_v38 }
 0x355   : > { %v4938_v41 = vpop.f32.mrf.mxu0 }
 0x356   : > { %3025 = vrot.lane.b32.xlu1 %v2509_v38, %s3928_s15  ;;  %2773 = vrot.lane.b32.xlu0 %v4938_v41, %s3928_s15 }
 0x357   : > { %v2513_v12 = vpop.f32.mrf.mxu0 }
 0x358   : > { %2687 = vst [vmem:[#allocation3 + $0x68] sm:$0xff] %v2513_v12 }
 0x35a   : > { %3027 = vrot.lane.b32.xlu0 %v2513_v12, %s3928_s15 }
 0x35b   : > { %v3192_v43 = vld [vmem:[#allocation3 + $0x50] sm:$0xfe] }
 0x35c   : > { %3196 = vrot.lane.b32.xlu1 %v3192_v43, %s3928_s15 }
 0x35f   : > { %v2837_v34 = vld [vmem:[#allocation3 + $0x68] sm:$0x80] }
 0x360   : > { %2871 = vrot.lane.b32.xlu1 %v2837_v34, %s3930_s26 }
 0x365   : > { %v4946_v42 = vpop.f32.mrf.mxu0  ;;  %v3812_v21 = vpop.f32.mrf.mxu1 }
 0x366   : > { %2691 = vst.msk [vmem:[#allocation3 + $0x88] sm:$0xff] %vm5527_vm1, %v3812_v21  ;;  %2775 = vrot.lane.b32.xlu1 %v4946_v42, %s3928_s15 }
 0x367   : > { %v2519_v19 = vpop.f32.mrf.mxu0  ;;  %v2620_v62 = vpop.f32.mrf.mxu1 }
 0x368   : > { %2873 = vrot.lane.b32.xlu0 %v2519_v19, %s3930_s26 }
 0x369   : > { %v4952_v13 = vpop.f32.mrf.mxu0  ;;  %v3813_v48 = vpop.f32.mrf.mxu1 }
 0x36a   : > { %2694 = vst.msk [vmem:[#allocation3 + $0xa0] sm:$0xff] %vm5531_vm6, %v3813_v48  ;;  %3029 = vrot.lane.b32.xlu1 %v2519_v19, %s3928_s15  ;;  %vm5535_vm6 = vmmov %vm5527_vm1 }
 0x36b   : > { %v2523_v31 = vpop.f32.mrf.mxu0  ;;  %v2623_v36 = vpop.f32.mrf.mxu1 }
 0x36c   : > { %2777 = vrot.lane.b32.xlu0 %v4952_v13, %s3928_s15 }
 0x36e   : > { %2875 = vrot.lane.b32.xlu1 %v2523_v31, %s3930_s26 }
 0x371   : > { %v3205_v7 = vld [vmem:[#allocation3 + $0xa0] sm:$0xff] }
 0x372   : > { %3240 = vrot.lane.b32.xlu0 %v3205_v7, %s3930_s26 }
 0x376   : > { %3031 = vrot.lane.b32.xlu0 %v2523_v31, %s3928_s15 }
 0x379   : > { %v4961_v56 = vpop.f32.mrf.mxu0 }
 0x37a   : > { %2779 = vrot.lane.b32.xlu1 %v4961_v56, %s3928_s15 }
 0x37b   : > { %v2529_v39 = vpop.f32.mrf.mxu0 }
 0x37c   : > { %2877 = vrot.lane.b32.xlu0 %v2529_v39, %s3930_s26 }
 0x37d   : > { %v4966_v35 = vpop.f32.mrf.mxu0 }
 0x37e   : > { %3033 = vrot.lane.b32.xlu1 %v2529_v39, %s3928_s15 }
 0x37f   : > { %v2533_v53 = vpop.f32.mrf.mxu0 }
 0x380   : > { %2781 = vrot.lane.b32.xlu0 %v4966_v35, %s3928_s15 }
 0x382   : > { %2879 = vrot.lane.b32.xlu1 %v2533_v53, %s3930_s26 }
 0x384   : > { %3035 = vrot.lane.b32.xlu0 %v2533_v53, %s3928_s15  ;;  %v5032_v53 = vpop.permute.xlu1 %3266 }
 0x385   : > { %v4973_v51 = vpop.f32.mrf.mxu0  ;;  %v3816_v23 = vpop.f32.mrf.mxu1 }
 0x386   : > { %2703 = vst.msk [vmem:[#allocation3 + $0xe8] sm:$0xff] %vm5532_vm3, %v3816_v23  ;;  %2783 = vrot.lane.b32.xlu1 %v4973_v51, %s3928_s15  ;;  %vm5536_vm3 = vmmov %vm5527_vm1  ;;  %v5039_v23 = vpop.permute.xlu0 %3858 }
 0x387   : > { %v2539_v60 = vpop.f32.mrf.mxu0  ;;  %v2636_v28 = vpop.f32.mrf.mxu1 }
 0x388   : > { %2697 = vst.msk [vmem:[#allocation3 + $0xb8] sm:$0xff] %vm5533_vm14, %v2636_v28  ;;  %2881 = vrot.lane.b32.xlu0 %v2539_v60, %s3930_s26  ;;  %vm5537_vm14 = vmmov %vm5527_vm1 }
 0x389   : > { %v4980_v2 = vpop.f32.mrf.mxu0  ;;  %v3817_v0 = vpop.f32.mrf.mxu1 }
 0x38a   : > { %2706 = vst.msk [vmem:[#allocation3 + $0x100] sm:$0xff] %vm5534_vm2, %v3817_v0  ;;  %vm5538_vm2 = vmmov %vm5527_vm1  ;;  %v5046_v28 = vpop.permute.xlu0 %3863 }
 0x38b   : > { %v2543_v18 = vpop.f32.mrf.mxu0  ;;  %v2639_v17 = vpop.f32.mrf.mxu1 }
 0x38c   : > { %2700 = vst.msk [vmem:[#allocation3 + $0xd0] sm:$0xff] %vm5527_vm1, %v2639_v17  ;;  %2785 = vrot.lane.b32.xlu0 %v4980_v2, %s3928_s15 }
 0x38d   : > { %v3208_v8 = vld [vmem:[#allocation3 + $0xe8] sm:$0xff] }
 0x38e   : > { %3246 = vrot.lane.b32.xlu1 %v3208_v8, %s3930_s26  ;;  %v5050_v8 = vpop.permute.xlu0 %3268 }
 0x38f   : > { %v3206_v25 = vld [vmem:[#allocation3 + $0xb8] sm:$0xff] }
 0x391   : > { %v4987_v40 = vpop.f32.mrf.mxu0  ;;  %v3209_v26 = vld [vmem:[#allocation3 + $0x100] sm:$0xff] }
 0x392   : > { %3037 = vrot.lane.b32.xlu1 %v2539_v60, %s3928_s15  ;;  %3248 = vrot.lane.b32.xlu0 %v3209_v26, %s3930_s26  ;;  %v5041_v60 = vpop.permute.xlu1 %3270 }
 0x393   : > { %v2549_v57 = vpop.f32.mrf.mxu0  ;;  %v3207_v55 = vld [vmem:[#allocation3 + $0xd0] sm:$0xff] }
 0x395   : > { %v4991_v27 = vpop.f32.mrf.mxu0 }
 0x396   : > { %3242 = vrot.lane.b32.xlu1 %v3206_v25, %s3930_s26  ;;  %3039 = vrot.lane.b32.xlu0 %v2543_v18, %s3928_s15 }
 0x397   : > { %v2553_v54 = vpop.f32.mrf.mxu0 }
 0x399   : > { %v4995_v63 = vpop.f32.mrf.mxu0  ;;  %v3820_v14 = vpop.f32.mrf.mxu1 }
 0x39a   : > { %2715 = vst.msk [vmem:[#allocation3 + $0x148] sm:$0xff] %vm5535_vm6, %v3820_v14  ;;  %2883 = vrot.lane.b32.xlu1 %v2543_v18, %s3930_s26  ;;  %3244 = vrot.lane.b32.xlu0 %v3207_v55, %s3930_s26  ;;  %vm5539_vm6 = vmmov %vm5527_vm1  ;;  %v2731_v55 = vld [vmem:[#allocation3] sm:$0x80] }
 0x39b   : > { %v2559_v49 = vpop.f32.mrf.mxu0  ;;  %v2652_v15 = vpop.f32.mrf.mxu1 }
 0x39c   : > { %2709 = vst.msk [vmem:[#allocation3 + $0x118] sm:$0xff] %vm5536_vm3, %v2652_v15  ;;  %vm5540_vm3 = vmmov %vm5527_vm1 }
 0x39d   : > { %v5001_v3 = vpop.f32.mrf.mxu0  ;;  %v3821_v61 = vpop.f32.mrf.mxu1 }
 0x39e   : > { %2718 = vst.msk [vmem:[#allocation3 + $0x160] sm:$0xff] %vm5537_vm14, %v3821_v61  ;;  %2787 = vrot.lane.b32.xlu1 %v4987_v40, %s3928_s15  ;;  %2885 = vrot.lane.b32.xlu0 %v2549_v57, %s3930_s26  ;;  %vm5541_vm14 = vmmov %vm5527_vm1 }
 0x39f   : > { %v2563_v47 = vpop.f32.mrf.mxu0  ;;  %v2655_v46 = vpop.f32.mrf.mxu1 }
 0x3a0   : > { %2712 = vst.msk [vmem:[#allocation3 + $0x130] sm:$0xff] %vm5538_vm2, %v2655_v46  ;;  %vm5542_vm2 = vcmask 1040384  }
 0x3a1   : > { %v5008_v29 = vpop.f32.mrf.mxu0  ;;  %v3212_v43 = vld [vmem:[#allocation3 + $0x148] sm:$0xff] }
 0x3a2   : > { %3041 = vrot.lane.b32.xlu1 %v2549_v57, %s3928_s15  ;;  %2789 = vrot.lane.b32.xlu0 %v4991_v27, %s3928_s15 }
 0x3a3   : > { %v2569_v50 = vpop.f32.mrf.mxu0  ;;  %v3210_v7 = vld [vmem:[#allocation3 + $0x118] sm:$0xff] }
 0x3a5   : > { %v5013_v59 = vpop.f32.mrf.mxu0  ;;  %v3213_v48 = vld [vmem:[#allocation3 + $0x160] sm:$0xff] }
 0x3a6   : > { %2722 = vst [vmem:[#allocation3 + $0x180] sm:$0xff] %v5013_v59  ;;  %2887 = vrot.lane.b32.xlu1 %v2553_v54, %s3930_s26  ;;  %3043 = vrot.lane.b32.xlu0 %v2553_v54, %s3928_s15 }
 0x3a7   : > { %v2573_v22 = vpop.f32.mrf.mxu0  ;;  %v3211_v39 = vld [vmem:[#allocation3 + $0x130] sm:$0xff] }
 0x3aa   : > { %2791 = vrot.lane.b32.xlu1 %v4995_v63, %s3928_s15  ;;  %2889 = vrot.lane.b32.xlu0 %v2559_v49, %s3930_s26 }
 0x3ac   : > { %v2577_v38 = vpop.f32.mrf.mxu0  ;;  %v3824_v12 = vpop.f32.mrf.mxu1 }
 0x3ad   : > { %2725 = vst [vmem:[#allocation3 + $0x198] sm:$0xff] %v2577_v38  ;;  %2727 = vst.msk [vmem:[#allocation3 + $0x1a8] sm:$0xff] %vm5527_vm1, %v3824_v12  ;;  %v2747_v1 = vld [vmem:[#allocation3 + $0x180] sm:$0x7f] }
 0x3ae   : > { %v2579_v34 = vpop.f32.mrf.mxu0  ;;  %v2668_v21 = vpop.f32.mrf.mxu1  ;;  %3254 = vrot.lane.b32.xlu1 %v3212_v43, %s3930_s26  ;;  %2793 = vrot.lane.b32.xlu0 %v5001_v3, %s3928_s15  ;;  %vm5543_vm1 = vmmov %vm5542_vm2 }
 0x3af   : > { %2721 = vst.msk [vmem:[#allocation3 + $0x178] sm:$0xff] %vm5539_vm6, %v2668_v21  ;;  %vm5544_vm6 = vmmov %vm5543_vm1 }
 0x3b0   : > { %v2581_v19 = vpop.f32.mrf.mxu0  ;;  %v3825_v62 = vpop.f32.mrf.mxu1 }
 0x3b1   : > { %2728 = vst [vmem:[#allocation3 + $0x1b0] sm:$0xff] %v2581_v19  ;;  %2730 = vst.msk [vmem:[#allocation3 + $0x1c0] sm:$0xff] %vm5540_vm3, %v3825_v62  ;;  %v3204_v62 = vld [vmem:[#allocation3 + $0x88] sm:$0xfe] }
 0x3b2   : > { %v2583_v31 = vpop.f32.mrf.mxu0  ;;  %v2671_v36 = vpop.f32.mrf.mxu1  ;;  %3045 = vrot.lane.b32.xlu1 %v2559_v49, %s3928_s15  ;;  %3256 = vrot.lane.b32.xlu0 %v3213_v48, %s3930_s26  ;;  %v3912_v48 = vld [vmem:[#allocation3 + $0x30] sm:$0xff]  ;;  %vm5545_vm3 = vmmov %vm5543_vm1 }
 0x3b3   : > { %2724 = vst.msk [vmem:[#allocation3 + $0x190] sm:$0xff] %vm5541_vm14, %v2671_v36  ;;  %vm5546_vm14 = vmmov %vm5543_vm1 }
 0x3b4   : > { %v3216_v18 = vld [vmem:[#allocation3 + $0x1a8] sm:$0xff] }
 0x3b6   : > { %3250 = vrot.lane.b32.xlu1 %v3210_v7, %s3930_s26  ;;  %3047 = vrot.lane.b32.xlu0 %v2563_v47, %s3928_s15  ;;  %v3214_v57 = vld [vmem:[#allocation3 + $0x178] sm:$0xff] }
 0x3b8   : > { %v3217_v17 = vld [vmem:[#allocation3 + $0x1c0] sm:$0xff]  ;;  %v2751_v15 = vld [vmem:[#allocation3 + $0x1b0] sm:$0x7f] }
 0x3ba   : > { %2891 = vrot.lane.b32.xlu1 %v2563_v47, %s3930_s26  ;;  %3252 = vrot.lane.b32.xlu0 %v3211_v39, %s3930_s26  ;;  %v3215_v14 = vld [vmem:[#allocation3 + $0x190] sm:$0xff]  ;;  %v3917_v47 = vadd.low.f32.bf16 %v2731_v55, %v5039_v23 }
 0x3be   : > { %2795 = vrot.lane.b32.xlu1 %v5008_v29, %s3928_s15  ;;  %2893 = vrot.lane.b32.xlu0 %v2569_v50, %s3930_s26 }
 0x3c2   : > { %3049 = vrot.lane.b32.xlu1 %v2569_v50, %s3928_s15  ;;  %2797 = vrot.lane.b32.xlu0 %v5013_v59, %s3928_s15 }
 0x3c4   : > { %v2772_v0 = vpop.permute.xlu1 %2771 }
 0x3c5   : > { %v2821_v50 = vadd.f32 %v4646_v5, %v2772_v0 }
 0x3c6   : > { %3262 = vrot.lane.b32.xlu1 %v3216_v18, %s3930_s26  ;;  %3051 = vrot.lane.b32.xlu0 %v2573_v22, %s3928_s15 }
 0x3c8   : > { %v3026_v26 = vpop.permute.xlu1 %3025  ;;  %v2774_v54 = vpop.permute.xlu0 %2773 }
 0x3c9   : > { %v2822_v36 = vadd.f32 %v3912_v48, %v2774_v54 }
 0x3ca   : > { %2895 = vrot.lane.b32.xlu1 %v2573_v22, %s3930_s26  ;;  %3264 = vrot.lane.b32.xlu0 %v3217_v17, %s3930_s26 }
 0x3cc   : > { %v3028_v61 = vpop.permute.xlu0 %3027 }
 0x3cd   : > { %v3074_v7 = vadd.f32 %v3912_v48, %v3028_v61 }
 0x3ce   : > { %3258 = vrot.lane.b32.xlu1 %v3214_v57, %s3930_s26  ;;  %2897 = vrot.lane.b32.xlu0 %v2579_v34, %s3930_s26  ;;  %v5056_v25 = vpop.permute.xlu1 %3196 }
 0x3d2   : > { %2799 = vrot.lane.b32.xlu1 %v2577_v38, %s3928_s15  ;;  %3260 = vrot.lane.b32.xlu0 %v3215_v14, %s3930_s26  ;;  %v2872_v49 = vpop.permute.xlu1 %2871 }
 0x3d3   : > { %v2922_v22 = vadd.f32 %v3917_v47, %v2872_v49 }
 0x3d5   : > { %v2956_v21 = vrot.slane %v2922_v22, 7 }
 0x3d6   : > { %3053 = vrot.lane.b32.xlu1 %v2579_v34, %s3928_s15  ;;  %2801 = vrot.lane.b32.xlu0 %v2751_v15, %s3928_s15  ;;  %v3073_v34 = vadd.f32 %v3912_v48, %v3026_v26 }
 0x3d8   : > { %v2776_v46 = vpop.permute.xlu1 %2775 }
 0x3d9   : > { %v2823_v15 = vadd.f32 %v2776_v46, %v4934_v52 }
 0x3da   : > { %2899 = vrot.lane.b32.xlu1 %v2583_v31, %s3930_s26  ;;  %3055 = vrot.lane.b32.xlu0 %v2583_v31, %s3928_s15  ;;  %v2874_v38 = vpop.permute.xlu0 %2873 }
 0x3db   : > { %v2923_v12 = vadd.f32 %v2874_v38, %v2821_v50  ;;  %v3094_v39 = vadd.f32 %v3073_v34, %v2874_v38 }
 0x3dc   : > { %v3030_v43 = vpop.permute.xlu1 %3029 }
 0x3dd   : > { %v2957_v19 = vrot.slane %v2923_v12, 7  ;;  %v3075_v61 = vadd.f32 %v3030_v43, %v4934_v52 }
 0x3de   : > { %3091 = vrot.lane.b32.xlu1 %v3912_v48, %s3930_s26  ;;  %3238 = vrot.lane.b32.xlu0 %v3204_v62, %s3930_s26  ;;  %v2778_v0 = vpop.permute.xlu0 %2777 }
 0x3df   : > { %v5069_v5 = vsel %vm5542_vm2, %v2956_v21, %v2957_v19  ;;  %v2824_v62 = vadd.f32 %v2778_v0, %v4938_v41  ;;  %vm5548_vm2 = vcmask 1046528  }
 0x3e0   : > { %v2876_v31 = vpop.permute.xlu1 %2875 }
 0x3e1   : > { %v2924_v18 = vadd.f32 %v2876_v31, %v2822_v36  ;;  %v3095_v17 = vadd.f32 %v3074_v7, %v2876_v31 }
 0x3e2   : > { %3126 = vrot.lane.b32.xlu0 %v3094_v39, %s3932_s30 }
 0x3e3   : > { %v2959_v57 = vrot.slane %v2924_v18, 7  ;;  %3128 = vrot.lane.b32.xlu1 %v3095_v17, %s3932_s30 }
 0x3e4   : > { %v3241_v26 = vpop.permute.xlu0 %3240 }
 0x3e5   : > { %v5073_v14 = vadd.f32 %v3241_v26, %v3074_v7  ;;  %v5076_v55 = vsel %vm5543_vm1, %v2957_v19, %v2959_v57  ;;  %vm5549_vm1 = vmmov %vm5548_vm2 }
 0x3e8   : > { %v3032_v54 = vpop.permute.xlu0 %3031 }
 0x3e9   : > { %v3076_v48 = vadd.f32 %v3032_v54, %v4938_v41 }
 0x3ec   : > { %v2780_v49 = vpop.permute.xlu1 %2779 }
 0x3ed   : > { %v2825_v52 = vadd.f32 %v2780_v49, %v4946_v42 }
 0x3ee   : > { %v2878_v47 = vpop.permute.xlu0 %2877 }
 0x3ef   : > { %v2925_v50 = vadd.f32 %v2878_v47, %v2823_v15  ;;  %v5080_v22 = vadd.f32 %v3075_v61, %v2878_v47 }
 0x3f0   : > { %v3034_v38 = vpop.permute.xlu1 %3033 }
 0x3f1   : > { %v2961_v12 = vrot.slane %v2925_v50, 7  ;;  %v3077_v43 = vadd.f32 %v3034_v38, %v4946_v42 }
 0x3f2   : > { %v2782_v21 = vpop.permute.xlu0 %2781 }
 0x3f3   : > { %v5085_v19 = vsel %vm5544_vm6, %v2959_v57, %v2961_v12  ;;  %vm5550_vm6 = vmmov %vm5549_vm1 }
 0x3f4   : > { %v2880_v34 = vpop.permute.xlu1 %2879 }
 0x3f5   : > { %v2926_v36 = vadd.f32 %v2880_v34, %v2824_v62  ;;  %v3097_v7 = vadd.f32 %v3076_v48, %v2880_v34 }
 0x3f6   : > { %v3036_v46 = vpop.permute.xlu0 %3035 }
 0x3f7   : > { %v2963_v39 = vrot.slane %v2926_v36, 7  ;;  %3132 = vrot.lane.b32.xlu1 %v3097_v7, %s3932_s30  ;;  %v3078_v47 = vadd.f32 %v3036_v46, %v4952_v13  ;;  %v2826_v46 = vadd.f32 %v2782_v21, %v4952_v13 }
 0x3f8   : > { %v2784_v17 = vpop.permute.xlu1 %2783 }
 0x3f9   : > { %v5091_v31 = vsel %vm5545_vm3, %v2961_v12, %v2963_v39 }
 0x3fa   : > { %v2882_v0 = vpop.permute.xlu0 %2881 }
 0x3fb   : > { %v2927_v18 = vadd.f32 %v2882_v0, %v2825_v52  ;;  %v5093_v41 = vadd.f32 %v3077_v43, %v2882_v0  ;;  %v5446_v52 = vrot.slane %v5073_v14, 1 }
 0x3fd   : > { %v2965_v57 = vrot.slane %v2927_v18, 7 }
 0x3fe   : > { %v2786_v15 = vpop.permute.xlu0 %2785 }
 0x3ff   : > { %v5096_v26 = vsel %vm5546_vm14, %v2963_v39, %v2965_v57  ;;  %vm5551_vm14 = vmmov %vm5545_vm3 }
 0x400   : > { %5547 = vst [vmem:[#allocation31_spill] sm:$0xff] %v5096_v26  ;;  %v3247_v54 = vpop.permute.xlu1 %3246 }
 0x401   : > { %v3293_v50 = vadd.f32 %v3247_v54, %v3077_v43 }
 0x403   : > { %v3330_v12 = vrot.slane %v3293_v50, 1 }
 0x404   : > { %v5099_v49 = vpop.permute.xlu1 %3037  ;;  %v3249_v42 = vpop.permute.xlu0 %3248 }
 0x405   : > { %v5101_v38 = vadd.f32 %v3249_v42, %v3078_v47 }
 0x407   : > { %v5443_v62 = vrot.slane %v5101_v38, 1 }
 0x408   : > { %v3243_v34 = vpop.permute.xlu1 %3242  ;;  %v3040_v36 = vpop.permute.xlu0 %3039 }
 0x409   : > { %v3291_v7 = vadd.f32 %v3243_v34, %v3075_v61  ;;  %v5107_v39 = vsel %vm5548_vm2, %v3330_v12, %v5443_v62  ;;  %v2827_v61 = vadd.f32 %v2784_v17, %v4961_v56  ;;  %vm5553_vm2 = vmmov %vm5549_vm1 }
 0x40b   : > { %v3326_v43 = vrot.slane %v3291_v7, 1 }
 0x40c   : > { %v2884_v0 = vpop.permute.xlu1 %2883  ;;  %v3245_v18 = vpop.permute.xlu0 %3244 }
 0x40d   : > { %v2928_v54 = vadd.f32 %v2884_v0, %v2826_v46  ;;  %v3099_v42 = vadd.f32 %v3078_v47, %v2884_v0  ;;  %v3292_v50 = vadd.f32 %v3245_v18, %v3076_v48  ;;  %v5114_v45 = vsel %vm5549_vm1, %v5446_v52, %v3326_v43  ;;  %vm5554_vm1 = vmmov %vm5545_vm3 }
 0x40e   : > { %v2828_v18 = vadd.f32 %v2786_v15, %v4966_v35 }
 0x40f   : > { %v2967_v34 = vrot.slane %v2928_v54, 7  ;;  %v3328_v62 = vrot.slane %v3292_v50, 1  ;;  %3136 = vrot.lane.b32.xlu1 %v3099_v42, %s3932_s30  ;;  %v3080_v54 = vadd.f32 %v3040_v36, %v4966_v35 }
 0x410   : > { %v2788_v44 = vpop.permute.xlu1 %2787  ;;  %v5118_v11 = vpop.permute.xlu0 %2885 }
 0x411   : > { %v2929_v13 = vadd.f32 %v5118_v11, %v2827_v61  ;;  %v3331_v21 = vsel %vm5550_vm6, %v3328_v62, %v3330_v12  ;;  %v5123_v48 = vsel %vm5545_vm3, %v2965_v57, %v2967_v34  ;;  %v3329_v0 = vsel %vm5553_vm2, %v3326_v43, %v3328_v62  ;;  %vm5555_vm6 = vmmov %vm5554_vm1 }
 0x412   : > { %v2829_v61 = vadd.f32 %v2788_v44, %v4973_v51  ;;  %vm5557_vm3 = vmmov %vm5553_vm2 }
 0x413   : > { %v2969_v47 = vrot.slane %v2929_v13, 7  ;;  %3362 = vrot.lane.b32.xlu1 %v3331_v21, %s3930_s26 }
 0x414   : > { %v3042_v7 = vpop.permute.xlu1 %3041  ;;  %v2790_v46 = vpop.permute.xlu0 %2789 }
 0x415   : > { %v5127_v17 = vsel %vm5551_vm14, %v2967_v34, %v2969_v47  ;;  %vm5558_vm14 = vmmov %vm5553_vm2 }
 0x416   : > { %5552 = vst [vmem:[#allocation32_spill] sm:$0xff] %v5127_v17  ;;  %vm5559_vm2 = vmmov %vm5554_vm1 }
 0x417   : > { %3360 = vrot.lane.b32.xlu1 %v3329_v0, %s3930_s26  ;;  %v5142_v0 = vadd.f32 %v3042_v7, %v4973_v51  ;;  %v2830_v7 = vadd.f32 %v2790_v46, %v4980_v2 }
 0x418   : > { %v2888_v12 = vpop.permute.xlu1 %2887  ;;  %v3044_v42 = vpop.permute.xlu0 %3043 }
 0x419   : > { %v2930_v57 = vadd.f32 %v2888_v12, %v2828_v18  ;;  %v3101_v50 = vadd.f32 %v3080_v54, %v2888_v12  ;;  %v3082_v44 = vadd.f32 %v3044_v42, %v4980_v2 }
 0x41b   : > { %v2971_v13 = vrot.slane %v2930_v57, 7  ;;  %3140 = vrot.lane.b32.xlu1 %v3101_v50, %s3932_s30 }
 0x41c   : > { %v2792_v21 = vpop.permute.xlu1 %2791  ;;  %v5135_v34 = vpop.permute.xlu0 %2889 }
 0x41d   : > { %v2931_v62 = vadd.f32 %v5135_v34, %v2829_v61  ;;  %v5139_v15 = vsel %vm5554_vm1, %v2969_v47, %v2971_v13 }
 0x41f   : > { %v2973_v35 = vrot.slane %v2931_v62, 7 }
 0x420   : > { %v3255_v36 = vpop.permute.xlu1 %3254  ;;  %v2794_v43 = vpop.permute.xlu0 %2793 }
 0x421   : > { %v5145_v18 = vsel %vm5555_vm6, %v2971_v13, %v2973_v35  ;;  %v3297_v12 = vadd.f32 %v3255_v36, %v5142_v0  ;;  %vm5561_vm6 = vmmov %vm5557_vm3 }
 0x422   : > { %5556 = vst [vmem:[#allocation33_spill] sm:$0xff] %v5145_v18 }
 0x423   : > { %v3338_v61 = vrot.slane %v3297_v12, 1  ;;  %v2831_v12 = vadd.f32 %v2792_v21, %v4987_v40 }
 0x424   : > { %v3046_v57 = vpop.permute.xlu1 %3045  ;;  %v3257_v50 = vpop.permute.xlu0 %3256 }
 0x425   : > { %v5149_v52 = vadd.f32 %v3257_v50, %v3082_v44  ;;  %v5160_v50 = vadd.f32 %v5099_v49, %v4961_v56 }
 0x427   : > { %v5451_v47 = vrot.slane %v5149_v52, 1 }
 0x428   : > { %v3251_v62 = vpop.permute.xlu1 %3250  ;;  %v3048_v24 = vpop.permute.xlu0 %3047 }
 0x429   : > { %v5155_v51 = vsel %vm5557_vm3, %v3338_v61, %v5451_v47  ;;  %v5165_v47 = vadd.f32 %v3251_v62, %v5160_v50 }
 0x42c   : > { %v2892_v13 = vpop.permute.xlu1 %2891  ;;  %v3253_v42 = vpop.permute.xlu0 %3252 }
 0x42d   : > { %v2932_v30 = vadd.f32 %v2892_v13, %v2830_v7  ;;  %v3103_v36 = vadd.f32 %v3082_v44, %v2892_v13  ;;  %v3296_v4 = vadd.f32 %v3253_v42, %v3080_v54  ;;  %v2832_v13 = vadd.f32 %v2794_v43, %v4991_v27 }
 0x42e   : > { %v3084_v42 = vadd.f32 %v3048_v24, %v4991_v27 }
 0x42f   : > { %v2975_v18 = vrot.slane %v2932_v30, 7  ;;  %v3336_v16 = vrot.slane %v3296_v4, 1  ;;  %3144 = vrot.lane.b32.xlu1 %v3103_v36, %s3932_s30  ;;  %v5453_v4 = vrot.slane %v5165_v47, 1 }
 0x430   : > { %v2796_v6 = vpop.permute.xlu1 %2795  ;;  %v5167_v2 = vpop.permute.xlu0 %2893 }
 0x431   : > { %v2933_v46 = vadd.f32 %v5167_v2, %v2831_v12  ;;  %v3339_v54 = vsel %vm5558_vm14, %v3336_v16, %v3338_v61  ;;  %v5172_v44 = vsel %vm5559_vm2, %v2973_v35, %v2975_v18  ;;  %v3337_v62 = vsel %vm5561_vm6, %v5453_v4, %v3336_v16  ;;  %vm5562_vm14 = vmmov %vm5554_vm1 }
 0x432   : > { %vm5563_vm2 = vmmov %vm5554_vm1 }
 0x433   : > { %v2977_v56 = vrot.slane %v2933_v46, 7  ;;  %3370 = vrot.lane.b32.xlu1 %v3339_v54, %s3930_s26 }
 0x434   : > { %v3050_v30 = vpop.permute.xlu1 %3049  ;;  %v2798_v49 = vpop.permute.xlu0 %2797 }
 0x435   : > { %v5177_v21 = vsel %vm5554_vm1, %v2975_v18, %v2977_v56  ;;  %v5184_v35 = vadd.f32 %v3050_v30, %v4995_v63  ;;  %vm5565_vm1 = vmmov %vm5557_vm3 }
 0x436   : > { %5560 = vst [vmem:[#allocation34_spill] sm:$0xff] %v5177_v21  ;;  %vm5566_vm6 = vmmov %vm5565_vm1 }
 0x437   : > { %3368 = vrot.lane.b32.xlu1 %v3337_v62, %s3930_s26  ;;  %v2833_v62 = vadd.f32 %v2796_v6, %v4995_v63  ;;  %v5457_v63 = vunpack.i.l.bf16 %v5046_v28 }
 0x438   : > { %v3263_v61 = vpop.permute.xlu1 %3262  ;;  %v3052_v7 = vpop.permute.xlu0 %3051 }
 0x439   : > { %v3301_v36 = vadd.f32 %v3263_v61, %v5184_v35  ;;  %v3086_v18 = vadd.f32 %v3052_v7, %v5001_v3 }
 0x43b   : > { %v3346_v4 = vrot.slane %v3301_v36, 1 }
 0x43c   : > { %v2896_v12 = vpop.permute.xlu1 %2895  ;;  %v3265_v46 = vpop.permute.xlu0 %3264 }
 0x43d   : > { %v2934_v54 = vadd.f32 %v2896_v12, %v2832_v13  ;;  %v3105_v21 = vadd.f32 %v3084_v42, %v2896_v12  ;;  %v5190_v16 = vadd.f32 %v3265_v46, %v3086_v18 }
 0x43f   : > { %v2979_v17 = vrot.slane %v2934_v54, 7  ;;  %v5454_v30 = vrot.slane %v5190_v16, 1  ;;  %3148 = vrot.lane.b32.xlu1 %v3105_v21, %s3932_s30  ;;  %v5208_v21 = vadd.f32 %v3046_v57, %v4987_v40  ;;  %v2834_v57 = vadd.f32 %v2798_v49, %v5001_v3 }
 0x440   : > { %v3259_v43 = vpop.permute.xlu1 %3258  ;;  %v5195_v24 = vpop.permute.xlu0 %2897 }
 0x441   : > { %v2935_v27 = vadd.f32 %v5195_v24, %v2833_v62  ;;  %v5201_v61 = vsel %vm5557_vm3, %v3346_v4, %v5454_v30  ;;  %v5204_v7 = vsel %vm5562_vm14, %v2977_v56, %v2979_v17  ;;  %v5215_v62 = vadd.f32 %v3259_v43, %v5208_v21  ;;  %v3191_v43 = vld [vmem:[#allocation3 + $0x198] sm:$0x1]  ;;  %vm5567_vm3 = vmmov %vm5563_vm2 }
 0x442   : > { %vm5568_vm14 = vmmov %vm5563_vm2 }
 0x443   : > { %v2981_v6 = vrot.slane %v2935_v27, 7 }
 0x444   : > { %v2800_v13 = vpop.permute.xlu1 %2799  ;;  %v3261_v36 = vpop.permute.xlu0 %3260 }
 0x445   : > { %v2835_v12 = vadd.f32 %v2800_v13, %v5008_v29  ;;  %v3300_v46 = vadd.f32 %v3261_v36, %v3084_v42  ;;  %v5212_v54 = vsel %vm5563_vm2, %v2979_v17, %v2981_v6  ;;  %v3342_v17 = vrot.slane %v5215_v62, 1  ;;  %v3190_v13 = vld [vmem:[#allocation3 + $0x18] sm:$0xfe] }
 0x446   : > { %5564 = vst [vmem:[#allocation35_spill] sm:$0xff] %v5212_v54  ;;  %v3202_v3 = vadd.f32 %v5056_v25, %v3190_v13 }
 0x447   : > { %v2937_v56 = vadd.f32 %v5457_v63, %v2835_v12  ;;  %v3344_v27 = vrot.slane %v3300_v46, 1 }
 0x448   : > { %v3054_v30 = vpop.permute.xlu1 %3053  ;;  %v2802_v26 = vpop.permute.xlu0 %2801 }
 0x449   : > { %v2836_v37 = vadd.f32 %v2802_v26, %v2747_v1  ;;  %v3347_v40 = vsel %vm5565_vm1, %v3344_v27, %v3346_v4  ;;  %v2985_v12 = vrot.slane %v2937_v56, 7  ;;  %v3345_v33 = vsel %vm5566_vm6, %v3342_v17, %v3344_v27  ;;  %vm5570_vm6 = vmmov %vm5565_vm1 }
 0x44a   : > { %3378 = vrot.lane.b32.xlu1 %v3347_v40, %s3930_s26  ;;  %v3919_v26 = vadd.high.f32.bf16 %v3191_v43, %v5039_v23  ;;  %v3087_v23 = vadd.f32 %v3054_v30, %v5008_v29 }
 0x44b   : > { %v3918_v42 = vadd.high.f32.bf16 %v2836_v37, %v5046_v28 }
 0x44c   : > { %v2900_v36 = vpop.permute.xlu1 %2899  ;;  %v3056_v54 = vpop.permute.xlu0 %3055 }
 0x44d   : > { %v2987_v46 = vrot.slane %v3918_v42, 7  ;;  %v2936_v63 = vadd.f32 %v2900_v36, %v2834_v57  ;;  %v3088_v1 = vadd.f32 %v3056_v54, %v5013_v59  ;;  %v3107_v49 = vadd.f32 %v3086_v18, %v2900_v36 }
 0x44e   : > { %3376 = vrot.lane.b32.xlu1 %v3345_v33, %s3930_s26  ;;  %v3305_v33 = vadd.f32 %v3919_v26, %v5041_v60  ;;  %v5569_v54 = vrot.slane %v5073_v14, 1  ;;  %v3303_v60 = vadd.f32 %v5032_v53, %v3087_v23  ;;  %v3100_v53 = vadd.f32 %v5160_v50, %v5118_v11 }
 0x44f   : > { %v2983_v4 = vrot.slane %v2936_v63, 7  ;;  %v5230_v37 = vsel %vm5567_vm3, %v2985_v12, %v2987_v46  ;;  %v3304_v56 = vadd.f32 %v5050_v8, %v3088_v1  ;;  %vm5571_vm3 = vmmov %vm5565_vm1  ;;  %v5578_v36 = vrot.slane %v5190_v16, 1 }
 0x450   : > { %v3092_v62 = vpop.permute.xlu1 %3091  ;;  %v3239_v40 = vpop.permute.xlu0 %3238  ;;  %v3354_v43 = vrot.slane %v3305_v33, 1  ;;  %v3350_v14 = vrot.slane %v3303_v60, 1  ;;  %v5582_v33 = vld [vmem:[#allocation6_spill] sm:$0xff] }
 0x451   : > { %v3289_v57 = vadd.f32 %v3239_v40, %v3202_v3  ;;  %v5234_v27 = vsel %vm5568_vm14, %v2981_v6, %v2983_v4  ;;  %v5237_v59 = vsel %vm5563_vm2, %v2983_v4, %v2985_v12  ;;  %v3109_v63 = vadd.f32 %v3092_v62, %v3088_v1  ;;  %vm5574_vm14 = vmmov %vm5565_vm1  ;;  %v5580_v3 = vld [vmem:[#allocation17_spill] sm:$0xff] }
 0x452   : > { %3152 = vrot.lane.b32.xlu1 %v3107_v49, %s3932_s30  ;;  %v3352_v18 = vrot.slane %v3304_v56, 1  ;;  %vm5576_vm2 = vmmov %vm5565_vm1 }
 0x453   : > { %v3323_v25 = vrot.slane %v3289_v57, 1 }
 0x454   : > { %v3355_v29 = vsel %vm5570_vm6, %v3352_v18, %v3354_v43  ;;  %v3353_v30 = vsel %vm5571_vm3, %v3350_v14, %v3352_v18 }
 0x455   : > { %v3325_v8 = vsel %vm5565_vm1, %v3323_v25, %v5569_v54  ;;  %v3129_v42 = vpop.permute.xlu1 %3128  ;;  %v3127_v54 = vpop.permute.xlu0 %3126 }
 0x456   : > { %3356 = vrot.lane.b32.xlu0 %v3325_v8, %s3930_s26  ;;  %3156 = vrot.lane.b32.xlu1 %v3109_v63, %s3932_s30  ;;  %v5248_v6 = vadd.f32 %v3129_v42, %v5076_v55  ;;  %v3102_v55 = vadd.f32 %v5142_v0, %v5135_v34 }
 0x45a   : > { %3130 = vrot.lane.b32.xlu0 %v5080_v22, %s3932_s30  ;;  %3386 = vrot.lane.b32.xlu1 %v3355_v29, %s3930_s26  ;;  %v5572_v22 = vrot.slane %v5165_v47, 1  ;;  %v5584_v29 = vld [vmem:[#allocation9_spill] sm:$0xff] }
 0x45e   : > { %3134 = vrot.lane.b32.xlu0 %v5093_v41, %s3932_s30  ;;  %3384 = vrot.lane.b32.xlu1 %v3353_v30, %s3930_s26  ;;  %v5573_v41 = vrot.slane %v5101_v38, 1  ;;  %v3106_v38 = vadd.f32 %v5184_v35, %v5195_v24  ;;  %v3913_v35 = vld [vmem:[%s5421_s5] ss:$0 sm:$0xff] }
 0x45f   : > { %v1007_v4 = vadd.f32 %v3913_v35, %v5580_v3  ;;  %v5598_v3 = vld [vmem:[#allocation32_spill] sm:$0xff] }
 0x460   : > { %v3335_v13 = vsel %vm5574_vm14, %v5573_v41, %v5572_v22  ;;  %v3007_v22 = vsel %vm4703_vm11, %v5085_v19, 0.0 }
 0x462   : > { %3358 = vrot.lane.b32.xlu0 %v5114_v45, %s3930_s26  ;;  %v3104_v45 = vadd.f32 %v5208_v21, %v5167_v2 }
 0x466   : > { %3364 = vrot.lane.b32.xlu0 %v5107_v39, %s3930_s26  ;;  %v5575_v39 = vrot.slane %v5149_v52, 1 }
 0x468   : > { %v3343_v34 = vsel %vm5576_vm2, %v5575_v39, %v3342_v17 }
 0x469   : > { %v3133_v11 = vpop.permute.xlu1 %3132 }
 0x46a   : > { %3138 = vrot.lane.b32.xlu0 %v3100_v53, %s3932_s30  ;;  %v3177_v2 = vadd.f32 %v3133_v11, %v5091_v31 }
 0x46e   : > { %3142 = vrot.lane.b32.xlu0 %v3102_v55, %s3932_s30  ;;  %v5610_v55 = vld [vmem:[#allocation34_spill] sm:$0xff] }
 0x472   : > { %3366 = vrot.lane.b32.xlu0 %v3335_v13, %s3930_s26 }
 0x476   : > { %3372 = vrot.lane.b32.xlu0 %v5155_v51, %s3930_s26  ;;  %v5577_v51 = vunpack.i.l.bf16 %v5046_v28  ;;  %v3351_v28 = vsel %vm5565_vm1, %v5578_v36, %v3350_v14 }
 0x478   : > { %v3108_v50 = vadd.f32 %v5577_v51, %v3087_v23  ;;  %v1023_v23 = vadd.f32 %v3913_v35, %v5582_v33 }
 0x47a   : > { %3146 = vrot.lane.b32.xlu0 %v3104_v45, %s3932_s30 }
 0x47e   : > { %3374 = vrot.lane.b32.xlu0 %v3343_v34, %s3930_s26  ;;  %v5588_v34 = vld [vmem:[#allocation13_spill] sm:$0xff] }
 0x481   : > { %v3137_v0 = vpop.permute.xlu1 %3136 }
 0x482   : > { %v5287_v47 = vadd.f32 %v3137_v0, %v5123_v48  ;;  %3150 = vrot.lane.b32.xlu0 %v3106_v38, %s3932_s30  ;;  %v991_v48 = vadd.f32 %v3913_v35, %v4301_v58  ;;  %v5593_v35 = vld [vmem:[#allocation31_spill] sm:$0xff] }
 0x485   : > { %v3363_v52 = vpop.permute.xlu1 %3362 }
 0x486   : > { %v3407_v21 = vsel %vm4721_vm13, %v3363_v52, 0.0  ;;  %3154 = vrot.lane.b32.xlu0 %v3108_v50, %s3932_s30  ;;  %vm5579_vm13 = vcmask 257024   ;;  %v3019_v52 = vsel %vm4908_vm7, %v5237_v59, 0.0 }
 0x487   : > { %v3423_v24 = vadd.f32 %v3407_v21, %v3177_v2  ;;  %vm5581_vm6 = vmmov %vm5579_vm13 }
 0x488   : > { %vm5591_vm11 = vmmov %vm5581_vm6 }
 0x489   : > { %v3439_v17 = vadd.f32 %v3423_v24, %v991_v48  ;;  %v3361_v58 = vpop.permute.xlu1 %3360  ;;  %v3009_v24 = vsel %vm4734_vm15, %v5593_v35, 0.0 }
 0x48a   : > { %3382 = vrot.lane.b32.xlu0 %v3351_v28, %s3930_s26  ;;  %v5595_v28 = vld [vmem:[#allocation10_spill] sm:$0xff] }
 0x48b   : > { %v3711_v32 = vpack.c.bf16 %v3439_v17, %v3439_v17 }
 0x48d   : > { %3519 = vst.msk [vmem:[%s5307_s20 + $0xc] sm:$0xf] %vm5579_vm13, %v3711_v32  ;;  %v3141_v31 = vpop.permute.xlu1 %3140 }
 0x48e   : > { %3380 = vrot.lane.b32.xlu0 %v5201_v61, %s3930_s26  ;;  %v3181_v46 = vadd.f32 %v3141_v31, %v5139_v15 }
 0x4a1   : > { %v3145_v16 = vpop.permute.xlu1 %3144 }
 0x4a2   : > { %v5315_v12 = vadd.f32 %v3145_v16, %v5172_v44 }
 0x4a5   : > { %v3371_v1 = vpop.permute.xlu1 %3370 }
 0x4a6   : > { %v3411_v26 = vsel %vm4785_vm12, %v3371_v1, 0.0  ;;  %vm5583_vm12 = vmmov %vm5581_vm6 }
 0x4a7   : > { %v3427_v49 = vadd.f32 %v3411_v26, %v3181_v46  ;;  %v5596_v46 = vld [vmem:[#allocation16_spill] sm:$0xff] }
 0x4a9   : > { %v3443_v62 = vadd.f32 %v3427_v49, %v1007_v4  ;;  %v3369_v61 = vpop.permute.xlu1 %3368  ;;  %v3011_v49 = vsel %vm4759_vm5, %v5598_v3, 0.0 }
 0x4ab   : > { %v3715_v40 = vpack.c.bf16 %v3443_v62, %v3443_v62 }
 0x4ad   : > { %3523 = vst.msk [vmem:[%s5307_s20 + $0x1c] sm:$0xf] %vm5581_vm6, %v3715_v40 }
 0x4b1   : > { %v3149_v56 = vpop.permute.xlu1 %3148 }
 0x4b2   : > { %v3185_v57 = vadd.f32 %v3149_v56, %v5204_v7  ;;  %v3005_v7 = vsel %vm4661_vm8, %v5069_v5, 0.0  ;;  %vm5587_vm8 = vmmov %vm5581_vm6 }
 0x4b3   : > { %v3174_v42 = vadd.f32 %v3127_v54, %v3005_v7 }
 0x4bc   : > { %v3379_v44 = vpop.permute.xlu1 %3378 }
 0x4bd   : > { %v3415_v15 = vsel %vm4860_vm10, %v3379_v44, 0.0  ;;  %vm5590_vm10 = vmmov %vm5581_vm6 }
 0x4be   : > { %v3431_v9 = vadd.f32 %v3415_v15, %v3185_v57  ;;  %v5601_v57 = vld [vmem:[#allocation15_spill] sm:$0xff] }
 0x4c0   : > { %v3447_v25 = vadd.f32 %v3431_v9, %v1023_v23  ;;  %v5327_v63 = vpop.permute.xlu1 %3376 }
 0x4c2   : > { %v3719_v18 = vpack.c.bf16 %v3447_v25, %v3447_v25  ;;  %v5604_v25 = vld [vmem:[#allocation33_spill] sm:$0xff] }
 0x4c4   : > { %3527 = vst.msk [vmem:[%s5307_s20 + $0x2c] sm:$0xf] %vm5583_vm12, %v3719_v18  ;;  %v5331_v8 = vpop.permute.xlu1 %3152  ;;  %v5605_v18 = vld [vmem:[#allocation24_spill] sm:$0xff] }
 0x4c5   : > { %vm5606_vm5 = vnez %v5605_v18 }
 0x4c6   : > { %v3013_v54 = vsel %vm5606_vm5, %v5604_v25, 0.0 }
 0x4c8   : > { %v3357_v10 = vpop.permute.xlu0 %3356  ;;  %v3157_v43 = vpop.permute.xlu1 %3156 }
 0x4c9   : > { %v3420_v60 = vadd.f32 %v3357_v10, %v3174_v42  ;;  %v3189_v30 = vadd.f32 %v3157_v43, %v5230_v37  ;;  %v5589_v37 = vld [vmem:[#allocation8_spill] sm:$0xff]  ;;  %v5607_v10 = vld [vmem:[#allocation18_spill] sm:$0xff] }
 0x4cb   : > { %v3436_v14 = vadd.f32 %v3420_v60, %v5584_v29 }
 0x4cc   : > { %v3131_v53 = vpop.permute.xlu0 %3130  ;;  %v3387_v41 = vpop.permute.xlu1 %3386 }
 0x4cd   : > { %v3708_v13 = vpack.c.bf16 %v3436_v14, %v3436_v14  ;;  %v3176_v45 = vadd.f32 %v3131_v53, %v3007_v22  ;;  %v3419_v5 = vsel %vm4914_vm0, %v3387_v41, 0.0  ;;  %vm5597_vm0 = vmmov %vm5581_vm6  ;;  %v5608_v14 = vld [vmem:[#allocation5_spill] sm:$0xff] }
 0x4ce   : > { %v3435_v11 = vadd.f32 %v3419_v5, %v3189_v30  ;;  %vm5602_vm15 = vmmov %vm5597_vm0  ;;  %v5611_v22 = vld [vmem:[#allocation25_spill] sm:$0xff]  ;;  %v5614_v5 = vld [vmem:[#allocation4_spill] sm:$0xff] }
 0x4cf   : > { %3516 = vst.msk [vmem:[%s5307_s20] sm:$0xf] %vm5587_vm8, %v3708_v13  ;;  %v3422_v39 = vadd.f32 %v3361_v58, %v3176_v45  ;;  %vm5609_vm3 = vmmov %vm5597_vm0 }
 0x4d0   : > { %v3451_v38 = vadd.f32 %v3435_v11, %v5588_v34  ;;  %v3135_v0 = vpop.permute.xlu0 %3134  ;;  %vm5613_vm14 = vmmov %vm5597_vm0  ;;  %v3385_v35 = vpop.permute.xlu1 %3384 }
 0x4d1   : > { %v3438_v51 = vadd.f32 %v3422_v39, %v5589_v37  ;;  %v3178_v36 = vadd.f32 %v3135_v0, %v3009_v24  ;;  %v5615_v39 = vld [vmem:[#allocation26_spill] sm:$0xff]  ;;  %v5617_v37 = vld [vmem:[#allocation7_spill] sm:$0xff]  ;;  %vm5618_vm1 = vmmov %vm5597_vm0 }
 0x4d2   : > { %v3723_v50 = vpack.c.bf16 %v3451_v38, %v3451_v38  ;;  %vm5616_vm2 = vnez %v5615_v39  ;;  %vm5619_vm13 = vmmov %vm5597_vm0 }
 0x4d3   : > { %v3710_v2 = vpack.c.bf16 %v3438_v51, %v3438_v51  ;;  %vm5628_vm7 = vmmov %vm5597_vm0 }
 0x4d4   : > { %3531 = vst.msk [vmem:[%s5307_s20 + $0x3c] sm:$0xf] %vm5590_vm10, %v3723_v50  ;;  %v3359_v19 = vpop.permute.xlu0 %3358  ;;  %vm5630_vm8 = vmmov %vm5597_vm0 }
 0x4d5   : > { %3518 = vst.msk [vmem:[%s5307_s20 + $0x8] sm:$0xf] %vm5591_vm11, %v3710_v2  ;;  %v3405_v21 = vsel %vm4680_vm9, %v3359_v19, 0.0  ;;  %vm5600_vm9 = vmmov %vm5597_vm0 }
 0x4d6   : > { %v3421_v17 = vadd.f32 %v3405_v21, %v5248_v6  ;;  %vm5631_vm10 = vmmov %vm5597_vm0 }
 0x4d8   : > { %v3437_v32 = vadd.f32 %v3421_v17, %v5595_v28  ;;  %v3365_v58 = vpop.permute.xlu0 %3364  ;;  %v5621_v17 = vld [vmem:[#allocation11_spill] sm:$0xff]  ;;  %v5622_v28 = vld [vmem:[#allocation28_spill] sm:$0xff] }
 0x4d9   : > { %v3424_v31 = vadd.f32 %v3365_v58, %v3178_v36  ;;  %vm5623_vm6 = vnez %v5622_v28  ;;  %v5624_v58 = vld [vmem:[#allocation35_spill] sm:$0xff] }
 0x4da   : > { %v3709_v16 = vpack.c.bf16 %v3437_v32, %v3437_v32 }
 0x4db   : > { %v3440_v1 = vadd.f32 %v3424_v31, %v5596_v46  ;;  %v5625_v31 = vld [vmem:[#allocation27_spill] sm:$0xff] }
 0x4dc   : > { %3517 = vst.msk [vmem:[%s5307_s20 + $0x4] sm:$0xf] %vm5597_vm0, %v3709_v16  ;;  %v3139_v26 = vpop.permute.xlu0 %3138  ;;  %vm5626_vm12 = vnez %v5625_v31 }
 0x4dd   : > { %v3712_v62 = vpack.c.bf16 %v3440_v1, %v3440_v1  ;;  %v3180_v40 = vadd.f32 %v3139_v26, %v3011_v49  ;;  %v3017_v16 = vsel %vm5626_vm12, %v5624_v58, 0.0  ;;  %v5627_v26 = vld [vmem:[#allocation14_spill] sm:$0xff]  ;;  %v5629_v49 = vld [vmem:[#allocation12_spill] sm:$0xff] }
 0x4df   : > { %3520 = vst.msk [vmem:[%s5307_s20 + $0x10] sm:$0xf] %vm5600_vm9, %v3712_v62  ;;  %v3426_v6 = vadd.f32 %v3369_v61, %v3180_v40 }
 0x4e0   : > { %v3143_v56 = vpop.permute.xlu0 %3142 }
 0x4e1   : > { %v3442_v44 = vadd.f32 %v3426_v6, %v5601_v57  ;;  %v3182_v42 = vadd.f32 %v3143_v56, %v3013_v54 }
 0x4e3   : > { %v3714_v15 = vpack.c.bf16 %v3442_v44, %v3442_v44 }
 0x4e4   : > { %v3367_v33 = vpop.permute.xlu0 %3366 }
 0x4e5   : > { %3522 = vst.msk [vmem:[%s5307_s20 + $0x18] sm:$0xf] %vm5602_vm15, %v3714_v15  ;;  %v3409_v9 = vsel %vm4754_vm4, %v3367_v33, 0.0  ;;  %vm5612_vm4 = vnez %v5611_v22 }
 0x4e6   : > { %v3425_v7 = vadd.f32 %v3409_v9, %v5287_v47  ;;  %v3015_v41 = vsel %vm5612_vm4, %v5610_v55, 0.0 }
 0x4e8   : > { %v3441_v61 = vadd.f32 %v3425_v7, %v5607_v10  ;;  %v3373_v43 = vpop.permute.xlu0 %3372 }
 0x4e9   : > { %v3428_v60 = vadd.f32 %v3373_v43, %v3182_v42 }
 0x4ea   : > { %v3713_v29 = vpack.c.bf16 %v3441_v61, %v3441_v61 }
 0x4eb   : > { %v3444_v30 = vadd.f32 %v3428_v60, %v5608_v14 }
 0x4ec   : > { %3521 = vst.msk [vmem:[%s5307_s20 + $0x14] sm:$0xf] %vm5609_vm3, %v3713_v29  ;;  %v3147_v53 = vpop.permute.xlu0 %3146 }
 0x4ed   : > { %v3716_v13 = vpack.c.bf16 %v3444_v30, %v3444_v30  ;;  %v3184_v45 = vadd.f32 %v3147_v53, %v3015_v41 }
 0x4ef   : > { %3524 = vst.msk [vmem:[%s5307_s20 + $0x20] sm:$0xf] %vm5613_vm14, %v3716_v13  ;;  %v3430_v47 = vadd.f32 %v5327_v63, %v3184_v45 }
 0x4f0   : > { %v3375_v20 = vpop.permute.xlu0 %3374 }
 0x4f1   : > { %v3446_v11 = vadd.f32 %v3430_v47, %v5614_v5  ;;  %v3413_v34 = vsel %vm5616_vm2, %v3375_v20, 0.0 }
 0x4f2   : > { %v3429_v38 = vadd.f32 %v3413_v34, %v5315_v12  ;;  %v3187_v12 = vadd.f32 %v5331_v8, %v5234_v27 }
 0x4f3   : > { %v3718_v0 = vpack.c.bf16 %v3446_v11, %v3446_v11 }
 0x4f4   : > { %v3445_v51 = vadd.f32 %v3429_v38, %v5617_v37  ;;  %v3151_v50 = vpop.permute.xlu0 %3150 }
 0x4f5   : > { %3526 = vst.msk [vmem:[%s5307_s20 + $0x28] sm:$0xf] %vm5618_vm1, %v3718_v0  ;;  %v3186_v59 = vadd.f32 %v3151_v50, %v3017_v16 }
 0x4f6   : > { %v3717_v2 = vpack.c.bf16 %v3445_v51, %v3445_v51 }
 0x4f8   : > { %3525 = vst.msk [vmem:[%s5307_s20 + $0x24] sm:$0xf] %vm5619_vm13, %v3717_v2  ;;  %v3155_v19 = vpop.permute.xlu0 %3154 }
 0x4f9   : > { %v3188_v21 = vadd.f32 %v3155_v19, %v3019_v52 }
 0x4fb   : > { %v3434_v48 = vadd.f32 %v3385_v35, %v3188_v21 }
 0x4fc   : > { %v3383_v24 = vpop.permute.xlu0 %3382 }
 0x4fd   : > { %v3450_v36 = vadd.f32 %v3434_v48, %v5621_v17  ;;  %v3417_v32 = vsel %vm5623_vm6, %v3383_v24, 0.0 }
 0x4fe   : > { %v3433_v46 = vadd.f32 %v3417_v32, %v3187_v12 }
 0x4ff   : > { %v3722_v1 = vpack.c.bf16 %v3450_v36, %v3450_v36 }
 0x500   : > { %v3449_v3 = vadd.f32 %v3433_v46, %v5627_v26  ;;  %v3381_v4 = vpop.permute.xlu0 %3380 }
 0x501   : > { %3530 = vst.msk [vmem:[%s5307_s20 + $0x38] sm:$0xf] %vm5628_vm7, %v3722_v1  ;;  %v3432_v27 = vadd.f32 %v3381_v4, %v3186_v59 }
 0x502   : > { %v3721_v8 = vpack.c.bf16 %v3449_v3, %v3449_v3 }
 0x503   : > { %v3448_v62 = vadd.f32 %v3432_v27, %v5629_v49 }
 0x504   : > { %3529 = vst.msk [vmem:[%s5307_s20 + $0x34] sm:$0xf] %vm5630_vm8, %v3721_v8 }
 0x505   : > { %v3720_v40 = vpack.c.bf16 %v3448_v62, %v3448_v62 }
 0x507   : > { %3528 = vst.msk [vmem:[%s5307_s20 + $0x30] sm:$0xf] %vm5631_vm10, %v3720_v40 }
 0x508 PF: > { %s22_s21 = sadd.s32 1, %s3926_s21  }
 0x509   : > { %p19_p4 = scmp.ge.s32.totalorder %s22_s21, 4  }
 0x50b   :  { %21 = sbr.rel (!%p19_p4) target bundleno = 1 (0x1), region = 101 }

</bundles_post_ra>
